<compile_context>
chip_gen: v6e
topology: v6e:2x2x1
jax: 0.10.0
libtpu: 0.0.40
codegen_flags: <defaults>
</compile_context>

<pallas_src>
import functools

import jax
import jax.numpy as jnp
from jax import lax
from jax.experimental import pallas as pl
from jax.experimental.pallas import tpu as pltpu


def _round_up(x, m):
    return ((x + m - 1) // m) * m


# ----------------------------- Pallas kernel --------------------------------
def _make_conv_t_hardsig_kernel(c_in, c_out, kk, th, wo_pad):
    """Direct (flipped-weight) conv + hardsigmoid epilogue, VPU broadcast-FMA form."""

    def kernel(w_ref, b3_ref, x_ref, o_ref):
        # w_ref : SMEM (c_out*c_in*kk*kk,)  flattened flipped weights
        # b3_ref: SMEM (c_out,)             bias + 3.0 (folded on host)
        # x_ref : VMEM (c_in, hp_pad, wp_pad)  zero-inserted + padded input (one sample)
        # o_ref : VMEM (c_out, th, wo_pad)     lane-dense output tile
        r = pl.program_id(1)
        row0 = pl.multiple_of(r * th, th)  # sublane-aligned (th % 8 == 0)

        accs = [jnp.zeros((th, wo_pad), jnp.float32) for _ in range(c_out)]
        for ci in range(c_in):
            # th + 8 rows cover the kk-1 (=2) halo with an 8-aligned extent.
            x_tile = x_ref[ci, pl.ds(row0, th + 8), :]          # (th+8, wp_pad)
            for kh in range(kk):
                for kw in range(kk):
                    patch = x_tile[kh:kh + th, kw:kw + wo_pad]  # (th, wo_pad)
                    base = (ci * kk + kh) * kk + kw
                    for co in range(c_out):
                        widx = co * (c_in * kk * kk) + base
                        accs[co] = accs[co] + w_ref[widx] * patch
        for co in range(c_out):
            # v2 = v1 + 3 ; v3 = clamp(v2, 0, 6) ; v4 = v3 / 6   (bias+3 pre-folded)
            o_ref[co] = jnp.clip(accs[co] + b3_ref[co], 0.0, 6.0) * (1.0 / 6.0)

    return kernel


# ------------------------------ glue / wrapper -------------------------------
@functools.partial(jax.jit, static_argnames=("stride", "padding", "th"))
def model_forward(x, w_pt, bias, stride=2, padding=1, th=16):
    """ConvTranspose2d(C_in, C_out, K, stride, padding) -> (+3, clamp(0,6), /6).

    x    : (N, C_in, H, W) float32
    w_pt : (C_in, C_out, K, K) float32  (PyTorch ConvTranspose2d weight layout)
    bias : (C_out,) float32
    """
    n, c_in, h, w = x.shape
    c_out, kk = w_pt.shape[1], w_pt.shape[2]

    ho = (h - 1) * stride - 2 * padding + kk
    wo = (w - 1) * stride - 2 * padding + kk
    pad = kk - 1 - padding                      # edge pad after zero-insertion

    ho_pad = _round_up(ho, th)                  # row tiles (sublane axis)
    wo_pad = _round_up(wo, 128)                 # lane-dense output width
    hp_pad = ho_pad + 8                         # halo (kk-1 <= 8) with aligned loads
    wp_pad = _round_up(wo_pad + kk - 1, 128)

    # Height/width of the "natural" zero-inserted + edge-padded input.
    base_h = pad + ((h - 1) * stride + 1) + pad
    base_w = pad + ((w - 1) * stride + 1) + pad

    # Single fused pad: zero-insertion (interior), conv edge pad, and alignment pad.
    x_pad = lax.pad(
        x,
        jnp.float32(0.0),
        (
            (0, 0, 0),
            (0, 0, 0),
            (pad, pad + (hp_pad - base_h), stride - 1),
            (pad, pad + (wp_pad - base_w), stride - 1),
        ),
    )

    # Spatially flipped, channel-swapped weights -> (C_out, C_in, K, K), flattened.
    w_eff = jnp.transpose(w_pt, (1, 0, 2, 3))[:, :, ::-1, ::-1]
    w_flat = w_eff.reshape(-1)
    b3 = bias + 3.0                              # fold the +3 into the bias

    kernel = _make_conv_t_hardsig_kernel(c_in, c_out, kk, th, wo_pad)

    out = pl.pallas_call(
        kernel,
        out_shape=jax.ShapeDtypeStruct((n, c_out, ho_pad, wo_pad), jnp.float32),
        grid_spec=pltpu.PrefetchScalarGridSpec(
            num_scalar_prefetch=0,
            grid=(n, ho_pad // th),
            in_specs=[
                pl.BlockSpec(memory_space=pltpu.MemorySpace.SMEM),   # w_flat
                pl.BlockSpec(memory_space=pltpu.MemorySpace.SMEM),   # bias + 3
                pl.BlockSpec((None, c_in, hp_pad, wp_pad), lambda b, r: (b, 0, 0, 0)),
            ],
            out_specs=pl.BlockSpec(
                (None, c_out, th, wo_pad), lambda b, r: (b, 0, r, 0)
            ),
        ),
        compiler_params=pltpu.CompilerParams(
            dimension_semantics=("parallel", "parallel"),
        ),
    )(w_flat, b3, x_pad)

    # Output is already NCHW; just strip the alignment padding.
    return out[:, :, :ho, :wo]


def _reference(x, w_pt, bias, stride=2, padding=1):
    kk = w_pt.shape[2]
    w_eff = jnp.transpose(w_pt, (1, 0, 2, 3))[:, :, ::-1, ::-1]
    pad = kk - 1 - padding
    y = lax.conv_general_dilated(
        x,
        w_eff,
        window_strides=(1, 1),
        padding=[(pad, pad), (pad, pad)],
        lhs_dilation=(stride, stride),
        dimension_numbers=("NCHW", "OIHW", "NCHW"),
        precision=lax.Precision.HIGHEST,
    )
    y = y + bias[None, :, None, None]
    return jnp.clip(y + 3.0, 0.0, 6.0) / 6.0


if __name__ == "__main__":
    key = jax.random.PRNGKey(0)
    k_x, k_w, k_b = jax.random.split(key, 3)

    # Small shapes consistent with the module: ConvTranspose2d(3, 6, 3, stride=2, padding=1)
    N, C_IN, H, W = 2, 3, 16, 16
    C_OUT, K = 6, 3

    x = jax.random.normal(k_x, (N, C_IN, H, W), dtype=jnp.float32)
    w_pt = jax.random.normal(k_w, (C_IN, C_OUT, K, K), dtype=jnp.float32) * 0.1
    bias = jax.random.normal(k_b, (C_OUT,), dtype=jnp.float32) * 0.1

    y = model_forward(x, w_pt, bias)
    jax.block_until_ready(y)

    y_ref = _reference(x, w_pt, bias)
    assert y.shape == (N, C_OUT, (H - 1) * 2 - 2 + K, (W - 1) * 2 - 2 + K), y.shape
    assert jnp.allclose(y, y_ref, atol=1e-4, rtol=1e-4), float(
        jnp.max(jnp.abs(y - y_ref))
    )
    print("KERNEL_OK")
</pallas_src>

<mosaic_0001>
module attributes {stable_mosaic.version = 11 : i64} {
  func.func @kernel(%arg0: i32, %arg1: i32, %arg2: memref<162xf32, #tpu.memory_space<smem>>, %arg3: memref<6xf32, #tpu.memory_space<smem>>, %arg4: memref<1x3x40x256xf32, #tpu.memory_space<vmem>>, %arg5: memref<1x6x16x128xf32, #tpu.memory_space<vmem>>) attributes {dimension_semantics = [#tpu.dimension_semantics<parallel>, #tpu.dimension_semantics<parallel>], iteration_bounds = array<i64: 2, 2>, scalar_prefetch = 0 : i64, scratch_operands = 0 : i64, tpu.core_type = #tpu.core_type<tc>, window_params = [{transform_indices = @transform_0, window_bounds = array<i64: 162>}, {transform_indices = @transform_1, window_bounds = array<i64: 6>}, {transform_indices = @transform_2, window_bounds = array<i64: 1, 3, 40, 256>}, {transform_indices = @transform_3, window_bounds = array<i64: 1, 6, 16, 128>}]} {
    %c16_i32 = arith.constant 16 : i32
    %0 = arith.muli %arg1, %c16_i32 : i32
    %1 = tpu.assume_multiple %0, 16 : i32
    %cst = arith.constant 0.000000e+00 : f32
    %2 = vector.broadcast %cst : f32 to vector<16x128xf32>
    %cst_0 = arith.constant 0.000000e+00 : f32
    %3 = vector.broadcast %cst_0 : f32 to vector<16x128xf32>
    %cst_1 = arith.constant 0.000000e+00 : f32
    %4 = vector.broadcast %cst_1 : f32 to vector<16x128xf32>
    %cst_2 = arith.constant 0.000000e+00 : f32
    %5 = vector.broadcast %cst_2 : f32 to vector<16x128xf32>
    %cst_3 = arith.constant 0.000000e+00 : f32
    %6 = vector.broadcast %cst_3 : f32 to vector<16x128xf32>
    %cst_4 = arith.constant 0.000000e+00 : f32
    %7 = vector.broadcast %cst_4 : f32 to vector<16x128xf32>
    %c0 = arith.constant 0 : index
    %c0_5 = arith.constant 0 : index
    %8 = arith.index_cast %1 : i32 to index
    %c0_6 = arith.constant 0 : index
    %9 = vector.load %arg4[%c0, %c0_5, %8, %c0_6] : memref<1x3x40x256xf32, #tpu.memory_space<vmem>>, vector<1x1x24x256xf32>
    %10 = vector.shape_cast %9 : vector<1x1x24x256xf32> to vector<24x256xf32>
    %11 = vector.extract_strided_slice %10 {offsets = [0, 0], sizes = [16, 128], strides = [1, 1]} : vector<24x256xf32> to vector<16x128xf32>
    %c0_7 = arith.constant 0 : index
    %12 = memref.load %arg2[%c0_7] : memref<162xf32, #tpu.memory_space<smem>>
    %13 = vector.broadcast %12 : f32 to vector<16x128xf32>
    %14 = arith.mulf %13, %11 : vector<16x128xf32>
    %15 = arith.addf %2, %14 : vector<16x128xf32>
    %c27 = arith.constant 27 : index
    %16 = memref.load %arg2[%c27] : memref<162xf32, #tpu.memory_space<smem>>
    %17 = vector.broadcast %16 : f32 to vector<16x128xf32>
    %18 = arith.mulf %17, %11 : vector<16x128xf32>
    %19 = arith.addf %3, %18 : vector<16x128xf32>
    %c54 = arith.constant 54 : index
    %20 = memref.load %arg2[%c54] : memref<162xf32, #tpu.memory_space<smem>>
    %21 = vector.broadcast %20 : f32 to vector<16x128xf32>
    %22 = arith.mulf %21, %11 : vector<16x128xf32>
    %23 = arith.addf %4, %22 : vector<16x128xf32>
    %c81 = arith.constant 81 : index
    %24 = memref.load %arg2[%c81] : memref<162xf32, #tpu.memory_space<smem>>
    %25 = vector.broadcast %24 : f32 to vector<16x128xf32>
    %26 = arith.mulf %25, %11 : vector<16x128xf32>
    %27 = arith.addf %5, %26 : vector<16x128xf32>
    %c108 = arith.constant 108 : index
    %28 = memref.load %arg2[%c108] : memref<162xf32, #tpu.memory_space<smem>>
    %29 = vector.broadcast %28 : f32 to vector<16x128xf32>
    %30 = arith.mulf %29, %11 : vector<16x128xf32>
    %31 = arith.addf %6, %30 : vector<16x128xf32>
    %c135 = arith.constant 135 : index
    %32 = memref.load %arg2[%c135] : memref<162xf32, #tpu.memory_space<smem>>
    %33 = vector.broadcast %32 : f32 to vector<16x128xf32>
    %34 = arith.mulf %33, %11 : vector<16x128xf32>
    %35 = arith.addf %7, %34 : vector<16x128xf32>
    %36 = vector.extract_strided_slice %10 {offsets = [0, 1], sizes = [16, 128], strides = [1, 1]} : vector<24x256xf32> to vector<16x128xf32>
    %c1 = arith.constant 1 : index
    %37 = memref.load %arg2[%c1] : memref<162xf32, #tpu.memory_space<smem>>
    %38 = vector.broadcast %37 : f32 to vector<16x128xf32>
    %39 = arith.mulf %38, %36 : vector<16x128xf32>
    %40 = arith.addf %15, %39 : vector<16x128xf32>
    %c28 = arith.constant 28 : index
    %41 = memref.load %arg2[%c28] : memref<162xf32, #tpu.memory_space<smem>>
    %42 = vector.broadcast %41 : f32 to vector<16x128xf32>
    %43 = arith.mulf %42, %36 : vector<16x128xf32>
    %44 = arith.addf %19, %43 : vector<16x128xf32>
    %c55 = arith.constant 55 : index
    %45 = memref.load %arg2[%c55] : memref<162xf32, #tpu.memory_space<smem>>
    %46 = vector.broadcast %45 : f32 to vector<16x128xf32>
    %47 = arith.mulf %46, %36 : vector<16x128xf32>
    %48 = arith.addf %23, %47 : vector<16x128xf32>
    %c82 = arith.constant 82 : index
    %49 = memref.load %arg2[%c82] : memref<162xf32, #tpu.memory_space<smem>>
    %50 = vector.broadcast %49 : f32 to vector<16x128xf32>
    %51 = arith.mulf %50, %36 : vector<16x128xf32>
    %52 = arith.addf %27, %51 : vector<16x128xf32>
    %c109 = arith.constant 109 : index
    %53 = memref.load %arg2[%c109] : memref<162xf32, #tpu.memory_space<smem>>
    %54 = vector.broadcast %53 : f32 to vector<16x128xf32>
    %55 = arith.mulf %54, %36 : vector<16x128xf32>
    %56 = arith.addf %31, %55 : vector<16x128xf32>
    %c136 = arith.constant 136 : index
    %57 = memref.load %arg2[%c136] : memref<162xf32, #tpu.memory_space<smem>>
    %58 = vector.broadcast %57 : f32 to vector<16x128xf32>
    %59 = arith.mulf %58, %36 : vector<16x128xf32>
    %60 = arith.addf %35, %59 : vector<16x128xf32>
    %61 = vector.extract_strided_slice %10 {offsets = [0, 2], sizes = [16, 128], strides = [1, 1]} : vector<24x256xf32> to vector<16x128xf32>
    %c2 = arith.constant 2 : index
    %62 = memref.load %arg2[%c2] : memref<162xf32, #tpu.memory_space<smem>>
    %63 = vector.broadcast %62 : f32 to vector<16x128xf32>
    %64 = arith.mulf %63, %61 : vector<16x128xf32>
    %65 = arith.addf %40, %64 : vector<16x128xf32>
    %c29 = arith.constant 29 : index
    %66 = memref.load %arg2[%c29] : memref<162xf32, #tpu.memory_space<smem>>
    %67 = vector.broadcast %66 : f32 to vector<16x128xf32>
    %68 = arith.mulf %67, %61 : vector<16x128xf32>
    %69 = arith.addf %44, %68 : vector<16x128xf32>
    %c56 = arith.constant 56 : index
    %70 = memref.load %arg2[%c56] : memref<162xf32, #tpu.memory_space<smem>>
    %71 = vector.broadcast %70 : f32 to vector<16x128xf32>
    %72 = arith.mulf %71, %61 : vector<16x128xf32>
    %73 = arith.addf %48, %72 : vector<16x128xf32>
    %c83 = arith.constant 83 : index
    %74 = memref.load %arg2[%c83] : memref<162xf32, #tpu.memory_space<smem>>
    %75 = vector.broadcast %74 : f32 to vector<16x128xf32>
    %76 = arith.mulf %75, %61 : vector<16x128xf32>
    %77 = arith.addf %52, %76 : vector<16x128xf32>
    %c110 = arith.constant 110 : index
    %78 = memref.load %arg2[%c110] : memref<162xf32, #tpu.memory_space<smem>>
    %79 = vector.broadcast %78 : f32 to vector<16x128xf32>
    %80 = arith.mulf %79, %61 : vector<16x128xf32>
    %81 = arith.addf %56, %80 : vector<16x128xf32>
    %c137 = arith.constant 137 : index
    %82 = memref.load %arg2[%c137] : memref<162xf32, #tpu.memory_space<smem>>
    %83 = vector.broadcast %82 : f32 to vector<16x128xf32>
    %84 = arith.mulf %83, %61 : vector<16x128xf32>
    %85 = arith.addf %60, %84 : vector<16x128xf32>
    %86 = vector.extract_strided_slice %10 {offsets = [1, 0], sizes = [16, 128], strides = [1, 1]} : vector<24x256xf32> to vector<16x128xf32>
    %c3 = arith.constant 3 : index
    %87 = memref.load %arg2[%c3] : memref<162xf32, #tpu.memory_space<smem>>
    %88 = vector.broadcast %87 : f32 to vector<16x128xf32>
    %89 = arith.mulf %88, %86 : vector<16x128xf32>
    %90 = arith.addf %65, %89 : vector<16x128xf32>
    %c30 = arith.constant 30 : index
    %91 = memref.load %arg2[%c30] : memref<162xf32, #tpu.memory_space<smem>>
    %92 = vector.broadcast %91 : f32 to vector<16x128xf32>
    %93 = arith.mulf %92, %86 : vector<16x128xf32>
    %94 = arith.addf %69, %93 : vector<16x128xf32>
    %c57 = arith.constant 57 : index
    %95 = memref.load %arg2[%c57] : memref<162xf32, #tpu.memory_space<smem>>
    %96 = vector.broadcast %95 : f32 to vector<16x128xf32>
    %97 = arith.mulf %96, %86 : vector<16x128xf32>
    %98 = arith.addf %73, %97 : vector<16x128xf32>
    %c84 = arith.constant 84 : index
    %99 = memref.load %arg2[%c84] : memref<162xf32, #tpu.memory_space<smem>>
    %100 = vector.broadcast %99 : f32 to vector<16x128xf32>
    %101 = arith.mulf %100, %86 : vector<16x128xf32>
    %102 = arith.addf %77, %101 : vector<16x128xf32>
    %c111 = arith.constant 111 : index
    %103 = memref.load %arg2[%c111] : memref<162xf32, #tpu.memory_space<smem>>
    %104 = vector.broadcast %103 : f32 to vector<16x128xf32>
    %105 = arith.mulf %104, %86 : vector<16x128xf32>
    %106 = arith.addf %81, %105 : vector<16x128xf32>
    %c138 = arith.constant 138 : index
    %107 = memref.load %arg2[%c138] : memref<162xf32, #tpu.memory_space<smem>>
    %108 = vector.broadcast %107 : f32 to vector<16x128xf32>
    %109 = arith.mulf %108, %86 : vector<16x128xf32>
    %110 = arith.addf %85, %109 : vector<16x128xf32>
    %111 = vector.extract_strided_slice %10 {offsets = [1, 1], sizes = [16, 128], strides = [1, 1]} : vector<24x256xf32> to vector<16x128xf32>
    %c4 = arith.constant 4 : index
    %112 = memref.load %arg2[%c4] : memref<162xf32, #tpu.memory_space<smem>>
    %113 = vector.broadcast %112 : f32 to vector<16x128xf32>
    %114 = arith.mulf %113, %111 : vector<16x128xf32>
    %115 = arith.addf %90, %114 : vector<16x128xf32>
    %c31 = arith.constant 31 : index
    %116 = memref.load %arg2[%c31] : memref<162xf32, #tpu.memory_space<smem>>
    %117 = vector.broadcast %116 : f32 to vector<16x128xf32>
    %118 = arith.mulf %117, %111 : vector<16x128xf32>
    %119 = arith.addf %94, %118 : vector<16x128xf32>
    %c58 = arith.constant 58 : index
    %120 = memref.load %arg2[%c58] : memref<162xf32, #tpu.memory_space<smem>>
    %121 = vector.broadcast %120 : f32 to vector<16x128xf32>
    %122 = arith.mulf %121, %111 : vector<16x128xf32>
    %123 = arith.addf %98, %122 : vector<16x128xf32>
    %c85 = arith.constant 85 : index
    %124 = memref.load %arg2[%c85] : memref<162xf32, #tpu.memory_space<smem>>
    %125 = vector.broadcast %124 : f32 to vector<16x128xf32>
    %126 = arith.mulf %125, %111 : vector<16x128xf32>
    %127 = arith.addf %102, %126 : vector<16x128xf32>
    %c112 = arith.constant 112 : index
    %128 = memref.load %arg2[%c112] : memref<162xf32, #tpu.memory_space<smem>>
    %129 = vector.broadcast %128 : f32 to vector<16x128xf32>
    %130 = arith.mulf %129, %111 : vector<16x128xf32>
    %131 = arith.addf %106, %130 : vector<16x128xf32>
    %c139 = arith.constant 139 : index
    %132 = memref.load %arg2[%c139] : memref<162xf32, #tpu.memory_space<smem>>
    %133 = vector.broadcast %132 : f32 to vector<16x128xf32>
    %134 = arith.mulf %133, %111 : vector<16x128xf32>
    %135 = arith.addf %110, %134 : vector<16x128xf32>
    %136 = vector.extract_strided_slice %10 {offsets = [1, 2], sizes = [16, 128], strides = [1, 1]} : vector<24x256xf32> to vector<16x128xf32>
    %c5 = arith.constant 5 : index
    %137 = memref.load %arg2[%c5] : memref<162xf32, #tpu.memory_space<smem>>
    %138 = vector.broadcast %137 : f32 to vector<16x128xf32>
    %139 = arith.mulf %138, %136 : vector<16x128xf32>
    %140 = arith.addf %115, %139 : vector<16x128xf32>
    %c32 = arith.constant 32 : index
    %141 = memref.load %arg2[%c32] : memref<162xf32, #tpu.memory_space<smem>>
    %142 = vector.broadcast %141 : f32 to vector<16x128xf32>
    %143 = arith.mulf %142, %136 : vector<16x128xf32>
    %144 = arith.addf %119, %143 : vector<16x128xf32>
    %c59 = arith.constant 59 : index
    %145 = memref.load %arg2[%c59] : memref<162xf32, #tpu.memory_space<smem>>
    %146 = vector.broadcast %145 : f32 to vector<16x128xf32>
    %147 = arith.mulf %146, %136 : vector<16x128xf32>
    %148 = arith.addf %123, %147 : vector<16x128xf32>
    %c86 = arith.constant 86 : index
    %149 = memref.load %arg2[%c86] : memref<162xf32, #tpu.memory_space<smem>>
    %150 = vector.broadcast %149 : f32 to vector<16x128xf32>
    %151 = arith.mulf %150, %136 : vector<16x128xf32>
    %152 = arith.addf %127, %151 : vector<16x128xf32>
    %c113 = arith.constant 113 : index
    %153 = memref.load %arg2[%c113] : memref<162xf32, #tpu.memory_space<smem>>
    %154 = vector.broadcast %153 : f32 to vector<16x128xf32>
    %155 = arith.mulf %154, %136 : vector<16x128xf32>
    %156 = arith.addf %131, %155 : vector<16x128xf32>
    %c140 = arith.constant 140 : index
    %157 = memref.load %arg2[%c140] : memref<162xf32, #tpu.memory_space<smem>>
    %158 = vector.broadcast %157 : f32 to vector<16x128xf32>
    %159 = arith.mulf %158, %136 : vector<16x128xf32>
    %160 = arith.addf %135, %159 : vector<16x128xf32>
    %161 = vector.extract_strided_slice %10 {offsets = [2, 0], sizes = [16, 128], strides = [1, 1]} : vector<24x256xf32> to vector<16x128xf32>
    %c6 = arith.constant 6 : index
    %162 = memref.load %arg2[%c6] : memref<162xf32, #tpu.memory_space<smem>>
    %163 = vector.broadcast %162 : f32 to vector<16x128xf32>
    %164 = arith.mulf %163, %161 : vector<16x128xf32>
    %165 = arith.addf %140, %164 : vector<16x128xf32>
    %c33 = arith.constant 33 : index
    %166 = memref.load %arg2[%c33] : memref<162xf32, #tpu.memory_space<smem>>
    %167 = vector.broadcast %166 : f32 to vector<16x128xf32>
    %168 = arith.mulf %167, %161 : vector<16x128xf32>
    %169 = arith.addf %144, %168 : vector<16x128xf32>
    %c60 = arith.constant 60 : index
    %170 = memref.load %arg2[%c60] : memref<162xf32, #tpu.memory_space<smem>>
    %171 = vector.broadcast %170 : f32 to vector<16x128xf32>
    %172 = arith.mulf %171, %161 : vector<16x128xf32>
    %173 = arith.addf %148, %172 : vector<16x128xf32>
    %c87 = arith.constant 87 : index
    %174 = memref.load %arg2[%c87] : memref<162xf32, #tpu.memory_space<smem>>
    %175 = vector.broadcast %174 : f32 to vector<16x128xf32>
    %176 = arith.mulf %175, %161 : vector<16x128xf32>
    %177 = arith.addf %152, %176 : vector<16x128xf32>
    %c114 = arith.constant 114 : index
    %178 = memref.load %arg2[%c114] : memref<162xf32, #tpu.memory_space<smem>>
    %179 = vector.broadcast %178 : f32 to vector<16x128xf32>
    %180 = arith.mulf %179, %161 : vector<16x128xf32>
    %181 = arith.addf %156, %180 : vector<16x128xf32>
    %c141 = arith.constant 141 : index
    %182 = memref.load %arg2[%c141] : memref<162xf32, #tpu.memory_space<smem>>
    %183 = vector.broadcast %182 : f32 to vector<16x128xf32>
    %184 = arith.mulf %183, %161 : vector<16x128xf32>
    %185 = arith.addf %160, %184 : vector<16x128xf32>
    %186 = vector.extract_strided_slice %10 {offsets = [2, 1], sizes = [16, 128], strides = [1, 1]} : vector<24x256xf32> to vector<16x128xf32>
    %c7 = arith.constant 7 : index
    %187 = memref.load %arg2[%c7] : memref<162xf32, #tpu.memory_space<smem>>
    %188 = vector.broadcast %187 : f32 to vector<16x128xf32>
    %189 = arith.mulf %188, %186 : vector<16x128xf32>
    %190 = arith.addf %165, %189 : vector<16x128xf32>
    %c34 = arith.constant 34 : index
    %191 = memref.load %arg2[%c34] : memref<162xf32, #tpu.memory_space<smem>>
    %192 = vector.broadcast %191 : f32 to vector<16x128xf32>
    %193 = arith.mulf %192, %186 : vector<16x128xf32>
    %194 = arith.addf %169, %193 : vector<16x128xf32>
    %c61 = arith.constant 61 : index
    %195 = memref.load %arg2[%c61] : memref<162xf32, #tpu.memory_space<smem>>
    %196 = vector.broadcast %195 : f32 to vector<16x128xf32>
    %197 = arith.mulf %196, %186 : vector<16x128xf32>
    %198 = arith.addf %173, %197 : vector<16x128xf32>
    %c88 = arith.constant 88 : index
    %199 = memref.load %arg2[%c88] : memref<162xf32, #tpu.memory_space<smem>>
    %200 = vector.broadcast %199 : f32 to vector<16x128xf32>
    %201 = arith.mulf %200, %186 : vector<16x128xf32>
    %202 = arith.addf %177, %201 : vector<16x128xf32>
    %c115 = arith.constant 115 : index
    %203 = memref.load %arg2[%c115] : memref<162xf32, #tpu.memory_space<smem>>
    %204 = vector.broadcast %203 : f32 to vector<16x128xf32>
    %205 = arith.mulf %204, %186 : vector<16x128xf32>
    %206 = arith.addf %181, %205 : vector<16x128xf32>
    %c142 = arith.constant 142 : index
    %207 = memref.load %arg2[%c142] : memref<162xf32, #tpu.memory_space<smem>>
    %208 = vector.broadcast %207 : f32 to vector<16x128xf32>
    %209 = arith.mulf %208, %186 : vector<16x128xf32>
    %210 = arith.addf %185, %209 : vector<16x128xf32>
    %211 = vector.extract_strided_slice %10 {offsets = [2, 2], sizes = [16, 128], strides = [1, 1]} : vector<24x256xf32> to vector<16x128xf32>
    %c8 = arith.constant 8 : index
    %212 = memref.load %arg2[%c8] : memref<162xf32, #tpu.memory_space<smem>>
    %213 = vector.broadcast %212 : f32 to vector<16x128xf32>
    %214 = arith.mulf %213, %211 : vector<16x128xf32>
    %215 = arith.addf %190, %214 : vector<16x128xf32>
    %c35 = arith.constant 35 : index
    %216 = memref.load %arg2[%c35] : memref<162xf32, #tpu.memory_space<smem>>
    %217 = vector.broadcast %216 : f32 to vector<16x128xf32>
    %218 = arith.mulf %217, %211 : vector<16x128xf32>
    %219 = arith.addf %194, %218 : vector<16x128xf32>
    %c62 = arith.constant 62 : index
    %220 = memref.load %arg2[%c62] : memref<162xf32, #tpu.memory_space<smem>>
    %221 = vector.broadcast %220 : f32 to vector<16x128xf32>
    %222 = arith.mulf %221, %211 : vector<16x128xf32>
    %223 = arith.addf %198, %222 : vector<16x128xf32>
    %c89 = arith.constant 89 : index
    %224 = memref.load %arg2[%c89] : memref<162xf32, #tpu.memory_space<smem>>
    %225 = vector.broadcast %224 : f32 to vector<16x128xf32>
    %226 = arith.mulf %225, %211 : vector<16x128xf32>
    %227 = arith.addf %202, %226 : vector<16x128xf32>
    %c116 = arith.constant 116 : index
    %228 = memref.load %arg2[%c116] : memref<162xf32, #tpu.memory_space<smem>>
    %229 = vector.broadcast %228 : f32 to vector<16x128xf32>
    %230 = arith.mulf %229, %211 : vector<16x128xf32>
    %231 = arith.addf %206, %230 : vector<16x128xf32>
    %c143 = arith.constant 143 : index
    %232 = memref.load %arg2[%c143] : memref<162xf32, #tpu.memory_space<smem>>
    %233 = vector.broadcast %232 : f32 to vector<16x128xf32>
    %234 = arith.mulf %233, %211 : vector<16x128xf32>
    %235 = arith.addf %210, %234 : vector<16x128xf32>
    %c0_8 = arith.constant 0 : index
    %c1_9 = arith.constant 1 : index
    %236 = arith.index_cast %1 : i32 to index
    %c0_10 = arith.constant 0 : index
    %237 = vector.load %arg4[%c0_8, %c1_9, %236, %c0_10] : memref<1x3x40x256xf32, #tpu.memory_space<vmem>>, vector<1x1x24x256xf32>
    %238 = vector.shape_cast %237 : vector<1x1x24x256xf32> to vector<24x256xf32>
    %239 = vector.extract_strided_slice %238 {offsets = [0, 0], sizes = [16, 128], strides = [1, 1]} : vector<24x256xf32> to vector<16x128xf32>
    %c9 = arith.constant 9 : index
    %240 = memref.load %arg2[%c9] : memref<162xf32, #tpu.memory_space<smem>>
    %241 = vector.broadcast %240 : f32 to vector<16x128xf32>
    %242 = arith.mulf %241, %239 : vector<16x128xf32>
    %243 = arith.addf %215, %242 : vector<16x128xf32>
    %c36 = arith.constant 36 : index
    %244 = memref.load %arg2[%c36] : memref<162xf32, #tpu.memory_space<smem>>
    %245 = vector.broadcast %244 : f32 to vector<16x128xf32>
    %246 = arith.mulf %245, %239 : vector<16x128xf32>
    %247 = arith.addf %219, %246 : vector<16x128xf32>
    %c63 = arith.constant 63 : index
    %248 = memref.load %arg2[%c63] : memref<162xf32, #tpu.memory_space<smem>>
    %249 = vector.broadcast %248 : f32 to vector<16x128xf32>
    %250 = arith.mulf %249, %239 : vector<16x128xf32>
    %251 = arith.addf %223, %250 : vector<16x128xf32>
    %c90 = arith.constant 90 : index
    %252 = memref.load %arg2[%c90] : memref<162xf32, #tpu.memory_space<smem>>
    %253 = vector.broadcast %252 : f32 to vector<16x128xf32>
    %254 = arith.mulf %253, %239 : vector<16x128xf32>
    %255 = arith.addf %227, %254 : vector<16x128xf32>
    %c117 = arith.constant 117 : index
    %256 = memref.load %arg2[%c117] : memref<162xf32, #tpu.memory_space<smem>>
    %257 = vector.broadcast %256 : f32 to vector<16x128xf32>
    %258 = arith.mulf %257, %239 : vector<16x128xf32>
    %259 = arith.addf %231, %258 : vector<16x128xf32>
    %c144 = arith.constant 144 : index
    %260 = memref.load %arg2[%c144] : memref<162xf32, #tpu.memory_space<smem>>
    %261 = vector.broadcast %260 : f32 to vector<16x128xf32>
    %262 = arith.mulf %261, %239 : vector<16x128xf32>
    %263 = arith.addf %235, %262 : vector<16x128xf32>
    %264 = vector.extract_strided_slice %238 {offsets = [0, 1], sizes = [16, 128], strides = [1, 1]} : vector<24x256xf32> to vector<16x128xf32>
    %c10 = arith.constant 10 : index
    %265 = memref.load %arg2[%c10] : memref<162xf32, #tpu.memory_space<smem>>
    %266 = vector.broadcast %265 : f32 to vector<16x128xf32>
    %267 = arith.mulf %266, %264 : vector<16x128xf32>
    %268 = arith.addf %243, %267 : vector<16x128xf32>
    %c37 = arith.constant 37 : index
    %269 = memref.load %arg2[%c37] : memref<162xf32, #tpu.memory_space<smem>>
    %270 = vector.broadcast %269 : f32 to vector<16x128xf32>
    %271 = arith.mulf %270, %264 : vector<16x128xf32>
    %272 = arith.addf %247, %271 : vector<16x128xf32>
    %c64 = arith.constant 64 : index
    %273 = memref.load %arg2[%c64] : memref<162xf32, #tpu.memory_space<smem>>
    %274 = vector.broadcast %273 : f32 to vector<16x128xf32>
    %275 = arith.mulf %274, %264 : vector<16x128xf32>
    %276 = arith.addf %251, %275 : vector<16x128xf32>
    %c91 = arith.constant 91 : index
    %277 = memref.load %arg2[%c91] : memref<162xf32, #tpu.memory_space<smem>>
    %278 = vector.broadcast %277 : f32 to vector<16x128xf32>
    %279 = arith.mulf %278, %264 : vector<16x128xf32>
    %280 = arith.addf %255, %279 : vector<16x128xf32>
    %c118 = arith.constant 118 : index
    %281 = memref.load %arg2[%c118] : memref<162xf32, #tpu.memory_space<smem>>
    %282 = vector.broadcast %281 : f32 to vector<16x128xf32>
    %283 = arith.mulf %282, %264 : vector<16x128xf32>
    %284 = arith.addf %259, %283 : vector<16x128xf32>
    %c145 = arith.constant 145 : index
    %285 = memref.load %arg2[%c145] : memref<162xf32, #tpu.memory_space<smem>>
    %286 = vector.broadcast %285 : f32 to vector<16x128xf32>
    %287 = arith.mulf %286, %264 : vector<16x128xf32>
    %288 = arith.addf %263, %287 : vector<16x128xf32>
    %289 = vector.extract_strided_slice %238 {offsets = [0, 2], sizes = [16, 128], strides = [1, 1]} : vector<24x256xf32> to vector<16x128xf32>
    %c11 = arith.constant 11 : index
    %290 = memref.load %arg2[%c11] : memref<162xf32, #tpu.memory_space<smem>>
    %291 = vector.broadcast %290 : f32 to vector<16x128xf32>
    %292 = arith.mulf %291, %289 : vector<16x128xf32>
    %293 = arith.addf %268, %292 : vector<16x128xf32>
    %c38 = arith.constant 38 : index
    %294 = memref.load %arg2[%c38] : memref<162xf32, #tpu.memory_space<smem>>
    %295 = vector.broadcast %294 : f32 to vector<16x128xf32>
    %296 = arith.mulf %295, %289 : vector<16x128xf32>
    %297 = arith.addf %272, %296 : vector<16x128xf32>
    %c65 = arith.constant 65 : index
    %298 = memref.load %arg2[%c65] : memref<162xf32, #tpu.memory_space<smem>>
    %299 = vector.broadcast %298 : f32 to vector<16x128xf32>
    %300 = arith.mulf %299, %289 : vector<16x128xf32>
    %301 = arith.addf %276, %300 : vector<16x128xf32>
    %c92 = arith.constant 92 : index
    %302 = memref.load %arg2[%c92] : memref<162xf32, #tpu.memory_space<smem>>
    %303 = vector.broadcast %302 : f32 to vector<16x128xf32>
    %304 = arith.mulf %303, %289 : vector<16x128xf32>
    %305 = arith.addf %280, %304 : vector<16x128xf32>
    %c119 = arith.constant 119 : index
    %306 = memref.load %arg2[%c119] : memref<162xf32, #tpu.memory_space<smem>>
    %307 = vector.broadcast %306 : f32 to vector<16x128xf32>
    %308 = arith.mulf %307, %289 : vector<16x128xf32>
    %309 = arith.addf %284, %308 : vector<16x128xf32>
    %c146 = arith.constant 146 : index
    %310 = memref.load %arg2[%c146] : memref<162xf32, #tpu.memory_space<smem>>
    %311 = vector.broadcast %310 : f32 to vector<16x128xf32>
    %312 = arith.mulf %311, %289 : vector<16x128xf32>
    %313 = arith.addf %288, %312 : vector<16x128xf32>
    %314 = vector.extract_strided_slice %238 {offsets = [1, 0], sizes = [16, 128], strides = [1, 1]} : vector<24x256xf32> to vector<16x128xf32>
    %c12 = arith.constant 12 : index
    %315 = memref.load %arg2[%c12] : memref<162xf32, #tpu.memory_space<smem>>
    %316 = vector.broadcast %315 : f32 to vector<16x128xf32>
    %317 = arith.mulf %316, %314 : vector<16x128xf32>
    %318 = arith.addf %293, %317 : vector<16x128xf32>
    %c39 = arith.constant 39 : index
    %319 = memref.load %arg2[%c39] : memref<162xf32, #tpu.memory_space<smem>>
    %320 = vector.broadcast %319 : f32 to vector<16x128xf32>
    %321 = arith.mulf %320, %314 : vector<16x128xf32>
    %322 = arith.addf %297, %321 : vector<16x128xf32>
    %c66 = arith.constant 66 : index
    %323 = memref.load %arg2[%c66] : memref<162xf32, #tpu.memory_space<smem>>
    %324 = vector.broadcast %323 : f32 to vector<16x128xf32>
    %325 = arith.mulf %324, %314 : vector<16x128xf32>
    %326 = arith.addf %301, %325 : vector<16x128xf32>
    %c93 = arith.constant 93 : index
    %327 = memref.load %arg2[%c93] : memref<162xf32, #tpu.memory_space<smem>>
    %328 = vector.broadcast %327 : f32 to vector<16x128xf32>
    %329 = arith.mulf %328, %314 : vector<16x128xf32>
    %330 = arith.addf %305, %329 : vector<16x128xf32>
    %c120 = arith.constant 120 : index
    %331 = memref.load %arg2[%c120] : memref<162xf32, #tpu.memory_space<smem>>
    %332 = vector.broadcast %331 : f32 to vector<16x128xf32>
    %333 = arith.mulf %332, %314 : vector<16x128xf32>
    %334 = arith.addf %309, %333 : vector<16x128xf32>
    %c147 = arith.constant 147 : index
    %335 = memref.load %arg2[%c147] : memref<162xf32, #tpu.memory_space<smem>>
    %336 = vector.broadcast %335 : f32 to vector<16x128xf32>
    %337 = arith.mulf %336, %314 : vector<16x128xf32>
    %338 = arith.addf %313, %337 : vector<16x128xf32>
    %339 = vector.extract_strided_slice %238 {offsets = [1, 1], sizes = [16, 128], strides = [1, 1]} : vector<24x256xf32> to vector<16x128xf32>
    %c13 = arith.constant 13 : index
    %340 = memref.load %arg2[%c13] : memref<162xf32, #tpu.memory_space<smem>>
    %341 = vector.broadcast %340 : f32 to vector<16x128xf32>
    %342 = arith.mulf %341, %339 : vector<16x128xf32>
    %343 = arith.addf %318, %342 : vector<16x128xf32>
    %c40 = arith.constant 40 : index
    %344 = memref.load %arg2[%c40] : memref<162xf32, #tpu.memory_space<smem>>
    %345 = vector.broadcast %344 : f32 to vector<16x128xf32>
    %346 = arith.mulf %345, %339 : vector<16x128xf32>
    %347 = arith.addf %322, %346 : vector<16x128xf32>
    %c67 = arith.constant 67 : index
    %348 = memref.load %arg2[%c67] : memref<162xf32, #tpu.memory_space<smem>>
    %349 = vector.broadcast %348 : f32 to vector<16x128xf32>
    %350 = arith.mulf %349, %339 : vector<16x128xf32>
    %351 = arith.addf %326, %350 : vector<16x128xf32>
    %c94 = arith.constant 94 : index
    %352 = memref.load %arg2[%c94] : memref<162xf32, #tpu.memory_space<smem>>
    %353 = vector.broadcast %352 : f32 to vector<16x128xf32>
    %354 = arith.mulf %353, %339 : vector<16x128xf32>
    %355 = arith.addf %330, %354 : vector<16x128xf32>
    %c121 = arith.constant 121 : index
    %356 = memref.load %arg2[%c121] : memref<162xf32, #tpu.memory_space<smem>>
    %357 = vector.broadcast %356 : f32 to vector<16x128xf32>
    %358 = arith.mulf %357, %339 : vector<16x128xf32>
    %359 = arith.addf %334, %358 : vector<16x128xf32>
    %c148 = arith.constant 148 : index
    %360 = memref.load %arg2[%c148] : memref<162xf32, #tpu.memory_space<smem>>
    %361 = vector.broadcast %360 : f32 to vector<16x128xf32>
    %362 = arith.mulf %361, %339 : vector<16x128xf32>
    %363 = arith.addf %338, %362 : vector<16x128xf32>
    %364 = vector.extract_strided_slice %238 {offsets = [1, 2], sizes = [16, 128], strides = [1, 1]} : vector<24x256xf32> to vector<16x128xf32>
    %c14 = arith.constant 14 : index
    %365 = memref.load %arg2[%c14] : memref<162xf32, #tpu.memory_space<smem>>
    %366 = vector.broadcast %365 : f32 to vector<16x128xf32>
    %367 = arith.mulf %366, %364 : vector<16x128xf32>
    %368 = arith.addf %343, %367 : vector<16x128xf32>
    %c41 = arith.constant 41 : index
    %369 = memref.load %arg2[%c41] : memref<162xf32, #tpu.memory_space<smem>>
    %370 = vector.broadcast %369 : f32 to vector<16x128xf32>
    %371 = arith.mulf %370, %364 : vector<16x128xf32>
    %372 = arith.addf %347, %371 : vector<16x128xf32>
    %c68 = arith.constant 68 : index
    %373 = memref.load %arg2[%c68] : memref<162xf32, #tpu.memory_space<smem>>
    %374 = vector.broadcast %373 : f32 to vector<16x128xf32>
    %375 = arith.mulf %374, %364 : vector<16x128xf32>
    %376 = arith.addf %351, %375 : vector<16x128xf32>
    %c95 = arith.constant 95 : index
    %377 = memref.load %arg2[%c95] : memref<162xf32, #tpu.memory_space<smem>>
    %378 = vector.broadcast %377 : f32 to vector<16x128xf32>
    %379 = arith.mulf %378, %364 : vector<16x128xf32>
    %380 = arith.addf %355, %379 : vector<16x128xf32>
    %c122 = arith.constant 122 : index
    %381 = memref.load %arg2[%c122] : memref<162xf32, #tpu.memory_space<smem>>
    %382 = vector.broadcast %381 : f32 to vector<16x128xf32>
    %383 = arith.mulf %382, %364 : vector<16x128xf32>
    %384 = arith.addf %359, %383 : vector<16x128xf32>
    %c149 = arith.constant 149 : index
    %385 = memref.load %arg2[%c149] : memref<162xf32, #tpu.memory_space<smem>>
    %386 = vector.broadcast %385 : f32 to vector<16x128xf32>
    %387 = arith.mulf %386, %364 : vector<16x128xf32>
    %388 = arith.addf %363, %387 : vector<16x128xf32>
    %389 = vector.extract_strided_slice %238 {offsets = [2, 0], sizes = [16, 128], strides = [1, 1]} : vector<24x256xf32> to vector<16x128xf32>
    %c15 = arith.constant 15 : index
    %390 = memref.load %arg2[%c15] : memref<162xf32, #tpu.memory_space<smem>>
    %391 = vector.broadcast %390 : f32 to vector<16x128xf32>
    %392 = arith.mulf %391, %389 : vector<16x128xf32>
    %393 = arith.addf %368, %392 : vector<16x128xf32>
    %c42 = arith.constant 42 : index
    %394 = memref.load %arg2[%c42] : memref<162xf32, #tpu.memory_space<smem>>
    %395 = vector.broadcast %394 : f32 to vector<16x128xf32>
    %396 = arith.mulf %395, %389 : vector<16x128xf32>
    %397 = arith.addf %372, %396 : vector<16x128xf32>
    %c69 = arith.constant 69 : index
    %398 = memref.load %arg2[%c69] : memref<162xf32, #tpu.memory_space<smem>>
    %399 = vector.broadcast %398 : f32 to vector<16x128xf32>
    %400 = arith.mulf %399, %389 : vector<16x128xf32>
    %401 = arith.addf %376, %400 : vector<16x128xf32>
    %c96 = arith.constant 96 : index
    %402 = memref.load %arg2[%c96] : memref<162xf32, #tpu.memory_space<smem>>
    %403 = vector.broadcast %402 : f32 to vector<16x128xf32>
    %404 = arith.mulf %403, %389 : vector<16x128xf32>
    %405 = arith.addf %380, %404 : vector<16x128xf32>
    %c123 = arith.constant 123 : index
    %406 = memref.load %arg2[%c123] : memref<162xf32, #tpu.memory_space<smem>>
    %407 = vector.broadcast %406 : f32 to vector<16x128xf32>
    %408 = arith.mulf %407, %389 : vector<16x128xf32>
    %409 = arith.addf %384, %408 : vector<16x128xf32>
    %c150 = arith.constant 150 : index
    %410 = memref.load %arg2[%c150] : memref<162xf32, #tpu.memory_space<smem>>
    %411 = vector.broadcast %410 : f32 to vector<16x128xf32>
    %412 = arith.mulf %411, %389 : vector<16x128xf32>
    %413 = arith.addf %388, %412 : vector<16x128xf32>
    %414 = vector.extract_strided_slice %238 {offsets = [2, 1], sizes = [16, 128], strides = [1, 1]} : vector<24x256xf32> to vector<16x128xf32>
    %c16 = arith.constant 16 : index
    %415 = memref.load %arg2[%c16] : memref<162xf32, #tpu.memory_space<smem>>
    %416 = vector.broadcast %415 : f32 to vector<16x128xf32>
    %417 = arith.mulf %416, %414 : vector<16x128xf32>
    %418 = arith.addf %393, %417 : vector<16x128xf32>
    %c43 = arith.constant 43 : index
    %419 = memref.load %arg2[%c43] : memref<162xf32, #tpu.memory_space<smem>>
    %420 = vector.broadcast %419 : f32 to vector<16x128xf32>
    %421 = arith.mulf %420, %414 : vector<16x128xf32>
    %422 = arith.addf %397, %421 : vector<16x128xf32>
    %c70 = arith.constant 70 : index
    %423 = memref.load %arg2[%c70] : memref<162xf32, #tpu.memory_space<smem>>
    %424 = vector.broadcast %423 : f32 to vector<16x128xf32>
    %425 = arith.mulf %424, %414 : vector<16x128xf32>
    %426 = arith.addf %401, %425 : vector<16x128xf32>
    %c97 = arith.constant 97 : index
    %427 = memref.load %arg2[%c97] : memref<162xf32, #tpu.memory_space<smem>>
    %428 = vector.broadcast %427 : f32 to vector<16x128xf32>
    %429 = arith.mulf %428, %414 : vector<16x128xf32>
    %430 = arith.addf %405, %429 : vector<16x128xf32>
    %c124 = arith.constant 124 : index
    %431 = memref.load %arg2[%c124] : memref<162xf32, #tpu.memory_space<smem>>
    %432 = vector.broadcast %431 : f32 to vector<16x128xf32>
    %433 = arith.mulf %432, %414 : vector<16x128xf32>
    %434 = arith.addf %409, %433 : vector<16x128xf32>
    %c151 = arith.constant 151 : index
    %435 = memref.load %arg2[%c151] : memref<162xf32, #tpu.memory_space<smem>>
    %436 = vector.broadcast %435 : f32 to vector<16x128xf32>
    %437 = arith.mulf %436, %414 : vector<16x128xf32>
    %438 = arith.addf %413, %437 : vector<16x128xf32>
    %439 = vector.extract_strided_slice %238 {offsets = [2, 2], sizes = [16, 128], strides = [1, 1]} : vector<24x256xf32> to vector<16x128xf32>
    %c17 = arith.constant 17 : index
    %440 = memref.load %arg2[%c17] : memref<162xf32, #tpu.memory_space<smem>>
    %441 = vector.broadcast %440 : f32 to vector<16x128xf32>
    %442 = arith.mulf %441, %439 : vector<16x128xf32>
    %443 = arith.addf %418, %442 : vector<16x128xf32>
    %c44 = arith.constant 44 : index
    %444 = memref.load %arg2[%c44] : memref<162xf32, #tpu.memory_space<smem>>
    %445 = vector.broadcast %444 : f32 to vector<16x128xf32>
    %446 = arith.mulf %445, %439 : vector<16x128xf32>
    %447 = arith.addf %422, %446 : vector<16x128xf32>
    %c71 = arith.constant 71 : index
    %448 = memref.load %arg2[%c71] : memref<162xf32, #tpu.memory_space<smem>>
    %449 = vector.broadcast %448 : f32 to vector<16x128xf32>
    %450 = arith.mulf %449, %439 : vector<16x128xf32>
    %451 = arith.addf %426, %450 : vector<16x128xf32>
    %c98 = arith.constant 98 : index
    %452 = memref.load %arg2[%c98] : memref<162xf32, #tpu.memory_space<smem>>
    %453 = vector.broadcast %452 : f32 to vector<16x128xf32>
    %454 = arith.mulf %453, %439 : vector<16x128xf32>
    %455 = arith.addf %430, %454 : vector<16x128xf32>
    %c125 = arith.constant 125 : index
    %456 = memref.load %arg2[%c125] : memref<162xf32, #tpu.memory_space<smem>>
    %457 = vector.broadcast %456 : f32 to vector<16x128xf32>
    %458 = arith.mulf %457, %439 : vector<16x128xf32>
    %459 = arith.addf %434, %458 : vector<16x128xf32>
    %c152 = arith.constant 152 : index
    %460 = memref.load %arg2[%c152] : memref<162xf32, #tpu.memory_space<smem>>
    %461 = vector.broadcast %460 : f32 to vector<16x128xf32>
    %462 = arith.mulf %461, %439 : vector<16x128xf32>
    %463 = arith.addf %438, %462 : vector<16x128xf32>
    %c0_11 = arith.constant 0 : index
    %c2_12 = arith.constant 2 : index
    %464 = arith.index_cast %1 : i32 to index
    %c0_13 = arith.constant 0 : index
    %465 = vector.load %arg4[%c0_11, %c2_12, %464, %c0_13] : memref<1x3x40x256xf32, #tpu.memory_space<vmem>>, vector<1x1x24x256xf32>
    %466 = vector.shape_cast %465 : vector<1x1x24x256xf32> to vector<24x256xf32>
    %467 = vector.extract_strided_slice %466 {offsets = [0, 0], sizes = [16, 128], strides = [1, 1]} : vector<24x256xf32> to vector<16x128xf32>
    %c18 = arith.constant 18 : index
    %468 = memref.load %arg2[%c18] : memref<162xf32, #tpu.memory_space<smem>>
    %469 = vector.broadcast %468 : f32 to vector<16x128xf32>
    %470 = arith.mulf %469, %467 : vector<16x128xf32>
    %471 = arith.addf %443, %470 : vector<16x128xf32>
    %c45 = arith.constant 45 : index
    %472 = memref.load %arg2[%c45] : memref<162xf32, #tpu.memory_space<smem>>
    %473 = vector.broadcast %472 : f32 to vector<16x128xf32>
    %474 = arith.mulf %473, %467 : vector<16x128xf32>
    %475 = arith.addf %447, %474 : vector<16x128xf32>
    %c72 = arith.constant 72 : index
    %476 = memref.load %arg2[%c72] : memref<162xf32, #tpu.memory_space<smem>>
    %477 = vector.broadcast %476 : f32 to vector<16x128xf32>
    %478 = arith.mulf %477, %467 : vector<16x128xf32>
    %479 = arith.addf %451, %478 : vector<16x128xf32>
    %c99 = arith.constant 99 : index
    %480 = memref.load %arg2[%c99] : memref<162xf32, #tpu.memory_space<smem>>
    %481 = vector.broadcast %480 : f32 to vector<16x128xf32>
    %482 = arith.mulf %481, %467 : vector<16x128xf32>
    %483 = arith.addf %455, %482 : vector<16x128xf32>
    %c126 = arith.constant 126 : index
    %484 = memref.load %arg2[%c126] : memref<162xf32, #tpu.memory_space<smem>>
    %485 = vector.broadcast %484 : f32 to vector<16x128xf32>
    %486 = arith.mulf %485, %467 : vector<16x128xf32>
    %487 = arith.addf %459, %486 : vector<16x128xf32>
    %c153 = arith.constant 153 : index
    %488 = memref.load %arg2[%c153] : memref<162xf32, #tpu.memory_space<smem>>
    %489 = vector.broadcast %488 : f32 to vector<16x128xf32>
    %490 = arith.mulf %489, %467 : vector<16x128xf32>
    %491 = arith.addf %463, %490 : vector<16x128xf32>
    %492 = vector.extract_strided_slice %466 {offsets = [0, 1], sizes = [16, 128], strides = [1, 1]} : vector<24x256xf32> to vector<16x128xf32>
    %c19 = arith.constant 19 : index
    %493 = memref.load %arg2[%c19] : memref<162xf32, #tpu.memory_space<smem>>
    %494 = vector.broadcast %493 : f32 to vector<16x128xf32>
    %495 = arith.mulf %494, %492 : vector<16x128xf32>
    %496 = arith.addf %471, %495 : vector<16x128xf32>
    %c46 = arith.constant 46 : index
    %497 = memref.load %arg2[%c46] : memref<162xf32, #tpu.memory_space<smem>>
    %498 = vector.broadcast %497 : f32 to vector<16x128xf32>
    %499 = arith.mulf %498, %492 : vector<16x128xf32>
    %500 = arith.addf %475, %499 : vector<16x128xf32>
    %c73 = arith.constant 73 : index
    %501 = memref.load %arg2[%c73] : memref<162xf32, #tpu.memory_space<smem>>
    %502 = vector.broadcast %501 : f32 to vector<16x128xf32>
    %503 = arith.mulf %502, %492 : vector<16x128xf32>
    %504 = arith.addf %479, %503 : vector<16x128xf32>
    %c100 = arith.constant 100 : index
    %505 = memref.load %arg2[%c100] : memref<162xf32, #tpu.memory_space<smem>>
    %506 = vector.broadcast %505 : f32 to vector<16x128xf32>
    %507 = arith.mulf %506, %492 : vector<16x128xf32>
    %508 = arith.addf %483, %507 : vector<16x128xf32>
    %c127 = arith.constant 127 : index
    %509 = memref.load %arg2[%c127] : memref<162xf32, #tpu.memory_space<smem>>
    %510 = vector.broadcast %509 : f32 to vector<16x128xf32>
    %511 = arith.mulf %510, %492 : vector<16x128xf32>
    %512 = arith.addf %487, %511 : vector<16x128xf32>
    %c154 = arith.constant 154 : index
    %513 = memref.load %arg2[%c154] : memref<162xf32, #tpu.memory_space<smem>>
    %514 = vector.broadcast %513 : f32 to vector<16x128xf32>
    %515 = arith.mulf %514, %492 : vector<16x128xf32>
    %516 = arith.addf %491, %515 : vector<16x128xf32>
    %517 = vector.extract_strided_slice %466 {offsets = [0, 2], sizes = [16, 128], strides = [1, 1]} : vector<24x256xf32> to vector<16x128xf32>
    %c20 = arith.constant 20 : index
    %518 = memref.load %arg2[%c20] : memref<162xf32, #tpu.memory_space<smem>>
    %519 = vector.broadcast %518 : f32 to vector<16x128xf32>
    %520 = arith.mulf %519, %517 : vector<16x128xf32>
    %521 = arith.addf %496, %520 : vector<16x128xf32>
    %c47 = arith.constant 47 : index
    %522 = memref.load %arg2[%c47] : memref<162xf32, #tpu.memory_space<smem>>
    %523 = vector.broadcast %522 : f32 to vector<16x128xf32>
    %524 = arith.mulf %523, %517 : vector<16x128xf32>
    %525 = arith.addf %500, %524 : vector<16x128xf32>
    %c74 = arith.constant 74 : index
    %526 = memref.load %arg2[%c74] : memref<162xf32, #tpu.memory_space<smem>>
    %527 = vector.broadcast %526 : f32 to vector<16x128xf32>
    %528 = arith.mulf %527, %517 : vector<16x128xf32>
    %529 = arith.addf %504, %528 : vector<16x128xf32>
    %c101 = arith.constant 101 : index
    %530 = memref.load %arg2[%c101] : memref<162xf32, #tpu.memory_space<smem>>
    %531 = vector.broadcast %530 : f32 to vector<16x128xf32>
    %532 = arith.mulf %531, %517 : vector<16x128xf32>
    %533 = arith.addf %508, %532 : vector<16x128xf32>
    %c128 = arith.constant 128 : index
    %534 = memref.load %arg2[%c128] : memref<162xf32, #tpu.memory_space<smem>>
    %535 = vector.broadcast %534 : f32 to vector<16x128xf32>
    %536 = arith.mulf %535, %517 : vector<16x128xf32>
    %537 = arith.addf %512, %536 : vector<16x128xf32>
    %c155 = arith.constant 155 : index
    %538 = memref.load %arg2[%c155] : memref<162xf32, #tpu.memory_space<smem>>
    %539 = vector.broadcast %538 : f32 to vector<16x128xf32>
    %540 = arith.mulf %539, %517 : vector<16x128xf32>
    %541 = arith.addf %516, %540 : vector<16x128xf32>
    %542 = vector.extract_strided_slice %466 {offsets = [1, 0], sizes = [16, 128], strides = [1, 1]} : vector<24x256xf32> to vector<16x128xf32>
    %c21 = arith.constant 21 : index
    %543 = memref.load %arg2[%c21] : memref<162xf32, #tpu.memory_space<smem>>
    %544 = vector.broadcast %543 : f32 to vector<16x128xf32>
    %545 = arith.mulf %544, %542 : vector<16x128xf32>
    %546 = arith.addf %521, %545 : vector<16x128xf32>
    %c48 = arith.constant 48 : index
    %547 = memref.load %arg2[%c48] : memref<162xf32, #tpu.memory_space<smem>>
    %548 = vector.broadcast %547 : f32 to vector<16x128xf32>
    %549 = arith.mulf %548, %542 : vector<16x128xf32>
    %550 = arith.addf %525, %549 : vector<16x128xf32>
    %c75 = arith.constant 75 : index
    %551 = memref.load %arg2[%c75] : memref<162xf32, #tpu.memory_space<smem>>
    %552 = vector.broadcast %551 : f32 to vector<16x128xf32>
    %553 = arith.mulf %552, %542 : vector<16x128xf32>
    %554 = arith.addf %529, %553 : vector<16x128xf32>
    %c102 = arith.constant 102 : index
    %555 = memref.load %arg2[%c102] : memref<162xf32, #tpu.memory_space<smem>>
    %556 = vector.broadcast %555 : f32 to vector<16x128xf32>
    %557 = arith.mulf %556, %542 : vector<16x128xf32>
    %558 = arith.addf %533, %557 : vector<16x128xf32>
    %c129 = arith.constant 129 : index
    %559 = memref.load %arg2[%c129] : memref<162xf32, #tpu.memory_space<smem>>
    %560 = vector.broadcast %559 : f32 to vector<16x128xf32>
    %561 = arith.mulf %560, %542 : vector<16x128xf32>
    %562 = arith.addf %537, %561 : vector<16x128xf32>
    %c156 = arith.constant 156 : index
    %563 = memref.load %arg2[%c156] : memref<162xf32, #tpu.memory_space<smem>>
    %564 = vector.broadcast %563 : f32 to vector<16x128xf32>
    %565 = arith.mulf %564, %542 : vector<16x128xf32>
    %566 = arith.addf %541, %565 : vector<16x128xf32>
    %567 = vector.extract_strided_slice %466 {offsets = [1, 1], sizes = [16, 128], strides = [1, 1]} : vector<24x256xf32> to vector<16x128xf32>
    %c22 = arith.constant 22 : index
    %568 = memref.load %arg2[%c22] : memref<162xf32, #tpu.memory_space<smem>>
    %569 = vector.broadcast %568 : f32 to vector<16x128xf32>
    %570 = arith.mulf %569, %567 : vector<16x128xf32>
    %571 = arith.addf %546, %570 : vector<16x128xf32>
    %c49 = arith.constant 49 : index
    %572 = memref.load %arg2[%c49] : memref<162xf32, #tpu.memory_space<smem>>
    %573 = vector.broadcast %572 : f32 to vector<16x128xf32>
    %574 = arith.mulf %573, %567 : vector<16x128xf32>
    %575 = arith.addf %550, %574 : vector<16x128xf32>
    %c76 = arith.constant 76 : index
    %576 = memref.load %arg2[%c76] : memref<162xf32, #tpu.memory_space<smem>>
    %577 = vector.broadcast %576 : f32 to vector<16x128xf32>
    %578 = arith.mulf %577, %567 : vector<16x128xf32>
    %579 = arith.addf %554, %578 : vector<16x128xf32>
    %c103 = arith.constant 103 : index
    %580 = memref.load %arg2[%c103] : memref<162xf32, #tpu.memory_space<smem>>
    %581 = vector.broadcast %580 : f32 to vector<16x128xf32>
    %582 = arith.mulf %581, %567 : vector<16x128xf32>
    %583 = arith.addf %558, %582 : vector<16x128xf32>
    %c130 = arith.constant 130 : index
    %584 = memref.load %arg2[%c130] : memref<162xf32, #tpu.memory_space<smem>>
    %585 = vector.broadcast %584 : f32 to vector<16x128xf32>
    %586 = arith.mulf %585, %567 : vector<16x128xf32>
    %587 = arith.addf %562, %586 : vector<16x128xf32>
    %c157 = arith.constant 157 : index
    %588 = memref.load %arg2[%c157] : memref<162xf32, #tpu.memory_space<smem>>
    %589 = vector.broadcast %588 : f32 to vector<16x128xf32>
    %590 = arith.mulf %589, %567 : vector<16x128xf32>
    %591 = arith.addf %566, %590 : vector<16x128xf32>
    %592 = vector.extract_strided_slice %466 {offsets = [1, 2], sizes = [16, 128], strides = [1, 1]} : vector<24x256xf32> to vector<16x128xf32>
    %c23 = arith.constant 23 : index
    %593 = memref.load %arg2[%c23] : memref<162xf32, #tpu.memory_space<smem>>
    %594 = vector.broadcast %593 : f32 to vector<16x128xf32>
    %595 = arith.mulf %594, %592 : vector<16x128xf32>
    %596 = arith.addf %571, %595 : vector<16x128xf32>
    %c50 = arith.constant 50 : index
    %597 = memref.load %arg2[%c50] : memref<162xf32, #tpu.memory_space<smem>>
    %598 = vector.broadcast %597 : f32 to vector<16x128xf32>
    %599 = arith.mulf %598, %592 : vector<16x128xf32>
    %600 = arith.addf %575, %599 : vector<16x128xf32>
    %c77 = arith.constant 77 : index
    %601 = memref.load %arg2[%c77] : memref<162xf32, #tpu.memory_space<smem>>
    %602 = vector.broadcast %601 : f32 to vector<16x128xf32>
    %603 = arith.mulf %602, %592 : vector<16x128xf32>
    %604 = arith.addf %579, %603 : vector<16x128xf32>
    %c104 = arith.constant 104 : index
    %605 = memref.load %arg2[%c104] : memref<162xf32, #tpu.memory_space<smem>>
    %606 = vector.broadcast %605 : f32 to vector<16x128xf32>
    %607 = arith.mulf %606, %592 : vector<16x128xf32>
    %608 = arith.addf %583, %607 : vector<16x128xf32>
    %c131 = arith.constant 131 : index
    %609 = memref.load %arg2[%c131] : memref<162xf32, #tpu.memory_space<smem>>
    %610 = vector.broadcast %609 : f32 to vector<16x128xf32>
    %611 = arith.mulf %610, %592 : vector<16x128xf32>
    %612 = arith.addf %587, %611 : vector<16x128xf32>
    %c158 = arith.constant 158 : index
    %613 = memref.load %arg2[%c158] : memref<162xf32, #tpu.memory_space<smem>>
    %614 = vector.broadcast %613 : f32 to vector<16x128xf32>
    %615 = arith.mulf %614, %592 : vector<16x128xf32>
    %616 = arith.addf %591, %615 : vector<16x128xf32>
    %617 = vector.extract_strided_slice %466 {offsets = [2, 0], sizes = [16, 128], strides = [1, 1]} : vector<24x256xf32> to vector<16x128xf32>
    %c24 = arith.constant 24 : index
    %618 = memref.load %arg2[%c24] : memref<162xf32, #tpu.memory_space<smem>>
    %619 = vector.broadcast %618 : f32 to vector<16x128xf32>
    %620 = arith.mulf %619, %617 : vector<16x128xf32>
    %621 = arith.addf %596, %620 : vector<16x128xf32>
    %c51 = arith.constant 51 : index
    %622 = memref.load %arg2[%c51] : memref<162xf32, #tpu.memory_space<smem>>
    %623 = vector.broadcast %622 : f32 to vector<16x128xf32>
    %624 = arith.mulf %623, %617 : vector<16x128xf32>
    %625 = arith.addf %600, %624 : vector<16x128xf32>
    %c78 = arith.constant 78 : index
    %626 = memref.load %arg2[%c78] : memref<162xf32, #tpu.memory_space<smem>>
    %627 = vector.broadcast %626 : f32 to vector<16x128xf32>
    %628 = arith.mulf %627, %617 : vector<16x128xf32>
    %629 = arith.addf %604, %628 : vector<16x128xf32>
    %c105 = arith.constant 105 : index
    %630 = memref.load %arg2[%c105] : memref<162xf32, #tpu.memory_space<smem>>
    %631 = vector.broadcast %630 : f32 to vector<16x128xf32>
    %632 = arith.mulf %631, %617 : vector<16x128xf32>
    %633 = arith.addf %608, %632 : vector<16x128xf32>
    %c132 = arith.constant 132 : index
    %634 = memref.load %arg2[%c132] : memref<162xf32, #tpu.memory_space<smem>>
    %635 = vector.broadcast %634 : f32 to vector<16x128xf32>
    %636 = arith.mulf %635, %617 : vector<16x128xf32>
    %637 = arith.addf %612, %636 : vector<16x128xf32>
    %c159 = arith.constant 159 : index
    %638 = memref.load %arg2[%c159] : memref<162xf32, #tpu.memory_space<smem>>
    %639 = vector.broadcast %638 : f32 to vector<16x128xf32>
    %640 = arith.mulf %639, %617 : vector<16x128xf32>
    %641 = arith.addf %616, %640 : vector<16x128xf32>
    %642 = vector.extract_strided_slice %466 {offsets = [2, 1], sizes = [16, 128], strides = [1, 1]} : vector<24x256xf32> to vector<16x128xf32>
    %c25 = arith.constant 25 : index
    %643 = memref.load %arg2[%c25] : memref<162xf32, #tpu.memory_space<smem>>
    %644 = vector.broadcast %643 : f32 to vector<16x128xf32>
    %645 = arith.mulf %644, %642 : vector<16x128xf32>
    %646 = arith.addf %621, %645 : vector<16x128xf32>
    %c52 = arith.constant 52 : index
    %647 = memref.load %arg2[%c52] : memref<162xf32, #tpu.memory_space<smem>>
    %648 = vector.broadcast %647 : f32 to vector<16x128xf32>
    %649 = arith.mulf %648, %642 : vector<16x128xf32>
    %650 = arith.addf %625, %649 : vector<16x128xf32>
    %c79 = arith.constant 79 : index
    %651 = memref.load %arg2[%c79] : memref<162xf32, #tpu.memory_space<smem>>
    %652 = vector.broadcast %651 : f32 to vector<16x128xf32>
    %653 = arith.mulf %652, %642 : vector<16x128xf32>
    %654 = arith.addf %629, %653 : vector<16x128xf32>
    %c106 = arith.constant 106 : index
    %655 = memref.load %arg2[%c106] : memref<162xf32, #tpu.memory_space<smem>>
    %656 = vector.broadcast %655 : f32 to vector<16x128xf32>
    %657 = arith.mulf %656, %642 : vector<16x128xf32>
    %658 = arith.addf %633, %657 : vector<16x128xf32>
    %c133 = arith.constant 133 : index
    %659 = memref.load %arg2[%c133] : memref<162xf32, #tpu.memory_space<smem>>
    %660 = vector.broadcast %659 : f32 to vector<16x128xf32>
    %661 = arith.mulf %660, %642 : vector<16x128xf32>
    %662 = arith.addf %637, %661 : vector<16x128xf32>
    %c160 = arith.constant 160 : index
    %663 = memref.load %arg2[%c160] : memref<162xf32, #tpu.memory_space<smem>>
    %664 = vector.broadcast %663 : f32 to vector<16x128xf32>
    %665 = arith.mulf %664, %642 : vector<16x128xf32>
    %666 = arith.addf %641, %665 : vector<16x128xf32>
    %667 = vector.extract_strided_slice %466 {offsets = [2, 2], sizes = [16, 128], strides = [1, 1]} : vector<24x256xf32> to vector<16x128xf32>
    %c26 = arith.constant 26 : index
    %668 = memref.load %arg2[%c26] : memref<162xf32, #tpu.memory_space<smem>>
    %669 = vector.broadcast %668 : f32 to vector<16x128xf32>
    %670 = arith.mulf %669, %667 : vector<16x128xf32>
    %671 = arith.addf %646, %670 : vector<16x128xf32>
    %c53 = arith.constant 53 : index
    %672 = memref.load %arg2[%c53] : memref<162xf32, #tpu.memory_space<smem>>
    %673 = vector.broadcast %672 : f32 to vector<16x128xf32>
    %674 = arith.mulf %673, %667 : vector<16x128xf32>
    %675 = arith.addf %650, %674 : vector<16x128xf32>
    %c80 = arith.constant 80 : index
    %676 = memref.load %arg2[%c80] : memref<162xf32, #tpu.memory_space<smem>>
    %677 = vector.broadcast %676 : f32 to vector<16x128xf32>
    %678 = arith.mulf %677, %667 : vector<16x128xf32>
    %679 = arith.addf %654, %678 : vector<16x128xf32>
    %c107 = arith.constant 107 : index
    %680 = memref.load %arg2[%c107] : memref<162xf32, #tpu.memory_space<smem>>
    %681 = vector.broadcast %680 : f32 to vector<16x128xf32>
    %682 = arith.mulf %681, %667 : vector<16x128xf32>
    %683 = arith.addf %658, %682 : vector<16x128xf32>
    %c134 = arith.constant 134 : index
    %684 = memref.load %arg2[%c134] : memref<162xf32, #tpu.memory_space<smem>>
    %685 = vector.broadcast %684 : f32 to vector<16x128xf32>
    %686 = arith.mulf %685, %667 : vector<16x128xf32>
    %687 = arith.addf %662, %686 : vector<16x128xf32>
    %c161 = arith.constant 161 : index
    %688 = memref.load %arg2[%c161] : memref<162xf32, #tpu.memory_space<smem>>
    %689 = vector.broadcast %688 : f32 to vector<16x128xf32>
    %690 = arith.mulf %689, %667 : vector<16x128xf32>
    %691 = arith.addf %666, %690 : vector<16x128xf32>
    %c0_14 = arith.constant 0 : index
    %692 = memref.load %arg3[%c0_14] : memref<6xf32, #tpu.memory_space<smem>>
    %693 = vector.broadcast %692 : f32 to vector<16x128xf32>
    %694 = arith.addf %671, %693 : vector<16x128xf32>
    %cst_15 = arith.constant 0.000000e+00 : f32
    %cst_16 = arith.constant 6.000000e+00 : f32
    %695 = vector.broadcast %cst_15 : f32 to vector<16x128xf32>
    %696 = arith.maximumf %695, %694 : vector<16x128xf32>
    %697 = vector.broadcast %cst_16 : f32 to vector<16x128xf32>
    %698 = arith.minimumf %697, %696 : vector<16x128xf32>
    %cst_17 = arith.constant 0.166666672 : f32
    %699 = vector.broadcast %cst_17 : f32 to vector<16x128xf32>
    %700 = arith.mulf %698, %699 : vector<16x128xf32>
    %c0_18 = arith.constant 0 : index
    %c0_19 = arith.constant 0 : index
    %c0_20 = arith.constant 0 : index
    %c0_21 = arith.constant 0 : index
    %701 = vector.load %arg5[%c0_18, %c0_19, %c0_20, %c0_21] : memref<1x6x16x128xf32, #tpu.memory_space<vmem>>, vector<1x1x16x128xf32>
    %702 = vector.shape_cast %701 : vector<1x1x16x128xf32> to vector<16x128xf32>
    %703 = vector.shape_cast %700 : vector<16x128xf32> to vector<1x1x16x128xf32>
    tpu.vector_store %arg5[%c0_18, %c0_19, %c0_20, %c0_21], %703 {strides = array<i32>} : memref<1x6x16x128xf32, #tpu.memory_space<vmem>>, vector<1x1x16x128xf32>,
    %c1_22 = arith.constant 1 : index
    %704 = memref.load %arg3[%c1_22] : memref<6xf32, #tpu.memory_space<smem>>
    %705 = vector.broadcast %704 : f32 to vector<16x128xf32>
    %706 = arith.addf %675, %705 : vector<16x128xf32>
    %cst_23 = arith.constant 0.000000e+00 : f32
    %cst_24 = arith.constant 6.000000e+00 : f32
    %707 = vector.broadcast %cst_23 : f32 to vector<16x128xf32>
    %708 = arith.maximumf %707, %706 : vector<16x128xf32>
    %709 = vector.broadcast %cst_24 : f32 to vector<16x128xf32>
    %710 = arith.minimumf %709, %708 : vector<16x128xf32>
    %cst_25 = arith.constant 0.166666672 : f32
    %711 = vector.broadcast %cst_25 : f32 to vector<16x128xf32>
    %712 = arith.mulf %710, %711 : vector<16x128xf32>
    %c0_26 = arith.constant 0 : index
    %c1_27 = arith.constant 1 : index
    %c0_28 = arith.constant 0 : index
    %c0_29 = arith.constant 0 : index
    %713 = vector.load %arg5[%c0_26, %c1_27, %c0_28, %c0_29] : memref<1x6x16x128xf32, #tpu.memory_space<vmem>>, vector<1x1x16x128xf32>
    %714 = vector.shape_cast %713 : vector<1x1x16x128xf32> to vector<16x128xf32>
    %715 = vector.shape_cast %712 : vector<16x128xf32> to vector<1x1x16x128xf32>
    tpu.vector_store %arg5[%c0_26, %c1_27, %c0_28, %c0_29], %715 {strides = array<i32>} : memref<1x6x16x128xf32, #tpu.memory_space<vmem>>, vector<1x1x16x128xf32>,
    %c2_30 = arith.constant 2 : index
    %716 = memref.load %arg3[%c2_30] : memref<6xf32, #tpu.memory_space<smem>>
    %717 = vector.broadcast %716 : f32 to vector<16x128xf32>
    %718 = arith.addf %679, %717 : vector<16x128xf32>
    %cst_31 = arith.constant 0.000000e+00 : f32
    %cst_32 = arith.constant 6.000000e+00 : f32
    %719 = vector.broadcast %cst_31 : f32 to vector<16x128xf32>
    %720 = arith.maximumf %719, %718 : vector<16x128xf32>
    %721 = vector.broadcast %cst_32 : f32 to vector<16x128xf32>
    %722 = arith.minimumf %721, %720 : vector<16x128xf32>
    %cst_33 = arith.constant 0.166666672 : f32
    %723 = vector.broadcast %cst_33 : f32 to vector<16x128xf32>
    %724 = arith.mulf %722, %723 : vector<16x128xf32>
    %c0_34 = arith.constant 0 : index
    %c2_35 = arith.constant 2 : index
    %c0_36 = arith.constant 0 : index
    %c0_37 = arith.constant 0 : index
    %725 = vector.load %arg5[%c0_34, %c2_35, %c0_36, %c0_37] : memref<1x6x16x128xf32, #tpu.memory_space<vmem>>, vector<1x1x16x128xf32>
    %726 = vector.shape_cast %725 : vector<1x1x16x128xf32> to vector<16x128xf32>
    %727 = vector.shape_cast %724 : vector<16x128xf32> to vector<1x1x16x128xf32>
    tpu.vector_store %arg5[%c0_34, %c2_35, %c0_36, %c0_37], %727 {strides = array<i32>} : memref<1x6x16x128xf32, #tpu.memory_space<vmem>>, vector<1x1x16x128xf32>,
    %c3_38 = arith.constant 3 : index
    %728 = memref.load %arg3[%c3_38] : memref<6xf32, #tpu.memory_space<smem>>
    %729 = vector.broadcast %728 : f32 to vector<16x128xf32>
    %730 = arith.addf %683, %729 : vector<16x128xf32>
    %cst_39 = arith.constant 0.000000e+00 : f32
    %cst_40 = arith.constant 6.000000e+00 : f32
    %731 = vector.broadcast %cst_39 : f32 to vector<16x128xf32>
    %732 = arith.maximumf %731, %730 : vector<16x128xf32>
    %733 = vector.broadcast %cst_40 : f32 to vector<16x128xf32>
    %734 = arith.minimumf %733, %732 : vector<16x128xf32>
    %cst_41 = arith.constant 0.166666672 : f32
    %735 = vector.broadcast %cst_41 : f32 to vector<16x128xf32>
    %736 = arith.mulf %734, %735 : vector<16x128xf32>
    %c0_42 = arith.constant 0 : index
    %c3_43 = arith.constant 3 : index
    %c0_44 = arith.constant 0 : index
    %c0_45 = arith.constant 0 : index
    %737 = vector.load %arg5[%c0_42, %c3_43, %c0_44, %c0_45] : memref<1x6x16x128xf32, #tpu.memory_space<vmem>>, vector<1x1x16x128xf32>
    %738 = vector.shape_cast %737 : vector<1x1x16x128xf32> to vector<16x128xf32>
    %739 = vector.shape_cast %736 : vector<16x128xf32> to vector<1x1x16x128xf32>
    tpu.vector_store %arg5[%c0_42, %c3_43, %c0_44, %c0_45], %739 {strides = array<i32>} : memref<1x6x16x128xf32, #tpu.memory_space<vmem>>, vector<1x1x16x128xf32>,
    %c4_46 = arith.constant 4 : index
    %740 = memref.load %arg3[%c4_46] : memref<6xf32, #tpu.memory_space<smem>>
    %741 = vector.broadcast %740 : f32 to vector<16x128xf32>
    %742 = arith.addf %687, %741 : vector<16x128xf32>
    %cst_47 = arith.constant 0.000000e+00 : f32
    %cst_48 = arith.constant 6.000000e+00 : f32
    %743 = vector.broadcast %cst_47 : f32 to vector<16x128xf32>
    %744 = arith.maximumf %743, %742 : vector<16x128xf32>
    %745 = vector.broadcast %cst_48 : f32 to vector<16x128xf32>
    %746 = arith.minimumf %745, %744 : vector<16x128xf32>
    %cst_49 = arith.constant 0.166666672 : f32
    %747 = vector.broadcast %cst_49 : f32 to vector<16x128xf32>
    %748 = arith.mulf %746, %747 : vector<16x128xf32>
    %c0_50 = arith.constant 0 : index
    %c4_51 = arith.constant 4 : index
    %c0_52 = arith.constant 0 : index
    %c0_53 = arith.constant 0 : index
    %749 = vector.load %arg5[%c0_50, %c4_51, %c0_52, %c0_53] : memref<1x6x16x128xf32, #tpu.memory_space<vmem>>, vector<1x1x16x128xf32>
    %750 = vector.shape_cast %749 : vector<1x1x16x128xf32> to vector<16x128xf32>
    %751 = vector.shape_cast %748 : vector<16x128xf32> to vector<1x1x16x128xf32>
    tpu.vector_store %arg5[%c0_50, %c4_51, %c0_52, %c0_53], %751 {strides = array<i32>} : memref<1x6x16x128xf32, #tpu.memory_space<vmem>>, vector<1x1x16x128xf32>,
    %c5_54 = arith.constant 5 : index
    %752 = memref.load %arg3[%c5_54] : memref<6xf32, #tpu.memory_space<smem>>
    %753 = vector.broadcast %752 : f32 to vector<16x128xf32>
    %754 = arith.addf %691, %753 : vector<16x128xf32>
    %cst_55 = arith.constant 0.000000e+00 : f32
    %cst_56 = arith.constant 6.000000e+00 : f32
    %755 = vector.broadcast %cst_55 : f32 to vector<16x128xf32>
    %756 = arith.maximumf %755, %754 : vector<16x128xf32>
    %757 = vector.broadcast %cst_56 : f32 to vector<16x128xf32>
    %758 = arith.minimumf %757, %756 : vector<16x128xf32>
    %cst_57 = arith.constant 0.166666672 : f32
    %759 = vector.broadcast %cst_57 : f32 to vector<16x128xf32>
    %760 = arith.mulf %758, %759 : vector<16x128xf32>
    %c0_58 = arith.constant 0 : index
    %c5_59 = arith.constant 5 : index
    %c0_60 = arith.constant 0 : index
    %c0_61 = arith.constant 0 : index
    %761 = vector.load %arg5[%c0_58, %c5_59, %c0_60, %c0_61] : memref<1x6x16x128xf32, #tpu.memory_space<vmem>>, vector<1x1x16x128xf32>
    %762 = vector.shape_cast %761 : vector<1x1x16x128xf32> to vector<16x128xf32>
    %763 = vector.shape_cast %760 : vector<16x128xf32> to vector<1x1x16x128xf32>
    tpu.vector_store %arg5[%c0_58, %c5_59, %c0_60, %c0_61], %763 {strides = array<i32>} : memref<1x6x16x128xf32, #tpu.memory_space<vmem>>, vector<1x1x16x128xf32>,
    return
  }
  func.func @transform_0(%arg0: i32, %arg1: i32) -> i32 {
    %c0_i32 = arith.constant 0 : i32
    %c0_i32_0 = arith.constant 0 : i32
    return %c0_i32 : i32
  }
  func.func @transform_1(%arg0: i32, %arg1: i32) -> i32 {
    %c0_i32 = arith.constant 0 : i32
    %c0_i32_0 = arith.constant 0 : i32
    return %c0_i32 : i32
  }
  func.func @transform_2(%arg0: i32, %arg1: i32) -> (i32, i32, i32, i32) {
    %c0_i32 = arith.constant 0 : i32
    %c0_i32_0 = arith.constant 0 : i32
    %c0_i32_1 = arith.constant 0 : i32
    %c0_i32_2 = arith.constant 0 : i32
    return %arg0, %c0_i32, %c0_i32_0, %c0_i32_1 : i32, i32, i32, i32
  }
  func.func @transform_3(%arg0: i32, %arg1: i32) -> (i32, i32, i32, i32) {
    %c0_i32 = arith.constant 0 : i32
    %c0_i32_0 = arith.constant 0 : i32
    %c0_i32_1 = arith.constant 0 : i32
    return %arg0, %c0_i32, %arg1, %c0_i32_0 : i32, i32, i32, i32
  }
}

</mosaic_0001>

<bundles_post_ra>
// kernel: model_forward.1
= control target key start
LH: loop header
LB: loop body
LE: loop exit
PB: predicated region body
PF: predicated region fallthrough
CT: control target
= control target key end

     0   :  { %8 = vsyncpa [#allocation3], 0  ;;  %s9465_s0 = inlined_call_operand.vmem [shape: f32[162], index: 0, kind: input, shape index: {}]   ;;  %s9466_s1 = inlined_call_operand.vmem [shape: f32[6], index: 1, kind: input, shape index: {}]   ;;  %s9467_s2 = inlined_call_operand.vmem [shape: f32[2,3,40,256], index: 2, kind: input, shape index: {}]   ;;  %s9468_s3 = inlined_call_operand.vmem [shape: f32[2,6,32,128], index: 3, kind: output, shape index: {}]  }
   0x1   :  { %9 = vsyncpa [#allocation5], 0  ;;  %s5267_s12 = smov 0   ;;  %s5269_s13 = smov 0  }
   0x2   :  { %s5271_s14 = smov 0   ;;  %s5273_s15 = smov 0  }
   0x3   :  { %s5275_s16 = smov 0   ;;  %s5277_s17 = smov 0  }
   0x4   :  { %s5279_s18 = smov 0  }
   0x5 LB: > { %s4824_s19 = sadd.s32 4294967295, %s5241_s18   ;;  %s24_s20 = sadd.s32 1, %s5233_s16  ;;  %s5241_s18 = sphi %s5279_s18, %s15_s18   ;;  %s5237_s17 = sphi %s5277_s17, %s10156_s17   ;;  %s5233_s16 = sphi %s5275_s16, %s10155_s16   ;;  %s5229_s15 = sphi %s5273_s15, %s10154_s15   ;;  %s5225_s14 = sphi %s5271_s14, %s10153_s14   ;;  %s5221_s13 = sphi %s5269_s13, %s10152_s13   ;;  %s5217_s12 = sphi %s5267_s12, %s10151_s12  }
   0x6   : > { %p25_p0 = scmp.ge.s32.totalorder %s24_s20, 2  ;;  %s27_s21 = sadd.s32 1, %s5237_s17 }
   0x7   : > { %s104_s22 = sadd.s32 1, %s5221_s13  ;;  %p114_p1 = scmp.ne.s32.totalorder %s5221_s13, %s5217_s12 }
   0x8   : > { %s10158_s20 = smov (%p25_p0, %s24_s20), 0  ;;  %s10160_s21 = smov (!%p25_p0, %s27_s21), %s5237_s17 }
   0x9   : > { %s100_s23 = ssub.s32 %s5233_s16, %s10158_s20  ;;  %p115_p2 = scmp.eq.s32.totalorder %s4824_s19, 3 }
   0xa   : > { %p29_p3 = scmp.ge.s32.totalorder %s10160_s21, 2  ;;  %p4826_p4 = scmp.ge.s32.totalorder %s5241_s18, 1 }
   0xb   : > { %p5314_p5 = por %p115_p2, %p114_p1  ;;  %p128_p6 = scmp.lt.s32.totalorder %s5241_s18, 5 }
   0xc   : > { %s10162_s21 = smov (%p29_p3, %s10160_s21), 0  ;;  %p5327_p8 = scmp.eq.s32.totalorder %s4824_s19, 0 }
   0xd   : > { %p5321_p7 = pnand %p4826_p4, %p128_p6  ;;  %s99_s26 = ssub.s32 %s5237_s17, %s10162_s21 }
   0xe   : > { %s101_s28 = sor.u32 %s100_s23, %s99_s26  ;;  %s141_s4 = sshll.u32 %s9465_s0, 4  ;;  %s142_s4 = int_to_ptr.vmem [resolvable:$true] %s141_s4 }
   0xf   : > { %p5047_p9 = pneg %p5321_p7  ;;  %p102_p10 = scmp.eq.s32.totalorder %s101_s28, 0 }
  0x10   : > { %s5149_s7 = scalar_lea.vmem %s142_s4, 32  ;;  %p5157_p2 = scmp.lt.s32.totalorder %s142_s4, %s142_s4 }
  0x11   : > { %p5338_p11 = pnand %p5327_p8, %p5047_p9  ;;  %p5150_p12 = scmp.ne.s32.totalorder %s142_s4, %s5149_s7 }
  0x12   : > { %s5343_s6 = scalar_select %p102_p10, %s5221_s13, %s104_s22  }
  0x13   : > { %p5151_p13 = pneg %p5338_p11  ;;  %p5158_p3 = scmp.lt.s32.totalorder %s5149_s7, %s5149_s7 }
  0x15   : > { %p5152_p0 = pnand %p5151_p13, %p5150_p12  ;;  %p5159_p4 = por %p5158_p3, %p5157_p2 }
  0x17   : > { %p5153_p1 = pneg %p5152_p0 }
  0x19   : > { %p5160_p6 = pnand %p5159_p4, %p5153_p1 }
  0x1b   : > { %5163 = shalt.err (!%p5160_p6)
}
  0x1c   : > { %s5243_s8 = smov [#allocation2]   ;;  %s152_s11 = sshll.u32 %s9466_s1, 4  ;;  %s153_s11 = int_to_ptr.vmem [resolvable:$true] %s152_s11 }
  0x1d   : > { %5050 = dma.vmem_to_smem (!%p5338_p11), %s142_s4, 32, %s5243_s8, [#allocation3]  }
  0x1e   : > { %s5164_s19 = scalar_lea.vmem %s153_s11, 16  ;;  %p5172_p0 = scmp.lt.s32.totalorder %s153_s11, %s153_s11 }
  0x1f   : > { %p5165_p9 = scmp.ne.s32.totalorder %s153_s11, %s5164_s19  ;;  %p5173_p2 = scmp.lt.s32.totalorder %s5164_s19, %s5164_s19 }
  0x21   : > { %p5167_p10 = pnand %p5165_p9, %p5151_p13  ;;  %p5174_p1 = por %p5173_p2, %p5172_p0 }
  0x23   : > { %p5168_p12 = pneg %p5167_p10 }
  0x25   : > { %p5175_p3 = pnand %p5174_p1, %p5168_p12 }
  0x27   : > { %5178 = shalt.err (!%p5175_p3)
}
  0x28   : > { %s5244_s22 = smov [#allocation4]   ;;  %173 = sbr.rel (%p5321_p7) target bundleno = 1056 (0x420), region = 32 }
  0x29   : > { %5053 = dma.vmem_to_smem (!%p5338_p11), %s153_s11, 16, %s5244_s22, [#allocation5]  }
  0x2d   : > { %5208 = dma.done.wait (%p5327_p8), [#allocation3], 32  }
  0x2e   : > { %5210 = vsyncadd (%p5327_p8), [#allocation3], 4294967264 }
  0x2f   : > { %5212 = dma.done.wait (%p5327_p8), [#allocation5], 16  }
  0x30   : > { %5214 = vsyncadd (%p5327_p8), [#allocation5], 4294967280 }
  0x31   : > { %183 = sfence }
  0x32   : > { %p201_p11 = scmp.lt.s32.totalorder %s5229_s15, 1  ;;  %s4834_s23 = sshll.u32 %s5225_s14, 4  ;;  %vm553_vm0 = vcmask 1046528   ;;  %vm1112_vm1 = vcmask 1045504   ;;  %vm273_vm2 = vcmask 1039360   ;;  %vm418_vm3 = vcmask 1031168  }
  0x33   : > { %s208_s25 = sshra.s32 %s4834_s23, 3  ;;  %s4842_s26 = sld [smem:[#allocation2 + $0x1]] }
  0x34   : > { %s202_s28 = scalar_select %p201_p11, %s5229_s15, 1 }
  0x35   : > { %s5033_s29 = sshll.u32 %s208_s25, 4  ;;  %s4843_s4 = sld [smem:[#allocation2 + $0x1c]] }
  0x36   : > { %s5037_s30 = smul.u32 240, %s202_s28  ;;  %s5245_s27 = smov 127  }
  0x37   : > { %s4844_s10 = sld [smem:[#allocation2 + $0x37]] }
  0x38   : > { %s205_s8 = scalar_lea.vmem %s9467_s2, %s5037_s30  ;;  %s4845_s11 = sld [smem:[#allocation2 + $0x52]] }
  0x39   : > { %s5376_s9 = scalar_lea.vmem %s205_s8, %s5033_s29  ;;  %v256_v0 = vstv %s4842_s26  ;;  %s4846_s19 = sld [smem:[#allocation2 + $0x6d]] }
  0x3a   : > { %v5379_v1 = vld [vmem:[%s5376_s9 + $0x10] sm:$0xff]  ;;  %v5382_v2 = vld [vmem:[%s5376_s9] sm:$0xff]  ;;  %v5385_v3 = vld [vmem:[%s5376_s9 + $0x18] sm:$0xff]  ;;  %s4847_s22 = sld [smem:[#allocation2 + $0x88]]  ;;  %s5246_s26 = smov 126  }
  0x3b   : > { %v259_v4 = vmul.f32 %v256_v0, %v5379_v1  ;;  %v257_v5 = vmul.f32 %v256_v0, %v5382_v2  ;;  %v5390_v6 = vld [vmem:[%s5376_s9 + $0x8] sm:$0xff]  ;;  %v260_v7 = vmul.f32 %v256_v0, %v5385_v3  ;;  %v281_v9 = vstv %s4843_s4  ;;  %s4848_s23 = sld [smem:[#allocation2 + $0x2]] }
  0x3c   : > { %v258_v8 = vmul.f32 %v256_v0, %v5390_v6  ;;  %v283_v10 = vmul.f32 %v281_v9, %v5390_v6  ;;  %v282_v11 = vmul.f32 %v281_v9, %v5382_v2  ;;  %v285_v12 = vmul.f32 %v281_v9, %v5385_v3  ;;  %s4849_s25 = sld [smem:[#allocation2 + $0x1d]] }
  0x3d   : > { %269 = vrot.lane.b32.xlu1 %v259_v4, %s5245_s27  ;;  %265 = vrot.lane.b32.xlu0 %v257_v5, %s5245_s27  ;;  %v284_v13 = vmul.f32 %v281_v9, %v5379_v1  ;;  %v305_v14 = vstv %s4844_s10  ;;  %s4850_s28 = sld [smem:[#allocation2 + $0x38]] }
  0x3e   : > { %v307_v15 = vmul.f32 %v305_v14, %v5390_v6  ;;  %v306_v16 = vmul.f32 %v305_v14, %v5382_v2  ;;  %v309_v17 = vmul.f32 %v305_v14, %v5385_v3  ;;  %v308_v18 = vmul.f32 %v305_v14, %v5379_v1  ;;  %s4851_s29 = sld [smem:[#allocation2 + $0x53]] }
  0x3f   : > { %v329_v19 = vstv %s4845_s11  ;;  %v353_v24 = vstv %s4846_s19  ;;  %s4852_s30 = sld [smem:[#allocation2 + $0x6e]] }
  0x40   : > { %v331_v20 = vmul.f32 %v329_v19, %v5390_v6  ;;  %v330_v21 = vmul.f32 %v329_v19, %v5382_v2  ;;  %v333_v22 = vmul.f32 %v329_v19, %v5385_v3  ;;  %v332_v23 = vmul.f32 %v329_v19, %v5379_v1  ;;  %s4853_s4 = sld [smem:[#allocation2 + $0x89]] }
  0x41   : > { %271 = vrot.lane.b32.xlu1 %v260_v7, %s5245_s27  ;;  %267 = vrot.lane.b32.xlu0 %v258_v8, %s5245_s27  ;;  %v355_v25 = vmul.f32 %v353_v24, %v5390_v6  ;;  %v354_v26 = vmul.f32 %v353_v24, %v5382_v2  ;;  %v357_v27 = vmul.f32 %v353_v24, %v5385_v3  ;;  %v377_v29 = vstv %s4847_s22  ;;  %s4860_s5 = sld [smem:[#allocation2 + $0x4]]  ;;  %v5485_v7 = vld [vmem:[%s5376_s9 + $0x28] sm:$0xff] }
  0x42   : > { %v356_v28 = vmul.f32 %v353_v24, %v5379_v1  ;;  %v379_v30 = vmul.f32 %v377_v29, %v5390_v6  ;;  %v378_v31 = vmul.f32 %v377_v29, %v5382_v2  ;;  %v381_v32 = vmul.f32 %v377_v29, %v5385_v3  ;;  %s4861_s7 = sld [smem:[#allocation2 + $0x1f]]  ;;  %v5488_v8 = vld [vmem:[%s5376_s9 + $0x20] sm:$0xff] }
  0x43   : > { %v380_v33 = vmul.f32 %v377_v29, %v5379_v1  ;;  %v401_v34 = vstv %s4848_s23  ;;  %v426_v39 = vstv %s4849_s25  ;;  %v450_v44 = vstv %s4850_s28  ;;  %s4862_s8 = sld [smem:[#allocation2 + $0x3a]] }
  0x44   : > { %v403_v35 = vmul.f32 %v401_v34, %v5390_v6  ;;  %v402_v36 = vmul.f32 %v401_v34, %v5382_v2  ;;  %v405_v37 = vmul.f32 %v401_v34, %v5385_v3  ;;  %v404_v38 = vmul.f32 %v401_v34, %v5379_v1  ;;  %s4863_s10 = sld [smem:[#allocation2 + $0x55]] }
  0x45   : > { %292 = vrot.lane.b32.xlu1 %v283_v10, %s5245_s27  ;;  %290 = vrot.lane.b32.xlu0 %v282_v11, %s5245_s27  ;;  %v428_v40 = vmul.f32 %v426_v39, %v5390_v6  ;;  %v427_v41 = vmul.f32 %v426_v39, %v5382_v2  ;;  %v430_v42 = vmul.f32 %v426_v39, %v5385_v3  ;;  %v474_v49 = vstv %s4851_s29  ;;  %s4864_s11 = sld [smem:[#allocation2 + $0x70]] }
  0x46   : > { %v429_v43 = vmul.f32 %v426_v39, %v5379_v1  ;;  %v452_v45 = vmul.f32 %v450_v44, %v5390_v6  ;;  %v451_v46 = vmul.f32 %v450_v44, %v5382_v2  ;;  %v454_v47 = vmul.f32 %v450_v44, %v5385_v3  ;;  %s4865_s19 = sld [smem:[#allocation2 + $0x8b]] }
  0x47   : > { %v453_v48 = vmul.f32 %v450_v44, %v5379_v1  ;;  %v476_v50 = vmul.f32 %v474_v49, %v5390_v6  ;;  %v475_v51 = vmul.f32 %v474_v49, %v5382_v2  ;;  %v478_v52 = vmul.f32 %v474_v49, %v5385_v3  ;;  %s4866_s22 = sld [smem:[#allocation2 + $0x5]] }
  0x48   : > { %v477_v53 = vmul.f32 %v474_v49, %v5379_v1  ;;  %v498_v54 = vstv %s4852_s30  ;;  %v522_v59 = vstv %s4853_s4  ;;  %v649_v60 = vstv %s4860_s5  ;;  %s4867_s23 = sld [smem:[#allocation2 + $0x20]] }
  0x49   : > { %296 = vrot.lane.b32.xlu1 %v285_v12, %s5245_s27  ;;  %294 = vrot.lane.b32.xlu0 %v284_v13, %s5245_s27  ;;  %v500_v55 = vmul.f32 %v498_v54, %v5390_v6  ;;  %v499_v56 = vmul.f32 %v498_v54, %v5382_v2  ;;  %v502_v57 = vmul.f32 %v498_v54, %v5385_v3  ;;  %v687_v13 = vstv %s4861_s7  ;;  %s4868_s25 = sld [smem:[#allocation2 + $0x3b]] }
  0x4a   : > { %v501_v58 = vmul.f32 %v498_v54, %v5379_v1  ;;  %v524_v61 = vmul.f32 %v522_v59, %v5390_v6  ;;  %v523_v62 = vmul.f32 %v522_v59, %v5382_v2  ;;  %v651_v63 = vmul.f32 %v649_v60, %v5390_v6  ;;  %s4869_s28 = sld [smem:[#allocation2 + $0x56]] }
  0x4b   : > { %v653_v0 = vmul.f32 %v649_v60, %v5385_v3  ;;  %v650_v4 = vmul.f32 %v649_v60, %v5382_v2  ;;  %v652_v5 = vmul.f32 %v649_v60, %v5379_v1  ;;  %v526_v9 = vmul.f32 %v522_v59, %v5385_v3  ;;  %s4870_s29 = sld [smem:[#allocation2 + $0x71]] }
  0x4c   : > { %v525_v10 = vmul.f32 %v522_v59, %v5379_v1  ;;  %v655_v11 = vmul.f32 %v649_v60, %v5485_v7  ;;  %v654_v12 = vmul.f32 %v649_v60, %v5488_v8  ;;  %v665_v14 = vrot.slane %v651_v63, 1  ;;  %s4871_s30 = sld [smem:[#allocation2 + $0x8c]] }
  0x4d   : > { %316 = vrot.lane.b32.xlu1 %v307_v15, %s5245_s27  ;;  %314 = vrot.lane.b32.xlu0 %v306_v16, %s5245_s27  ;;  %v666_v15 = vrot.slane %v653_v0, 1  ;;  %v662_v16 = vrot.slane %v650_v4, 1  ;;  %v691_v19 = vmul.f32 %v687_v13, %v5385_v3  ;;  %v725_v34 = vstv %s4862_s8  ;;  %s4878_s4 = sld [smem:[#allocation2 + $0x7]] }
  0x4e   : > { %v670_v24 = vrot.slane %v655_v11, 1  ;;  %v727_v39 = vmul.f32 %v725_v34, %v5390_v6  ;;  %s4879_s5 = sld [smem:[#allocation2 + $0x22]] }
  0x4f   : > { %s4880_s7 = sld [smem:[#allocation2 + $0x3d]] }
  0x50   : > { %s4881_s8 = sld [smem:[#allocation2 + $0x58]] }
  0x51   : > { %320 = vrot.lane.b32.xlu1 %v309_v17, %s5245_s27  ;;  %318 = vrot.lane.b32.xlu0 %v308_v18, %s5245_s27  ;;  %v663_v17 = vrot.slane %v652_v5, 1  ;;  %v689_v18 = vmul.f32 %v687_v13, %v5390_v6 }
  0x55   : > { %340 = vrot.lane.b32.xlu1 %v331_v20, %s5245_s27  ;;  %338 = vrot.lane.b32.xlu0 %v330_v21, %s5245_s27  ;;  %v688_v20 = vmul.f32 %v687_v13, %v5382_v2  ;;  %v690_v21 = vmul.f32 %v687_v13, %v5379_v1 }
  0x57   : > { %v700_v29 = vrot.slane %v688_v20, 1 }
  0x59   : > { %344 = vrot.lane.b32.xlu1 %v333_v22, %s5245_s27  ;;  %342 = vrot.lane.b32.xlu0 %v332_v23, %s5245_s27  ;;  %v667_v22 = vsel %vm553_vm0, %v665_v14, %v666_v15  ;;  %v664_v23 = vsel %vm553_vm0, %v662_v16, %v663_v17 }
  0x5d   : > { %364 = vrot.lane.b32.xlu1 %v355_v25, %s5245_s27  ;;  %362 = vrot.lane.b32.xlu0 %v354_v26, %s5245_s27  ;;  %v668_v25 = vrot.slane %v654_v12, 1  ;;  %v703_v26 = vrot.slane %v689_v18, 1 }
  0x61   : > { %368 = vrot.lane.b32.xlu1 %v357_v27, %s5245_s27  ;;  %366 = vrot.lane.b32.xlu0 %v356_v28, %s5245_s27  ;;  %v693_v27 = vmul.f32 %v687_v13, %v5485_v7  ;;  %v704_v28 = vrot.slane %v691_v19, 1 }
  0x65   : > { %388 = vrot.lane.b32.xlu1 %v379_v30, %s5245_s27  ;;  %386 = vrot.lane.b32.xlu0 %v378_v31, %s5245_s27  ;;  %v701_v30 = vrot.slane %v690_v21, 1  ;;  %v692_v31 = vmul.f32 %v687_v13, %v5488_v8 }
  0x69   : > { %392 = vrot.lane.b32.xlu1 %v381_v32, %s5245_s27  ;;  %390 = vrot.lane.b32.xlu0 %v380_v33, %s5245_s27  ;;  %v671_v32 = vsel %vm553_vm0, %v666_v15, %v670_v24  ;;  %v669_v33 = vsel %vm553_vm0, %v663_v17, %v668_v25 }
  0x6d   : > { %412 = vrot.lane.b32.xlu1 %v403_v35, %s5246_s26  ;;  %410 = vrot.lane.b32.xlu0 %v402_v36, %s5246_s26  ;;  %v708_v35 = vrot.slane %v693_v27, 1  ;;  %v705_v36 = vsel %vm553_vm0, %v703_v26, %v704_v28 }
  0x71   : > { %416 = vrot.lane.b32.xlu1 %v405_v37, %s5246_s26  ;;  %414 = vrot.lane.b32.xlu0 %v404_v38, %s5246_s26  ;;  %v702_v37 = vsel %vm553_vm0, %v700_v29, %v701_v30  ;;  %v706_v38 = vrot.slane %v692_v31, 1  ;;  %v839_v31 = vstv %s4865_s19  ;;  %s4884_s19 = sld [smem:[#allocation2 + $0x8]] }
  0x73   : > { %v707_v44 = vsel %vm553_vm0, %v701_v30, %v706_v38 }
  0x75   : > { %437 = vrot.lane.b32.xlu1 %v428_v40, %s5246_s26  ;;  %435 = vrot.lane.b32.xlu0 %v427_v41, %s5246_s26  ;;  %v729_v40 = vmul.f32 %v725_v34, %v5385_v3  ;;  %v726_v41 = vmul.f32 %v725_v34, %v5382_v2 }
  0x77   : > { %v742_v49 = vrot.slane %v729_v40, 1  ;;  %v840_v40 = vmul.f32 %v839_v31, %v5382_v2 }
  0x79   : > { %441 = vrot.lane.b32.xlu1 %v430_v42, %s5246_s26  ;;  %439 = vrot.lane.b32.xlu0 %v429_v43, %s5246_s26  ;;  %v728_v42 = vmul.f32 %v725_v34, %v5379_v1  ;;  %v709_v43 = vsel %vm553_vm0, %v704_v28, %v708_v35 }
  0x7d   : > { %461 = vrot.lane.b32.xlu1 %v452_v45, %s5246_s26  ;;  %459 = vrot.lane.b32.xlu0 %v451_v46, %s5246_s26  ;;  %v731_v45 = vmul.f32 %v725_v34, %v5485_v7  ;;  %v730_v46 = vmul.f32 %v725_v34, %v5488_v8 }
  0x81   : > { %465 = vrot.lane.b32.xlu1 %v454_v47, %s5246_s26  ;;  %463 = vrot.lane.b32.xlu0 %v453_v48, %s5246_s26  ;;  %v763_v47 = vstv %s4863_s10  ;;  %v741_v48 = vrot.slane %v727_v39, 1  ;;  %v843_v39 = vmul.f32 %v839_v31, %v5385_v3  ;;  %s4882_s10 = sld [smem:[#allocation2 + $0x73]] }
  0x82   : > { %v765_v54 = vmul.f32 %v763_v47, %v5390_v6  ;;  %v766_v59 = vmul.f32 %v763_v47, %v5379_v1  ;;  %v769_v60 = vmul.f32 %v763_v47, %v5485_v7 }
  0x84   : > { %v779_v63 = vrot.slane %v765_v54, 1  ;;  %v777_v5 = vrot.slane %v766_v59, 1  ;;  %v784_v13 = vrot.slane %v769_v60, 1 }
  0x85   : > { %485 = vrot.lane.b32.xlu1 %v476_v50, %s5246_s26  ;;  %483 = vrot.lane.b32.xlu0 %v475_v51, %s5246_s26  ;;  %v738_v50 = vrot.slane %v726_v41, 1  ;;  %v739_v51 = vrot.slane %v728_v42, 1  ;;  %v842_v41 = vmul.f32 %v839_v31, %v5379_v1 }
  0x89   : > { %489 = vrot.lane.b32.xlu1 %v478_v52, %s5246_s26  ;;  %487 = vrot.lane.b32.xlu0 %v477_v53, %s5246_s26  ;;  %v746_v52 = vrot.slane %v731_v45, 1  ;;  %v744_v53 = vrot.slane %v730_v46, 1 }
  0x8d   : > { %509 = vrot.lane.b32.xlu1 %v500_v55, %s5246_s26  ;;  %507 = vrot.lane.b32.xlu0 %v499_v56, %s5246_s26  ;;  %v767_v55 = vmul.f32 %v763_v47, %v5385_v3  ;;  %v743_v56 = vsel %vm553_vm0, %v741_v48, %v742_v49  ;;  %v877_v48 = vstv %s4866_s22  ;;  %s4885_s22 = sld [smem:[#allocation2 + $0x23]] }
  0x8f   : > { %v780_v0 = vrot.slane %v767_v55, 1  ;;  %v879_v55 = vmul.f32 %v877_v48, %v5390_v6 }
  0x91   : > { %513 = vrot.lane.b32.xlu1 %v502_v57, %s5246_s26  ;;  %511 = vrot.lane.b32.xlu0 %v501_v58, %s5246_s26  ;;  %v740_v57 = vsel %vm553_vm0, %v738_v50, %v739_v51  ;;  %v764_v58 = vmul.f32 %v763_v47, %v5382_v2  ;;  %v781_v14 = vsel %vm553_vm0, %v779_v63, %v780_v0  ;;  %v852_v50 = vrot.slane %v840_v40, 1 }
  0x93   : > { %v776_v4 = vrot.slane %v764_v58, 1  ;;  %v880_v58 = vmul.f32 %v877_v48, %v5379_v1 }
  0x95   : > { %533 = vrot.lane.b32.xlu1 %v524_v61, %s5246_s26  ;;  %531 = vrot.lane.b32.xlu0 %v523_v62, %s5246_s26  ;;  %v747_v61 = vsel %vm553_vm0, %v742_v49, %v746_v52  ;;  %v745_v62 = vsel %vm553_vm0, %v739_v51, %v744_v53  ;;  %v778_v17 = vsel %vm553_vm0, %v776_v4, %v777_v5  ;;  %v856_v49 = vrot.slane %v843_v39, 1 }
  0x96   : > { %v853_v51 = vrot.slane %v842_v41, 1  ;;  %v844_v52 = vmul.f32 %v839_v31, %v5488_v8  ;;  %v893_v4 = vrot.slane %v879_v55, 1 }
  0x98   : > { %v854_v60 = vsel %vm553_vm0, %v852_v50, %v853_v51 }
  0x99   : > { %537 = vrot.lane.b32.xlu1 %v526_v9, %s5246_s26  ;;  %535 = vrot.lane.b32.xlu0 %v525_v10, %s5246_s26  ;;  %v768_v9 = vmul.f32 %v763_v47, %v5488_v8  ;;  %v801_v10 = vstv %s4864_s11  ;;  %s4883_s11 = sld [smem:[#allocation2 + $0x8e]] }
  0x9a   : > { %v803_v15 = vmul.f32 %v801_v10, %v5390_v6  ;;  %v805_v16 = vmul.f32 %v801_v10, %v5385_v3  ;;  %v802_v19 = vmul.f32 %v801_v10, %v5382_v2  ;;  %v804_v20 = vmul.f32 %v801_v10, %v5379_v1 }
  0x9b   : > { %v782_v18 = vrot.slane %v768_v9, 1  ;;  %v807_v26 = vmul.f32 %v801_v10, %v5485_v7  ;;  %v806_v27 = vmul.f32 %v801_v10, %v5488_v8 }
  0x9c   : > { %v817_v24 = vrot.slane %v803_v15, 1  ;;  %v818_v25 = vrot.slane %v805_v16, 1  ;;  %v814_v29 = vrot.slane %v802_v19, 1  ;;  %v815_v30 = vrot.slane %v804_v20, 1 }
  0x9d   : > { %674 = vrot.lane.b32.xlu1 %v667_v22, %s5245_s27  ;;  %672 = vrot.lane.b32.xlu0 %v664_v23, %s5245_s27  ;;  %v785_v23 = vsel %vm553_vm0, %v780_v0, %v784_v13  ;;  %v783_v28 = vsel %vm553_vm0, %v777_v5, %v782_v18  ;;  %v822_v35 = vrot.slane %v807_v26, 1  ;;  %v883_v5 = vmul.f32 %v877_v48, %v5485_v7 }
  0x9e   : > { %v819_v34 = vsel %vm553_vm0, %v817_v24, %v818_v25  ;;  %v816_v38 = vsel %vm553_vm0, %v814_v29, %v815_v30  ;;  %v891_v13 = vrot.slane %v880_v58, 1  ;;  %v915_v19 = vstv %s4867_s23  ;;  %s4886_s23 = sld [smem:[#allocation2 + $0x3e]] }
  0x9f   : > { %v823_v45 = vsel %vm553_vm0, %v818_v25, %v822_v35  ;;  %v898_v20 = vrot.slane %v883_v5, 1  ;;  %v917_v26 = vmul.f32 %v915_v19, %v5390_v6  ;;  %v918_v29 = vmul.f32 %v915_v19, %v5379_v1 }
  0xa1   : > { %678 = vrot.lane.b32.xlu1 %v671_v32, %s5245_s27  ;;  %676 = vrot.lane.b32.xlu0 %v669_v33, %s5245_s27  ;;  %v931_v39 = vrot.slane %v917_v26, 1 }
  0xa5   : > { %712 = vrot.lane.b32.xlu1 %v705_v36, %s5245_s27  ;;  %710 = vrot.lane.b32.xlu0 %v702_v37, %s5245_s27  ;;  %v820_v36 = vrot.slane %v806_v27, 1  ;;  %v841_v37 = vmul.f32 %v839_v31, %v5390_v6  ;;  %v919_v27 = vmul.f32 %v915_v19, %v5385_v3 }
  0xa7   : > { %v821_v46 = vsel %vm553_vm0, %v815_v30, %v820_v36  ;;  %v855_v47 = vrot.slane %v841_v37, 1  ;;  %v921_v36 = vmul.f32 %v915_v19, %v5485_v7  ;;  %v920_v37 = vmul.f32 %v915_v19, %v5488_v8 }
  0xa8   : > { %v932_v40 = vrot.slane %v919_v27, 1 }
  0xa9   : > { %716 = vrot.lane.b32.xlu1 %v709_v43, %s5245_s27  ;;  %714 = vrot.lane.b32.xlu0 %v707_v44, %s5245_s27  ;;  %v845_v44 = vmul.f32 %v839_v31, %v5485_v7  ;;  %v857_v59 = vsel %vm553_vm0, %v855_v47, %v856_v49 }
  0xad   : > { %750 = vrot.lane.b32.xlu1 %v743_v56, %s5245_s27  ;;  %748 = vrot.lane.b32.xlu0 %v740_v57, %s5245_s27  ;;  %v881_v56 = vmul.f32 %v877_v48, %v5385_v3  ;;  %v878_v57 = vmul.f32 %v877_v48, %v5382_v2 }
  0xaf   : > { %v5538_v11 = vpop.permute.xlu1 %269  ;;  %v5540_v12 = vpop.permute.xlu0 %265  ;;  %v894_v9 = vrot.slane %v881_v56, 1  ;;  %v890_v10 = vrot.slane %v878_v57, 1 }
  0xb1   : > { %754 = vrot.lane.b32.xlu1 %v747_v61, %s5245_s27  ;;  %752 = vrot.lane.b32.xlu0 %v745_v62, %s5245_s27  ;;  %v860_v61 = vrot.slane %v845_v44, 1  ;;  %v858_v62 = vrot.slane %v844_v52, 1  ;;  %v892_v24 = vsel %vm553_vm0, %v890_v10, %v891_v13  ;;  %v929_v44 = vrot.slane %v918_v29, 1 }
  0xb3   : > { %v5550_v21 = vpop.permute.xlu1 %271  ;;  %v5552_v22 = vpop.permute.xlu0 %267  ;;  %v861_v15 = vsel %vm553_vm0, %v856_v49, %v860_v61  ;;  %v859_v16 = vsel %vm553_vm0, %v853_v51, %v858_v62  ;;  %v934_v49 = vrot.slane %v920_v37, 1  ;;  %v933_v51 = vsel %vm553_vm0, %v931_v39, %v932_v40 }
  0xb5   : > { %788 = vrot.lane.b32.xlu1 %v781_v14, %s5245_s27  ;;  %786 = vrot.lane.b32.xlu0 %v778_v17, %s5245_s27  ;;  %v882_v14 = vmul.f32 %v877_v48, %v5488_v8  ;;  %v936_v48 = vrot.slane %v921_v36, 1  ;;  %v935_v61 = vsel %vm553_vm0, %v929_v44, %v934_v49 }
  0xb7   : > { %v5560_v32 = vpop.permute.xlu1 %292  ;;  %v5562_v33 = vpop.permute.xlu0 %290  ;;  %v896_v25 = vrot.slane %v882_v14, 1 }
  0xb9   : > { %792 = vrot.lane.b32.xlu1 %v785_v23, %s5245_s27  ;;  %790 = vrot.lane.b32.xlu0 %v783_v28, %s5245_s27  ;;  %v895_v23 = vsel %vm553_vm0, %v893_v4, %v894_v9  ;;  %v916_v28 = vmul.f32 %v915_v19, %v5382_v2  ;;  %v897_v35 = vsel %vm553_vm0, %v891_v13, %v896_v25  ;;  %v991_v13 = vstv %s4869_s28  ;;  %s4888_s28 = sld [smem:[#allocation2 + $0x74]] }
  0xba   : > { %v992_v26 = vmul.f32 %v991_v13, %v5382_v2  ;;  %v994_v27 = vmul.f32 %v991_v13, %v5379_v1  ;;  %v996_v37 = vmul.f32 %v991_v13, %v5488_v8 }
  0xbb   : > { %v5572_v42 = vpop.permute.xlu1 %296  ;;  %v5574_v43 = vpop.permute.xlu0 %294  ;;  %v928_v41 = vrot.slane %v916_v28, 1 }
  0xbd   : > { %826 = vrot.lane.b32.xlu1 %v819_v34, %s5245_s27  ;;  %824 = vrot.lane.b32.xlu0 %v816_v38, %s5245_s27  ;;  %v899_v34 = vsel %vm553_vm0, %v894_v9, %v898_v20  ;;  %v953_v38 = vstv %s4868_s25  ;;  %v930_v52 = vsel %vm553_vm0, %v928_v41, %v929_v44  ;;  %v993_v20 = vmul.f32 %v991_v13, %v5390_v6  ;;  %s4887_s25 = sld [smem:[#allocation2 + $0x59]] }
  0xbe   : > { %v955_v47 = vmul.f32 %v953_v38, %v5390_v6  ;;  %v957_v50 = vmul.f32 %v953_v38, %v5385_v3  ;;  %v954_v55 = vmul.f32 %v953_v38, %v5382_v2  ;;  %v956_v56 = vmul.f32 %v953_v38, %v5379_v1 }
  0xbf   : > { %v5582_v53 = vpop.permute.xlu1 %316  ;;  %v5584_v54 = vpop.permute.xlu0 %314  ;;  %v959_v4 = vmul.f32 %v953_v38, %v5485_v7  ;;  %v958_v10 = vmul.f32 %v953_v38, %v5488_v8  ;;  %v1029_v38 = vstv %s4870_s29  ;;  %v1004_v41 = vrot.slane %v992_v26, 1  ;;  %s4889_s29 = sld [smem:[#allocation2 + $0x8f]] }
  0xc0   : > { %v970_v62 = vrot.slane %v957_v50, 1  ;;  %v966_v5 = vrot.slane %v954_v55, 1  ;;  %v967_v9 = vrot.slane %v956_v56, 1  ;;  %v1005_v44 = vrot.slane %v994_v27, 1 }
  0xc1   : > { %830 = vrot.lane.b32.xlu1 %v823_v45, %s5245_s27  ;;  %828 = vrot.lane.b32.xlu0 %v821_v46, %s5245_s27  ;;  %v974_v19 = vrot.slane %v959_v4, 1  ;;  %v972_v25 = vrot.slane %v958_v10, 1  ;;  %v1033_v56 = vmul.f32 %v1029_v38, %v5385_v3  ;;  %v1035_v10 = vmul.f32 %v1029_v38, %v5485_v7 }
  0xc2   : > { %v1006_v55 = vsel %vm553_vm0, %v1004_v41, %v1005_v44 }
  0xc3   : > { %v5594_v63 = vpop.permute.xlu1 %320  ;;  %v5596_v0 = vpop.permute.xlu0 %318  ;;  %v975_v39 = vsel %vm553_vm0, %v970_v62, %v974_v19  ;;  %v1050_v26 = vrot.slane %v1035_v10, 1 }
  0xc5   : > { %864 = vrot.lane.b32.xlu1 %v857_v59, %s5245_s27  ;;  %862 = vrot.lane.b32.xlu0 %v854_v60, %s5245_s27  ;;  %v969_v59 = vrot.slane %v955_v47, 1  ;;  %v937_v60 = vsel %vm553_vm0, %v932_v40, %v936_v48  ;;  %v973_v40 = vsel %vm553_vm0, %v967_v9, %v972_v25 }
  0xc7   : > { %v5604_v17 = vpop.permute.xlu1 %340  ;;  %v5606_v18 = vpop.permute.xlu0 %338 }
  0xc9   : > { %868 = vrot.lane.b32.xlu1 %v861_v15, %s5245_s27  ;;  %866 = vrot.lane.b32.xlu0 %v859_v16, %s5245_s27  ;;  %v971_v16 = vsel %vm553_vm0, %v969_v59, %v970_v62  ;;  %v1030_v59 = vmul.f32 %v1029_v38, %v5382_v2 }
  0xcb   : > { %v5616_v30 = vpop.permute.xlu1 %344  ;;  %v5618_v31 = vpop.permute.xlu0 %342  ;;  %v1042_v19 = vrot.slane %v1030_v59, 1 }
  0xcd   : > { %902 = vrot.lane.b32.xlu1 %v895_v23, %s5246_s26  ;;  %900 = vrot.lane.b32.xlu0 %v892_v24, %s5246_s26  ;;  %v995_v23 = vmul.f32 %v991_v13, %v5385_v3  ;;  %v968_v24 = vsel %vm553_vm0, %v966_v5, %v967_v9 }
  0xcf   : > { %v5626_v45 = vpop.permute.xlu1 %364  ;;  %v5628_v46 = vpop.permute.xlu0 %362  ;;  %v1008_v36 = vrot.slane %v995_v23, 1  ;;  %v1067_v23 = vstv %s4871_s30  ;;  %s4904_s30 = sld [smem:[#allocation2 + $0xa]] }
  0xd0   : > { %9476 = vst [vmem:[#allocation9_spill] sm:$0xff] %v5626_v45  ;;  %9477 = vst [vmem:[#allocation10_spill] sm:$0xff] %v5628_v46  ;;  %v1072_v59 = vmul.f32 %v1067_v23, %v5488_v8 }
  0xd1   : > { %906 = vrot.lane.b32.xlu1 %v899_v34, %s5246_s26  ;;  %904 = vrot.lane.b32.xlu0 %v897_v35, %s5246_s26  ;;  %v997_v34 = vmul.f32 %v991_v13, %v5485_v7  ;;  %v1007_v35 = vrot.slane %v993_v20, 1  ;;  %v1034_v13 = vmul.f32 %v1029_v38, %v5488_v8 }
  0xd3   : > { %v5638_v57 = vpop.permute.xlu1 %368  ;;  %v5640_v58 = vpop.permute.xlu0 %366  ;;  %v1012_v49 = vrot.slane %v997_v34, 1  ;;  %v1009_v50 = vsel %vm553_vm0, %v1007_v35, %v1008_v36  ;;  %v1048_v27 = vrot.slane %v1034_v13, 1  ;;  %v1069_v34 = vmul.f32 %v1067_v23, %v5390_v6 }
  0xd4   : > { %9478 = vst [vmem:[#allocation11_spill] sm:$0xff] %v5638_v57  ;;  %9479 = vst [vmem:[#allocation12_spill] sm:$0xff] %v5640_v58  ;;  %v1071_v35 = vmul.f32 %v1067_v23, %v5385_v3 }
  0xd5   : > { %940 = vrot.lane.b32.xlu1 %v933_v51, %s5246_s26  ;;  %938 = vrot.lane.b32.xlu0 %v930_v52, %s5246_s26  ;;  %v1010_v51 = vrot.slane %v996_v37, 1  ;;  %v1031_v52 = vmul.f32 %v1029_v38, %v5390_v6  ;;  %v1013_v4 = vsel %vm553_vm0, %v1008_v36, %v1012_v49 }
  0xd7   : > { %v5648_v14 = vpop.permute.xlu1 %388  ;;  %v5650_v15 = vpop.permute.xlu0 %386  ;;  %v1011_v5 = vsel %vm553_vm0, %v1005_v44, %v1010_v51  ;;  %v1045_v9 = vrot.slane %v1031_v52, 1  ;;  %v1073_v44 = vmul.f32 %v1067_v23, %v5485_v7  ;;  %v1083_v51 = vrot.slane %v1069_v34, 1 }
  0xd8   : > { %9480 = vst [vmem:[#allocation13_spill] sm:$0xff] %v5648_v14  ;;  %9481 = vst [vmem:[#allocation14_spill] sm:$0xff] %v5650_v15  ;;  %v1084_v52 = vrot.slane %v1071_v35, 1 }
  0xd9   : > { %944 = vrot.lane.b32.xlu1 %v937_v60, %s5246_s26  ;;  %942 = vrot.lane.b32.xlu0 %v935_v61, %s5246_s26  ;;  %v1032_v60 = vmul.f32 %v1029_v38, %v5379_v1  ;;  %v1068_v38 = vmul.f32 %v1067_v23, %v5382_v2 }
  0xda   : > { %v1085_v10 = vsel %vm553_vm0, %v1083_v51, %v1084_v52  ;;  %v1246_v51 = vstv %s4879_s5  ;;  %s4906_s5 = sld [smem:[#allocation2 + $0x40]] }
  0xdb   : > { %v5660_v28 = vpop.permute.xlu1 %392  ;;  %v5662_v29 = vpop.permute.xlu0 %390  ;;  %v1043_v20 = vrot.slane %v1032_v60, 1  ;;  %v1208_v60 = vstv %s4878_s4  ;;  %s4905_s4 = sld [smem:[#allocation2 + $0x25]] }
  0xdc   : > { %9482 = vst [vmem:[#allocation15_spill] sm:$0xff] %v5660_v28  ;;  %9483 = vst [vmem:[#allocation16_spill] sm:$0xff] %v5662_v29  ;;  %v1210_v13 = vmul.f32 %v1208_v60, %v5390_v6 }
  0xdd   : > { %978 = vrot.lane.b32.xlu1 %v971_v16, %s5246_s26  ;;  %976 = vrot.lane.b32.xlu0 %v968_v24, %s5246_s26  ;;  %v1046_v16 = vrot.slane %v1033_v56, 1  ;;  %v1044_v37 = vsel %vm553_vm0, %v1042_v19, %v1043_v20 }
  0xdf   : > { %v5670_v47 = vpop.permute.xlu1 %412  ;;  %v5672_v48 = vpop.permute.xlu0 %410  ;;  %v1047_v36 = vsel %vm553_vm0, %v1045_v9, %v1046_v16  ;;  %v1051_v49 = vsel %vm553_vm0, %v1046_v16, %v1050_v26  ;;  %v1088_v9 = vrot.slane %v1073_v44, 1  ;;  %v1212_v16 = vmul.f32 %v1208_v60, %v5385_v3 }
  0xe0   : > { %9484 = vst [vmem:[#allocation17_spill] sm:$0xff] %v5670_v47  ;;  %9485 = vst [vmem:[#allocation18_spill] sm:$0xff] %v5672_v48  ;;  %v1211_v26 = vmul.f32 %v1208_v60, %v5379_v1 }
  0xe1   : > { %982 = vrot.lane.b32.xlu1 %v975_v39, %s5246_s26  ;;  %980 = vrot.lane.b32.xlu0 %v973_v40, %s5246_s26  ;;  %v1070_v39 = vmul.f32 %v1067_v23, %v5379_v1  ;;  %v1209_v23 = vmul.f32 %v1208_v60, %v5382_v2  ;;  %v1089_v35 = vsel %vm553_vm0, %v1084_v52, %v1088_v9 }
  0xe3   : > { %v5682_v61 = vpop.permute.xlu1 %416  ;;  %v5684_v62 = vpop.permute.xlu0 %414  ;;  %v1081_v56 = vrot.slane %v1070_v39, 1  ;;  %v1213_v39 = vmul.f32 %v1208_v60, %v5488_v8 }
  0xe4   : > { %9486 = vst [vmem:[#allocation19_spill] sm:$0xff] %v5682_v61  ;;  %9487 = vst [vmem:[#allocation20_spill] sm:$0xff] %v5684_v62 }
  0xe5   : > { %1016 = vrot.lane.b32.xlu1 %v1009_v50, %s5246_s26  ;;  %1014 = vrot.lane.b32.xlu0 %v1006_v55, %s5246_s26  ;;  %v1049_v50 = vsel %vm553_vm0, %v1043_v20, %v1048_v27  ;;  %v1080_v55 = vrot.slane %v1068_v38, 1  ;;  %v1086_v20 = vrot.slane %v1072_v59, 1  ;;  %v1214_v38 = vmul.f32 %v1208_v60, %v5485_v7 }
  0xe6   : > { %v1248_v60 = vmul.f32 %v1246_v51, %v5390_v6 }
  0xe7   : > { %v5692_v24 = vpop.permute.xlu1 %437  ;;  %v5694_v25 = vpop.permute.xlu0 %435  ;;  %v1082_v19 = vsel %vm553_vm0, %v1080_v55, %v1081_v56  ;;  %v1087_v44 = vsel %vm553_vm0, %v1081_v56, %v1086_v20  ;;  %v1229_v9 = vrot.slane %v1214_v38, 2 }
  0xe8   : > { %9488 = vst [vmem:[#allocation21_spill] sm:$0xff] %v5692_v24  ;;  %9489 = vst [vmem:[#allocation22_spill] sm:$0xff] %v5694_v25  ;;  %v1262_v38 = vrot.slane %v1248_v60, 2 }
  0xe9   : > { %1020 = vrot.lane.b32.xlu1 %v1013_v4, %s5246_s26  ;;  %1018 = vrot.lane.b32.xlu0 %v1011_v5, %s5246_s26 }
  0xeb   : > { %v5704_v40 = vpop.permute.xlu1 %441  ;;  %v5706_v41 = vpop.permute.xlu0 %439 }
  0xec   : > { %9490 = vst [vmem:[#allocation23_spill] sm:$0xff] %v5704_v40  ;;  %9491 = vst [vmem:[#allocation24_spill] sm:$0xff] %v5706_v41 }
  0xed   : > { %1054 = vrot.lane.b32.xlu1 %v1047_v36, %s5246_s26  ;;  %1052 = vrot.lane.b32.xlu0 %v1044_v37, %s5246_s26  ;;  %v1224_v36 = vrot.slane %v1210_v13, 2  ;;  %v1225_v37 = vrot.slane %v1212_v16, 2  ;;  %v1250_v13 = vmul.f32 %v1246_v51, %v5385_v3  ;;  %v1247_v16 = vmul.f32 %v1246_v51, %v5382_v2 }
  0xef   : > { %v5714_v4 = vpop.permute.xlu1 %461  ;;  %v5716_v5 = vpop.permute.xlu0 %459  ;;  %v1226_v59 = vsel %vm1112_vm1, %v1224_v36, %v1225_v37 }
  0xf0   : > { %9492 = vst [vmem:[#allocation25_spill] sm:$0xff] %v5714_v4  ;;  %9493 = vst [vmem:[#allocation26_spill] sm:$0xff] %v5716_v5 }
  0xf1   : > { %1058 = vrot.lane.b32.xlu1 %v1051_v49, %s5246_s26  ;;  %1056 = vrot.lane.b32.xlu0 %v1049_v50, %s5246_s26  ;;  %v1221_v49 = vrot.slane %v1209_v23, 2  ;;  %v1222_v50 = vrot.slane %v1211_v26, 2  ;;  %v1252_v26 = vmul.f32 %v1246_v51, %v5485_v7 }
  0xf3   : > { %v5726_v27 = vpop.permute.xlu1 %465  ;;  %v5728_v34 = vpop.permute.xlu0 %463  ;;  %v1223_v56 = vsel %vm1112_vm1, %v1221_v49, %v1222_v50  ;;  %v1259_v49 = vrot.slane %v1247_v16, 2 }
  0xf4   : > { %9494 = vst [vmem:[#allocation27_spill] sm:$0xff] %v5726_v27  ;;  %9495 = vst [vmem:[#allocation28_spill] sm:$0xff] %v5728_v34  ;;  %v1267_v34 = vrot.slane %v1252_v26, 2 }
  0xf5   : > { %1092 = vrot.lane.b32.xlu1 %v1085_v10, %s5246_s26  ;;  %1090 = vrot.lane.b32.xlu0 %v1082_v19, %s5246_s26  ;;  %v1227_v10 = vrot.slane %v1213_v39, 2  ;;  %v1249_v19 = vmul.f32 %v1246_v51, %v5379_v1  ;;  %v1251_v39 = vmul.f32 %v1246_v51, %v5488_v8 }
  0xf7   : > { %v5736_v55 = vpop.permute.xlu1 %485  ;;  %v5738_v52 = vpop.permute.xlu0 %483  ;;  %v1228_v36 = vsel %vm1112_vm1, %v1222_v50, %v1227_v10 }
  0xf8   : > { %9496 = vst [vmem:[#allocation29_spill] sm:$0xff] %v5736_v55  ;;  %9497 = vst [vmem:[#allocation30_spill] sm:$0xff] %v5738_v52  ;;  %v1260_v52 = vrot.slane %v1249_v19, 2  ;;  %v1284_v55 = vstv %s4880_s7  ;;  %s4907_s7 = sld [smem:[#allocation2 + $0x5b]] }
  0xf9   : > { %1096 = vrot.lane.b32.xlu1 %v1089_v35, %s5246_s26  ;;  %1094 = vrot.lane.b32.xlu0 %v1087_v44, %s5246_s26  ;;  %v1230_v35 = vsel %vm1112_vm1, %v1225_v37, %v1229_v9  ;;  %v1263_v44 = vrot.slane %v1250_v13, 2  ;;  %v1265_v37 = vrot.slane %v1251_v39, 2  ;;  %v1286_v50 = vmul.f32 %v1284_v55, %v5390_v6 }
  0xfa   : > { %v1261_v9 = vsel %vm1112_vm1, %v1259_v49, %v1260_v52  ;;  %v1285_v10 = vmul.f32 %v1284_v55, %v5382_v2  ;;  %v1287_v60 = vmul.f32 %v1284_v55, %v5379_v1  ;;  %v1289_v49 = vmul.f32 %v1284_v55, %v5488_v8 }
  0xfb   : > { %v5748_v20 = vpop.permute.xlu1 %489  ;;  %v5750_v23 = vpop.permute.xlu0 %487  ;;  %v1264_v51 = vsel %vm1112_vm1, %v1262_v38, %v1263_v44  ;;  %v1268_v16 = vsel %vm1112_vm1, %v1263_v44, %v1267_v34  ;;  %v1266_v19 = vsel %vm1112_vm1, %v1260_v52, %v1265_v37  ;;  %v1300_v26 = vrot.slane %v1286_v50, 2 }
  0xfc   : > { %9498 = vst [vmem:[#allocation31_spill] sm:$0xff] %v5748_v20  ;;  %9499 = vst [vmem:[#allocation32_spill] sm:$0xff] %v5750_v23  ;;  %v1297_v38 = vrot.slane %v1285_v10, 2  ;;  %v1298_v39 = vrot.slane %v1287_v60, 2 }
  0xfd   : > { %1233 = vrot.lane.b32.xlu1 %v1226_v59, %s5245_s27  ;;  %1231 = vrot.lane.b32.xlu0 %v1223_v56, %s5245_s27  ;;  %v1288_v59 = vmul.f32 %v1284_v55, %v5385_v3 }
  0xfe   : > { %v1299_v50 = vsel %vm1112_vm1, %v1297_v38, %v1298_v39 }
  0xff   : > { %v5758_v20 = vpop.permute.xlu1 %509  ;;  %v5760_v23 = vpop.permute.xlu0 %507 }
 0x100   : > { %9500 = vst [vmem:[#allocation33_spill] sm:$0xff] %v5758_v20  ;;  %9501 = vst [vmem:[#allocation34_spill] sm:$0xff] %v5760_v23  ;;  %v1322_v23 = vstv %s4881_s8  ;;  %s4908_s8 = sld [smem:[#allocation2 + $0x76]] }
 0x101   : > { %1237 = vrot.lane.b32.xlu1 %v1230_v35, %s5245_s27  ;;  %1235 = vrot.lane.b32.xlu0 %v1228_v36, %s5245_s27  ;;  %v1301_v35 = vrot.slane %v1288_v59, 2  ;;  %v1290_v36 = vmul.f32 %v1284_v55, %v5485_v7  ;;  %v1324_v44 = vmul.f32 %v1322_v23, %v5390_v6  ;;  %v1326_v37 = vmul.f32 %v1322_v23, %v5385_v3 }
 0x102   : > { %v1303_v55 = vrot.slane %v1289_v49, 2  ;;  %v1323_v59 = vmul.f32 %v1322_v23, %v5382_v2  ;;  %v1328_v60 = vmul.f32 %v1322_v23, %v5485_v7 }
 0x103   : > { %v5770_v56 = vpop.permute.xlu1 %513  ;;  %v5772_v13 = vpop.permute.xlu0 %511  ;;  %v1302_v34 = vsel %vm1112_vm1, %v1300_v26, %v1301_v35  ;;  %v1305_v52 = vrot.slane %v1290_v36, 2  ;;  %v1338_v3 = vrot.slane %v1324_v44, 2  ;;  %v1360_v36 = vstv %s4882_s10  ;;  %s4909_s10 = sld [smem:[#allocation2 + $0x91]] }
 0x104   : > { %9502 = vst [vmem:[#allocation35_spill] sm:$0xff] %v5770_v56  ;;  %9503 = vst [vmem:[#allocation36_spill] sm:$0xff] %v5772_v13  ;;  %v1335_v2 = vrot.slane %v1323_v59, 2 }
 0x105   : > { %1271 = vrot.lane.b32.xlu1 %v1264_v51, %s5245_s27  ;;  %1269 = vrot.lane.b32.xlu0 %v1261_v9, %s5245_s27  ;;  %v1325_v51 = vmul.f32 %v1322_v23, %v5379_v1  ;;  %v1306_v6 = vsel %vm1112_vm1, %v1301_v35, %v1305_v52  ;;  %v1304_v1 = vsel %vm1112_vm1, %v1298_v39, %v1303_v55  ;;  %v5810_v52 = vld [vmem:[%s5376_s9 + $0x8] sm:$0xff]  ;;  %v5819_v55 = vld [vmem:[%s5376_s9] sm:$0xff] }
 0x106   : > { %v1362_v39 = vmul.f32 %v5810_v52, %v1360_v36  ;;  %v1361_v59 = vmul.f32 %v5819_v55, %v1360_v36 }
 0x107   : > { %v5780_v56 = vpop.permute.xlu1 %533  ;;  %v5782_v13 = vpop.permute.xlu0 %531  ;;  %v1336_v26 = vrot.slane %v1325_v51, 2  ;;  %v5823_v51 = vld [vmem:[%s5376_s9 + $0x10] sm:$0xff] }
 0x108   : > { %9504 = vst [vmem:[#allocation37_spill] sm:$0xff] %v5780_v56  ;;  %9505 = vst [vmem:[#allocation38_spill] sm:$0xff] %v5782_v13  ;;  %v1398_v56 = vstv %s4883_s11  ;;  %s4910_s11 = sld [smem:[#allocation2 + $0xb]] }
 0x109   : > { %1275 = vrot.lane.b32.xlu1 %v1268_v16, %s5245_s27  ;;  %1273 = vrot.lane.b32.xlu0 %v1266_v19, %s5245_s27  ;;  %v1339_v16 = vrot.slane %v1326_v37, 2  ;;  %v1327_v19 = vmul.f32 %v1322_v23, %v5488_v8  ;;  %v1337_v44 = vsel %vm1112_vm1, %v1335_v2, %v1336_v26  ;;  %v5815_v37 = vld [vmem:[%s5376_s9 + $0x18] sm:$0xff]  ;;  %v1376_v2 = vrot.slane %v1362_v39, 2 }
 0x10a   : > { %v1399_v39 = vmul.f32 %v5819_v55, %v1398_v56 }
 0x10b   : > { %v5792_v9 = vpop.permute.xlu1 %537  ;;  %v5794_v10 = vpop.permute.xlu0 %535  ;;  %v1340_v23 = vsel %vm1112_vm1, %v1338_v3, %v1339_v16  ;;  %v1341_v35 = vrot.slane %v1327_v19, 2 }
 0x10c   : > { %9506 = vst [vmem:[#allocation39_spill] sm:$0xff] %v5792_v9  ;;  %9507 = vst [vmem:[#allocation40_spill] sm:$0xff] %v5794_v10  ;;  %v1373_v9 = vrot.slane %v1361_v59, 2 }
 0x10d   : > { %1309 = vrot.lane.b32.xlu1 %v1302_v34, %s5245_s27  ;;  %1307 = vrot.lane.b32.xlu0 %v1299_v50, %s5245_s27  ;;  %v1343_v34 = vrot.slane %v1328_v60, 2  ;;  %v1364_v50 = vmul.f32 %v5815_v37, %v1360_v36  ;;  %v1363_v60 = vmul.f32 %v5823_v51, %v1360_v36 }
 0x10f   : > { %v5802_v38 = vpop.permute.xlu1 %674  ;;  %v5804_v49 = vpop.permute.xlu0 %672  ;;  %v1344_v19 = vsel %vm1112_vm1, %v1339_v16, %v1343_v34  ;;  %v1377_v10 = vrot.slane %v1364_v50, 2  ;;  %v1374_v13 = vrot.slane %v1363_v60, 2  ;;  %v1400_v34 = vmul.f32 %v5810_v52, %v1398_v56 }
 0x110   : > { %9508 = vst [vmem:[#allocation41_spill] sm:$0xff] %v5802_v38  ;;  %9509 = vst [vmem:[#allocation42_spill] sm:$0xff] %v5804_v49  ;;  %v1366_v49 = vmul.f32 %v1360_v36, %v5485_v7  ;;  %v1365_v38 = vmul.f32 %v1360_v36, %v5488_v8  ;;  %v1404_v60 = vmul.f32 %v1398_v56, %v5485_v7 }
 0x111   : > { %1313 = vrot.lane.b32.xlu1 %v1306_v6, %s5245_s27  ;;  %1311 = vrot.lane.b32.xlu0 %v1304_v1, %s5245_s27  ;;  %v1342_v1 = vsel %vm1112_vm1, %v1336_v26, %v1341_v35  ;;  %v1378_v36 = vsel %vm1112_vm1, %v1376_v2, %v1377_v10  ;;  %v1375_v35 = vsel %vm1112_vm1, %v1373_v9, %v1374_v13 }
 0x112   : > { %v1381_v16 = vrot.slane %v1366_v49, 2  ;;  %v1379_v26 = vrot.slane %v1365_v38, 2  ;;  %v1419_v20 = vrot.slane %v1404_v60, 2 }
 0x113   : > { %v5826_v6 = vpop.permute.xlu1 %678  ;;  %v5828_v3 = vpop.permute.xlu0 %676 }
 0x114   : > { %9510 = vst [vmem:[#allocation43_spill] sm:$0xff] %v5826_v6  ;;  %9511 = vst [vmem:[#allocation44_spill] sm:$0xff] %v5828_v3  ;;  %v1382_v38 = vsel %vm1112_vm1, %v1377_v10, %v1381_v16  ;;  %v1380_v49 = vsel %vm1112_vm1, %v1374_v13, %v1379_v26 }
 0x115   : > { %1347 = vrot.lane.b32.xlu1 %v1340_v23, %s5245_s27  ;;  %1345 = vrot.lane.b32.xlu0 %v1337_v44, %s5245_s27  ;;  %v1402_v23 = vmul.f32 %v5815_v37, %v1398_v56  ;;  %v1401_v44 = vmul.f32 %v5823_v51, %v1398_v56 }
 0x117   : > { %v5836_v6 = vpop.permute.xlu1 %712  ;;  %v5838_v3 = vpop.permute.xlu0 %710  ;;  %v1415_v9 = vrot.slane %v1402_v23, 2  ;;  %v1412_v2 = vrot.slane %v1401_v44, 2 }
 0x118   : > { %9512 = vst [vmem:[#allocation45_spill] sm:$0xff] %v5836_v6  ;;  %9513 = vst [vmem:[#allocation46_spill] sm:$0xff] %v5838_v3  ;;  %v1403_v3 = vmul.f32 %v1398_v56, %v5488_v8  ;;  %v1436_v6 = vstv %s4884_s19  ;;  %s4911_s19 = sld [smem:[#allocation2 + $0x26]] }
 0x119   : > { %1351 = vrot.lane.b32.xlu1 %v1344_v19, %s5245_s27  ;;  %1349 = vrot.lane.b32.xlu0 %v1342_v1, %s5245_s27  ;;  %v1414_v19 = vrot.slane %v1400_v34, 2  ;;  %v1411_v1 = vrot.slane %v1399_v39, 2  ;;  %v1438_v13 = vmul.f32 %v5810_v52, %v1436_v6  ;;  %v1440_v16 = vmul.f32 %v5815_v37, %v1436_v6 }
 0x11a   : > { %v1417_v56 = vrot.slane %v1403_v3, 2  ;;  %v1437_v34 = vmul.f32 %v5819_v55, %v1436_v6  ;;  %v1439_v23 = vmul.f32 %v5823_v51, %v1436_v6  ;;  %v1420_v39 = vsel %vm1112_vm1, %v1415_v9, %v1419_v20 }
 0x11b   : > { %v5848_v50 = vpop.permute.xlu1 %716  ;;  %v5850_v59 = vpop.permute.xlu0 %714  ;;  %v1416_v10 = vsel %vm1112_vm1, %v1414_v19, %v1415_v9  ;;  %v1413_v26 = vsel %vm1112_vm1, %v1411_v1, %v1412_v2  ;;  %v1452_v44 = vrot.slane %v1438_v13, 2  ;;  %v1453_v60 = vrot.slane %v1440_v16, 2 }
 0x11c   : > { %9514 = vst [vmem:[#allocation47_spill] sm:$0xff] %v5848_v50  ;;  %9515 = vst [vmem:[#allocation48_spill] sm:$0xff] %v5850_v59  ;;  %v1441_v3 = vmul.f32 %v1436_v6, %v5488_v8  ;;  %v1449_v19 = vrot.slane %v1437_v34, 2  ;;  %v1450_v1 = vrot.slane %v1439_v23, 2 }
 0x11d   : > { %1385 = vrot.lane.b32.xlu1 %v1378_v36, %s5245_s27  ;;  %1383 = vrot.lane.b32.xlu0 %v1375_v35, %s5245_s27  ;;  %v1454_v20 = vsel %vm1112_vm1, %v1452_v44, %v1453_v60 }
 0x11f   : > { %v5858_v50 = vpop.permute.xlu1 %750  ;;  %v5860_v59 = vpop.permute.xlu0 %748 }
 0x120   : > { %9516 = vst [vmem:[#allocation49_spill] sm:$0xff] %v5858_v50  ;;  %9517 = vst [vmem:[#allocation50_spill] sm:$0xff] %v5860_v59  ;;  %v1474_v59 = vstv %s4885_s22  ;;  %s4912_s22 = sld [smem:[#allocation2 + $0x41]] }
 0x121   : > { %1389 = vrot.lane.b32.xlu1 %v1382_v38, %s5245_s27  ;;  %1387 = vrot.lane.b32.xlu0 %v1380_v49, %s5245_s27  ;;  %v1442_v38 = vmul.f32 %v1436_v6, %v5485_v7  ;;  %v1418_v49 = vsel %vm1112_vm1, %v1412_v2, %v1417_v56  ;;  %v1476_v6 = vmul.f32 %v5810_v52, %v1474_v59 }
 0x122   : > { %v1451_v2 = vsel %vm1112_vm1, %v1449_v19, %v1450_v1  ;;  %v1478_v13 = vmul.f32 %v5815_v37, %v1474_v59  ;;  %v1475_v16 = vmul.f32 %v5819_v55, %v1474_v59  ;;  %v1480_v23 = vmul.f32 %v1474_v59, %v5485_v7 }
 0x123   : > { %v5870_v36 = vpop.permute.xlu1 %754  ;;  %v5872_v35 = vpop.permute.xlu0 %752  ;;  %v1457_v9 = vrot.slane %v1442_v38, 2  ;;  %v1490_v38 = vrot.slane %v1476_v6, 2 }
 0x124   : > { %9518 = vst [vmem:[#allocation51_spill] sm:$0xff] %v5870_v36  ;;  %9519 = vst [vmem:[#allocation52_spill] sm:$0xff] %v5872_v35  ;;  %v1487_v19 = vrot.slane %v1475_v16, 2  ;;  %v1495_v7 = vrot.slane %v1480_v23, 2 }
 0x125   : > { %1423 = vrot.lane.b32.xlu1 %v1416_v10, %s5245_s27  ;;  %1421 = vrot.lane.b32.xlu0 %v1413_v26, %s5245_s27  ;;  %v1455_v10 = vrot.slane %v1441_v3, 2  ;;  %v1477_v26 = vmul.f32 %v5823_v51, %v1474_v59  ;;  %v1479_v3 = vmul.f32 %v1474_v59, %v5488_v8 }
 0x127   : > { %v5880_v36 = vpop.permute.xlu1 %788  ;;  %v5882_v35 = vpop.permute.xlu0 %786  ;;  %v1456_v44 = vsel %vm1112_vm1, %v1450_v1, %v1455_v10 }
 0x128   : > { %9520 = vst [vmem:[#allocation53_spill] sm:$0xff] %v5880_v36  ;;  %9521 = vst [vmem:[#allocation54_spill] sm:$0xff] %v5882_v35  ;;  %v1488_v35 = vrot.slane %v1477_v26, 2  ;;  %v1512_v36 = vstv %s4886_s23  ;;  %s4913_s23 = sld [smem:[#allocation2 + $0x5c]] }
 0x129   : > { %1427 = vrot.lane.b32.xlu1 %v1420_v39, %s5245_s27  ;;  %1425 = vrot.lane.b32.xlu0 %v1418_v49, %s5245_s27  ;;  %v1458_v39 = vsel %vm1112_vm1, %v1453_v60, %v1457_v9  ;;  %v1491_v49 = vrot.slane %v1478_v13, 2  ;;  %v1493_v60 = vrot.slane %v1479_v3, 2  ;;  %v1514_v1 = vmul.f32 %v5810_v52, %v1512_v36 }
 0x12a   : > { %v1516_v8 = vmul.f32 %v5815_v37, %v1512_v36  ;;  %v1513_v9 = vmul.f32 %v5819_v55, %v1512_v36  ;;  %v1515_v10 = vmul.f32 %v5823_v51, %v1512_v36 }
 0x12b   : > { %v5892_v56 = vpop.permute.xlu1 %792  ;;  %v5894_v34 = vpop.permute.xlu0 %790  ;;  %v1492_v59 = vsel %vm1112_vm1, %v1490_v38, %v1491_v49  ;;  %v1496_v13 = vsel %vm1112_vm1, %v1491_v49, %v1495_v7  ;;  %v1494_v16 = vsel %vm1112_vm1, %v1488_v35, %v1493_v60  ;;  %v1528_v26 = vrot.slane %v1514_v1, 2 }
 0x12c   : > { %9522 = vst [vmem:[#allocation55_spill] sm:$0xff] %v5892_v56  ;;  %9523 = vst [vmem:[#allocation56_spill] sm:$0xff] %v5894_v34  ;;  %v1529_v23 = vrot.slane %v1516_v8, 2  ;;  %v1525_v38 = vrot.slane %v1513_v9, 2  ;;  %v1526_v3 = vrot.slane %v1515_v10, 2 }
 0x12d   : > { %1461 = vrot.lane.b32.xlu1 %v1454_v20, %s5246_s26  ;;  %1459 = vrot.lane.b32.xlu0 %v1451_v2, %s5246_s26  ;;  %v1489_v20 = vsel %vm1112_vm1, %v1487_v19, %v1488_v35  ;;  %v5927_v19 = vld [vmem:[%s5376_s9 + $0x20] sm:$0xff] }
 0x12e   : > { %v1530_v35 = vsel %vm1112_vm1, %v1528_v26, %v1529_v23 }
 0x12f   : > { %v5902_v56 = vpop.permute.xlu1 %826  ;;  %v5904_v34 = vpop.permute.xlu0 %824 }
 0x130   : > { %9524 = vst [vmem:[#allocation57_spill] sm:$0xff] %v5902_v56  ;;  %9525 = vst [vmem:[#allocation58_spill] sm:$0xff] %v5904_v34  ;;  %v1588_v56 = vstv %s4888_s28  ;;  %s4915_s28 = sld [smem:[#allocation2 + $0x92]] }
 0x131   : > { %1465 = vrot.lane.b32.xlu1 %v1458_v39, %s5246_s26  ;;  %1463 = vrot.lane.b32.xlu0 %v1456_v44, %s5246_s26  ;;  %v5923_v39 = vld [vmem:[%s5376_s9 + $0x28] sm:$0xff] }
 0x132   : > { %v1518_v44 = vmul.f32 %v5923_v39, %v1512_v36 }
 0x133   : > { %v5914_v6 = vpop.permute.xlu1 %830  ;;  %v5916_v2 = vpop.permute.xlu0 %828 }
 0x134   : > { %9526 = vst [vmem:[#allocation59_spill] sm:$0xff] %v5914_v6  ;;  %9527 = vst [vmem:[#allocation60_spill] sm:$0xff] %v5916_v2  ;;  %v1517_v2 = vmul.f32 %v5927_v19, %v1512_v36  ;;  %v1550_v6 = vstv %s4887_s25  ;;  %v1533_v60 = vrot.slane %v1518_v44, 2  ;;  %s4914_s25 = sld [smem:[#allocation2 + $0x77]] }
 0x135   : > { %1499 = vrot.lane.b32.xlu1 %v1492_v59, %s5246_s26  ;;  %1497 = vrot.lane.b32.xlu0 %v1489_v20, %s5246_s26  ;;  %v1552_v1 = vmul.f32 %v5810_v52, %v1550_v6  ;;  %v1554_v8 = vmul.f32 %v5815_v37, %v1550_v6  ;;  %v1527_v59 = vsel %vm1112_vm1, %v1525_v38, %v1526_v3 }
 0x136   : > { %v1531_v36 = vrot.slane %v1517_v2, 2  ;;  %v1551_v20 = vmul.f32 %v5819_v55, %v1550_v6  ;;  %v1553_v9 = vmul.f32 %v5823_v51, %v1550_v6  ;;  %v1555_v2 = vmul.f32 %v5927_v19, %v1550_v6 }
 0x137   : > { %v5930_v49 = vpop.permute.xlu1 %864  ;;  %v5932_v7 = vpop.permute.xlu0 %862  ;;  %v1566_v26 = vrot.slane %v1552_v1, 2  ;;  %v1567_v44 = vrot.slane %v1554_v8, 2  ;;  %v1589_v1 = vmul.f32 %v5819_v55, %v1588_v56  ;;  %v1591_v8 = vmul.f32 %v5823_v51, %v1588_v56 }
 0x138   : > { %9528 = vst [vmem:[#allocation61_spill] sm:$0xff] %v5930_v49  ;;  %9529 = vst [vmem:[#allocation62_spill] sm:$0xff] %v5932_v7  ;;  %v1532_v38 = vsel %vm1112_vm1, %v1526_v3, %v1531_v36  ;;  %v1563_v49 = vrot.slane %v1551_v20, 2  ;;  %v1564_v34 = vrot.slane %v1553_v9, 2 }
 0x139   : > { %1503 = vrot.lane.b32.xlu1 %v1496_v13, %s5246_s26  ;;  %1501 = vrot.lane.b32.xlu0 %v1494_v16, %s5246_s26  ;;  %v1556_v13 = vmul.f32 %v5923_v39, %v1550_v6  ;;  %v1534_v16 = vsel %vm1112_vm1, %v1529_v23, %v1533_v60  ;;  %v1568_v23 = vsel %vm1112_vm1, %v1566_v26, %v1567_v44 }
 0x13a   : > { %v1590_v6 = vmul.f32 %v5810_v52, %v1588_v56  ;;  %v1565_v3 = vsel %vm1112_vm1, %v1563_v49, %v1564_v34  ;;  %v1592_v60 = vmul.f32 %v5815_v37, %v1588_v56  ;;  %v1594_v49 = vmul.f32 %v5923_v39, %v1588_v56 }
 0x13b   : > { %v5942_v10 = vpop.permute.xlu1 %868  ;;  %v5944_v7 = vpop.permute.xlu0 %866  ;;  %v1571_v50 = vrot.slane %v1556_v13, 2 }
 0x13c   : > { %9530 = vst [vmem:[#allocation63_spill] sm:$0xff] %v5942_v10  ;;  %9531 = vst [vmem:[#allocation64_spill] sm:$0xff] %v5944_v7  ;;  %v1604_v13 = vrot.slane %v1590_v6, 2  ;;  %v1605_v26 = vrot.slane %v1592_v60, 2 }
 0x13d   : > { %1537 = vrot.lane.b32.xlu1 %v1530_v35, %s5246_s26  ;;  %1535 = vrot.lane.b32.xlu0 %v1527_v59, %s5246_s26  ;;  %v1569_v35 = vrot.slane %v1555_v2, 2  ;;  %v1572_v20 = vsel %vm1112_vm1, %v1567_v44, %v1571_v50  ;;  %v1601_v2 = vrot.slane %v1589_v1, 2  ;;  %v1609_v50 = vrot.slane %v1594_v49, 2 }
 0x13f   : > { %v5952_v10 = vpop.permute.xlu1 %902  ;;  %v5954_v7 = vpop.permute.xlu0 %900  ;;  %v1570_v9 = vsel %vm1112_vm1, %v1564_v34, %v1569_v35 }
 0x140   : > { %9532 = vst [vmem:[#allocation65_spill] sm:$0xff] %v5952_v10  ;;  %9533 = vst [vmem:[#allocation66_spill] sm:$0xff] %v5954_v7  ;;  %v1626_v7 = vstv %s4889_s29  ;;  %s4922_s29 = sld [smem:[#allocation2 + $0xd]] }
 0x141   : > { %1541 = vrot.lane.b32.xlu1 %v1534_v16, %s5246_s26  ;;  %1539 = vrot.lane.b32.xlu0 %v1532_v38, %s5246_s26  ;;  %v1593_v16 = vmul.f32 %v5927_v19, %v1588_v56  ;;  %v1602_v38 = vrot.slane %v1591_v8, 2  ;;  %v1628_v34 = vmul.f32 %v5810_v52, %v1626_v7  ;;  %v1606_v56 = vsel %vm1112_vm1, %v1604_v13, %v1605_v26 }
 0x142   : > { %v1627_v6 = vmul.f32 %v5819_v55, %v1626_v7  ;;  %v1610_v52 = vsel %vm1112_vm1, %v1605_v26, %v1609_v50  ;;  %v1632_v55 = vmul.f32 %v5923_v39, %v1626_v7 }
 0x143   : > { %v5964_v59 = vpop.permute.xlu1 %906  ;;  %v5966_v36 = vpop.permute.xlu0 %904  ;;  %v1607_v44 = vrot.slane %v1593_v16, 2  ;;  %v1603_v35 = vsel %vm1112_vm1, %v1601_v2, %v1602_v38  ;;  %v1642_v8 = vrot.slane %v1628_v34, 2  ;;  %v6013_v34 = vld [vmem:[%s5376_s9 + $0x58] sm:$0xff] }
 0x144   : > { %9534 = vst [vmem:[#allocation67_spill] sm:$0xff] %v5964_v59  ;;  %9535 = vst [vmem:[#allocation68_spill] sm:$0xff] %v5966_v36 }
 0x145   : > { %1575 = vrot.lane.b32.xlu1 %v1568_v23, %s5246_s26  ;;  %1573 = vrot.lane.b32.xlu0 %v1565_v3, %s5246_s26  ;;  %v1630_v23 = vmul.f32 %v5815_v37, %v1626_v7  ;;  %v1629_v3 = vmul.f32 %v5823_v51, %v1626_v7  ;;  %v1608_v37 = vsel %vm1112_vm1, %v1602_v38, %v1607_v44  ;;  %v1647_v38 = vrot.slane %v1632_v55, 2 }
 0x146   : > { %v1631_v51 = vmul.f32 %v5927_v19, %v1626_v7 }
 0x147   : > { %v5974_v59 = vpop.permute.xlu1 %940  ;;  %v5976_v36 = vpop.permute.xlu0 %938  ;;  %v1640_v13 = vrot.slane %v1629_v3, 2 }
 0x148   : > { %9536 = vst [vmem:[#allocation69_spill] sm:$0xff] %v5974_v59  ;;  %9537 = vst [vmem:[#allocation70_spill] sm:$0xff] %v5976_v36  ;;  %v1645_v50 = vrot.slane %v1631_v51, 2  ;;  %v1733_v51 = vstv %s4905_s4  ;;  %s4924_s4 = sld [smem:[#allocation2 + $0x43]] }
 0x149   : > { %1579 = vrot.lane.b32.xlu1 %v1572_v20, %s5246_s26  ;;  %1577 = vrot.lane.b32.xlu0 %v1570_v9, %s5246_s26  ;;  %v1643_v20 = vrot.slane %v1630_v23, 2  ;;  %v1639_v9 = vrot.slane %v1627_v6, 2  ;;  %v1709_v23 = vstv %s4904_s30  ;;  %s4923_s30 = sld [smem:[#allocation2 + $0x28]] }
 0x14a   : > { %v1646_v44 = vsel %vm1112_vm1, %v1640_v13, %v1645_v50  ;;  %v1711_v3 = vmul.f32 %v6013_v34, %v1709_v23 }
 0x14b   : > { %v5986_v60 = vpop.permute.xlu1 %944  ;;  %v5988_v1 = vpop.permute.xlu0 %942  ;;  %v1644_v26 = vsel %vm1112_vm1, %v1642_v8, %v1643_v20  ;;  %v1641_v2 = vsel %vm1112_vm1, %v1639_v9, %v1640_v13  ;;  %v1648_v7 = vsel %vm1112_vm1, %v1643_v20, %v1647_v38  ;;  %v6030_v8 = vld [vmem:[%s5376_s9 + $0x60] sm:$0xff]  ;;  %v1735_v38 = vmul.f32 %v6013_v34, %v1733_v51 }
 0x14c   : > { %9538 = vst [vmem:[#allocation71_spill] sm:$0xff] %v5986_v60  ;;  %9539 = vst [vmem:[#allocation72_spill] sm:$0xff] %v5988_v1  ;;  %v1712_v55 = vmul.f32 %v6030_v8, %v1709_v23 }
 0x14d   : > { %1613 = vrot.lane.b32.xlu1 %v1606_v56, %s5246_s26  ;;  %1611 = vrot.lane.b32.xlu0 %v1603_v35, %s5246_s26  ;;  %v6016_v56 = vld [vmem:[%s5376_s9 + $0x50] sm:$0xff] }
 0x14e   : > { %v1734_v50 = vmul.f32 %v6016_v56, %v1733_v51  ;;  %v2175_v59 = vstv %s4924_s4  ;;  %s4943_s4 = sld [smem:[#allocation2 + $0x61]] }
 0x14f   : > { %v5996_v49 = vpop.permute.xlu1 %978  ;;  %v5998_v16 = vpop.permute.xlu0 %976  ;;  %v2137_v1 = vstv %s4923_s30  ;;  %s4942_s30 = sld [smem:[#allocation2 + $0x46]] }
 0x150   : > { %9540 = vst [vmem:[#allocation73_spill] sm:$0xff] %v5996_v49  ;;  %9541 = vst [vmem:[#allocation74_spill] sm:$0xff] %v5998_v16 }
 0x151   : > { %1617 = vrot.lane.b32.xlu1 %v1610_v52, %s5246_s26  ;;  %1615 = vrot.lane.b32.xlu0 %v1608_v37, %s5246_s26  ;;  %v1710_v52 = vmul.f32 %v6016_v56, %v1709_v23  ;;  %v6027_v37 = vld [vmem:[%s5376_s9 + $0x68] sm:$0xff] }
 0x152   : > { %v1713_v13 = vmul.f32 %v6027_v37, %v1709_v23  ;;  %v1737_v23 = vmul.f32 %v6027_v37, %v1733_v51 }
 0x153   : > { %v6004_v39 = vpop.permute.xlu1 %982  ;;  %v6006_v19 = vpop.permute.xlu0 %980 }
 0x154   : > { %9542 = vst [vmem:[#allocation75_spill] sm:$0xff] %v6004_v39  ;;  %9543 = vst [vmem:[#allocation76_spill] sm:$0xff] %v6006_v19 }
 0x155   : > { %1651 = vrot.lane.b32.xlu1 %v1644_v26, %s5246_s26  ;;  %1649 = vrot.lane.b32.xlu0 %v1641_v2, %s5246_s26 }
 0x157   : > { %v6018_v35 = vpop.permute.xlu1 %1016  ;;  %v6020_v6 = vpop.permute.xlu0 %1014 }
 0x158   : > { %9544 = vst [vmem:[#allocation77_spill] sm:$0xff] %v6018_v35  ;;  %9545 = vst [vmem:[#allocation78_spill] sm:$0xff] %v6020_v6 }
 0x159   : > { %1655 = vrot.lane.b32.xlu1 %v1648_v7, %s5246_s26  ;;  %1653 = vrot.lane.b32.xlu0 %v1646_v44, %s5246_s26 }
 0x15b   : > { %v6032_v20 = vpop.permute.xlu1 %1020  ;;  %v6034_v9 = vpop.permute.xlu0 %1018 }
 0x15c   : > { %9546 = vst [vmem:[#allocation79_spill] sm:$0xff] %v6032_v20  ;;  %9547 = vst [vmem:[#allocation80_spill] sm:$0xff] %v6034_v9  ;;  %v6213_v9 = vld [vmem:[%s5376_s9 + $0x78] sm:$0xff] }
 0x15d   : > { %1720 = vrot.lane.b32.xlu1 %v1711_v3, %s5245_s27  ;;  %1718 = vrot.lane.b32.xlu0 %v1710_v52, %s5245_s27  ;;  %v1736_v3 = vmul.f32 %v6030_v8, %v1733_v51  ;;  %v1757_v52 = vstv %s4906_s5  ;;  %s4925_s5 = sld [smem:[#allocation2 + $0x5e]] }
 0x15e   : > { %v1761_v51 = vmul.f32 %v6027_v37, %v1757_v52 }
 0x15f   : > { %v6040_v26 = vpop.permute.xlu1 %1054  ;;  %v6042_v2 = vpop.permute.xlu0 %1052 }
 0x160   : > { %9548 = vst [vmem:[#allocation81_spill] sm:$0xff] %v6040_v26  ;;  %9549 = vst [vmem:[#allocation82_spill] sm:$0xff] %v6042_v2 }
 0x161   : > { %1724 = vrot.lane.b32.xlu1 %v1713_v13, %s5245_s27  ;;  %1722 = vrot.lane.b32.xlu0 %v1712_v55, %s5245_s27 }
 0x163   : > { %v6048_v7 = vpop.permute.xlu1 %1058  ;;  %v6050_v44 = vpop.permute.xlu0 %1056 }
 0x164   : > { %9550 = vst [vmem:[#allocation83_spill] sm:$0xff] %v6048_v7  ;;  %9551 = vst [vmem:[#allocation84_spill] sm:$0xff] %v6050_v44  ;;  %v1759_v44 = vmul.f32 %v6013_v34, %v1757_v52 }
 0x165   : > { %1744 = vrot.lane.b32.xlu1 %v1735_v38, %s5245_s27  ;;  %1742 = vrot.lane.b32.xlu0 %v1734_v50, %s5245_s27  ;;  %v1758_v38 = vmul.f32 %v6016_v56, %v1757_v52 }
 0x167   : > { %v6056_v13 = vpop.permute.xlu1 %1092  ;;  %v6058_v55 = vpop.permute.xlu0 %1090 }
 0x168   : > { %9552 = vst [vmem:[#allocation85_spill] sm:$0xff] %v6056_v13  ;;  %9553 = vst [vmem:[#allocation86_spill] sm:$0xff] %v6058_v55  ;;  %v1760_v55 = vmul.f32 %v6030_v8, %v1757_v52  ;;  %v1781_v13 = vstv %s4907_s7  ;;  %s4926_s7 = sld [smem:[#allocation2 + $0x79]] }
 0x169   : > { %1748 = vrot.lane.b32.xlu1 %v1737_v23, %s5245_s27  ;;  %1746 = vrot.lane.b32.xlu0 %v1736_v3, %s5245_s27  ;;  %v1785_v52 = vmul.f32 %v6027_v37, %v1781_v13 }
 0x16b   : > { %v6064_v7 = vpop.permute.xlu1 %1096  ;;  %v6066_v50 = vpop.permute.xlu0 %1094 }
 0x16c   : > { %9554 = vst [vmem:[#allocation87_spill] sm:$0xff] %v6064_v7  ;;  %9555 = vst [vmem:[#allocation88_spill] sm:$0xff] %v6066_v50  ;;  %v1783_v50 = vmul.f32 %v6013_v34, %v1781_v13 }
 0x16d   : > { %1768 = vrot.lane.b32.xlu1 %v1759_v44, %s5245_s27  ;;  %1766 = vrot.lane.b32.xlu0 %v1758_v38, %s5245_s27  ;;  %v1782_v44 = vmul.f32 %v6016_v56, %v1781_v13 }
 0x16f   : > { %v6072_v23 = vpop.permute.xlu1 %1233  ;;  %v6074_v3 = vpop.permute.xlu0 %1231 }
 0x170   : > { %9556 = vst [vmem:[#allocation89_spill] sm:$0xff] %v6072_v23  ;;  %9557 = vst [vmem:[#allocation90_spill] sm:$0xff] %v6074_v3  ;;  %v1784_v3 = vmul.f32 %v6030_v8, %v1781_v13  ;;  %v1805_v23 = vstv %s4908_s8  ;;  %s4927_s8 = sld [smem:[#allocation2 + $0x94]] }
 0x171   : > { %1772 = vrot.lane.b32.xlu1 %v1761_v51, %s5245_s27  ;;  %1770 = vrot.lane.b32.xlu0 %v1760_v55, %s5245_s27  ;;  %v1809_v13 = vmul.f32 %v6027_v37, %v1805_v23 }
 0x173   : > { %v6080_v7 = vpop.permute.xlu1 %1237  ;;  %v6082_v38 = vpop.permute.xlu0 %1235 }
 0x174   : > { %9558 = vst [vmem:[#allocation91_spill] sm:$0xff] %v6080_v7  ;;  %9559 = vst [vmem:[#allocation92_spill] sm:$0xff] %v6082_v38  ;;  %v1807_v38 = vmul.f32 %v6013_v34, %v1805_v23 }
 0x175   : > { %1792 = vrot.lane.b32.xlu1 %v1783_v50, %s5245_s27  ;;  %1790 = vrot.lane.b32.xlu0 %v1782_v44, %s5245_s27  ;;  %v1806_v50 = vmul.f32 %v6016_v56, %v1805_v23 }
 0x177   : > { %v6088_v51 = vpop.permute.xlu1 %1271  ;;  %v6090_v55 = vpop.permute.xlu0 %1269 }
 0x178   : > { %9560 = vst [vmem:[#allocation93_spill] sm:$0xff] %v6088_v51  ;;  %9561 = vst [vmem:[#allocation94_spill] sm:$0xff] %v6090_v55  ;;  %v1808_v55 = vmul.f32 %v6030_v8, %v1805_v23  ;;  %v1829_v51 = vstv %s4909_s10  ;;  %s4928_s10 = sld [smem:[#allocation2 + $0xe]] }
 0x179   : > { %1796 = vrot.lane.b32.xlu1 %v1785_v52, %s5245_s27  ;;  %1794 = vrot.lane.b32.xlu0 %v1784_v3, %s5245_s27  ;;  %v1833_v23 = vmul.f32 %v6027_v37, %v1829_v51 }
 0x17b   : > { %v6096_v7 = vpop.permute.xlu1 %1275  ;;  %v6098_v44 = vpop.permute.xlu0 %1273 }
 0x17c   : > { %9562 = vst [vmem:[#allocation95_spill] sm:$0xff] %v6096_v7  ;;  %9563 = vst [vmem:[#allocation96_spill] sm:$0xff] %v6098_v44  ;;  %v1831_v44 = vmul.f32 %v6013_v34, %v1829_v51 }
 0x17d   : > { %1816 = vrot.lane.b32.xlu1 %v1807_v38, %s5245_s27  ;;  %1814 = vrot.lane.b32.xlu0 %v1806_v50, %s5245_s27  ;;  %v1830_v38 = vmul.f32 %v6016_v56, %v1829_v51 }
 0x17f   : > { %v6104_v52 = vpop.permute.xlu1 %1309  ;;  %v6106_v3 = vpop.permute.xlu0 %1307 }
 0x180   : > { %9564 = vst [vmem:[#allocation97_spill] sm:$0xff] %v6104_v52  ;;  %9565 = vst [vmem:[#allocation98_spill] sm:$0xff] %v6106_v3  ;;  %v1832_v3 = vmul.f32 %v6030_v8, %v1829_v51  ;;  %v1853_v52 = vstv %s4910_s11  ;;  %s4929_s11 = sld [smem:[#allocation2 + $0x29]] }
 0x181   : > { %1820 = vrot.lane.b32.xlu1 %v1809_v13, %s5245_s27  ;;  %1818 = vrot.lane.b32.xlu0 %v1808_v55, %s5245_s27  ;;  %v1857_v51 = vmul.f32 %v6027_v37, %v1853_v52 }
 0x183   : > { %v6112_v7 = vpop.permute.xlu1 %1313  ;;  %v6114_v50 = vpop.permute.xlu0 %1311 }
 0x184   : > { %9566 = vst [vmem:[#allocation99_spill] sm:$0xff] %v6112_v7  ;;  %9567 = vst [vmem:[#allocation100_spill] sm:$0xff] %v6114_v50  ;;  %v1855_v50 = vmul.f32 %v6013_v34, %v1853_v52 }
 0x185   : > { %1840 = vrot.lane.b32.xlu1 %v1831_v44, %s5245_s27  ;;  %1838 = vrot.lane.b32.xlu0 %v1830_v38, %s5245_s27  ;;  %v1854_v44 = vmul.f32 %v6016_v56, %v1853_v52 }
 0x187   : > { %v6120_v13 = vpop.permute.xlu1 %1347  ;;  %v6122_v55 = vpop.permute.xlu0 %1345 }
 0x188   : > { %9568 = vst [vmem:[#allocation101_spill] sm:$0xff] %v6120_v13  ;;  %9569 = vst [vmem:[#allocation102_spill] sm:$0xff] %v6122_v55  ;;  %v1856_v55 = vmul.f32 %v6030_v8, %v1853_v52  ;;  %v1877_v13 = vstv %s4911_s19  ;;  %s4930_s19 = sld [smem:[#allocation2 + $0x44]] }
 0x189   : > { %1844 = vrot.lane.b32.xlu1 %v1833_v23, %s5245_s27  ;;  %1842 = vrot.lane.b32.xlu0 %v1832_v3, %s5245_s27  ;;  %v1881_v52 = vmul.f32 %v6027_v37, %v1877_v13 }
 0x18b   : > { %v6128_v7 = vpop.permute.xlu1 %1351  ;;  %v6130_v38 = vpop.permute.xlu0 %1349 }
 0x18c   : > { %9570 = vst [vmem:[#allocation103_spill] sm:$0xff] %v6128_v7  ;;  %9571 = vst [vmem:[#allocation104_spill] sm:$0xff] %v6130_v38  ;;  %v1879_v38 = vmul.f32 %v6013_v34, %v1877_v13 }
 0x18d   : > { %1864 = vrot.lane.b32.xlu1 %v1855_v50, %s5246_s26  ;;  %1862 = vrot.lane.b32.xlu0 %v1854_v44, %s5246_s26  ;;  %v1878_v50 = vmul.f32 %v6016_v56, %v1877_v13 }
 0x18f   : > { %v6136_v23 = vpop.permute.xlu1 %1385  ;;  %v6138_v3 = vpop.permute.xlu0 %1383 }
 0x190   : > { %9572 = vst [vmem:[#allocation105_spill] sm:$0xff] %v6136_v23  ;;  %9573 = vst [vmem:[#allocation106_spill] sm:$0xff] %v6138_v3  ;;  %v1880_v3 = vmul.f32 %v6030_v8, %v1877_v13  ;;  %v1901_v23 = vstv %s4912_s22  ;;  %s4931_s22 = sld [smem:[#allocation2 + $0x5f]] }
 0x191   : > { %1868 = vrot.lane.b32.xlu1 %v1857_v51, %s5246_s26  ;;  %1866 = vrot.lane.b32.xlu0 %v1856_v55, %s5246_s26  ;;  %v1905_v13 = vmul.f32 %v6027_v37, %v1901_v23 }
 0x193   : > { %v6144_v7 = vpop.permute.xlu1 %1389  ;;  %v6146_v44 = vpop.permute.xlu0 %1387 }
 0x194   : > { %9574 = vst [vmem:[#allocation107_spill] sm:$0xff] %v6144_v7  ;;  %9575 = vst [vmem:[#allocation108_spill] sm:$0xff] %v6146_v44  ;;  %v1903_v44 = vmul.f32 %v6013_v34, %v1901_v23 }
 0x195   : > { %1888 = vrot.lane.b32.xlu1 %v1879_v38, %s5246_s26  ;;  %1886 = vrot.lane.b32.xlu0 %v1878_v50, %s5246_s26  ;;  %v1902_v38 = vmul.f32 %v6016_v56, %v1901_v23 }
 0x197   : > { %v6152_v51 = vpop.permute.xlu1 %1423  ;;  %v6154_v55 = vpop.permute.xlu0 %1421 }
 0x198   : > { %9576 = vst [vmem:[#allocation109_spill] sm:$0xff] %v6152_v51  ;;  %9577 = vst [vmem:[#allocation110_spill] sm:$0xff] %v6154_v55  ;;  %v1904_v55 = vmul.f32 %v6030_v8, %v1901_v23  ;;  %v1925_v51 = vstv %s4913_s23  ;;  %s4932_s23 = sld [smem:[#allocation2 + $0x7a]] }
 0x199   : > { %1892 = vrot.lane.b32.xlu1 %v1881_v52, %s5246_s26  ;;  %1890 = vrot.lane.b32.xlu0 %v1880_v3, %s5246_s26  ;;  %v1929_v23 = vmul.f32 %v6027_v37, %v1925_v51 }
 0x19b   : > { %v6160_v7 = vpop.permute.xlu1 %1427  ;;  %v6162_v50 = vpop.permute.xlu0 %1425 }
 0x19c   : > { %9578 = vst [vmem:[#allocation111_spill] sm:$0xff] %v6160_v7  ;;  %9579 = vst [vmem:[#allocation112_spill] sm:$0xff] %v6162_v50  ;;  %v1927_v50 = vmul.f32 %v6013_v34, %v1925_v51 }
 0x19d   : > { %1912 = vrot.lane.b32.xlu1 %v1903_v44, %s5246_s26  ;;  %1910 = vrot.lane.b32.xlu0 %v1902_v38, %s5246_s26  ;;  %v1926_v44 = vmul.f32 %v6016_v56, %v1925_v51 }
 0x19f   : > { %v6168_v52 = vpop.permute.xlu1 %1461  ;;  %v6170_v3 = vpop.permute.xlu0 %1459 }
 0x1a0   : > { %9580 = vst [vmem:[#allocation113_spill] sm:$0xff] %v6168_v52  ;;  %9581 = vst [vmem:[#allocation114_spill] sm:$0xff] %v6170_v3  ;;  %v1928_v3 = vmul.f32 %v6030_v8, %v1925_v51 }
 0x1a1   : > { %1916 = vrot.lane.b32.xlu1 %v1905_v13, %s5246_s26  ;;  %1914 = vrot.lane.b32.xlu0 %v1904_v55, %s5246_s26  ;;  %v1949_v13 = vstv %s4914_s25  ;;  %s4933_s25 = sld [smem:[#allocation2 + $0x95]] }
 0x1a2   : > { %v1953_v51 = vmul.f32 %v6027_v37, %v1949_v13 }
 0x1a3   : > { %v6176_v7 = vpop.permute.xlu1 %1465  ;;  %v6178_v38 = vpop.permute.xlu0 %1463 }
 0x1a4   : > { %9582 = vst [vmem:[#allocation115_spill] sm:$0xff] %v6176_v7  ;;  %9583 = vst [vmem:[#allocation116_spill] sm:$0xff] %v6178_v38  ;;  %v1951_v38 = vmul.f32 %v6013_v34, %v1949_v13 }
 0x1a5   : > { %1936 = vrot.lane.b32.xlu1 %v1927_v50, %s5246_s26  ;;  %1934 = vrot.lane.b32.xlu0 %v1926_v44, %s5246_s26  ;;  %v1950_v50 = vmul.f32 %v6016_v56, %v1949_v13 }
 0x1a7   : > { %v6184_v55 = vpop.permute.xlu1 %1499  ;;  %v6186_v52 = vpop.permute.xlu0 %1497 }
 0x1a8   : > { %9584 = vst [vmem:[#allocation117_spill] sm:$0xff] %v6184_v55  ;;  %9585 = vst [vmem:[#allocation118_spill] sm:$0xff] %v6186_v52  ;;  %v1973_v52 = vstv %s4915_s28  ;;  %s4940_s28 = sld [smem:[#allocation2 + $0x10]] }
 0x1a9   : > { %1940 = vrot.lane.b32.xlu1 %v1929_v23, %s5246_s26  ;;  %1938 = vrot.lane.b32.xlu0 %v1928_v3, %s5246_s26  ;;  %v1952_v23 = vmul.f32 %v6030_v8, %v1949_v13  ;;  %v2099_v3 = vstv %s4922_s29  ;;  %s4941_s29 = sld [smem:[#allocation2 + $0x2b]] }
 0x1aa   : > { %v2100_v13 = vmul.f32 %v6016_v56, %v2099_v3  ;;  %v2102_v26 = vmul.f32 %v6030_v8, %v2099_v3  ;;  %v2105_v19 = vmul.f32 %v6213_v9, %v2099_v3 }
 0x1ab   : > { %v6192_v44 = vpop.permute.xlu1 %1503  ;;  %v6194_v7 = vpop.permute.xlu0 %1501 }
 0x1ac   : > { %9586 = vst [vmem:[#allocation119_spill] sm:$0xff] %v6192_v44  ;;  %9587 = vst [vmem:[#allocation120_spill] sm:$0xff] %v6194_v7  ;;  %v1975_v44 = vmul.f32 %v6013_v34, %v1973_v52  ;;  %v2103_v7 = vmul.f32 %v6027_v37, %v2099_v3  ;;  %v2112_v16 = vrot.slane %v2100_v13, 1  ;;  %v2113_v49 = vrot.slane %v2102_v26, 1 }
 0x1ad   : > { %1960 = vrot.lane.b32.xlu1 %v1951_v38, %s5246_s26  ;;  %1958 = vrot.lane.b32.xlu0 %v1950_v50, %s5246_s26  ;;  %v1974_v38 = vmul.f32 %v6016_v56, %v1973_v52  ;;  %v2101_v50 = vmul.f32 %v6013_v34, %v2099_v3  ;;  %v2141_v26 = vmul.f32 %v6027_v37, %v2137_v1 }
 0x1ae   : > { %v2116_v35 = vrot.slane %v2103_v7, 1  ;;  %v2140_v13 = vmul.f32 %v6030_v8, %v2137_v1 }
 0x1af   : > { %v6200_v55 = vpop.permute.xlu1 %1537  ;;  %v6202_v2 = vpop.permute.xlu0 %1535  ;;  %v2115_v6 = vrot.slane %v2101_v50, 1  ;;  %v2138_v50 = vmul.f32 %v6016_v56, %v2137_v1 }
 0x1b0   : > { %9588 = vst [vmem:[#allocation121_spill] sm:$0xff] %v6200_v55  ;;  %9589 = vst [vmem:[#allocation122_spill] sm:$0xff] %v6202_v2  ;;  %v6216_v55 = vld [vmem:[%s5376_s9 + $0x70] sm:$0xff]  ;;  %v2151_v36 = vrot.slane %v2140_v13, 1 }
 0x1b1   : > { %1964 = vrot.lane.b32.xlu1 %v1953_v51, %s5246_s26  ;;  %1962 = vrot.lane.b32.xlu0 %v1952_v23, %s5246_s26  ;;  %v1977_v51 = vmul.f32 %v6027_v37, %v1973_v52  ;;  %v1976_v23 = vmul.f32 %v6030_v8, %v1973_v52  ;;  %v2104_v39 = vmul.f32 %v6216_v55, %v2099_v3  ;;  %v2150_v60 = vrot.slane %v2138_v50, 1 }
 0x1b2   : > { %v2117_v52 = vsel %vm553_vm0, %v2115_v6, %v2116_v35  ;;  %v2114_v3 = vsel %vm553_vm0, %v2112_v16, %v2113_v49  ;;  %v2142_v6 = vmul.f32 %v6216_v55, %v2137_v1 }
 0x1b3   : > { %v6218_v2 = vpop.permute.xlu1 %1541  ;;  %v6220_v20 = vpop.permute.xlu0 %1539  ;;  %v2118_v7 = vrot.slane %v2104_v39, 1 }
 0x1b4   : > { %9590 = vst [vmem:[#allocation123_spill] sm:$0xff] %v6218_v2  ;;  %9591 = vst [vmem:[#allocation124_spill] sm:$0xff] %v6220_v20 }
 0x1b5   : > { %1984 = vrot.lane.b32.xlu1 %v1975_v44, %s5246_s26  ;;  %1982 = vrot.lane.b32.xlu0 %v1974_v38, %s5246_s26  ;;  %v2120_v44 = vrot.slane %v2105_v19, 1  ;;  %v2139_v38 = vmul.f32 %v6013_v34, %v2137_v1  ;;  %v2119_v16 = vsel %vm553_vm0, %v2113_v49, %v2118_v7  ;;  %v2177_v49 = vmul.f32 %v6013_v34, %v2175_v59 }
 0x1b6   : > { %v2176_v7 = vmul.f32 %v6016_v56, %v2175_v59 }
 0x1b7   : > { %v6228_v2 = vpop.permute.xlu1 %1575  ;;  %v6230_v20 = vpop.permute.xlu0 %1573  ;;  %v2121_v39 = vsel %vm553_vm0, %v2116_v35, %v2120_v44  ;;  %v2153_v19 = vrot.slane %v2139_v38, 1  ;;  %v2156_v35 = vrot.slane %v2142_v6, 1  ;;  %v2152_v44 = vsel %vm553_vm0, %v2150_v60, %v2151_v36 }
 0x1b8   : > { %9592 = vst [vmem:[#allocation125_spill] sm:$0xff] %v6228_v2  ;;  %9593 = vst [vmem:[#allocation126_spill] sm:$0xff] %v6230_v20  ;;  %v2178_v38 = vmul.f32 %v6030_v8, %v2175_v59  ;;  %v2181_v60 = vmul.f32 %v6213_v9, %v2175_v59  ;;  %v2180_v6 = vmul.f32 %v6216_v55, %v2175_v59 }
 0x1b9   : > { %1988 = vrot.lane.b32.xlu1 %v1977_v51, %s5246_s26  ;;  %1986 = vrot.lane.b32.xlu0 %v1976_v23, %s5246_s26  ;;  %v2143_v51 = vmul.f32 %v6213_v9, %v2137_v1  ;;  %v2154_v23 = vrot.slane %v2141_v26, 1  ;;  %v2157_v13 = vsel %vm553_vm0, %v2151_v36, %v2156_v35 }
 0x1ba   : > { %v2196_v36 = vrot.slane %v2181_v60, 1 }
 0x1bb   : > { %v6240_v2 = vpop.permute.xlu1 %1579  ;;  %v6242_v20 = vpop.permute.xlu0 %1577  ;;  %v2158_v10 = vrot.slane %v2143_v51, 1  ;;  %v2155_v1 = vsel %vm553_vm0, %v2153_v19, %v2154_v23  ;;  %v2191_v51 = vrot.slane %v2177_v49, 1  ;;  %v2189_v19 = vrot.slane %v2178_v38, 1 }
 0x1bc   : > { %9594 = vst [vmem:[#allocation127_spill] sm:$0xff] %v6240_v2  ;;  %9595 = vst [vmem:[#allocation128_spill] sm:$0xff] %v6242_v20 }
 0x1bd   : > { %2124 = vrot.lane.b32.xlu1 %v2117_v52, %s5245_s27  ;;  %2122 = vrot.lane.b32.xlu0 %v2114_v3, %s5245_s27  ;;  %v2179_v52 = vmul.f32 %v6027_v37, %v2175_v59  ;;  %v2159_v50 = vsel %vm553_vm0, %v2154_v23, %v2158_v10  ;;  %v2194_v59 = vrot.slane %v2180_v6, 1 }
 0x1bf   : > { %v6250_v2 = vpop.permute.xlu1 %1613  ;;  %v6252_v20 = vpop.permute.xlu0 %1611 }
 0x1c0   : > { %9596 = vst [vmem:[#allocation129_spill] sm:$0xff] %v6250_v2  ;;  %9597 = vst [vmem:[#allocation130_spill] sm:$0xff] %v6252_v20  ;;  %v2213_v20 = vstv %s4925_s5  ;;  %s4944_s5 = sld [smem:[#allocation2 + $0x7c]] }
 0x1c1   : > { %2128 = vrot.lane.b32.xlu1 %v2121_v39, %s5245_s27  ;;  %2126 = vrot.lane.b32.xlu0 %v2119_v16, %s5245_s27  ;;  %v2192_v39 = vrot.slane %v2179_v52, 1  ;;  %v2188_v16 = vrot.slane %v2176_v7, 1  ;;  %v2215_v23 = vmul.f32 %v6013_v34, %v2213_v20  ;;  %v2217_v35 = vmul.f32 %v6027_v37, %v2213_v20 }
 0x1c2   : > { %v2214_v52 = vmul.f32 %v6016_v56, %v2213_v20  ;;  %v2219_v38 = vmul.f32 %v6213_v9, %v2213_v20  ;;  %v2218_v60 = vmul.f32 %v6216_v55, %v2213_v20 }
 0x1c3   : > { %v6262_v3 = vpop.permute.xlu1 %1617  ;;  %v6264_v26 = vpop.permute.xlu0 %1615  ;;  %v2193_v10 = vsel %vm553_vm0, %v2191_v51, %v2192_v39  ;;  %v2190_v49 = vsel %vm553_vm0, %v2188_v16, %v2189_v19  ;;  %v2230_v51 = vrot.slane %v2217_v35, 1  ;;  %v2195_v16 = vsel %vm553_vm0, %v2189_v19, %v2194_v59 }
 0x1c4   : > { %9598 = vst [vmem:[#allocation131_spill] sm:$0xff] %v6262_v3  ;;  %9599 = vst [vmem:[#allocation132_spill] sm:$0xff] %v6264_v26  ;;  %v2226_v6 = vrot.slane %v2214_v52, 1  ;;  %v2234_v2 = vrot.slane %v2219_v38, 1 }
 0x1c5   : > { %2162 = vrot.lane.b32.xlu1 %v2155_v1, %s5245_s27  ;;  %2160 = vrot.lane.b32.xlu0 %v2152_v44, %s5245_s27  ;;  %v2216_v1 = vmul.f32 %v6030_v8, %v2213_v20 }
 0x1c6   : > { %v2235_v52 = vsel %vm553_vm0, %v2230_v51, %v2234_v2 }
 0x1c7   : > { %v6272_v3 = vpop.permute.xlu1 %1651  ;;  %v6274_v26 = vpop.permute.xlu0 %1649 }
 0x1c8   : > { %9600 = vst [vmem:[#allocation133_spill] sm:$0xff] %v6272_v3  ;;  %9601 = vst [vmem:[#allocation134_spill] sm:$0xff] %v6274_v26  ;;  %v2227_v26 = vrot.slane %v2216_v1, 1  ;;  %v2251_v3 = vstv %s4926_s7  ;;  %s4945_s7 = sld [smem:[#allocation2 + $0x97]] }
 0x1c9   : > { %2166 = vrot.lane.b32.xlu1 %v2159_v50, %s5245_s27  ;;  %2164 = vrot.lane.b32.xlu0 %v2157_v13, %s5245_s27  ;;  %v2197_v50 = vsel %vm553_vm0, %v2192_v39, %v2196_v36  ;;  %v2229_v13 = vrot.slane %v2215_v23, 1  ;;  %v2253_v20 = vmul.f32 %v6013_v34, %v2251_v3  ;;  %v2255_v36 = vmul.f32 %v6027_v37, %v2251_v3 }
 0x1ca   : > { %v2228_v19 = vsel %vm553_vm0, %v2226_v6, %v2227_v26  ;;  %v2252_v23 = vmul.f32 %v6016_v56, %v2251_v3  ;;  %v2254_v35 = vmul.f32 %v6030_v8, %v2251_v3 }
 0x1cb   : > { %v6284_v44 = vpop.permute.xlu1 %1655  ;;  %v6286_v7 = vpop.permute.xlu0 %1653  ;;  %v2231_v39 = vsel %vm553_vm0, %v2229_v13, %v2230_v51  ;;  %v2267_v38 = vrot.slane %v2253_v20, 1  ;;  %v2256_v13 = vmul.f32 %v6216_v55, %v2251_v3 }
 0x1cc   : > { %9602 = vst [vmem:[#allocation135_spill] sm:$0xff] %v6284_v44  ;;  %9603 = vst [vmem:[#allocation136_spill] sm:$0xff] %v6286_v7  ;;  %v2265_v6 = vrot.slane %v2254_v35, 1 }
 0x1cd   : > { %2200 = vrot.lane.b32.xlu1 %v2193_v10, %s5245_s27  ;;  %2198 = vrot.lane.b32.xlu0 %v2190_v49, %s5245_s27  ;;  %v2232_v10 = vrot.slane %v2218_v60, 1  ;;  %v2268_v60 = vrot.slane %v2255_v36, 1 }
 0x1cf   : > { %v6294_v44 = vpop.permute.xlu1 %1720  ;;  %v6296_v7 = vpop.permute.xlu0 %1718  ;;  %v2233_v1 = vsel %vm553_vm0, %v2227_v26, %v2232_v10  ;;  %v2270_v26 = vrot.slane %v2256_v13, 1 }
 0x1d0   : > { %9604 = vst [vmem:[#allocation137_spill] sm:$0xff] %v6294_v44  ;;  %9605 = vst [vmem:[#allocation138_spill] sm:$0xff] %v6296_v7  ;;  %v2289_v7 = vstv %s4927_s8  ;;  %s4946_s8 = sld [smem:[#allocation2 + $0x11]] }
 0x1d1   : > { %2204 = vrot.lane.b32.xlu1 %v2197_v50, %s5245_s27  ;;  %2202 = vrot.lane.b32.xlu0 %v2195_v16, %s5245_s27  ;;  %v2257_v50 = vmul.f32 %v6213_v9, %v2251_v3  ;;  %v2264_v16 = vrot.slane %v2252_v23, 1  ;;  %v2291_v51 = vmul.f32 %v6013_v34, %v2289_v7  ;;  %v2269_v3 = vsel %vm553_vm0, %v2267_v38, %v2268_v60 }
 0x1d2   : > { %v2290_v20 = vmul.f32 %v6016_v56, %v2289_v7  ;;  %v2295_v35 = vmul.f32 %v6213_v9, %v2289_v7 }
 0x1d3   : > { %v6306_v49 = vpop.permute.xlu1 %1724  ;;  %v6308_v59 = vpop.permute.xlu0 %1722  ;;  %v2272_v2 = vrot.slane %v2257_v50, 1  ;;  %v2266_v10 = vsel %vm553_vm0, %v2264_v16, %v2265_v6  ;;  %v2305_v38 = vrot.slane %v2291_v51, 1 }
 0x1d4   : > { %9606 = vst [vmem:[#allocation139_spill] sm:$0xff] %v6306_v49  ;;  %9607 = vst [vmem:[#allocation140_spill] sm:$0xff] %v6308_v59  ;;  %v2302_v13 = vrot.slane %v2290_v20, 1  ;;  %v2310_v44 = vrot.slane %v2295_v35, 1 }
 0x1d5   : > { %2238 = vrot.lane.b32.xlu1 %v2231_v39, %s5245_s27  ;;  %2236 = vrot.lane.b32.xlu0 %v2228_v19, %s5245_s27  ;;  %v2293_v39 = vmul.f32 %v6027_v37, %v2289_v7  ;;  %v2292_v19 = vmul.f32 %v6030_v8, %v2289_v7 }
 0x1d7   : > { %v6316_v49 = vpop.permute.xlu1 %1744  ;;  %v6318_v59 = vpop.permute.xlu0 %1742  ;;  %v2306_v50 = vrot.slane %v2293_v39, 1  ;;  %v2303_v16 = vrot.slane %v2292_v19, 1 }
 0x1d8   : > { %9608 = vst [vmem:[#allocation141_spill] sm:$0xff] %v6316_v49  ;;  %9609 = vst [vmem:[#allocation142_spill] sm:$0xff] %v6318_v59  ;;  %v2294_v59 = vmul.f32 %v6216_v55, %v2289_v7  ;;  %v2327_v49 = vstv %s4928_s10  ;;  %s4947_s10 = sld [smem:[#allocation2 + $0x2c]] }
 0x1d9   : > { %2242 = vrot.lane.b32.xlu1 %v2235_v52, %s5245_s27  ;;  %2240 = vrot.lane.b32.xlu0 %v2233_v1, %s5245_s27  ;;  %v2273_v52 = vsel %vm553_vm0, %v2268_v60, %v2272_v2  ;;  %v2271_v1 = vsel %vm553_vm0, %v2265_v6, %v2270_v26  ;;  %v2307_v60 = vsel %vm553_vm0, %v2305_v38, %v2306_v50 }
 0x1da   : > { %v2329_v6 = vmul.f32 %v6013_v34, %v2327_v49  ;;  %v2331_v2 = vmul.f32 %v6027_v37, %v2327_v49  ;;  %v2304_v26 = vsel %vm553_vm0, %v2302_v13, %v2303_v16  ;;  %v2308_v7 = vrot.slane %v2294_v59, 1 }
 0x1db   : > { %v6328_v36 = vpop.permute.xlu1 %1748  ;;  %v6330_v23 = vpop.permute.xlu0 %1746  ;;  %v2328_v51 = vmul.f32 %v6016_v56, %v2327_v49  ;;  %v2330_v39 = vmul.f32 %v6030_v8, %v2327_v49  ;;  %v2311_v20 = vsel %vm553_vm0, %v2306_v50, %v2310_v44  ;;  %v2332_v59 = vmul.f32 %v6216_v55, %v2327_v49 }
 0x1dc   : > { %9610 = vst [vmem:[#allocation143_spill] sm:$0xff] %v6328_v36  ;;  %9611 = vst [vmem:[#allocation144_spill] sm:$0xff] %v6330_v23  ;;  %v2343_v19 = vrot.slane %v2329_v6, 1  ;;  %v2344_v35 = vrot.slane %v2331_v2, 1 }
 0x1dd   : > { %2276 = vrot.lane.b32.xlu1 %v2269_v3, %s5245_s27  ;;  %2274 = vrot.lane.b32.xlu0 %v2266_v10, %s5245_s27  ;;  %v2340_v38 = vrot.slane %v2328_v51, 1  ;;  %v2341_v13 = vrot.slane %v2330_v39, 1 }
 0x1de   : > { %v2345_v44 = vsel %vm553_vm0, %v2343_v19, %v2344_v35 }
 0x1df   : > { %v6338_v36 = vpop.permute.xlu1 %1768  ;;  %v6340_v23 = vpop.permute.xlu0 %1766 }
 0x1e0   : > { %9612 = vst [vmem:[#allocation145_spill] sm:$0xff] %v6338_v36  ;;  %9613 = vst [vmem:[#allocation146_spill] sm:$0xff] %v6340_v23  ;;  %v2365_v23 = vstv %s4929_s11  ;;  %s6623_s11 = sld [smem:[#allocation2]] }
 0x1e1   : > { %2280 = vrot.lane.b32.xlu1 %v2273_v52, %s5245_s27  ;;  %2278 = vrot.lane.b32.xlu0 %v2271_v1, %s5245_s27  ;;  %v2333_v52 = vmul.f32 %v6213_v9, %v2327_v49  ;;  %v2309_v1 = vsel %vm553_vm0, %v2303_v16, %v2308_v7  ;;  %v2367_v49 = vmul.f32 %v6013_v34, %v2365_v23 }
 0x1e2   : > { %v2342_v16 = vsel %vm553_vm0, %v2340_v38, %v2341_v13  ;;  %v2369_v6 = vmul.f32 %v6027_v37, %v2365_v23  ;;  %v2366_v2 = vmul.f32 %v6016_v56, %v2365_v23  ;;  %v2371_v39 = vmul.f32 %v6213_v9, %v2365_v23 }
 0x1e3   : > { %v6350_v3 = vpop.permute.xlu1 %1772  ;;  %v6352_v10 = vpop.permute.xlu0 %1770  ;;  %v2348_v50 = vrot.slane %v2333_v52, 1  ;;  %v2381_v52 = vrot.slane %v2367_v49, 1 }
 0x1e4   : > { %9614 = vst [vmem:[#allocation147_spill] sm:$0xff] %v6350_v3  ;;  %9615 = vst [vmem:[#allocation148_spill] sm:$0xff] %v6352_v10  ;;  %v2378_v38 = vrot.slane %v2366_v2, 1  ;;  %v2386_v36 = vrot.slane %v2371_v39, 1 }
 0x1e5   : > { %2314 = vrot.lane.b32.xlu1 %v2307_v60, %s5245_s27  ;;  %2312 = vrot.lane.b32.xlu0 %v2304_v26, %s5245_s27  ;;  %v2346_v60 = vrot.slane %v2332_v59, 1  ;;  %v2368_v26 = vmul.f32 %v6030_v8, %v2365_v23  ;;  %v2370_v59 = vmul.f32 %v6216_v55, %v2365_v23 }
 0x1e7   : > { %v6360_v3 = vpop.permute.xlu1 %1792  ;;  %v6362_v10 = vpop.permute.xlu0 %1790  ;;  %v2347_v19 = vsel %vm553_vm0, %v2341_v13, %v2346_v60 }
 0x1e8   : > { %9616 = vst [vmem:[#allocation149_spill] sm:$0xff] %v6360_v3  ;;  %9617 = vst [vmem:[#allocation150_spill] sm:$0xff] %v6362_v10  ;;  %v2379_v10 = vrot.slane %v2368_v26, 1  ;;  %v2403_v3 = vstv %s4930_s19  ;;  %s6628_s19 = sld [smem:[#allocation2 + $0x1b]] }
 0x1e9   : > { %2318 = vrot.lane.b32.xlu1 %v2311_v20, %s5245_s27  ;;  %2316 = vrot.lane.b32.xlu0 %v2309_v1, %s5245_s27  ;;  %v2349_v20 = vsel %vm553_vm0, %v2344_v35, %v2348_v50  ;;  %v2382_v1 = vrot.slane %v2369_v6, 1  ;;  %v2384_v35 = vrot.slane %v2370_v59, 1  ;;  %v2405_v13 = vmul.f32 %v6013_v34, %v2403_v3 }
 0x1ea   : > { %v2380_v50 = vsel %vm553_vm0, %v2378_v38, %v2379_v10  ;;  %v2404_v60 = vmul.f32 %v6016_v56, %v2403_v3  ;;  %v2406_v49 = vmul.f32 %v6030_v8, %v2403_v3  ;;  %v2408_v38 = vmul.f32 %v6216_v55, %v2403_v3 }
 0x1eb   : > { %v6372_v7 = vpop.permute.xlu1 %1796  ;;  %v6374_v51 = vpop.permute.xlu0 %1794  ;;  %v2383_v23 = vsel %vm553_vm0, %v2381_v52, %v2382_v1  ;;  %v2387_v2 = vsel %vm553_vm0, %v2382_v1, %v2386_v36  ;;  %v2385_v26 = vsel %vm553_vm0, %v2379_v10, %v2384_v35  ;;  %v2419_v39 = vrot.slane %v2405_v13, 1 }
 0x1ec   : > { %9618 = vst [vmem:[#allocation151_spill] sm:$0xff] %v6372_v7  ;;  %9619 = vst [vmem:[#allocation152_spill] sm:$0xff] %v6374_v51  ;;  %v2416_v52 = vrot.slane %v2404_v60, 1  ;;  %v2417_v59 = vrot.slane %v2406_v49, 1 }
 0x1ed   : > { %2352 = vrot.lane.b32.xlu1 %v2345_v44, %s5246_s26  ;;  %2350 = vrot.lane.b32.xlu0 %v2342_v16, %s5246_s26  ;;  %v2407_v44 = vmul.f32 %v6027_v37, %v2403_v3 }
 0x1ee   : > { %v2418_v13 = vsel %vm553_vm0, %v2416_v52, %v2417_v59 }
 0x1ef   : > { %v6382_v7 = vpop.permute.xlu1 %1816  ;;  %v6384_v51 = vpop.permute.xlu0 %1814 }
 0x1f0   : > { %9620 = vst [vmem:[#allocation153_spill] sm:$0xff] %v6382_v7  ;;  %9621 = vst [vmem:[#allocation154_spill] sm:$0xff] %v6384_v51  ;;  %v2441_v51 = vstv %s4931_s22  ;;  %s6634_s22 = sld [smem:[#allocation2 + $0x36]] }
 0x1f1   : > { %2356 = vrot.lane.b32.xlu1 %v2349_v20, %s5246_s26  ;;  %2354 = vrot.lane.b32.xlu0 %v2347_v19, %s5246_s26  ;;  %v2420_v20 = vrot.slane %v2407_v44, 1  ;;  %v2409_v19 = vmul.f32 %v6213_v9, %v2403_v3  ;;  %v2443_v1 = vmul.f32 %v6013_v34, %v2441_v51  ;;  %v2445_v35 = vmul.f32 %v6027_v37, %v2441_v51 }
 0x1f2   : > { %v2422_v3 = vrot.slane %v2408_v38, 1  ;;  %v2442_v44 = vmul.f32 %v6016_v56, %v2441_v51  ;;  %v2447_v49 = vmul.f32 %v6213_v9, %v2441_v51 }
 0x1f3   : > { %v6394_v16 = vpop.permute.xlu1 %1820  ;;  %v6396_v6 = vpop.permute.xlu0 %1818  ;;  %v2421_v36 = vsel %vm553_vm0, %v2419_v39, %v2420_v20  ;;  %v2424_v10 = vrot.slane %v2409_v19, 1  ;;  %v2458_v39 = vrot.slane %v2445_v35, 1  ;;  %v2446_v19 = vmul.f32 %v6216_v55, %v2441_v51 }
 0x1f4   : > { %9622 = vst [vmem:[#allocation155_spill] sm:$0xff] %v6394_v16  ;;  %9623 = vst [vmem:[#allocation156_spill] sm:$0xff] %v6396_v6  ;;  %v2423_v52 = vsel %vm553_vm0, %v2417_v59, %v2422_v3  ;;  %v2454_v38 = vrot.slane %v2442_v44, 1  ;;  %v2462_v7 = vrot.slane %v2447_v49, 1 }
 0x1f5   : > { %2390 = vrot.lane.b32.xlu1 %v2383_v23, %s5246_s26  ;;  %2388 = vrot.lane.b32.xlu0 %v2380_v50, %s5246_s26  ;;  %v2444_v23 = vmul.f32 %v6030_v8, %v2441_v51 }
 0x1f6   : > { %v2463_v44 = vsel %vm553_vm0, %v2458_v39, %v2462_v7 }
 0x1f7   : > { %v6404_v16 = vpop.permute.xlu1 %1840  ;;  %v6406_v6 = vpop.permute.xlu0 %1838 }
 0x1f8   : > { %9624 = vst [vmem:[#allocation157_spill] sm:$0xff] %v6404_v16  ;;  %9625 = vst [vmem:[#allocation158_spill] sm:$0xff] %v6406_v6  ;;  %v2455_v6 = vrot.slane %v2444_v23, 1  ;;  %v2479_v16 = vstv %s4932_s23  ;;  %s6642_s23 = sld [smem:[#allocation2 + $0x47]] }
 0x1f9   : > { %2394 = vrot.lane.b32.xlu1 %v2387_v2, %s5246_s26  ;;  %2392 = vrot.lane.b32.xlu0 %v2385_v26, %s5246_s26  ;;  %v2425_v2 = vsel %vm553_vm0, %v2420_v20, %v2424_v10  ;;  %v2457_v26 = vrot.slane %v2443_v1, 1  ;;  %v2481_v51 = vmul.f32 %v6013_v34, %v2479_v16  ;;  %v2483_v10 = vmul.f32 %v6027_v37, %v2479_v16 }
 0x1fa   : > { %v2456_v59 = vsel %vm553_vm0, %v2454_v38, %v2455_v6  ;;  %v2480_v1 = vmul.f32 %v6016_v56, %v2479_v16  ;;  %v2482_v35 = vmul.f32 %v6030_v8, %v2479_v16 }
 0x1fb   : > { %v6416_v50 = vpop.permute.xlu1 %1844  ;;  %v6418_v60 = vpop.permute.xlu0 %1842  ;;  %v2459_v20 = vsel %vm553_vm0, %v2457_v26, %v2458_v39  ;;  %v2495_v49 = vrot.slane %v2481_v51, 1  ;;  %v2484_v26 = vmul.f32 %v6216_v55, %v2479_v16 }
 0x1fc   : > { %9626 = vst [vmem:[#allocation159_spill] sm:$0xff] %v6416_v50  ;;  %9627 = vst [vmem:[#allocation160_spill] sm:$0xff] %v6418_v60  ;;  %v2493_v38 = vrot.slane %v2482_v35, 1 }
 0x1fd   : > { %2428 = vrot.lane.b32.xlu1 %v2421_v36, %s5246_s26  ;;  %2426 = vrot.lane.b32.xlu0 %v2418_v13, %s5246_s26  ;;  %v2460_v36 = vrot.slane %v2446_v19, 1  ;;  %v2496_v19 = vrot.slane %v2483_v10, 1 }
 0x1ff   : > { %v6426_v50 = vpop.permute.xlu1 %1864  ;;  %v6428_v60 = vpop.permute.xlu0 %1862  ;;  %v2461_v23 = vsel %vm553_vm0, %v2455_v6, %v2460_v36  ;;  %v2498_v6 = vrot.slane %v2484_v26, 1 }
 0x200   : > { %9628 = vst [vmem:[#allocation161_spill] sm:$0xff] %v6426_v50  ;;  %9629 = vst [vmem:[#allocation162_spill] sm:$0xff] %v6428_v60  ;;  %v2517_v60 = vstv %s4933_s25  ;;  %s6644_s25 = sld [smem:[#allocation2 + $0x51]] }
 0x201   : > { %2432 = vrot.lane.b32.xlu1 %v2425_v2, %s5246_s26  ;;  %2430 = vrot.lane.b32.xlu0 %v2423_v52, %s5246_s26  ;;  %v2485_v2 = vmul.f32 %v6213_v9, %v2479_v16  ;;  %v2492_v52 = vrot.slane %v2480_v1, 1  ;;  %v2519_v39 = vmul.f32 %v6013_v34, %v2517_v60  ;;  %v2497_v16 = vsel %vm553_vm0, %v2495_v49, %v2496_v19 }
 0x202   : > { %v2518_v51 = vmul.f32 %v6016_v56, %v2517_v60  ;;  %v2523_v35 = vmul.f32 %v6213_v9, %v2517_v60 }
 0x203   : > { %v6438_v13 = vpop.permute.xlu1 %1868  ;;  %v6440_v3 = vpop.permute.xlu0 %1866  ;;  %v2500_v7 = vrot.slane %v2485_v2, 1  ;;  %v2494_v36 = vsel %vm553_vm0, %v2492_v52, %v2493_v38  ;;  %v2533_v49 = vrot.slane %v2519_v39, 1 }
 0x204   : > { %9630 = vst [vmem:[#allocation163_spill] sm:$0xff] %v6438_v13  ;;  %9631 = vst [vmem:[#allocation164_spill] sm:$0xff] %v6440_v3  ;;  %v2530_v26 = vrot.slane %v2518_v51, 1  ;;  %v2538_v50 = vrot.slane %v2523_v35, 1 }
 0x205   : > { %2466 = vrot.lane.b32.xlu1 %v2459_v20, %s5246_s26  ;;  %2464 = vrot.lane.b32.xlu0 %v2456_v59, %s5246_s26  ;;  %v2521_v20 = vmul.f32 %v6027_v37, %v2517_v60  ;;  %v2520_v59 = vmul.f32 %v6030_v8, %v2517_v60 }
 0x207   : > { %v6448_v13 = vpop.permute.xlu1 %1888  ;;  %v6450_v3 = vpop.permute.xlu0 %1886  ;;  %v2534_v2 = vrot.slane %v2521_v20, 1  ;;  %v2531_v52 = vrot.slane %v2520_v59, 1 }
 0x208   : > { %9632 = vst [vmem:[#allocation165_spill] sm:$0xff] %v6448_v13  ;;  %9633 = vst [vmem:[#allocation166_spill] sm:$0xff] %v6450_v3  ;;  %v2522_v3 = vmul.f32 %v6216_v55, %v2517_v60  ;;  %v2657_v13 = vstv %s4940_s28  ;;  %s6650_s28 = sld [smem:[#allocation2 + $0x3]] }
 0x209   : > { %2470 = vrot.lane.b32.xlu1 %v2463_v44, %s5246_s26  ;;  %2468 = vrot.lane.b32.xlu0 %v2461_v23, %s5246_s26  ;;  %v2501_v44 = vsel %vm553_vm0, %v2496_v19, %v2500_v7  ;;  %v2499_v23 = vsel %vm553_vm0, %v2493_v38, %v2498_v6  ;;  %v2535_v19 = vsel %vm553_vm0, %v2533_v49, %v2534_v2 }
 0x20a   : > { %v2659_v38 = vmul.f32 %v6013_v34, %v2657_v13  ;;  %v2661_v7 = vmul.f32 %v6027_v37, %v2657_v13  ;;  %v2532_v6 = vsel %vm553_vm0, %v2530_v26, %v2531_v52  ;;  %v2536_v60 = vrot.slane %v2522_v3, 1 }
 0x20b   : > { %v6460_v10 = vpop.permute.xlu1 %1892  ;;  %v6462_v1 = vpop.permute.xlu0 %1890  ;;  %v2658_v39 = vmul.f32 %v6016_v56, %v2657_v13  ;;  %v2660_v20 = vmul.f32 %v6030_v8, %v2657_v13  ;;  %v2539_v51 = vsel %vm553_vm0, %v2534_v2, %v2538_v50  ;;  %v2662_v3 = vmul.f32 %v6216_v55, %v2657_v13 }
 0x20c   : > { %9634 = vst [vmem:[#allocation167_spill] sm:$0xff] %v6460_v10  ;;  %9635 = vst [vmem:[#allocation168_spill] sm:$0xff] %v6462_v1  ;;  %v2673_v59 = vrot.slane %v2659_v38, 2  ;;  %v2674_v35 = vrot.slane %v2661_v7, 2 }
 0x20d   : > { %2504 = vrot.lane.b32.xlu1 %v2497_v16, %s5246_s26  ;;  %2502 = vrot.lane.b32.xlu0 %v2494_v36, %s5246_s26  ;;  %v2670_v49 = vrot.slane %v2658_v39, 2  ;;  %v2671_v26 = vrot.slane %v2660_v20, 2 }
 0x20e   : > { %v2675_v50 = vsel %vm1112_vm1, %v2673_v59, %v2674_v35 }
 0x20f   : > { %v6470_v10 = vpop.permute.xlu1 %1912  ;;  %v6472_v1 = vpop.permute.xlu0 %1910 }
 0x210   : > { %9636 = vst [vmem:[#allocation169_spill] sm:$0xff] %v6470_v10  ;;  %9637 = vst [vmem:[#allocation170_spill] sm:$0xff] %v6472_v1  ;;  %v2695_v1 = vstv %s4941_s29  ;;  %s6652_s29 = sld [smem:[#allocation2 + $0x6c]] }
 0x211   : > { %2508 = vrot.lane.b32.xlu1 %v2501_v44, %s5246_s26  ;;  %2506 = vrot.lane.b32.xlu0 %v2499_v23, %s5246_s26  ;;  %v2663_v44 = vmul.f32 %v6213_v9, %v2657_v13  ;;  %v2537_v23 = vsel %vm553_vm0, %v2531_v52, %v2536_v60  ;;  %v2697_v13 = vmul.f32 %v6013_v34, %v2695_v1 }
 0x212   : > { %v2672_v52 = vsel %vm1112_vm1, %v2670_v49, %v2671_v26  ;;  %v2699_v38 = vmul.f32 %v6027_v37, %v2695_v1  ;;  %v2696_v7 = vmul.f32 %v6016_v56, %v2695_v1  ;;  %v2701_v20 = vmul.f32 %v6213_v9, %v2695_v1 }
 0x213   : > { %v6482_v16 = vpop.permute.xlu1 %1916  ;;  %v6484_v36 = vpop.permute.xlu0 %1914  ;;  %v2678_v2 = vrot.slane %v2663_v44, 2  ;;  %v2711_v37 = vrot.slane %v2697_v13, 2  ;;  %v2700_v56 = vmul.f32 %v6216_v55, %v2695_v1 }
 0x214   : > { %9638 = vst [vmem:[#allocation171_spill] sm:$0xff] %v6482_v16  ;;  %9639 = vst [vmem:[#allocation172_spill] sm:$0xff] %v6484_v36  ;;  %v2708_v59 = vrot.slane %v2696_v7, 2 }
 0x215   : > { %2542 = vrot.lane.b32.xlu1 %v2535_v19, %s5246_s26  ;;  %2540 = vrot.lane.b32.xlu0 %v2532_v6, %s5246_s26  ;;  %v2676_v19 = vrot.slane %v2662_v3, 2  ;;  %v2698_v6 = vmul.f32 %v6030_v8, %v2695_v1  ;;  %v2679_v34 = vsel %vm1112_vm1, %v2674_v35, %v2678_v2  ;;  %v2712_v8 = vrot.slane %v2699_v38, 2  ;;  %v6525_v2 = vld [vmem:[%s5376_s9 + $0x68] sm:$0xff]  ;;  %v6531_v38 = vld [vmem:[%s5376_s9 + $0x50] sm:$0xff] }
 0x216   : > { %v2733_v3 = vstv %s4942_s30  ;;  %v2714_v35 = vrot.slane %v2700_v56, 2  ;;  %s6669_s30 = sld [smem:[#allocation2 + $0x87]] }
 0x217   : > { %v6492_v16 = vpop.permute.xlu1 %1936  ;;  %v6494_v36 = vpop.permute.xlu0 %1934  ;;  %v2709_v44 = vrot.slane %v2698_v6, 2  ;;  %v2713_v13 = vsel %vm1112_vm1, %v2711_v37, %v2712_v8  ;;  %v2734_v7 = vmul.f32 %v6531_v38, %v2733_v3  ;;  %v6535_v6 = vld [vmem:[%s5376_s9 + $0x60] sm:$0xff] }
 0x218   : > { %9640 = vst [vmem:[#allocation173_spill] sm:$0xff] %v6492_v16  ;;  %9641 = vst [vmem:[#allocation174_spill] sm:$0xff] %v6494_v36  ;;  %v2738_v36 = vmul.f32 %v6216_v55, %v2733_v3  ;;  %v2771_v16 = vstv %s4943_s4  ;;  %s6681_s4 = sld [smem:[#allocation2 + $0x62]] }
 0x219   : > { %2546 = vrot.lane.b32.xlu1 %v2539_v51, %s5246_s26  ;;  %2544 = vrot.lane.b32.xlu0 %v2537_v23, %s5246_s26  ;;  %v2677_v51 = vsel %vm1112_vm1, %v2671_v26, %v2676_v19  ;;  %v6521_v26 = vld [vmem:[%s5376_s9 + $0x58] sm:$0xff]  ;;  %v2737_v19 = vmul.f32 %v6525_v2, %v2733_v3  ;;  %v2715_v37 = vsel %vm1112_vm1, %v2709_v44, %v2714_v35 }
 0x21a   : > { %v2735_v1 = vmul.f32 %v6521_v26, %v2733_v3  ;;  %v2775_v35 = vmul.f32 %v6525_v2, %v2771_v16 }
 0x21b   : > { %v6504_v60 = vpop.permute.xlu1 %1940  ;;  %v6506_v39 = vpop.permute.xlu0 %1938 }
 0x21c   : > { %9642 = vst [vmem:[#allocation175_spill] sm:$0xff] %v6504_v60  ;;  %9643 = vst [vmem:[#allocation176_spill] sm:$0xff] %v6506_v39  ;;  %v2746_v39 = vrot.slane %v2734_v7, 2 }
 0x21d   : > { %2682 = vrot.lane.b32.xlu1 %v2675_v50, %s5245_s27  ;;  %2680 = vrot.lane.b32.xlu0 %v2672_v52, %s5245_s27  ;;  %v2716_v50 = vrot.slane %v2701_v20, 2  ;;  %v2710_v52 = vsel %vm1112_vm1, %v2708_v59, %v2709_v44  ;;  %v2736_v20 = vmul.f32 %v6535_v6, %v2733_v3  ;;  %v2749_v59 = vrot.slane %v2735_v1, 2 }
 0x21f   : > { %v6514_v23 = vpop.permute.xlu1 %1960  ;;  %v6516_v49 = vpop.permute.xlu0 %1958  ;;  %v2717_v56 = vsel %vm1112_vm1, %v2712_v8, %v2716_v50  ;;  %v2747_v60 = vrot.slane %v2736_v20, 2  ;;  %v2773_v50 = vmul.f32 %v6521_v26, %v2771_v16  ;;  %v2777_v20 = vmul.f32 %v6213_v9, %v2771_v16 }
 0x220   : > { %9644 = vst [vmem:[#allocation177_spill] sm:$0xff] %v6514_v23  ;;  %9645 = vst [vmem:[#allocation178_spill] sm:$0xff] %v6516_v49  ;;  %v2750_v49 = vrot.slane %v2737_v19, 2  ;;  %v2739_v23 = vmul.f32 %v6213_v9, %v2733_v3  ;;  %v2752_v3 = vrot.slane %v2738_v36, 2  ;;  %v2772_v19 = vmul.f32 %v6531_v38, %v2771_v16 }
 0x221   : > { %2686 = vrot.lane.b32.xlu1 %v2679_v34, %s5245_s27  ;;  %2684 = vrot.lane.b32.xlu0 %v2677_v51, %s5245_s27  ;;  %v2748_v1 = vsel %vm1112_vm1, %v2746_v39, %v2747_v60  ;;  %v2776_v36 = vmul.f32 %v6216_v55, %v2771_v16  ;;  %v2792_v10 = vrot.slane %v2777_v20, 2 }
 0x222   : > { %v2751_v8 = vsel %vm1112_vm1, %v2749_v59, %v2750_v49  ;;  %v2754_v44 = vrot.slane %v2739_v23, 2  ;;  %v2753_v39 = vsel %vm1112_vm1, %v2747_v60, %v2752_v3  ;;  %v2784_v59 = vrot.slane %v2772_v19, 2 }
 0x223   : > { %v6538_v34 = vpop.permute.xlu1 %1964  ;;  %v6540_v51 = vpop.permute.xlu0 %1962 }
 0x224   : > { %9646 = vst [vmem:[#allocation179_spill] sm:$0xff] %v6538_v34  ;;  %9647 = vst [vmem:[#allocation180_spill] sm:$0xff] %v6540_v51  ;;  %v2755_v23 = vsel %vm1112_vm1, %v2750_v49, %v2754_v44 }
 0x225   : > { %2720 = vrot.lane.b32.xlu1 %v2713_v13, %s5245_s27  ;;  %2718 = vrot.lane.b32.xlu0 %v2710_v52, %s5245_s27  ;;  %v2774_v13 = vmul.f32 %v6535_v6, %v2771_v16 }
 0x227   : > { %v6548_v34 = vpop.permute.xlu1 %1984  ;;  %v6550_v51 = vpop.permute.xlu0 %1982 }
 0x228   : > { %9648 = vst [vmem:[#allocation181_spill] sm:$0xff] %v6548_v34  ;;  %9649 = vst [vmem:[#allocation182_spill] sm:$0xff] %v6550_v51  ;;  %v2785_v51 = vrot.slane %v2774_v13, 2  ;;  %v2809_v34 = vstv %s4944_s5  ;;  %s6701_s5 = sld [smem:[#allocation2 + $0x1e]] }
 0x229   : > { %2724 = vrot.lane.b32.xlu1 %v2717_v56, %s5245_s27  ;;  %2722 = vrot.lane.b32.xlu0 %v2715_v37, %s5245_s27  ;;  %v2787_v56 = vrot.slane %v2773_v50, 2  ;;  %v2788_v37 = vrot.slane %v2775_v35, 2  ;;  %v2811_v16 = vmul.f32 %v6521_v26, %v2809_v34  ;;  %v2813_v44 = vmul.f32 %v6525_v2, %v2809_v34 }
 0x22a   : > { %v2786_v60 = vsel %vm1112_vm1, %v2784_v59, %v2785_v51  ;;  %v2810_v50 = vmul.f32 %v6531_v38, %v2809_v34  ;;  %v2812_v35 = vmul.f32 %v6535_v6, %v2809_v34 }
 0x22b   : > { %v6560_v52 = vpop.permute.xlu1 %1988  ;;  %v6562_v7 = vpop.permute.xlu0 %1986  ;;  %v2789_v49 = vsel %vm1112_vm1, %v2787_v56, %v2788_v37  ;;  %v2793_v19 = vsel %vm1112_vm1, %v2788_v37, %v2792_v10  ;;  %v2825_v20 = vrot.slane %v2811_v16, 2  ;;  %v2814_v56 = vmul.f32 %v6216_v55, %v2809_v34 }
 0x22c   : > { %9650 = vst [vmem:[#allocation183_spill] sm:$0xff] %v6560_v52  ;;  %9651 = vst [vmem:[#allocation184_spill] sm:$0xff] %v6562_v7  ;;  %v2823_v59 = vrot.slane %v2812_v35, 2 }
 0x22d   : > { %2758 = vrot.lane.b32.xlu1 %v2751_v8, %s5245_s27  ;;  %2756 = vrot.lane.b32.xlu0 %v2748_v1, %s5245_s27  ;;  %v2790_v8 = vrot.slane %v2776_v36, 2  ;;  %v2826_v36 = vrot.slane %v2813_v44, 2 }
 0x22f   : > { %v6570_v52 = vpop.permute.xlu1 %2124  ;;  %v6572_v7 = vpop.permute.xlu0 %2122  ;;  %v2791_v13 = vsel %vm1112_vm1, %v2785_v51, %v2790_v8  ;;  %v2828_v51 = vrot.slane %v2814_v56, 2 }
 0x230   : > { %9652 = vst [vmem:[#allocation185_spill] sm:$0xff] %v6570_v52  ;;  %9653 = vst [vmem:[#allocation186_spill] sm:$0xff] %v6572_v7  ;;  %v2847_v7 = vstv %s4945_s7  ;;  %s6712_s7 = sld [smem:[#allocation2 + $0x39]] }
 0x231   : > { %2762 = vrot.lane.b32.xlu1 %v2755_v23, %s5245_s27  ;;  %2760 = vrot.lane.b32.xlu0 %v2753_v39, %s5245_s27  ;;  %v2815_v23 = vmul.f32 %v6213_v9, %v2809_v34  ;;  %v2822_v39 = vrot.slane %v2810_v50, 2  ;;  %v2849_v37 = vmul.f32 %v6521_v26, %v2847_v7  ;;  %v2827_v34 = vsel %vm1112_vm1, %v2825_v20, %v2826_v36 }
 0x232   : > { %v2848_v16 = vmul.f32 %v6531_v38, %v2847_v7  ;;  %v2853_v35 = vmul.f32 %v6213_v9, %v2847_v7 }
 0x233   : > { %v6582_v1 = vpop.permute.xlu1 %2128  ;;  %v6584_v3 = vpop.permute.xlu0 %2126  ;;  %v2830_v10 = vrot.slane %v2815_v23, 2  ;;  %v2824_v8 = vsel %vm1112_vm1, %v2822_v39, %v2823_v59  ;;  %v2863_v20 = vrot.slane %v2849_v37, 2 }
 0x234   : > { %9654 = vst [vmem:[#allocation187_spill] sm:$0xff] %v6582_v1  ;;  %9655 = vst [vmem:[#allocation188_spill] sm:$0xff] %v6584_v3  ;;  %v2860_v56 = vrot.slane %v2848_v16, 2  ;;  %v2868_v52 = vrot.slane %v2853_v35, 2 }
 0x235   : > { %2796 = vrot.lane.b32.xlu1 %v2789_v49, %s5245_s27  ;;  %2794 = vrot.lane.b32.xlu0 %v2786_v60, %s5245_s27  ;;  %v2851_v49 = vmul.f32 %v6525_v2, %v2847_v7  ;;  %v2850_v60 = vmul.f32 %v6535_v6, %v2847_v7 }
 0x237   : > { %v6592_v1 = vpop.permute.xlu1 %2162  ;;  %v6594_v3 = vpop.permute.xlu0 %2160  ;;  %v2864_v23 = vrot.slane %v2851_v49, 2  ;;  %v2861_v39 = vrot.slane %v2850_v60, 2 }
 0x238   : > { %9656 = vst [vmem:[#allocation189_spill] sm:$0xff] %v6592_v1  ;;  %9657 = vst [vmem:[#allocation190_spill] sm:$0xff] %v6594_v3  ;;  %v2852_v3 = vmul.f32 %v6216_v55, %v2847_v7  ;;  %v2885_v1 = vstv %s4946_s8  ;;  %s6760_s8 = sld [smem:[#allocation2 + $0x7d]] }
 0x239   : > { %2800 = vrot.lane.b32.xlu1 %v2793_v19, %s5245_s27  ;;  %2798 = vrot.lane.b32.xlu0 %v2791_v13, %s5245_s27  ;;  %v2831_v19 = vsel %vm1112_vm1, %v2826_v36, %v2830_v10  ;;  %v2829_v13 = vsel %vm1112_vm1, %v2823_v59, %v2828_v51  ;;  %v2865_v36 = vsel %vm1112_vm1, %v2863_v20, %v2864_v23 }
 0x23a   : > { %v2887_v59 = vmul.f32 %v6521_v26, %v2885_v1  ;;  %v2889_v10 = vmul.f32 %v6525_v2, %v2885_v1  ;;  %v2862_v7 = vsel %vm1112_vm1, %v2860_v56, %v2861_v39  ;;  %v2866_v51 = vrot.slane %v2852_v3, 2 }
 0x23b   : > { %v6604_v44 = vpop.permute.xlu1 %2166  ;;  %v6606_v50 = vpop.permute.xlu0 %2164  ;;  %v2886_v37 = vmul.f32 %v6531_v38, %v2885_v1  ;;  %v2888_v49 = vmul.f32 %v6535_v6, %v2885_v1  ;;  %v2869_v16 = vsel %vm1112_vm1, %v2864_v23, %v2868_v52  ;;  %v2891_v35 = vmul.f32 %v6213_v9, %v2885_v1 }
 0x23c   : > { %9658 = vst [vmem:[#allocation191_spill] sm:$0xff] %v6604_v44  ;;  %9659 = vst [vmem:[#allocation192_spill] sm:$0xff] %v6606_v50  ;;  %v2901_v60 = vrot.slane %v2887_v59, 2  ;;  %v2902_v3 = vrot.slane %v2889_v10, 2 }
 0x23d   : > { %2834 = vrot.lane.b32.xlu1 %v2827_v34, %s5245_s27  ;;  %2832 = vrot.lane.b32.xlu0 %v2824_v8, %s5245_s27  ;;  %v2898_v20 = vrot.slane %v2886_v37, 2  ;;  %v2899_v56 = vrot.slane %v2888_v49, 2 }
 0x23f   : > { %v6614_v44 = vpop.permute.xlu1 %2200  ;;  %v6616_v50 = vpop.permute.xlu0 %2198  ;;  %v2900_v59 = vsel %vm1112_vm1, %v2898_v20, %v2899_v56 }
 0x240   : > { %9660 = vst [vmem:[#allocation193_spill] sm:$0xff] %v6614_v44  ;;  %9661 = vst [vmem:[#allocation194_spill] sm:$0xff] %v6616_v50  ;;  %v2961_v44 = vstv %s6642_s23  ;;  %s6854_s23 = sld [smem:[#allocation2 + $0x6]] }
 0x241   : > { %2838 = vrot.lane.b32.xlu1 %v2831_v19, %s5245_s27  ;;  %2836 = vrot.lane.b32.xlu0 %v2829_v13, %s5245_s27  ;;  %v2890_v19 = vmul.f32 %v6216_v55, %v2885_v1  ;;  %v2867_v13 = vsel %vm1112_vm1, %v2861_v39, %v2866_v51  ;;  %v2903_v55 = vsel %vm1112_vm1, %v2901_v60, %v2902_v3  ;;  %v2906_v1 = vrot.slane %v2891_v35, 2 }
 0x242   : > { %v226_v60 = vstv %s6628_s19  ;;  %v232_v35 = vstv %s6634_s22  ;;  %v2963_v27 = vmul.f32 %v6521_v26, %v2961_v44  ;;  %v2962_v4 = vmul.f32 %v6531_v38, %v2961_v44  ;;  %s6813_s19 = sld [smem:[#allocation2 + $0x98]] }
 0x243   : > { %v6630_v34 = vpop.permute.xlu1 %2204  ;;  %v6632_v8 = vpop.permute.xlu0 %2202  ;;  %v2904_v39 = vrot.slane %v2890_v19, 2  ;;  %s6821_s22 = sld [smem:[#allocation2 + $0x8a]] }
 0x244   : > { %9662 = vst [vmem:[#allocation195_spill] sm:$0xff] %v6630_v34  ;;  %9663 = vst [vmem:[#allocation196_spill] sm:$0xff] %v6632_v8  ;;  %v2923_v34 = vstv %s4947_s10  ;;  %v2974_v62 = vrot.slane %v2962_v4, 2  ;;  %s6770_s10 = sld [smem:[#allocation2 + $0x54]] }
 0x245   : > { %2872 = vrot.lane.b32.xlu1 %v2865_v36, %s5245_s27  ;;  %2870 = vrot.lane.b32.xlu0 %v2862_v7, %s5245_s27  ;;  %v2925_v36 = vmul.f32 %v6521_v26, %v2923_v34  ;;  %v2927_v10 = vmul.f32 %v6525_v2, %v2923_v34  ;;  %v2924_v7 = vmul.f32 %v6531_v38, %v2923_v34 }
 0x246   : > { %v2926_v51 = vmul.f32 %v6535_v6, %v2923_v34  ;;  %v2929_v19 = vmul.f32 %v6213_v9, %v2923_v34  ;;  %v2905_v20 = vsel %vm1112_vm1, %v2899_v56, %v2904_v39  ;;  %v6684_v9 = vld [vmem:[%s5376_s9 + $0x10] sm:$0xff]  ;;  %v6690_v56 = vld [vmem:[%s5376_s9] sm:$0xff] }
 0x247   : > { %v6646_v52 = vpop.permute.xlu1 %2238  ;;  %v6648_v23 = vpop.permute.xlu0 %2236  ;;  %v2936_v8 = vrot.slane %v2924_v7, 2  ;;  %v546_v7 = vstv %s6650_s28  ;;  %s6899_s28 = sld [smem:[#allocation2 + $0x3c]] }
 0x248   : > { %9664 = vst [vmem:[#allocation197_spill] sm:$0xff] %v6646_v52  ;;  %9665 = vst [vmem:[#allocation198_spill] sm:$0xff] %v6648_v23  ;;  %v2940_v52 = vrot.slane %v2927_v10, 2  ;;  %v2937_v50 = vrot.slane %v2926_v51, 2  ;;  %v238_v10 = vstv %s6644_s25  ;;  %v2944_v51 = vrot.slane %v2929_v19, 2  ;;  %s6877_s25 = sld [smem:[#allocation2 + $0x21]] }
 0x249   : > { %2876 = vrot.lane.b32.xlu1 %v2869_v16, %s5245_s27  ;;  %2874 = vrot.lane.b32.xlu0 %v2867_v13, %s5245_s27  ;;  %v220_v16 = vstv %s6623_s11  ;;  %v2907_v13 = vsel %vm1112_vm1, %v2902_v3, %v2906_v1  ;;  %v6699_v1 = vmul.f32 %v6684_v9, %v226_v60  ;;  %v6725_v19 = vmul.f32 %v6535_v6, %v2961_v44  ;;  %s6804_s11 = sld [smem:[#allocation2 + $0x6f]] }
 0x24a   : > { %v6687_v3 = vmul.f32 %v6684_v9, %v220_v16  ;;  %v2938_v5 = vsel %vm1112_vm1, %v2936_v8, %v2937_v50  ;;  %v6735_v41 = vmul.f32 %v6684_v9, %v546_v7  ;;  %v6742_v40 = vmul.f32 %v6684_v9, %v238_v10 }
 0x24b   : > { %v6662_v37 = vpop.permute.xlu1 %2242  ;;  %v6664_v49 = vpop.permute.xlu0 %2240  ;;  %v2945_v24 = vsel %vm1112_vm1, %v2940_v52, %v2944_v51  ;;  %v2975_v61 = vrot.slane %v6725_v19, 2  ;;  %v2999_v51 = vstv %s6681_s4  ;;  %s6970_s4 = sld [smem:[#allocation2 + $0x72]] }
 0x24c   : > { %9666 = vst [vmem:[#allocation199_spill] sm:$0xff] %v6662_v37  ;;  %9667 = vst [vmem:[#allocation200_spill] sm:$0xff] %v6664_v49  ;;  %v2939_v37 = vrot.slane %v2925_v36, 2  ;;  %v6677_v49 = vld [vmem:[%s5376_s9 + $0x70] sm:$0xff]  ;;  %v3001_v48 = vmul.f32 %v6521_v26, %v2999_v51 }
 0x24d   : > { %2910 = vrot.lane.b32.xlu1 %v2903_v55, %s5246_s26  ;;  %2908 = vrot.lane.b32.xlu0 %v2900_v59, %s5246_s26  ;;  %v2928_v23 = vmul.f32 %v6677_v49, %v2923_v34  ;;  %v6693_v55 = vmul.f32 %v6690_v56, %v220_v16  ;;  %v6696_v34 = vmul.f32 %v6690_v56, %v226_v60  ;;  %v244_v16 = vstv %s6652_s29  ;;  %s6909_s29 = sld [smem:[#allocation2 + $0x13]] }
 0x24e   : > { %v6708_v59 = vmul.f32 %v6690_v56, %v232_v35  ;;  %9672 = vst [vmem:[#allocation205_spill] sm:$0xff] %v6742_v40  ;;  %v6745_v25 = vmul.f32 %v6690_v56, %v244_v16  ;;  %v3037_v40 = vstv %s6760_s8  ;;  %s7062_s8 = sld [smem:[#allocation2 + $0x49]] }
 0x24f   : > { %v6703_v39 = vpop.permute.xlu1 %2276  ;;  %v6705_v36 = vpop.permute.xlu0 %2274  ;;  %v2942_v60 = vrot.slane %v2928_v23, 2  ;;  %v6731_v23 = vmul.f32 %v6690_v56, %v238_v10 }
 0x250   : > { %9668 = vst [vmem:[#allocation201_spill] sm:$0xff] %v6703_v39  ;;  %9669 = vst [vmem:[#allocation202_spill] sm:$0xff] %v6705_v36  ;;  %v6719_v39 = vmul.f32 %v6525_v2, %v2961_v44  ;;  %v2941_v36 = vsel %vm1112_vm1, %v2939_v37, %v2940_v52  ;;  %v2966_v52 = vmul.f32 %v6677_v49, %v2961_v44 }
 0x251   : > { %2914 = vrot.lane.b32.xlu1 %v2907_v13, %s5246_s26  ;;  %2912 = vrot.lane.b32.xlu0 %v2905_v20, %s5246_s26  ;;  %v6728_v13 = vmul.f32 %v6684_v9, %v232_v35  ;;  %v547_v20 = vmul.f32 %v6690_v56, %v546_v7  ;;  %9673 = vst [vmem:[#allocation206_spill] sm:$0xff] %v6745_v25  ;;  %v250_v35 = vstv %s6669_s30  ;;  %s6966_s30 = sld [smem:[#allocation2 + $0x57]] }
 0x252   : > { %v2943_v29 = vsel %vm1112_vm1, %v2937_v50, %v2942_v60  ;;  %v2978_v28 = vrot.slane %v6719_v39, 2  ;;  %v555_v50 = vrot.slane %v6735_v41, 1  ;;  %v6767_v39 = vld [vmem:[%s5376_s9 + $0x20] sm:$0xff]  ;;  %v6780_v19 = vmul.f32 %v6684_v9, %v250_v35 }
 0x253   : > { %v6737_v37 = vpop.permute.xlu1 %2280  ;;  %v6739_v8 = vpop.permute.xlu0 %2278  ;;  %v2980_v47 = vrot.slane %v2966_v52, 2 }
 0x254   : > { %9670 = vst [vmem:[#allocation203_spill] sm:$0xff] %v6737_v37  ;;  %9671 = vst [vmem:[#allocation204_spill] sm:$0xff] %v6739_v8  ;;  %v2977_v37 = vrot.slane %v2963_v27, 2  ;;  %v6754_v8 = vld [vmem:[%s5376_s9 + $0x78] sm:$0xff]  ;;  %v554_v27 = vrot.slane %v547_v20, 1  ;;  %v581_v20 = vstv %s6712_s7  ;;  %s7035_s7 = sld [smem:[#allocation2 + $0x8d]] }
 0x255   : > { %2948 = vrot.lane.b32.xlu1 %v2941_v36, %s5246_s26  ;;  %2946 = vrot.lane.b32.xlu0 %v2938_v5, %s5246_s26  ;;  %v2967_v10 = vmul.f32 %v6754_v8, %v2961_v44  ;;  %v6763_v5 = vmul.f32 %v6684_v9, %v244_v16  ;;  %v549_v36 = vmul.f32 %v6767_v39, %v546_v7  ;;  %v564_v16 = vstv %s6701_s5  ;;  %s6984_s5 = sld [smem:[#allocation2 + $0x2e]] }
 0x256   : > { %v6777_v44 = vmul.f32 %v6690_v56, %v250_v35  ;;  %9678 = vst [vmem:[#allocation211_spill] sm:$0xff] %v6780_v19  ;;  %v2979_v41 = vsel %vm1112_vm1, %v2977_v37, %v2978_v28  ;;  %v3002_v35 = vmul.f32 %v6535_v6, %v2999_v51  ;;  %v6793_v19 = vsel %vm553_vm0, %v554_v27, %v555_v50 }
 0x257   : > { %9674 = vst [vmem:[#allocation207_spill] sm:$0xff] %v6763_v5  ;;  %v6772_v4 = vpop.permute.xlu1 %2314  ;;  %v6774_v60 = vpop.permute.xlu0 %2312  ;;  %v2982_v7 = vrot.slane %v2967_v10, 2  ;;  %9679 = vst [vmem:[#allocation212_spill] sm:$0xff] %v6793_v19  ;;  %v566_v37 = vmul.f32 %v6684_v9, %v564_v16  ;;  %v582_v52 = vmul.f32 %v6690_v56, %v581_v20  ;;  %v583_v14 = vmul.f32 %v6684_v9, %v581_v20 }
 0x258   : > { %9675 = vst [vmem:[#allocation208_spill] sm:$0xff] %v6772_v4  ;;  %9676 = vst [vmem:[#allocation209_spill] sm:$0xff] %v6774_v60  ;;  %v3003_v4 = vmul.f32 %v6525_v2, %v2999_v51  ;;  %v2976_v60 = vsel %vm1112_vm1, %v2974_v62, %v2975_v61  ;;  %v567_v62 = vmul.f32 %v6767_v39, %v564_v16  ;;  %v3013_v25 = vrot.slane %v3002_v35, 2 }
 0x259   : > { %9677 = vst [vmem:[#allocation210_spill] sm:$0xff] %v6777_v44  ;;  %2952 = vrot.lane.b32.xlu1 %v2945_v24, %s5246_s26  ;;  %2950 = vrot.lane.b32.xlu0 %v2943_v29, %s5246_s26  ;;  %v3000_v44 = vmul.f32 %v6531_v38, %v2999_v51  ;;  %v557_v24 = vrot.slane %v549_v36, 1  ;;  %v565_v29 = vmul.f32 %v6690_v56, %v564_v16  ;;  %v572_v57 = vrot.slane %v566_v37, 1 }
 0x25a   : > { %v3005_v27 = vmul.f32 %v6754_v8, %v2999_v51  ;;  %v2983_v36 = vsel %vm1112_vm1, %v2978_v28, %v2982_v7  ;;  %v3016_v19 = vrot.slane %v3003_v4, 2  ;;  %v2981_v16 = vsel %vm1112_vm1, %v2975_v61, %v2980_v47 }
 0x25b   : > { %v6797_v10 = vpop.permute.xlu1 %2318  ;;  %v6799_v15 = vpop.permute.xlu0 %2316  ;;  %v3012_v5 = vrot.slane %v3000_v44, 2  ;;  %v571_v58 = vrot.slane %v565_v29, 1  ;;  %v584_v46 = vmul.f32 %v6767_v39, %v581_v20  ;;  %v574_v28 = vrot.slane %v567_v62, 1 }
 0x25c   : > { %9680 = vst [vmem:[#allocation213_spill] sm:$0xff] %v6797_v10  ;;  %9681 = vst [vmem:[#allocation214_spill] sm:$0xff] %v6799_v15  ;;  %v3015_v10 = vrot.slane %v3001_v48, 2  ;;  %v3004_v15 = vmul.f32 %v6677_v49, %v2999_v51  ;;  %v588_v48 = vrot.slane %v582_v52, 1  ;;  %v589_v4 = vrot.slane %v583_v14, 1 }
 0x25d   : > { %2986 = vrot.lane.b32.xlu1 %v2979_v41, %s5246_s26  ;;  %2984 = vrot.lane.b32.xlu0 %v2976_v60, %s5246_s26  ;;  %v598_v41 = vstv %s6770_s10  ;;  %v3020_v47 = vrot.slane %v3005_v27, 2  ;;  %v6824_v61 = vsel %vm553_vm0, %v555_v50, %v557_v24  ;;  %v3039_v20 = vmul.f32 %v6521_v26, %v3037_v40  ;;  %s7115_s10 = sld [smem:[#allocation2 + $0x64]] }
 0x25e   : > { %v3017_v51 = vsel %vm1112_vm1, %v3015_v10, %v3016_v19  ;;  %v3018_v44 = vrot.slane %v3004_v15, 2  ;;  %v3014_v7 = vsel %vm1112_vm1, %v3012_v5, %v3013_v25  ;;  %v3041_v14 = vmul.f32 %v6525_v2, %v3037_v40 }
 0x25f   : > { %v6817_v45 = vpop.permute.xlu1 %2352  ;;  %v6819_v60 = vpop.permute.xlu0 %2350  ;;  %v3038_v35 = vmul.f32 %v6531_v38, %v3037_v40  ;;  %v3040_v29 = vmul.f32 %v6535_v6, %v3037_v40  ;;  %v6835_v50 = vsel %vm553_vm0, %v571_v58, %v572_v57  ;;  %v591_v24 = vrot.slane %v584_v46, 1 }
 0x260   : > { %9682 = vst [vmem:[#allocation215_spill] sm:$0xff] %v6817_v45  ;;  %9683 = vst [vmem:[#allocation216_spill] sm:$0xff] %v6819_v60  ;;  %v6838_v37 = vmul.f32 %v6690_v56, %v598_v41  ;;  %v6841_v10 = vmul.f32 %v6684_v9, %v598_v41  ;;  %v6848_v5 = vsel %vm553_vm0, %v572_v57, %v574_v28  ;;  %v615_v58 = vstv %s6804_s11  ;;  %s7186_s11 = sld [smem:[#allocation2 + $0x7f]] }
 0x261   : > { %2990 = vrot.lane.b32.xlu1 %v2983_v36, %s5246_s26  ;;  %2988 = vrot.lane.b32.xlu0 %v2981_v16, %s5246_s26  ;;  %v6851_v52 = vsel %vm553_vm0, %v588_v48, %v589_v4  ;;  %v3021_v46 = vsel %vm1112_vm1, %v3016_v19, %v3020_v47  ;;  %v3019_v27 = vsel %vm1112_vm1, %v3013_v25, %v3018_v44  ;;  %v3053_v36 = vrot.slane %v3039_v20, 2 }
 0x262   : > { %v3043_v57 = vmul.f32 %v6754_v8, %v3037_v40  ;;  %v3042_v16 = vmul.f32 %v6677_v49, %v3037_v40  ;;  %v3054_v28 = vrot.slane %v3041_v14, 2  ;;  %v3050_v48 = vrot.slane %v3038_v35, 2 }
 0x263   : > { %v6843_v15 = vpop.permute.xlu1 %2356  ;;  %v6845_v62 = vpop.permute.xlu0 %2354  ;;  %v6864_v60 = vsel %vm553_vm0, %v589_v4, %v591_v24  ;;  %v605_v19 = vrot.slane %v6838_v37, 1  ;;  %v606_v47 = vrot.slane %v6841_v10, 1  ;;  %v616_v20 = vmul.f32 %v6690_v56, %v615_v58 }
 0x264   : > { %9684 = vst [vmem:[#allocation217_spill] sm:$0xff] %v6843_v15  ;;  %9685 = vst [vmem:[#allocation218_spill] sm:$0xff] %v6845_v62  ;;  %v3051_v62 = vrot.slane %v3040_v29, 2  ;;  %v3075_v15 = vstv %s6813_s19  ;;  %v617_v40 = vmul.f32 %v6684_v9, %v615_v58  ;;  %v632_v14 = vstv %s6821_s22  ;;  %s7196_s19 = sld [smem:[#allocation2 + $0x9]] }
 0x265   : > { %3024 = vrot.lane.b32.xlu1 %v3017_v51, %s5246_s26  ;;  %3022 = vrot.lane.b32.xlu0 %v3014_v7, %s5246_s26  ;;  %v601_v51 = vmul.f32 %v6767_v39, %v598_v41  ;;  %v618_v7 = vmul.f32 %v6767_v39, %v615_v58  ;;  %v3058_v4 = vrot.slane %v3043_v57, 2  ;;  %v3056_v35 = vrot.slane %v3042_v16, 2  ;;  %s7208_s22 = sld [smem:[#allocation2 + $0x24]] }
 0x266   : > { %v3077_v41 = vmul.f32 %v6521_v26, %v3075_v15  ;;  %v6883_v29 = vmul.f32 %v6525_v2, %v3075_v15  ;;  %v3055_v24 = vsel %vm1112_vm1, %v3053_v36, %v3054_v28  ;;  %v3052_v37 = vsel %vm1112_vm1, %v3050_v48, %v3051_v62 }
 0x267   : > { %v6869_v25 = vpop.permute.xlu1 %2390  ;;  %v6871_v44 = vpop.permute.xlu0 %2388  ;;  %v3076_v10 = vmul.f32 %v6531_v38, %v3075_v15  ;;  %v6889_v58 = vmul.f32 %v6535_v6, %v3075_v15  ;;  %v634_v57 = vmul.f32 %v6684_v9, %v632_v14  ;;  %v635_v16 = vmul.f32 %v6767_v39, %v632_v14 }
 0x268   : > { %9686 = vst [vmem:[#allocation219_spill] sm:$0xff] %v6869_v25  ;;  %9687 = vst [vmem:[#allocation220_spill] sm:$0xff] %v6871_v44  ;;  %v622_v44 = vrot.slane %v616_v20, 1  ;;  %v623_v36 = vrot.slane %v617_v40, 1  ;;  %v625_v25 = vrot.slane %v618_v7, 1  ;;  %v1105_v48 = vstv %s6854_s23  ;;  %s7237_s23 = sld [smem:[#allocation2 + $0x3f]] }
 0x269   : > { %3028 = vrot.lane.b32.xlu1 %v3021_v46, %s5246_s26  ;;  %3026 = vrot.lane.b32.xlu0 %v3019_v27, %s5246_s26  ;;  %v608_v46 = vrot.slane %v601_v51, 1  ;;  %v633_v27 = vmul.f32 %v6690_v56, %v632_v14  ;;  %v3059_v38 = vsel %vm1112_vm1, %v3054_v28, %v3058_v4  ;;  %v3057_v6 = vsel %vm1112_vm1, %v3051_v62, %v3056_v35 }
 0x26a   : > { %v3091_v51 = vrot.slane %v3077_v41, 2  ;;  %v3092_v14 = vrot.slane %v6883_v29, 2  ;;  %v3081_v20 = vmul.f32 %v6754_v8, %v3075_v15  ;;  %v3080_v40 = vmul.f32 %v6677_v49, %v3075_v15 }
 0x26b   : > { %v6894_v26 = vpop.permute.xlu1 %2394  ;;  %v6896_v2 = vpop.permute.xlu0 %2392  ;;  %v6912_v7 = vsel %vm553_vm0, %v605_v19, %v606_v47  ;;  %v640_v28 = vrot.slane %v634_v57, 1  ;;  %v642_v4 = vrot.slane %v635_v16, 1  ;;  %v275_v41 = vsel %vm273_vm2, %v5538_v11, %v5550_v21 }
 0x26c   : > { %9688 = vst [vmem:[#allocation221_spill] sm:$0xff] %v6894_v26  ;;  %9689 = vst [vmem:[#allocation222_spill] sm:$0xff] %v6896_v2  ;;  %v3088_v26 = vrot.slane %v3076_v10, 2  ;;  %v3089_v2 = vrot.slane %v6889_v58, 2  ;;  %v6922_v8 = vsel %vm553_vm0, %v606_v47, %v608_v46  ;;  %v6925_v49 = vsel %vm553_vm0, %v622_v44, %v623_v36 }
 0x26d   : > { %3062 = vrot.lane.b32.xlu1 %v3055_v24, %s5246_s26  ;;  %3060 = vrot.lane.b32.xlu0 %v3052_v37, %s5246_s26  ;;  %v639_v24 = vrot.slane %v633_v27, 1  ;;  %v6928_v15 = vsel %vm553_vm0, %v623_v36, %v625_v25  ;;  %v274_v19 = vsel %vm273_vm2, %v5540_v12, %v5552_v22  ;;  %v1106_v29 = vmul.f32 %v6690_v56, %v1105_v48 }
 0x26e   : > { %v1107_v37 = vmul.f32 %v6684_v9, %v1105_v48  ;;  %v1123_v10 = vstv %s6877_s25  ;;  %v3093_v11 = vsel %vm1112_vm1, %v3091_v51, %v3092_v14  ;;  %v3090_v21 = vsel %vm1112_vm1, %v3088_v26, %v3089_v2  ;;  %s7242_s25 = sld [smem:[#allocation2 + $0x5a]] }
 0x26f   : > { %v6914_v62 = vpop.permute.xlu1 %2428  ;;  %v6916_v35 = vpop.permute.xlu0 %2426  ;;  %v3096_v47 = vrot.slane %v3081_v20, 2  ;;  %v3094_v25 = vrot.slane %v3080_v40, 2  ;;  %v6941_v44 = vadd.f32 %v275_v41, %v6687_v3  ;;  %v6944_v12 = vsel %vm553_vm0, %v639_v24, %v640_v28 }
 0x270   : > { %9690 = vst [vmem:[#allocation223_spill] sm:$0xff] %v6914_v62  ;;  %9691 = vst [vmem:[#allocation224_spill] sm:$0xff] %v6916_v35  ;;  %v6947_v22 = vsel %vm553_vm0, %v640_v28, %v642_v4  ;;  %v1108_v58 = vmul.f32 %v6767_v39, %v1105_v48  ;;  %v6955_v57 = vadd.f32 %v274_v19, %v6693_v55  ;;  %v1113_v36 = vrot.slane %v1106_v29, 2  ;;  %v7021_v19 = vld [vmem:[%s5376_s9 + $0xb8] sm:$0xff]  ;;  %v7024_v29 = vld [vmem:[%s5376_s9 + $0xb0] sm:$0xff] }
 0x271   : > { %3066 = vrot.lane.b32.xlu1 %v3059_v38, %s5246_s26  ;;  %3064 = vrot.lane.b32.xlu0 %v3057_v6, %s5246_s26  ;;  %v298_v3 = vsel %vm273_vm2, %v5562_v33, %v5560_v32  ;;  %v299_v16 = vsel %vm273_vm2, %v5574_v43, %v5572_v42  ;;  %v322_v26 = vsel %vm273_vm2, %v5584_v54, %v5582_v53  ;;  %v1114_v48 = vrot.slane %v1107_v37, 2  ;;  %v6978_v43 = vld [vmem:[%s5376_s9 + $0xa8] sm:$0xff]  ;;  %v6982_v54 = vld [vmem:[%s5376_s9 + $0xa0] sm:$0xff] }
 0x272   : > { %v1124_v55 = vmul.f32 %v6690_v56, %v1123_v10  ;;  %v1140_v38 = vstv %s6899_s28  ;;  %v1125_v32 = vmul.f32 %v6684_v9, %v1123_v10  ;;  %v3097_v33 = vsel %vm1112_vm1, %v3092_v14, %v3096_v47  ;;  %s7252_s28 = sld [smem:[#allocation2 + $0x9a]] }
 0x273   : > { %v6950_v46 = vpop.permute.xlu1 %2432  ;;  %v6952_v27 = vpop.permute.xlu0 %2430  ;;  %v3095_v42 = vsel %vm1112_vm1, %v3089_v2, %v3094_v25  ;;  %v3158_v53 = vstv %s6909_s29  ;;  %v6987_v6 = vadd.f32 %v298_v3, %v6696_v34  ;;  %v323_v51 = vsel %vm273_vm2, %v5596_v0, %v5594_v63  ;;  %v9698_v25 = vld [vmem:[#allocation9_spill] sm:$0xff]  ;;  %s7264_s29 = sld [smem:[#allocation2 + $0x75]] }
 0x274   : > { %9692 = vst [vmem:[#allocation225_spill] sm:$0xff] %v6950_v46  ;;  %9693 = vst [vmem:[#allocation226_spill] sm:$0xff] %v6952_v27  ;;  %v1116_v20 = vrot.slane %v1108_v58, 2  ;;  %v1126_v40 = vmul.f32 %v6767_v39, %v1123_v10  ;;  %v6998_v24 = vadd.f32 %v299_v16, %v6699_v1  ;;  %v346_v34 = vsel %vm273_vm2, %v5606_v18, %v5604_v17  ;;  %v9699_v58 = vld [vmem:[#allocation10_spill] sm:$0xff] }
 0x275   : > { %3100 = vrot.lane.b32.xlu1 %v3093_v11, %s5246_s26  ;;  %3098 = vrot.lane.b32.xlu0 %v3090_v21, %s5246_s26  ;;  %v1141_v28 = vmul.f32 %v6690_v56, %v1140_v38  ;;  %v7005_v63 = vmul.f32 %v6684_v9, %v1140_v38  ;;  %v7008_v0 = vadd.f32 %v322_v26, %v6708_v59  ;;  %v1130_v18 = vrot.slane %v1124_v55, 2 }
 0x276   : > { %v3160_v1 = vmul.f32 %v6978_v43, %v3158_v53  ;;  %v3159_v4 = vmul.f32 %v6982_v54, %v3158_v53  ;;  %v7015_v41 = vadd.f32 %v323_v51, %v6728_v13  ;;  %v7018_v17 = vsel %vm1112_vm1, %v1113_v36, %v1114_v48 }
 0x277   : > { %v6993_v14 = vpop.permute.xlu1 %2466  ;;  %v6995_v2 = vpop.permute.xlu0 %2464  ;;  %v1131_v59 = vrot.slane %v1125_v32, 2  ;;  %v7027_v37 = vadd.f32 %v346_v34, %v6731_v23  ;;  %v347_v10 = vsel %vm273_vm2, %v5618_v31, %v5616_v30  ;;  %v7033_v13 = vsel %vm1112_vm1, %v1114_v48, %v1116_v20  ;;  %v9700_v30 = vld [vmem:[#allocation11_spill] sm:$0xff]  ;;  %v9701_v31 = vld [vmem:[#allocation12_spill] sm:$0xff]  ;;  %v9703_v34 = vld [vmem:[#allocation206_spill] sm:$0xff] }
 0x278   : > { %9694 = vst [vmem:[#allocation227_spill] sm:$0xff] %v6993_v14  ;;  %9695 = vst [vmem:[#allocation228_spill] sm:$0xff] %v6995_v2  ;;  %v1133_v11 = vrot.slane %v1126_v40, 2  ;;  %v370_v23 = vsel %vm273_vm2, %v9699_v58, %v9698_v25  ;;  %v1147_v3 = vrot.slane %v1141_v28, 2  ;;  %v1148_v16 = vrot.slane %v7005_v63, 2 }
 0x279   : > { %3104 = vrot.lane.b32.xlu1 %v3097_v33, %s5246_s26  ;;  %3102 = vrot.lane.b32.xlu0 %v3095_v42, %s5246_s26  ;;  %v1157_v26 = vstv %s6966_s30  ;;  %v371_v36 = vsel %vm273_vm2, %v9701_v31, %v9700_v30  ;;  %v1174_v48 = vstv %s6970_s4  ;;  %v3162_v55 = vmul.f32 %v7021_v19, %v3158_v53  ;;  %v9702_v33 = vld [vmem:[#allocation205_spill] sm:$0xff]  ;;  %s7329_s30 = sld [smem:[#allocation2 + $0x90]] }
 0x27a   : > { %v3161_v32 = vmul.f32 %v7024_v29, %v3158_v53  ;;  %v7055_v42 = vadd.f32 %v347_v10, %v9702_v33  ;;  %v7058_v51 = vsel %vm1112_vm1, %v1130_v18, %v1131_v59  ;;  %v1143_v20 = vmul.f32 %v6767_v39, %v1140_v38  ;;  %v9706_v18 = vld [vmem:[#allocation207_spill] sm:$0xff]  ;;  %v9707_v31 = vld [vmem:[#allocation13_spill] sm:$0xff]  ;;  %s7340_s4 = sld [smem:[#allocation2 + $0x14]] }
 0x27b   : > { %v7037_v21 = vpop.permute.xlu1 %2470  ;;  %v7039_v47 = vpop.permute.xlu0 %2468  ;;  %v3182_v40 = vstv %s6984_s5  ;;  %v7065_v28 = vadd.f32 %v370_v23, %v9703_v34  ;;  %v7068_v63 = vsel %vm1112_vm1, %v1131_v59, %v1133_v11  ;;  %v1159_v53 = vmul.f32 %v6684_v9, %v1157_v26  ;;  %v9710_v34 = vld [vmem:[#allocation18_spill] sm:$0xff]  ;;  %s7385_s5 = sld [smem:[#allocation2 + $0xc]] }
 0x27c   : > { %9696 = vst [vmem:[#allocation229_spill] sm:$0xff] %v7037_v21  ;;  %9697 = vst [vmem:[#allocation230_spill] sm:$0xff] %v7039_v47  ;;  %v7077_v25 = vadd.f32 %v371_v36, %v9706_v18  ;;  %v1160_v38 = vmul.f32 %v6767_v39, %v1157_v26  ;;  %v1175_v58 = vmul.f32 %v6690_v56, %v1174_v48  ;;  %v9708_v36 = vld [vmem:[#allocation14_spill] sm:$0xff]  ;;  %v9712_v47 = vld [vmem:[#allocation20_spill] sm:$0xff]  ;;  %v1191_v2 = vstv %s7035_s7  ;;  %s7416_s7 = sld [smem:[#allocation2 + $0x2f]] }
 0x27d   : > { %3169 = vrot.lane.b32.xlu1 %v3160_v1, %s5245_s27  ;;  %3167 = vrot.lane.b32.xlu0 %v3159_v4, %s5245_s27  ;;  %v1158_v1 = vmul.f32 %v6690_v56, %v1157_v26  ;;  %v1176_v23 = vmul.f32 %v6684_v9, %v1174_v48  ;;  %v7083_v59 = vsel %vm1112_vm1, %v1147_v3, %v1148_v16  ;;  %v9709_v26 = vld [vmem:[#allocation17_spill] sm:$0xff]  ;;  %v1165_v21 = vrot.slane %v1159_v53, 2 }
 0x27e   : > { %v3184_v11 = vmul.f32 %v6978_v43, %v3182_v40  ;;  %v3183_v30 = vmul.f32 %v6982_v54, %v3182_v40  ;;  %v394_v33 = vsel %vm273_vm2, %v9708_v36, %v9707_v31  ;;  %v419_v18 = vsel %vm418_vm3, %v9710_v34, %v9709_v26  ;;  %v9715_v31 = vld [vmem:[#allocation15_spill] sm:$0xff]  ;;  %v9716_v36 = vld [vmem:[#allocation16_spill] sm:$0xff] }
 0x27f   : > { %v7072_v4 = vpop.permute.xlu1 %2504  ;;  %v7074_v10 = vpop.permute.xlu0 %2502  ;;  %v1177_v3 = vmul.f32 %v6767_v39, %v1174_v48  ;;  %v395_v46 = vsel %vm273_vm2, %v9716_v36, %v9715_v31  ;;  %v1167_v26 = vrot.slane %v1160_v38, 2  ;;  %v1182_v34 = vrot.slane %v1176_v23, 2  ;;  %v9717_v38 = vld [vmem:[#allocation210_spill] sm:$0xff] }
 0x280   : > { %9704 = vst [vmem:[#allocation9_spill] sm:$0xff] %v7072_v4  ;;  %9705 = vst [vmem:[#allocation10_spill] sm:$0xff] %v7074_v10  ;;  %v1150_v10 = vrot.slane %v1143_v20, 2  ;;  %v9711_v4 = vld [vmem:[#allocation19_spill] sm:$0xff]  ;;  %v1181_v20 = vrot.slane %v1175_v58, 2  ;;  %v423_v48 = vadd.f32 %v419_v18, %v6955_v57  ;;  %v398_v58 = vadd.f32 %v394_v33, %v9717_v38  ;;  %v9725_v38 = vld [vmem:[#allocation24_spill] sm:$0xff] }
 0x281   : > { %3173 = vrot.lane.b32.xlu1 %v3162_v55, %s5245_s27  ;;  %3171 = vrot.lane.b32.xlu0 %v3161_v32, %s5245_s27  ;;  %v420_v55 = vsel %vm418_vm3, %v9712_v47, %v9711_v4  ;;  %v1164_v32 = vrot.slane %v1158_v1, 2  ;;  %v3186_v47 = vmul.f32 %v7021_v19, %v3182_v40  ;;  %v3185_v1 = vmul.f32 %v7024_v29, %v3182_v40 }
 0x282   : > { %v424_v53 = vadd.f32 %v420_v55, %v6941_v44  ;;  %v1184_v4 = vrot.slane %v1177_v3, 2  ;;  %v7119_v57 = vsel %vm1112_vm1, %v1148_v16, %v1150_v10  ;;  %v9720_v44 = vld [vmem:[#allocation211_spill] sm:$0xff]  ;;  %v9722_v3 = vld [vmem:[#allocation22_spill] sm:$0xff]  ;;  %v7134_v33 = vsel %vm1112_vm1, %v1165_v21, %v1167_v26  ;;  %v9723_v10 = vld [vmem:[#allocation212_spill] sm:$0xff] }
 0x283   : > { %v7100_v14 = vpop.permute.xlu1 %2508  ;;  %v7102_v27 = vpop.permute.xlu0 %2506  ;;  %v7122_v23 = vsel %vm1112_vm1, %v1164_v32, %v1165_v21  ;;  %v399_v18 = vadd.f32 %v395_v46, %v9720_v44  ;;  %v7137_v16 = vsel %vm1112_vm1, %v1181_v20, %v1182_v34  ;;  %v7140_v32 = vadd.f32 %v9723_v10, %v423_v48  ;;  %v9724_v48 = vld [vmem:[#allocation23_spill] sm:$0xff]  ;;  %v9727_v44 = vld [vmem:[#allocation26_spill] sm:$0xff]  ;;  %v9735_v10 = vld [vmem:[#allocation32_spill] sm:$0xff] }
 0x284   : > { %9713 = vst [vmem:[#allocation11_spill] sm:$0xff] %v7100_v14  ;;  %9714 = vst [vmem:[#allocation12_spill] sm:$0xff] %v7102_v27  ;;  %v1192_v27 = vmul.f32 %v6690_v56, %v1191_v2  ;;  %v3206_v14 = vstv %s7062_s8  ;;  %v9721_v56 = vld [vmem:[#allocation21_spill] sm:$0xff]  ;;  %v7147_v31 = vadd.f32 %v6824_v61, %v424_v53  ;;  %v7150_v21 = vsel %vm1112_vm1, %v1182_v34, %v1184_v4  ;;  %v9730_v34 = vld [vmem:[#allocation27_spill] sm:$0xff]  ;;  %s7424_s8 = sld [smem:[#allocation2 + $0x27]] }
 0x285   : > { %3193 = vrot.lane.b32.xlu1 %v3184_v11, %s5245_s27  ;;  %3191 = vrot.lane.b32.xlu0 %v3183_v30, %s5245_s27  ;;  %v1193_v11 = vmul.f32 %v6684_v9, %v1191_v2  ;;  %v443_v55 = vsel %vm418_vm3, %v9722_v3, %v9721_v56  ;;  %v3208_v9 = vmul.f32 %v6978_v43, %v3206_v14 }
 0x286   : > { %v3207_v46 = vmul.f32 %v6982_v54, %v3206_v14  ;;  %v1198_v36 = vrot.slane %v1192_v27, 2  ;;  %v1194_v26 = vmul.f32 %v6767_v39, %v1191_v2  ;;  %v447_v20 = vadd.f32 %v443_v55, %v6987_v6  ;;  %v9731_v27 = vld [vmem:[#allocation28_spill] sm:$0xff]  ;;  %v9732_v2 = vld [vmem:[#allocation29_spill] sm:$0xff]  ;;  %v9733_v6 = vld [vmem:[#allocation30_spill] sm:$0xff] }
 0x287   : > { %v7125_v30 = vpop.permute.xlu1 %2542  ;;  %v7127_v40 = vpop.permute.xlu0 %2540  ;;  %v1199_v3 = vrot.slane %v1193_v11, 2  ;;  %v468_v39 = vsel %vm418_vm3, %v9731_v27, %v9730_v34  ;;  %v491_v4 = vsel %vm418_vm3, %v9733_v6, %v9732_v2  ;;  %v9734_v55 = vld [vmem:[#allocation31_spill] sm:$0xff]  ;;  %v3210_v34 = vmul.f32 %v7021_v19, %v3206_v14 }
 0x288   : > { %9718 = vst [vmem:[#allocation205_spill] sm:$0xff] %v7125_v30  ;;  %9719 = vst [vmem:[#allocation206_spill] sm:$0xff] %v7127_v40  ;;  %v3209_v27 = vmul.f32 %v7024_v29, %v3206_v14  ;;  %v9743_v40 = vld [vmem:[#allocation40_spill] sm:$0xff] }
 0x289   : > { %3197 = vrot.lane.b32.xlu1 %v3186_v47, %s5245_s27  ;;  %3195 = vrot.lane.b32.xlu0 %v3185_v1, %s5245_s27  ;;  %v444_v47 = vsel %vm418_vm3, %v9725_v38, %v9724_v48  ;;  %v9726_v1 = vld [vmem:[#allocation25_spill] sm:$0xff]  ;;  %v492_v48 = vsel %vm418_vm3, %v9735_v10, %v9734_v55  ;;  %v1201_v55 = vrot.slane %v1194_v26, 2  ;;  %v3230_v10 = vstv %s7115_s10  ;;  %s7466_s10 = sld [smem:[#allocation2 + $0x42]] }
 0x28a   : > { %v467_v56 = vsel %vm418_vm3, %v9727_v44, %v9726_v1  ;;  %v9736_v38 = vld [vmem:[#allocation33_spill] sm:$0xff]  ;;  %v9737_v1 = vld [vmem:[#allocation34_spill] sm:$0xff]  ;;  %v9738_v44 = vld [vmem:[#allocation35_spill] sm:$0xff]  ;;  %v448_v2 = vadd.f32 %v444_v47, %v6998_v24  ;;  %v496_v26 = vadd.f32 %v492_v48, %v7055_v42  ;;  %v7206_v47 = vsel %vm1112_vm1, %v1198_v36, %v1199_v3 }
 0x28b   : > { %v7160_v61 = vpop.permute.xlu1 %2546  ;;  %v7162_v53 = vpop.permute.xlu0 %2544  ;;  %v515_v11 = vsel %vm418_vm3, %v9737_v1, %v9736_v38  ;;  %v471_v6 = vadd.f32 %v467_v56, %v7008_v0  ;;  %v472_v38 = vadd.f32 %v468_v39, %v7015_v41  ;;  %v9740_v1 = vld [vmem:[#allocation37_spill] sm:$0xff]  ;;  %v578_v56 = vadd.f32 %v6835_v50, %v447_v20 }
 0x28c   : > { %9728 = vst [vmem:[#allocation207_spill] sm:$0xff] %v7160_v61  ;;  %9729 = vst [vmem:[#allocation13_spill] sm:$0xff] %v7162_v53  ;;  %v9739_v61 = vld [vmem:[#allocation36_spill] sm:$0xff]  ;;  %v519_v41 = vadd.f32 %v515_v11, %v7065_v28  ;;  %v3231_v39 = vmul.f32 %v6982_v54, %v3230_v10  ;;  %v579_v28 = vadd.f32 %v6848_v5, %v448_v2  ;;  %v9746_v36 = vld [vmem:[#allocation41_spill] sm:$0xff] }
 0x28d   : > { %v516_v53 = vsel %vm418_vm3, %v9739_v61, %v9738_v44  ;;  %3217 = vrot.lane.b32.xlu1 %v3208_v9, %s5245_s27  ;;  %3215 = vrot.lane.b32.xlu0 %v3207_v46, %s5245_s27  ;;  %v495_v61 = vadd.f32 %v491_v4, %v7027_v37  ;;  %v9741_v9 = vld [vmem:[#allocation38_spill] sm:$0xff]  ;;  %v9742_v44 = vld [vmem:[#allocation39_spill] sm:$0xff]  ;;  %v595_v50 = vadd.f32 %v6851_v52, %v471_v6  ;;  %v9751_v5 = vld [vmem:[#allocation44_spill] sm:$0xff] }
 0x28e   : > { %v539_v46 = vsel %vm418_vm3, %v9741_v9, %v9740_v1  ;;  %v540_v14 = vsel %vm418_vm3, %v9743_v40, %v9742_v44  ;;  %v520_v37 = vadd.f32 %v516_v53, %v7077_v25  ;;  %v3232_v40 = vmul.f32 %v6978_v43, %v3230_v10  ;;  %v9747_v53 = vld [vmem:[#allocation42_spill] sm:$0xff]  ;;  %v9754_v1 = vld [vmem:[#allocation47_spill] sm:$0xff]  ;;  %v9755_v9 = vld [vmem:[#allocation48_spill] sm:$0xff] }
 0x28f   : > { %v7198_v24 = vpop.permute.xlu1 %2682  ;;  %v7200_v0 = vpop.permute.xlu0 %2680  ;;  %v543_v42 = vadd.f32 %v539_v46, %v398_v58  ;;  %v544_v4 = vadd.f32 %v540_v14, %v399_v18  ;;  %v7217_v25 = vsel %vm1112_vm1, %v1199_v3, %v1201_v55  ;;  %v680_v48 = vsel %vm273_vm2, %v9747_v53, %v9746_v36  ;;  %v9750_v18 = vld [vmem:[#allocation43_spill] sm:$0xff]  ;;  %v9753_v52 = vld [vmem:[#allocation46_spill] sm:$0xff]  ;;  %v9756_v44 = vld [vmem:[#allocation49_spill] sm:$0xff] }
 0x290   : > { %9744 = vst [vmem:[#allocation14_spill] sm:$0xff] %v7198_v24  ;;  %9745 = vst [vmem:[#allocation17_spill] sm:$0xff] %v7200_v0  ;;  %v596_v20 = vadd.f32 %v6864_v60, %v472_v38  ;;  %v612_v11 = vadd.f32 %v6912_v7, %v495_v61  ;;  %v681_v3 = vsel %vm273_vm2, %v9751_v5, %v9750_v18  ;;  %v9752_v60 = vld [vmem:[#allocation45_spill] sm:$0xff]  ;;  %v3254_v61 = vstv %s7186_s11  ;;  %v9757_v14 = vld [vmem:[#allocation50_spill] sm:$0xff]  ;;  %s7478_s11 = sld [smem:[#allocation2 + $0x4a]] }
 0x291   : > { %3221 = vrot.lane.b32.xlu1 %v3210_v34, %s5245_s27  ;;  %3219 = vrot.lane.b32.xlu0 %v3209_v27, %s5245_s27  ;;  %v613_v27 = vadd.f32 %v6922_v8, %v496_v26  ;;  %v629_v2 = vadd.f32 %v6925_v49, %v519_v41  ;;  %v7235_v55 = vadd.f32 %v6928_v15, %v520_v37  ;;  %v9758_v41 = vld [vmem:[#allocation51_spill] sm:$0xff]  ;;  %v1679_v53 = vstv %s7208_s22  ;;  %v9765_v18 = vld [vmem:[#allocation56_spill] sm:$0xff]  ;;  %s7512_s22 = sld [smem:[#allocation2 + $0x78]] }
 0x292   : > { %v718_v7 = vsel %vm273_vm2, %v9753_v52, %v9752_v60  ;;  %v3234_v8 = vmul.f32 %v7021_v19, %v3230_v10  ;;  %v3233_v49 = vmul.f32 %v7024_v29, %v3230_v10  ;;  %v684_v15 = vadd.f32 %v680_v48, %v7140_v32  ;;  %v9759_v10 = vld [vmem:[#allocation52_spill] sm:$0xff]  ;;  %v9764_v48 = vld [vmem:[#allocation55_spill] sm:$0xff] }
 0x293   : > { %v7225_v34 = vpop.permute.xlu1 %2686  ;;  %v7227_v58 = vpop.permute.xlu0 %2684  ;;  %v646_v6 = vadd.f32 %v6944_v12, %v543_v42  ;;  %v647_v38 = vadd.f32 %v6947_v22, %v544_v4  ;;  %v719_v46 = vsel %vm273_vm2, %v9755_v9, %v9754_v1  ;;  %v756_v26 = vsel %vm273_vm2, %v9757_v14, %v9756_v44  ;;  %v9762_v42 = vld [vmem:[#allocation53_spill] sm:$0xff]  ;;  %v9763_v4 = vld [vmem:[#allocation54_spill] sm:$0xff] }
 0x294   : > { %9748 = vst [vmem:[#allocation18_spill] sm:$0xff] %v7225_v34  ;;  %9749 = vst [vmem:[#allocation19_spill] sm:$0xff] %v7227_v58  ;;  %v757_v37 = vsel %vm273_vm2, %v9759_v10, %v9758_v41  ;;  %v1673_v32 = vstv %s7196_s19  ;;  %v794_v36 = vsel %vm273_vm2, %v9763_v4, %v9762_v42  ;;  %v795_v5 = vsel %vm273_vm2, %v9765_v18, %v9764_v48  ;;  %v7302_v14 = vld [vmem:[%s5376_s9 + $0x60] sm:$0xff]  ;;  %v9771_v41 = vld [vmem:[#allocation58_spill] sm:$0xff]  ;;  %s7491_s19 = sld [smem:[#allocation2 + $0x5d]] }
 0x295   : > { %3241 = vrot.lane.b32.xlu1 %v3232_v40, %s5245_s27  ;;  %3239 = vrot.lane.b32.xlu0 %v3231_v39, %s5245_s27  ;;  %v685_v40 = vadd.f32 %v681_v3, %v7147_v31  ;;  %v7271_v39 = vadd.f32 %v718_v7, %v578_v56  ;;  %v3256_v60 = vmul.f32 %v6978_v43, %v3254_v61  ;;  %v7291_v7 = vld [vmem:[%s5376_s9 + $0x50] sm:$0xff]  ;;  %v9773_v42 = vld [vmem:[#allocation60_spill] sm:$0xff]  ;;  %v9776_v18 = vld [vmem:[#allocation61_spill] sm:$0xff]  ;;  %v1703_v0 = vstv %s7329_s30  ;;  %s7684_s30 = sld [smem:[#allocation2 + $0x16]] }
 0x296   : > { %v3255_v31 = vmul.f32 %v6982_v54, %v3254_v61  ;;  %v7284_v3 = vadd.f32 %v719_v46, %v579_v28  ;;  %v7286_v56 = vadd.f32 %v756_v26, %v595_v50  ;;  %v7288_v52 = vadd.f32 %v757_v37, %v596_v20  ;;  %v9770_v26 = vld [vmem:[#allocation57_spill] sm:$0xff]  ;;  %v9772_v37 = vld [vmem:[#allocation59_spill] sm:$0xff] }
 0x297   : > { %v7266_v12 = vpop.permute.xlu1 %2720  ;;  %v7268_v22 = vpop.permute.xlu0 %2718  ;;  %v7294_v1 = vmul.f32 %v7291_v7, %v1673_v32  ;;  %v7296_v9 = vadd.f32 %v794_v36, %v612_v11  ;;  %v7305_v28 = vmul.f32 %v7302_v14, %v1673_v32  ;;  %v7308_v50 = vmul.f32 %v7291_v7, %v1679_v53  ;;  %v9774_v4 = vld [vmem:[#allocation67_spill] sm:$0xff]  ;;  %v9775_v36 = vld [vmem:[#allocation68_spill] sm:$0xff]  ;;  %v9796_v34 = vld [vmem:[#allocation81_spill] sm:$0xff] }
 0x298   : > { %9760 = vst [vmem:[#allocation20_spill] sm:$0xff] %v7266_v12  ;;  %9761 = vst [vmem:[#allocation15_spill] sm:$0xff] %v7268_v22  ;;  %v7314_v11 = vadd.f32 %v795_v5, %v613_v27  ;;  %v832_v10 = vsel %vm273_vm2, %v9771_v41, %v9770_v26  ;;  %v833_v32 = vsel %vm273_vm2, %v9773_v42, %v9772_v37  ;;  %v1691_v37 = vstv %s7242_s25  ;;  %v9795_v12 = vld [vmem:[#allocation80_spill] sm:$0xff]  ;;  %s7572_s25 = sld [smem:[#allocation2 + $0x93]] }
 0x299   : > { %3245 = vrot.lane.b32.xlu1 %v3234_v8, %s5245_s27  ;;  %3243 = vrot.lane.b32.xlu0 %v3233_v49, %s5245_s27  ;;  %v9766_v8 = vld [vmem:[#allocation65_spill] sm:$0xff]  ;;  %v9767_v49 = vld [vmem:[#allocation66_spill] sm:$0xff]  ;;  %v909_v48 = vsel %vm418_vm3, %v9775_v36, %v9774_v4  ;;  %v3258_v27 = vmul.f32 %v7021_v19, %v3254_v61  ;;  %v3257_v5 = vmul.f32 %v7024_v29, %v3254_v61  ;;  %v3278_v42 = vstv %s7252_s28  ;;  %v9778_v36 = vld [vmem:[#allocation63_spill] sm:$0xff]  ;;  %s7620_s28 = sld [smem:[#allocation2 + $0x80]] }
 0x29a   : > { %v908_v44 = vsel %vm418_vm3, %v9767_v49, %v9766_v8  ;;  %v9777_v8 = vld [vmem:[#allocation62_spill] sm:$0xff]  ;;  %v7336_v41 = vmul.f32 %v7302_v14, %v1679_v53  ;;  %v836_v4 = vadd.f32 %v832_v10, %v629_v2  ;;  %v7358_v2 = vmul.f32 %v7291_v7, %v1691_v37 }
 0x29b   : > { %v7310_v20 = vpop.permute.xlu1 %2724  ;;  %v7312_v46 = vpop.permute.xlu0 %2722  ;;  %v870_v49 = vsel %vm273_vm2, %v9777_v8, %v9776_v18  ;;  %v912_v26 = vadd.f32 %v908_v44, %v684_v15  ;;  %v9779_v18 = vld [vmem:[#allocation64_spill] sm:$0xff]  ;;  %v837_v15 = vadd.f32 %v833_v32, %v7235_v55  ;;  %v3279_v10 = vmul.f32 %v6982_v54, %v3278_v42  ;;  %v9782_v32 = vld [vmem:[#allocation69_spill] sm:$0xff] }
 0x29c   : > { %9768 = vst [vmem:[#allocation16_spill] sm:$0xff] %v7310_v20  ;;  %9769 = vst [vmem:[#allocation210_spill] sm:$0xff] %v7312_v46  ;;  %v1685_v46 = vstv %s7237_s23  ;;  %v871_v8 = vsel %vm273_vm2, %v9779_v18, %v9778_v36  ;;  %v1697_v20 = vstv %s7264_s29  ;;  %v874_v61 = vadd.f32 %v870_v49, %v646_v6  ;;  %v9783_v49 = vld [vmem:[#allocation70_spill] sm:$0xff]  ;;  %v9784_v36 = vld [vmem:[#allocation71_spill] sm:$0xff]  ;;  %s7551_s23 = sld [smem:[#allocation2 + $0x65]] }
 0x29d   : > { %3265 = vrot.lane.b32.xlu1 %v3256_v60, %s5245_s27  ;;  %3263 = vrot.lane.b32.xlu0 %v3255_v31, %s5245_s27  ;;  %v913_v60 = vadd.f32 %v909_v48, %v685_v40  ;;  %v7352_v53 = vmul.f32 %v7291_v7, %v1685_v46  ;;  %v7355_v44 = vmul.f32 %v7302_v14, %v1685_v46  ;;  %s7677_s29 = sld [smem:[#allocation2 + $0x9b]] }
 0x29e   : > { %v3280_v40 = vmul.f32 %v6978_v43, %v3278_v42  ;;  %v875_v48 = vadd.f32 %v871_v8, %v647_v38  ;;  %v7365_v55 = vadd.f32 %v7018_v17, %v912_v26  ;;  %v7368_v6 = vmul.f32 %v7302_v14, %v1691_v37  ;;  %v9788_v37 = vld [vmem:[#allocation73_spill] sm:$0xff]  ;;  %v9789_v8 = vld [vmem:[#allocation74_spill] sm:$0xff] }
 0x29f   : > { %v7346_v31 = vpop.permute.xlu1 %2758  ;;  %v7348_v22 = vpop.permute.xlu0 %2756  ;;  %v7371_v46 = vmul.f32 %v7291_v7, %v1697_v20  ;;  %v7383_v17 = vmul.f32 %v7302_v14, %v1697_v20 }
 0x2a0   : > { %9780 = vst [vmem:[#allocation211_spill] sm:$0xff] %v7346_v31  ;;  %9781 = vst [vmem:[#allocation21_spill] sm:$0xff] %v7348_v22  ;;  %v7380_v22 = vadd.f32 %v7033_v13, %v913_v60  ;;  %v9792_v60 = vld [vmem:[#allocation77_spill] sm:$0xff]  ;;  %v9794_v31 = vld [vmem:[#allocation79_spill] sm:$0xff] }
 0x2a1   : > { %3269 = vrot.lane.b32.xlu1 %v3258_v27, %s5245_s27  ;;  %3267 = vrot.lane.b32.xlu0 %v3257_v5, %s5245_s27  ;;  %v946_v27 = vsel %vm418_vm3, %v9783_v49, %v9782_v32  ;;  %v9785_v5 = vld [vmem:[#allocation72_spill] sm:$0xff]  ;;  %v984_v32 = vsel %vm418_vm3, %v9789_v8, %v9788_v37  ;;  %v9790_v49 = vld [vmem:[#allocation75_spill] sm:$0xff]  ;;  %v1023_v58 = vsel %vm418_vm3, %v9795_v12, %v9794_v31  ;;  %v3302_v12 = vstv %s7340_s4  ;;  %s7710_s4 = sld [smem:[#allocation2 + $0xf]] }
 0x2a2   : > { %v947_v18 = vsel %vm418_vm3, %v9785_v5, %v9784_v36  ;;  %v9791_v36 = vld [vmem:[#allocation76_spill] sm:$0xff]  ;;  %v9793_v5 = vld [vmem:[#allocation78_spill] sm:$0xff]  ;;  %v3282_v37 = vmul.f32 %v7021_v19, %v3278_v42  ;;  %v3281_v8 = vmul.f32 %v7024_v29, %v3278_v42  ;;  %v988_v31 = vadd.f32 %v984_v32, %v7286_v56 }
 0x2a3   : > { %v7387_v38 = vpop.permute.xlu1 %2762  ;;  %v7389_v26 = vpop.permute.xlu0 %2760  ;;  %v985_v13 = vsel %vm418_vm3, %v9791_v36, %v9790_v49  ;;  %v1022_v20 = vsel %vm418_vm3, %v9793_v5, %v9792_v60  ;;  %v950_v49 = vadd.f32 %v946_v27, %v7271_v39  ;;  %v9798_v36 = vld [vmem:[#allocation83_spill] sm:$0xff]  ;;  %v9799_v60 = vld [vmem:[#allocation84_spill] sm:$0xff] }
 0x2a4   : > { %9786 = vst [vmem:[#allocation22_spill] sm:$0xff] %v7387_v38  ;;  %9787 = vst [vmem:[#allocation212_spill] sm:$0xff] %v7389_v26  ;;  %v9797_v38 = vld [vmem:[#allocation82_spill] sm:$0xff]  ;;  %v1061_v5 = vsel %vm418_vm3, %v9799_v60, %v9798_v36  ;;  %v1026_v36 = vadd.f32 %v1022_v20, %v7296_v9  ;;  %v1027_v60 = vadd.f32 %v1023_v58, %v7314_v11  ;;  %v9805_v56 = vld [vmem:[#allocation88_spill] sm:$0xff] }
 0x2a5   : > { %v1060_v26 = vsel %vm418_vm3, %v9797_v38, %v9796_v34  ;;  %3289 = vrot.lane.b32.xlu1 %v3280_v40, %s5245_s27  ;;  %3287 = vrot.lane.b32.xlu0 %v3279_v10, %s5245_s27  ;;  %v951_v34 = vadd.f32 %v947_v18, %v7284_v3  ;;  %v989_v40 = vadd.f32 %v985_v13, %v7288_v52  ;;  %v9800_v10 = vld [vmem:[#allocation85_spill] sm:$0xff]  ;;  %v9801_v38 = vld [vmem:[#allocation86_spill] sm:$0xff]  ;;  %v9804_v18 = vld [vmem:[#allocation87_spill] sm:$0xff] }
 0x2a6   : > { %v1098_v42 = vsel %vm418_vm3, %v9801_v38, %v9800_v10  ;;  %v1064_v3 = vadd.f32 %v1060_v26, %v836_v4  ;;  %v1099_v52 = vsel %vm418_vm3, %v9805_v56, %v9804_v18  ;;  %v1065_v32 = vadd.f32 %v1061_v5, %v837_v15  ;;  %v9809_v5 = vld [vmem:[#allocation90_spill] sm:$0xff]  ;;  %v9814_v56 = vld [vmem:[#allocation93_spill] sm:$0xff] }
 0x2a7   : > { %v7426_v39 = vpop.permute.xlu1 %2796  ;;  %v7428_v27 = vpop.permute.xlu0 %2794  ;;  %v3304_v13 = vmul.f32 %v6978_v43, %v3302_v12  ;;  %v3303_v10 = vmul.f32 %v6982_v54, %v3302_v12  ;;  %v1102_v38 = vadd.f32 %v1098_v42, %v874_v61  ;;  %v1137_v9 = vadd.f32 %v7058_v51, %v950_v49 }
 0x2a8   : > { %9802 = vst [vmem:[#allocation23_spill] sm:$0xff] %v7426_v39  ;;  %9803 = vst [vmem:[#allocation24_spill] sm:$0xff] %v7428_v27  ;;  %v7441_v20 = vmul.f32 %v7291_v7, %v1703_v0  ;;  %v7444_v58 = vmul.f32 %v7302_v14, %v1703_v0  ;;  %v1103_v11 = vadd.f32 %v1099_v52, %v875_v48  ;;  %v1997_v26 = vstv %s7385_s5  ;;  %v9815_v52 = vld [vmem:[#allocation94_spill] sm:$0xff]  ;;  %s7749_s5 = sld [smem:[#allocation2 + $0x31]] }
 0x2a9   : > { %3293 = vrot.lane.b32.xlu1 %v3282_v37, %s5245_s27  ;;  %3291 = vrot.lane.b32.xlu0 %v3281_v8, %s5245_s27  ;;  %v1138_v4 = vadd.f32 %v7068_v63, %v951_v34  ;;  %v1154_v15 = vadd.f32 %v7083_v59, %v988_v31  ;;  %v1155_v61 = vadd.f32 %v7119_v57, %v989_v40  ;;  %v3326_v49 = vstv %s7416_s7  ;;  %v7487_v40 = vld [vmem:[%s5376_s9 + $0x70] sm:$0xff]  ;;  %s7774_s7 = sld [smem:[#allocation2 + $0x2a]] }
 0x2aa   : > { %v7455_v51 = vadd.f32 %v7122_v23, %v1026_v36  ;;  %v7458_v0 = vadd.f32 %v7134_v33, %v1027_v60  ;;  %v7461_v48 = vadd.f32 %v7137_v16, %v1064_v3  ;;  %v7464_v63 = vadd.f32 %v7150_v21, %v1065_v32  ;;  %v9808_v21 = vld [vmem:[#allocation89_spill] sm:$0xff]  ;;  %v9812_v60 = vld [vmem:[#allocation91_spill] sm:$0xff]  ;;  %v9813_v3 = vld [vmem:[#allocation92_spill] sm:$0xff] }
 0x2ab   : > { %v7449_v37 = vpop.permute.xlu1 %2800  ;;  %v7451_v8 = vpop.permute.xlu0 %2798  ;;  %v3306_v59 = vmul.f32 %v7021_v19, %v3302_v12  ;;  %v3305_v57 = vmul.f32 %v7024_v29, %v3302_v12  ;;  %v7473_v23 = vadd.f32 %v7206_v47, %v1102_v38  ;;  %v1998_v33 = vmul.f32 %v7291_v7, %v1997_v26  ;;  %v9816_v32 = vld [vmem:[#allocation95_spill] sm:$0xff]  ;;  %v9818_v38 = vld [vmem:[#allocation97_spill] sm:$0xff] }
 0x2ac   : > { %9806 = vst [vmem:[#allocation25_spill] sm:$0xff] %v7449_v37  ;;  %9807 = vst [vmem:[#allocation26_spill] sm:$0xff] %v7451_v8  ;;  %v1999_v16 = vmul.f32 %v7302_v14, %v1997_v26  ;;  %v1239_v34 = vsel %vm273_vm2, %v9809_v5, %v9808_v21  ;;  %v7484_v31 = vadd.f32 %v7217_v25, %v1103_v11  ;;  %v2014_v47 = vstv %s7424_s8  ;;  %v9819_v11 = vld [vmem:[#allocation98_spill] sm:$0xff]  ;;  %v9820_v21 = vld [vmem:[#allocation99_spill] sm:$0xff]  ;;  %s7830_s8 = sld [smem:[#allocation2 + $0x4c]] }
 0x2ad   : > { %3313 = vrot.lane.b32.xlu1 %v3304_v13, %s5246_s26  ;;  %3311 = vrot.lane.b32.xlu0 %v3303_v10, %s5246_s26  ;;  %v2000_v12 = vmul.f32 %v7487_v40, %v1997_v26  ;;  %v1240_v18 = vsel %vm273_vm2, %v9813_v3, %v9812_v60  ;;  %v1277_v25 = vsel %vm273_vm2, %v9815_v52, %v9814_v56  ;;  %v9817_v13 = vld [vmem:[#allocation96_spill] sm:$0xff]  ;;  %v2004_v56 = vrot.slane %v1998_v33, 1 }
 0x2ae   : > { %v1278_v10 = vsel %vm273_vm2, %v9817_v13, %v9816_v32  ;;  %v1315_v26 = vsel %vm273_vm2, %v9819_v11, %v9818_v38  ;;  %v9821_v5 = vld [vmem:[#allocation100_spill] sm:$0xff]  ;;  %v3328_v60 = vmul.f32 %v6978_v43, %v3326_v49  ;;  %v3327_v3 = vmul.f32 %v6982_v54, %v3326_v49 }
 0x2af   : > { %v7493_v42 = vpop.permute.xlu1 %2834  ;;  %v7495_v36 = vpop.permute.xlu0 %2832  ;;  %v2005_v52 = vrot.slane %v1999_v16, 1  ;;  %v2015_v32 = vmul.f32 %v7291_v7, %v2014_v47  ;;  %v2016_v13 = vmul.f32 %v7302_v14, %v2014_v47  ;;  %v7521_v38 = vadd.f32 %v1239_v34, %v7365_v55  ;;  %v9824_v34 = vld [vmem:[#allocation101_spill] sm:$0xff] }
 0x2b0   : > { %9810 = vst [vmem:[#allocation27_spill] sm:$0xff] %v7493_v42  ;;  %9811 = vst [vmem:[#allocation28_spill] sm:$0xff] %v7495_v36  ;;  %v1316_v36 = vsel %vm273_vm2, %v9821_v5, %v9820_v21  ;;  %v7524_v11 = vadd.f32 %v1240_v18, %v7380_v22  ;;  %v7531_v33 = vadd.f32 %v1277_v25, %v1137_v9  ;;  %v9825_v22 = vld [vmem:[#allocation102_spill] sm:$0xff]  ;;  %v2031_v18 = vstv %s7466_s10  ;;  %v9826_v25 = vld [vmem:[#allocation103_spill] sm:$0xff]  ;;  %s7845_s10 = sld [smem:[#allocation2 + $0x45]] }
 0x2b1   : > { %3317 = vrot.lane.b32.xlu1 %v3306_v59, %s5246_s26  ;;  %3315 = vrot.lane.b32.xlu0 %v3305_v57, %s5246_s26  ;;  %v2007_v59 = vrot.slane %v2000_v12, 1  ;;  %v2017_v57 = vmul.f32 %v7487_v40, %v2014_v47  ;;  %v7533_v16 = vadd.f32 %v1278_v10, %v1138_v4  ;;  %v7535_v42 = vadd.f32 %v1315_v26, %v1154_v15  ;;  %v9827_v10 = vld [vmem:[#allocation104_spill] sm:$0xff] }
 0x2b2   : > { %v7537_v55 = vadd.f32 %v1316_v36, %v1155_v61  ;;  %v1353_v12 = vsel %vm273_vm2, %v9825_v22, %v9824_v34  ;;  %v3330_v47 = vmul.f32 %v7021_v19, %v3326_v49  ;;  %v3329_v9 = vmul.f32 %v7024_v29, %v3326_v49 }
 0x2b3   : > { %v7527_v21 = vpop.permute.xlu1 %2838  ;;  %v7529_v5 = vpop.permute.xlu0 %2836  ;;  %v7548_v4 = vsel %vm553_vm0, %v2004_v56, %v2005_v52  ;;  %v2021_v15 = vrot.slane %v2015_v32, 1  ;;  %v2022_v61 = vrot.slane %v2016_v13, 1  ;;  %v3350_v36 = vstv %s7478_s11  ;;  %v9830_v32 = vld [vmem:[#allocation105_spill] sm:$0xff]  ;;  %v9831_v13 = vld [vmem:[#allocation106_spill] sm:$0xff]  ;;  %s7879_s11 = sld [smem:[#allocation2 + $0x60]] }
 0x2b4   : > { %9822 = vst [vmem:[#allocation29_spill] sm:$0xff] %v7527_v21  ;;  %9823 = vst [vmem:[#allocation30_spill] sm:$0xff] %v7529_v5  ;;  %v1354_v26 = vsel %vm273_vm2, %v9827_v10, %v9826_v25  ;;  %v2048_v34 = vstv %s7491_s19  ;;  %v7565_v56 = vadd.f32 %v1353_v12, %v7455_v51  ;;  %v1391_v5 = vsel %vm273_vm2, %v9831_v13, %v9830_v32  ;;  %s7889_s19 = sld [smem:[#allocation2 + $0x67]] }
 0x2b5   : > { %3337 = vrot.lane.b32.xlu1 %v3328_v60, %s5246_s26  ;;  %3335 = vrot.lane.b32.xlu0 %v3327_v3, %s5246_s26  ;;  %v7557_v60 = vsel %vm553_vm0, %v2005_v52, %v2007_v59  ;;  %v2024_v3 = vrot.slane %v2017_v57, 1  ;;  %v2032_v21 = vmul.f32 %v7291_v7, %v2031_v18  ;;  %v2033_v25 = vmul.f32 %v7302_v14, %v2031_v18  ;;  %v9832_v52 = vld [vmem:[#allocation107_spill] sm:$0xff]  ;;  %v9833_v59 = vld [vmem:[#allocation108_spill] sm:$0xff] }
 0x2b6   : > { %v1392_v57 = vsel %vm273_vm2, %v9833_v59, %v9832_v52  ;;  %v2065_v10 = vstv %s7512_s22  ;;  %v3352_v51 = vmul.f32 %v6978_v43, %v3350_v36  ;;  %v3351_v12 = vmul.f32 %v6982_v54, %v3350_v36  ;;  %s7941_s22 = sld [smem:[#allocation2 + $0x7b]] }
 0x2b7   : > { %v7560_v22 = vpop.permute.xlu1 %2872  ;;  %v7562_v49 = vpop.permute.xlu0 %2870  ;;  %v7583_v32 = vadd.f32 %v1354_v26, %v7458_v0  ;;  %v7586_v13 = vsel %vm553_vm0, %v2021_v15, %v2022_v61  ;;  %v7591_v52 = vadd.f32 %v1391_v5, %v7461_v48  ;;  %v2051_v59 = vmul.f32 %v7487_v40, %v2048_v34  ;;  %v9836_v5 = vld [vmem:[#allocation113_spill] sm:$0xff] }
 0x2b8   : > { %9828 = vst [vmem:[#allocation31_spill] sm:$0xff] %v7560_v22  ;;  %9829 = vst [vmem:[#allocation32_spill] sm:$0xff] %v7562_v49  ;;  %v2034_v49 = vmul.f32 %v7487_v40, %v2031_v18  ;;  %v2049_v22 = vmul.f32 %v7291_v7, %v2048_v34  ;;  %v7603_v15 = vadd.f32 %v1392_v57, %v7464_v63  ;;  %v2038_v18 = vrot.slane %v2032_v21, 1  ;;  %v9838_v21 = vld [vmem:[#allocation109_spill] sm:$0xff]  ;;  %v9839_v57 = vld [vmem:[#allocation110_spill] sm:$0xff] }
 0x2b9   : > { %3341 = vrot.lane.b32.xlu1 %v3330_v47, %s5246_s26  ;;  %3339 = vrot.lane.b32.xlu0 %v3329_v9, %s5246_s26  ;;  %v7594_v47 = vsel %vm553_vm0, %v2022_v61, %v2024_v3  ;;  %v2050_v9 = vmul.f32 %v7302_v14, %v2048_v34  ;;  %v2066_v8 = vmul.f32 %v7291_v7, %v2065_v10  ;;  %v9837_v61 = vld [vmem:[#allocation114_spill] sm:$0xff]  ;;  %v2039_v37 = vrot.slane %v2033_v25, 1  ;;  %v9841_v25 = vld [vmem:[#allocation112_spill] sm:$0xff] }
 0x2ba   : > { %v7607_v48 = vmul.f32 %v7302_v14, %v2065_v10  ;;  %v1467_v3 = vsel %vm418_vm3, %v9837_v61, %v9836_v5  ;;  %v3354_v34 = vmul.f32 %v7021_v19, %v3350_v36  ;;  %v3353_v63 = vmul.f32 %v7024_v29, %v3350_v36  ;;  %v9840_v5 = vld [vmem:[#allocation111_spill] sm:$0xff] }
 0x2bb   : > { %v7598_v0 = vpop.permute.xlu1 %2876  ;;  %v7600_v26 = vpop.permute.xlu0 %2874  ;;  %v2055_v27 = vrot.slane %v2049_v22, 1  ;;  %v3374_v39 = vstv %s7551_s23  ;;  %v9842_v61 = vld [vmem:[#allocation115_spill] sm:$0xff]  ;;  %v2056_v30 = vrot.slane %v2050_v9, 1  ;;  %v2058_v35 = vrot.slane %v2051_v59, 1  ;;  %s7950_s23 = sld [smem:[#allocation2 + $0x82]] }
 0x2bc   : > { %9834 = vst [vmem:[#allocation33_spill] sm:$0xff] %v7598_v0  ;;  %9835 = vst [vmem:[#allocation34_spill] sm:$0xff] %v7600_v26  ;;  %v1429_v26 = vsel %vm273_vm2, %v9839_v57, %v9838_v21  ;;  %v2041_v0 = vrot.slane %v2034_v49, 1  ;;  %v1471_v49 = vadd.f32 %v1467_v3, %v7521_v38  ;;  %v2072_v22 = vrot.slane %v2066_v8, 1 }
 0x2bd   : > { %3361 = vrot.lane.b32.xlu1 %v3352_v51, %s5246_s26  ;;  %3359 = vrot.lane.b32.xlu0 %v3351_v12, %s5246_s26  ;;  %v1430_v51 = vsel %vm273_vm2, %v9841_v25, %v9840_v5  ;;  %v9843_v12 = vld [vmem:[#allocation116_spill] sm:$0xff]  ;;  %v2073_v21 = vrot.slane %v7607_v48, 1  ;;  %v2082_v57 = vstv %s7572_s25  ;;  %v7636_v45 = vsel %vm553_vm0, %v2038_v18, %v2039_v37  ;;  %s7990_s25 = sld [smem:[#allocation2 + $0x96]] }
 0x2be   : > { %v1468_v24 = vsel %vm418_vm3, %v9843_v12, %v9842_v61  ;;  %v3376_v9 = vmul.f32 %v6978_v43, %v3374_v39  ;;  %v3375_v59 = vmul.f32 %v6982_v54, %v3374_v39  ;;  %v1433_v5 = vadd.f32 %v1429_v26, %v7473_v23 }
 0x2bf   : > { %v7628_v36 = vpop.permute.xlu1 %2910  ;;  %v7630_v62 = vpop.permute.xlu0 %2908  ;;  %v1472_v25 = vadd.f32 %v1468_v24, %v7524_v11  ;;  %v7645_v8 = vsel %vm553_vm0, %v2039_v37, %v2041_v0  ;;  %v2068_v38 = vmul.f32 %v7487_v40, %v2065_v10  ;;  %v1434_v18 = vadd.f32 %v1430_v51, %v7484_v31  ;;  %v9848_v24 = vld [vmem:[#allocation117_spill] sm:$0xff]  ;;  %v9849_v37 = vld [vmem:[#allocation118_spill] sm:$0xff]  ;;  %v9851_v31 = vld [vmem:[#allocation120_spill] sm:$0xff] }
 0x2c0   : > { %9844 = vst [vmem:[#allocation35_spill] sm:$0xff] %v7628_v36  ;;  %9845 = vst [vmem:[#allocation36_spill] sm:$0xff] %v7630_v62  ;;  %v7650_v48 = vsel %vm553_vm0, %v2055_v27, %v2056_v30  ;;  %v7653_v3 = vsel %vm553_vm0, %v2056_v30, %v2058_v35  ;;  %v1505_v11 = vsel %vm418_vm3, %v9849_v37, %v9848_v24  ;;  %v9850_v30 = vld [vmem:[#allocation119_spill] sm:$0xff]  ;;  %v9853_v24 = vld [vmem:[#allocation122_spill] sm:$0xff] }
 0x2c1   : > { %3365 = vrot.lane.b32.xlu1 %v3354_v34, %s5246_s26  ;;  %3363 = vrot.lane.b32.xlu0 %v3353_v63, %s5246_s26  ;;  %v2083_v34 = vmul.f32 %v7291_v7, %v2082_v57  ;;  %v7664_v10 = vadd.f32 %v7294_v1, %v1471_v49  ;;  %v7667_v27 = vsel %vm553_vm0, %v2072_v22, %v2073_v21  ;;  %v2075_v61 = vrot.slane %v2068_v38, 1  ;;  %v9854_v37 = vld [vmem:[#allocation123_spill] sm:$0xff]  ;;  %v9859_v38 = vld [vmem:[#allocation126_spill] sm:$0xff] }
 0x2c2   : > { %v2084_v35 = vmul.f32 %v7302_v14, %v2082_v57  ;;  %v1506_v0 = vsel %vm418_vm3, %v9851_v31, %v9850_v30  ;;  %v3378_v26 = vmul.f32 %v7021_v19, %v3374_v39  ;;  %v3377_v51 = vmul.f32 %v7024_v29, %v3374_v39  ;;  %v9855_v30 = vld [vmem:[#allocation124_spill] sm:$0xff] }
 0x2c3   : > { %v7656_v63 = vpop.permute.xlu1 %2914  ;;  %v7658_v23 = vpop.permute.xlu0 %2912  ;;  %v7680_v1 = vadd.f32 %v7305_v28, %v1472_v25  ;;  %v2085_v12 = vmul.f32 %v7487_v40, %v2082_v57  ;;  %v3398_v49 = vstv %s7620_s28  ;;  %v1509_v22 = vadd.f32 %v1505_v11, %v7531_v33  ;;  %v9858_v25 = vld [vmem:[#allocation125_spill] sm:$0xff]  ;;  %v9860_v33 = vld [vmem:[#allocation127_spill] sm:$0xff]  ;;  %v9861_v11 = vld [vmem:[#allocation128_spill] sm:$0xff]  ;;  %s7999_s28 = sld [smem:[#allocation2 + $0x9d]] }
 0x2c4   : > { %9846 = vst [vmem:[#allocation37_spill] sm:$0xff] %v7656_v63  ;;  %9847 = vst [vmem:[#allocation38_spill] sm:$0xff] %v7658_v23  ;;  %v1544_v39 = vsel %vm418_vm3, %v9855_v30, %v9854_v37  ;;  %v2089_v31 = vrot.slane %v2083_v34, 1  ;;  %v1510_v57 = vadd.f32 %v1506_v0, %v7533_v16  ;;  %v1581_v63 = vsel %vm418_vm3, %v9859_v38, %v9858_v25  ;;  %v9864_v37 = vld [vmem:[#allocation131_spill] sm:$0xff]  ;;  %v9865_v34 = vld [vmem:[#allocation132_spill] sm:$0xff] }
 0x2c5   : > { %3385 = vrot.lane.b32.xlu1 %v3376_v9, %s5246_s26  ;;  %3383 = vrot.lane.b32.xlu0 %v3375_v59, %s5246_s26  ;;  %v9852_v9 = vld [vmem:[#allocation121_spill] sm:$0xff]  ;;  %v1582_v62 = vsel %vm418_vm3, %v9861_v11, %v9860_v33  ;;  %v1620_v30 = vsel %vm418_vm3, %v9865_v34, %v9864_v37  ;;  %v3400_v16 = vmul.f32 %v6978_v43, %v3398_v49  ;;  %v2092_v11 = vrot.slane %v2085_v12, 1  ;;  %v9868_v37 = vld [vmem:[#allocation135_spill] sm:$0xff]  ;;  %v9869_v34 = vld [vmem:[#allocation136_spill] sm:$0xff] }
 0x2c6   : > { %v1543_v59 = vsel %vm418_vm3, %v9853_v24, %v9852_v9  ;;  %v9862_v9 = vld [vmem:[#allocation129_spill] sm:$0xff]  ;;  %v9863_v24 = vld [vmem:[#allocation130_spill] sm:$0xff]  ;;  %v3399_v0 = vmul.f32 %v6982_v54, %v3398_v49  ;;  %v1548_v38 = vadd.f32 %v1544_v39, %v7537_v55  ;;  %v7719_v33 = vsel %vm553_vm0, %v2073_v21, %v2075_v61 }
 0x2c7   : > { %v7693_v23 = vpop.permute.xlu1 %2948  ;;  %v7695_v28 = vpop.permute.xlu0 %2946  ;;  %v1619_v36 = vsel %vm418_vm3, %v9863_v24, %v9862_v9  ;;  %v1547_v25 = vadd.f32 %v1543_v59, %v7535_v42  ;;  %v1586_v9 = vadd.f32 %v1582_v62, %v7583_v32  ;;  %v9867_v24 = vld [vmem:[#allocation134_spill] sm:$0xff]  ;;  %v1624_v61 = vadd.f32 %v1620_v30, %v7603_v15 }
 0x2c8   : > { %9856 = vst [vmem:[#allocation39_spill] sm:$0xff] %v7693_v23  ;;  %9857 = vst [vmem:[#allocation40_spill] sm:$0xff] %v7695_v28  ;;  %v2090_v23 = vrot.slane %v2084_v35, 1  ;;  %v1585_v35 = vadd.f32 %v1581_v63, %v7565_v56  ;;  %v1658_v28 = vsel %vm418_vm3, %v9869_v34, %v9868_v37  ;;  %v1623_v21 = vadd.f32 %v1619_v36, %v7591_v52  ;;  %v9880_v37 = vld [vmem:[#allocation143_spill] sm:$0xff] }
 0x2c9   : > { %3389 = vrot.lane.b32.xlu1 %v3378_v26, %s5246_s26  ;;  %3387 = vrot.lane.b32.xlu0 %v3377_v51, %s5246_s26  ;;  %v9866_v26 = vld [vmem:[#allocation133_spill] sm:$0xff]  ;;  %v1682_v56 = vadd.f32 %v7308_v50, %v1509_v22  ;;  %v1683_v62 = vadd.f32 %v7336_v41, %v1510_v57  ;;  %v3402_v63 = vmul.f32 %v7021_v19, %v3398_v49  ;;  %v3422_v59 = vstv %s7677_s29  ;;  %s8051_s29 = sld [smem:[#allocation2 + $0x17]] }
 0x2ca   : > { %v1657_v51 = vsel %vm418_vm3, %v9867_v24, %v9866_v26  ;;  %v7738_v32 = vsel %vm553_vm0, %v2089_v31, %v2090_v23  ;;  %v3401_v12 = vmul.f32 %v7024_v29, %v3398_v49  ;;  %v1662_v52 = vadd.f32 %v1658_v28, %v1434_v18  ;;  %v9875_v31 = vld [vmem:[#allocation138_spill] sm:$0xff]  ;;  %v9878_v24 = vld [vmem:[#allocation141_spill] sm:$0xff] }
 0x2cb   : > { %v7729_v42 = vpop.permute.xlu1 %2952  ;;  %v7731_v55 = vpop.permute.xlu0 %2950  ;;  %v1661_v39 = vadd.f32 %v1657_v51, %v1433_v5  ;;  %v7746_v15 = vsel %vm553_vm0, %v2090_v23, %v2092_v11  ;;  %v3548_v50 = vstv %s7684_s30  ;;  %v1688_v41 = vadd.f32 %v7352_v53, %v1547_v25  ;;  %v9874_v23 = vld [vmem:[#allocation137_spill] sm:$0xff]  ;;  %v9879_v51 = vld [vmem:[#allocation142_spill] sm:$0xff]  ;;  %s8105_s30 = sld [smem:[#allocation2 + $0x32]] }
 0x2cc   : > { %9870 = vst [vmem:[#allocation41_spill] sm:$0xff] %v7729_v42  ;;  %9871 = vst [vmem:[#allocation42_spill] sm:$0xff] %v7731_v55  ;;  %v7753_v36 = vadd.f32 %v7355_v44, %v1548_v38  ;;  %v7756_v22 = vadd.f32 %v7358_v2, %v1585_v35  ;;  %v7759_v49 = vadd.f32 %v7368_v6, %v1586_v9  ;;  %v2555_v6 = vstv %s7710_s4  ;;  %v7797_v11 = vld [vmem:[%s5376_s9 + $0xc0] sm:$0xff]  ;;  %v9877_v9 = vld [vmem:[#allocation140_spill] sm:$0xff]  ;;  %s8164_s4 = sld [smem:[#allocation2 + $0x4d]] }
 0x2cd   : > { %3409 = vrot.lane.b32.xlu1 %v3400_v16, %s5246_s26  ;;  %3407 = vrot.lane.b32.xlu0 %v3399_v0, %s5246_s26  ;;  %v1726_v28 = vsel %vm273_vm2, %v9875_v31, %v9874_v23  ;;  %v7769_v53 = vadd.f32 %v7371_v46, %v1623_v21  ;;  %v7772_v44 = vadd.f32 %v7383_v17, %v1624_v61  ;;  %v7786_v46 = vld [vmem:[%s5376_s9 + $0xc8] sm:$0xff]  ;;  %v9884_v61 = vld [vmem:[#allocation145_spill] sm:$0xff] }
 0x2ce   : > { %v3424_v2 = vmul.f32 %v6978_v43, %v3422_v59  ;;  %v3423_v57 = vmul.f32 %v6982_v54, %v3422_v59  ;;  %v3550_v30 = vmul.f32 %v6978_v43, %v3548_v50  ;;  %v7783_v16 = vmul.f32 %v7021_v19, %v3548_v50  ;;  %v9876_v43 = vld [vmem:[#allocation139_spill] sm:$0xff] }
 0x2cf   : > { %v7761_v5 = vpop.permute.xlu1 %2986  ;;  %v7763_v18 = vpop.permute.xlu0 %2984  ;;  %v7789_v17 = vadd.f32 %v7441_v20, %v1661_v39  ;;  %v7792_v0 = vadd.f32 %v7444_v58, %v1662_v52  ;;  %v3549_v25 = vmul.f32 %v6982_v54, %v3548_v50  ;;  %v3551_v38 = vmul.f32 %v7024_v29, %v3548_v50  ;;  %v9881_v58 = vld [vmem:[#allocation144_spill] sm:$0xff] }
 0x2d0   : > { %9872 = vst [vmem:[#allocation43_spill] sm:$0xff] %v7761_v5  ;;  %9873 = vst [vmem:[#allocation44_spill] sm:$0xff] %v7763_v18  ;;  %v7800_v35 = vadd.f32 %v1726_v28, %v7664_v10  ;;  %v1727_v26 = vsel %vm273_vm2, %v9877_v9, %v9876_v43  ;;  %v1750_v20 = vsel %vm273_vm2, %v9879_v51, %v9878_v24  ;;  %v9885_v10 = vld [vmem:[#allocation146_spill] sm:$0xff]  ;;  %v3564_v31 = vrot.slane %v3550_v30, 1 }
 0x2d1   : > { %3413 = vrot.lane.b32.xlu1 %v3402_v63, %s5246_s26  ;;  %3411 = vrot.lane.b32.xlu0 %v3401_v12, %s5246_s26  ;;  %v1751_v34 = vsel %vm273_vm2, %v9881_v58, %v9880_v37  ;;  %v1774_v63 = vsel %vm273_vm2, %v9885_v10, %v9884_v61  ;;  %v2556_v12 = vmul.f32 %v7291_v7, %v2555_v6  ;;  %v3565_v28 = vrot.slane %v7783_v16, 1 }
 0x2d2   : > { %v3426_v39 = vmul.f32 %v7021_v19, %v3422_v59  ;;  %v3554_v52 = vmul.f32 %v7786_v46, %v3548_v50  ;;  %v3425_v23 = vmul.f32 %v7024_v29, %v3422_v59  ;;  %v3553_v43 = vmul.f32 %v7797_v11, %v3548_v50 }
 0x2d3   : > { %v7811_v54 = vpop.permute.xlu1 %2990  ;;  %v7813_v21 = vpop.permute.xlu0 %2988  ;;  %v7827_v9 = vadd.f32 %v1727_v26, %v7680_v1  ;;  %v3561_v24 = vrot.slane %v3549_v25, 1  ;;  %v3562_v51 = vrot.slane %v3551_v38, 1  ;;  %v3586_v37 = vstv %s7749_s5  ;;  %v9888_v38 = vld [vmem:[#allocation147_spill] sm:$0xff]  ;;  %v9889_v26 = vld [vmem:[#allocation148_spill] sm:$0xff]  ;;  %s8204_s5 = sld [smem:[#allocation2 + $0x12]] }
 0x2d4   : > { %9882 = vst [vmem:[#allocation45_spill] sm:$0xff] %v7811_v54  ;;  %9883 = vst [vmem:[#allocation46_spill] sm:$0xff] %v7813_v21  ;;  %v7832_v58 = vadd.f32 %v1750_v20, %v1682_v56  ;;  %v2557_v59 = vmul.f32 %v7302_v14, %v2555_v6  ;;  %v7842_v1 = vadd.f32 %v1774_v63, %v1688_v41  ;;  %v2562_v16 = vrot.slane %v2556_v12, 2  ;;  %v7862_v63 = vld [vmem:[%s5376_s9 + $0xa0] sm:$0xff]  ;;  %v9902_v21 = vld [vmem:[#allocation154_spill] sm:$0xff] }
 0x2d5   : > { %3433 = vrot.lane.b32.xlu1 %v3424_v2, %s5246_s26  ;;  %3431 = vrot.lane.b32.xlu0 %v3423_v57, %s5246_s26  ;;  %v7834_v2 = vadd.f32 %v1751_v34, %v1683_v62  ;;  %v2558_v57 = vmul.f32 %v7487_v40, %v2555_v6  ;;  %v2572_v25 = vstv %s7774_s7  ;;  %v3569_v56 = vrot.slane %v3554_v52, 1  ;;  %v7854_v34 = vld [vmem:[%s5376_s9 + $0xa8] sm:$0xff]  ;;  %s8219_s7 = sld [smem:[#allocation2 + $0x2d]] }
 0x2d6   : > { %v1775_v62 = vsel %vm273_vm2, %v9889_v26, %v9888_v38  ;;  %v3566_v6 = vsel %vm553_vm0, %v3564_v31, %v3565_v28  ;;  %v3567_v20 = vrot.slane %v3553_v43, 1  ;;  %v3588_v41 = vmul.f32 %v7854_v34, %v3586_v37 }
 0x2d7   : > { %v7838_v30 = vpop.permute.xlu1 %3024  ;;  %v7840_v50 = vpop.permute.xlu0 %3022  ;;  %v3563_v61 = vsel %vm553_vm0, %v3561_v24, %v3562_v51  ;;  %v7859_v10 = vmul.f32 %v7021_v19, %v3586_v37  ;;  %v3587_v12 = vmul.f32 %v7862_v63, %v3586_v37  ;;  %v2563_v52 = vrot.slane %v2557_v59, 2  ;;  %v9892_v24 = vld [vmem:[#allocation149_spill] sm:$0xff] }
 0x2d8   : > { %9886 = vst [vmem:[#allocation47_spill] sm:$0xff] %v7838_v30  ;;  %9887 = vst [vmem:[#allocation48_spill] sm:$0xff] %v7840_v50  ;;  %v2573_v31 = vmul.f32 %v7291_v7, %v2572_v25  ;;  %v2574_v43 = vmul.f32 %v7302_v14, %v2572_v25  ;;  %v7873_v19 = vadd.f32 %v1775_v62, %v7753_v36  ;;  %v9893_v50 = vld [vmem:[#allocation150_spill] sm:$0xff] }
 0x2d9   : > { %3437 = vrot.lane.b32.xlu1 %v3426_v39, %s5246_s26  ;;  %3435 = vrot.lane.b32.xlu0 %v3425_v23, %s5246_s26  ;;  %v3589_v39 = vmul.f32 %v7024_v29, %v3586_v37  ;;  %v2565_v23 = vrot.slane %v2558_v57, 2  ;;  %v1798_v30 = vsel %vm273_vm2, %v9893_v50, %v9892_v24  ;;  %v2575_v29 = vmul.f32 %v7487_v40, %v2572_v25 }
 0x2da   : > { %v3570_v59 = vsel %vm553_vm0, %v3565_v28, %v3569_v56  ;;  %v3568_v57 = vsel %vm553_vm0, %v3562_v51, %v3567_v20  ;;  %v3592_v36 = vmul.f32 %v7786_v46, %v3586_v37  ;;  %v3591_v62 = vmul.f32 %v7797_v11, %v3586_v37 }
 0x2db   : > { %v7868_v38 = vpop.permute.xlu1 %3028  ;;  %v7870_v26 = vpop.permute.xlu0 %3026  ;;  %v3603_v50 = vrot.slane %v7859_v10, 1  ;;  %v3599_v24 = vrot.slane %v3587_v12, 1  ;;  %v3600_v25 = vrot.slane %v3589_v39, 1  ;;  %v7892_v28 = vsel %vm1112_vm1, %v2562_v16, %v2563_v52  ;;  %v9897_v10 = vld [vmem:[#allocation152_spill] sm:$0xff] }
 0x2dc   : > { %9890 = vst [vmem:[#allocation49_spill] sm:$0xff] %v7868_v38  ;;  %9891 = vst [vmem:[#allocation50_spill] sm:$0xff] %v7870_v26  ;;  %v3602_v26 = vrot.slane %v3588_v41, 1  ;;  %v3624_v38 = vstv %s7830_s8  ;;  %v7895_v56 = vsel %vm1112_vm1, %v2563_v52, %v2565_v23  ;;  %v2579_v51 = vrot.slane %v2573_v31, 2  ;;  %s8228_s8 = sld [smem:[#allocation2 + $0x68]] }
 0x2dd   : > { %3573 = vrot.lane.b32.xlu1 %v3566_v6, %s5245_s27  ;;  %3571 = vrot.lane.b32.xlu0 %v3563_v61, %s5245_s27  ;;  %v2580_v6 = vrot.slane %v2574_v43, 2  ;;  %v7902_v41 = vadd.f32 %v1798_v30, %v7756_v22  ;;  %v9896_v61 = vld [vmem:[#allocation151_spill] sm:$0xff]  ;;  %v2582_v39 = vrot.slane %v2575_v29, 2  ;;  %v2589_v16 = vstv %s7845_s10  ;;  %v7912_v43 = vld [vmem:[%s5376_s9 + $0xb8] sm:$0xff]  ;;  %s8276_s10 = sld [smem:[#allocation2 + $0x48]] }
 0x2de   : > { %v1799_v12 = vsel %vm273_vm2, %v9897_v10, %v9896_v61  ;;  %v3607_v52 = vrot.slane %v3592_v36, 1  ;;  %v3605_v23 = vrot.slane %v3591_v62, 1  ;;  %v3626_v31 = vmul.f32 %v7854_v34, %v3624_v38  ;;  %v7919_v61 = vld [vmem:[%s5376_s9 + $0xb0] sm:$0xff] }
 0x2df   : > { %v7897_v20 = vpop.permute.xlu1 %3062  ;;  %v7899_v37 = vpop.permute.xlu0 %3060  ;;  %v3628_v22 = vmul.f32 %v7912_v43, %v3624_v38  ;;  %v3604_v30 = vsel %vm553_vm0, %v3602_v26, %v3603_v50  ;;  %v3625_v29 = vmul.f32 %v7862_v63, %v3624_v38  ;;  %v7926_v36 = vsel %vm1112_vm1, %v2579_v51, %v2580_v6 }
 0x2e0   : > { %9894 = vst [vmem:[#allocation51_spill] sm:$0xff] %v7897_v20  ;;  %9895 = vst [vmem:[#allocation52_spill] sm:$0xff] %v7899_v37  ;;  %v3601_v37 = vsel %vm553_vm0, %v3599_v24, %v3600_v25  ;;  %v2590_v62 = vmul.f32 %v7291_v7, %v2589_v16  ;;  %v2591_v10 = vmul.f32 %v7302_v14, %v2589_v16  ;;  %v9901_v24 = vld [vmem:[#allocation153_spill] sm:$0xff] }
 0x2e1   : > { %3577 = vrot.lane.b32.xlu1 %v3570_v59, %s5245_s27  ;;  %3575 = vrot.lane.b32.xlu0 %v3568_v57, %s5245_s27  ;;  %v3627_v59 = vmul.f32 %v7919_v61, %v3624_v38  ;;  %v7923_v57 = vadd.f32 %v1799_v12, %v7759_v49  ;;  %9898 = vst [vmem:[#allocation53_spill] sm:$0xff] %v7926_v36  ;;  %v2606_v49 = vstv %s7879_s11  ;;  %v3641_v5 = vrot.slane %v3628_v22, 1  ;;  %s8289_s11 = sld [smem:[#allocation2 + $0x63]] }
 0x2e2   : > { %v1822_v54 = vsel %vm273_vm2, %v9902_v21, %v9901_v24  ;;  %v7938_v18 = vsel %vm1112_vm1, %v2580_v6, %v2582_v39  ;;  %v3630_v51 = vmul.f32 %v7786_v46, %v3624_v38  ;;  %v3608_v12 = vsel %vm553_vm0, %v3603_v50, %v3607_v52  ;;  %v9907_v52 = vld [vmem:[#allocation156_spill] sm:$0xff] }
 0x2e3   : > { %v7930_v20 = vpop.permute.xlu1 %3066  ;;  %v7932_v26 = vpop.permute.xlu0 %3064  ;;  %9903 = vst [vmem:[#allocation56_spill] sm:$0xff] %v7938_v18  ;;  %v3637_v55 = vrot.slane %v3625_v29, 1  ;;  %v3638_v21 = vrot.slane %v3627_v59, 1  ;;  %v3629_v6 = vmul.f32 %v7797_v11, %v3624_v38  ;;  %v3662_v39 = vstv %s7889_s19  ;;  %s8298_s19 = sld [smem:[#allocation2 + $0x83]] }
 0x2e4   : > { %9899 = vst [vmem:[#allocation54_spill] sm:$0xff] %v7930_v20  ;;  %9900 = vst [vmem:[#allocation55_spill] sm:$0xff] %v7932_v26  ;;  %v3606_v26 = vsel %vm553_vm0, %v3600_v25, %v3605_v23  ;;  %v3640_v20 = vrot.slane %v3626_v31, 1  ;;  %v7953_v24 = vadd.f32 %v1822_v54, %v7769_v53  ;;  %v2596_v42 = vrot.slane %v2590_v62, 2  ;;  %v9906_v25 = vld [vmem:[#allocation155_spill] sm:$0xff] }
 0x2e5   : > { %3611 = vrot.lane.b32.xlu1 %v3604_v30, %s5245_s27  ;;  %3609 = vrot.lane.b32.xlu0 %v3601_v37, %s5245_s27  ;;  %v2597_v30 = vrot.slane %v2591_v10, 2  ;;  %v2592_v37 = vmul.f32 %v7487_v40, %v2589_v16  ;;  %v1823_v23 = vsel %vm273_vm2, %v9907_v52, %v9906_v25  ;;  %v2607_v38 = vmul.f32 %v7291_v7, %v2606_v49  ;;  %v9909_v25 = vld [vmem:[#allocation158_spill] sm:$0xff] }
 0x2e6   : > { %v7965_v31 = vmul.f32 %v7302_v14, %v2606_v49  ;;  %v3645_v22 = vrot.slane %v3630_v51, 1  ;;  %v3642_v53 = vsel %vm553_vm0, %v3640_v20, %v3641_v5  ;;  %v3664_v54 = vmul.f32 %v7854_v34, %v3662_v39 }
 0x2e7   : > { %v7956_v18 = vpop.permute.xlu1 %3100  ;;  %v7958_v50 = vpop.permute.xlu0 %3098  ;;  %v3666_v16 = vmul.f32 %v7912_v43, %v3662_v39  ;;  %v3639_v29 = vsel %vm553_vm0, %v3637_v55, %v3638_v21  ;;  %v3643_v59 = vrot.slane %v3629_v6, 1  ;;  %v3663_v62 = vmul.f32 %v7862_v63, %v3662_v39 }
 0x2e8   : > { %9904 = vst [vmem:[#allocation65_spill] sm:$0xff] %v7956_v18  ;;  %9905 = vst [vmem:[#allocation66_spill] sm:$0xff] %v7958_v50  ;;  %v3665_v10 = vmul.f32 %v7919_v61, %v3662_v39  ;;  %v7976_v51 = vadd.f32 %v1823_v23, %v7772_v44  ;;  %v7982_v20 = vsel %vm1112_vm1, %v2596_v42, %v2597_v30  ;;  %v2599_v52 = vrot.slane %v2592_v37, 2 }
 0x2e9   : > { %3615 = vrot.lane.b32.xlu1 %v3608_v12, %s5245_s27  ;;  %3613 = vrot.lane.b32.xlu0 %v3606_v26, %s5245_s27  ;;  %v9908_v12 = vld [vmem:[#allocation157_spill] sm:$0xff]  ;;  %v2613_v6 = vrot.slane %v2607_v38, 2  ;;  %v2614_v18 = vrot.slane %v7965_v31, 2  ;;  %v2623_v36 = vstv %s7941_s22  ;;  %v3646_v44 = vsel %vm553_vm0, %v3641_v5, %v3645_v22  ;;  %s8343_s22 = sld [smem:[#allocation2 + $0x7e]] }
 0x2ea   : > { %v1846_v26 = vsel %vm273_vm2, %v9909_v25, %v9908_v12  ;;  %v3678_v42 = vrot.slane %v3664_v54, 1  ;;  %v3679_v23 = vrot.slane %v3666_v16, 1  ;;  %v3668_v37 = vmul.f32 %v7786_v46, %v3662_v39  ;;  %v9915_v16 = vld [vmem:[#allocation159_spill] sm:$0xff] }
 0x2eb   : > { %v7984_v50 = vpop.permute.xlu1 %3104  ;;  %v7986_v55 = vpop.permute.xlu0 %3102  ;;  %v3667_v12 = vmul.f32 %v7797_v11, %v3662_v39  ;;  %v3644_v25 = vsel %vm553_vm0, %v3638_v21, %v3643_v59  ;;  %v3675_v38 = vrot.slane %v3663_v62, 1  ;;  %v3700_v31 = vstv %s7950_s23  ;;  %v9918_v62 = vld [vmem:[#allocation162_spill] sm:$0xff]  ;;  %s8363_s23 = sld [smem:[#allocation2 + $0x9e]] }
 0x2ec   : > { %9910 = vst [vmem:[#allocation57_spill] sm:$0xff] %v7984_v50  ;;  %9911 = vst [vmem:[#allocation58_spill] sm:$0xff] %v7986_v55  ;;  %v3676_v55 = vrot.slane %v3665_v10, 1  ;;  %v8002_v50 = vsel %vm1112_vm1, %v2597_v30, %v2599_v52  ;;  %v2609_v5 = vmul.f32 %v7487_v40, %v2606_v49  ;;  %v2624_v22 = vmul.f32 %v7291_v7, %v2623_v36  ;;  %v9917_v30 = vld [vmem:[#allocation161_spill] sm:$0xff] }
 0x2ed   : > { %3649 = vrot.lane.b32.xlu1 %v3642_v53, %s5245_s27  ;;  %3647 = vrot.lane.b32.xlu0 %v3639_v29, %s5245_s27  ;;  %9912 = vst [vmem:[#allocation59_spill] sm:$0xff] %v8002_v50  ;;  %v8007_v53 = vmul.f32 %v7302_v14, %v2623_v36  ;;  %v8014_v21 = vadd.f32 %v1846_v26, %v7789_v17  ;;  %v9916_v29 = vld [vmem:[#allocation160_spill] sm:$0xff]  ;;  %v3683_v17 = vrot.slane %v3668_v37, 1  ;;  %v3681_v26 = vrot.slane %v3667_v12, 1 }
 0x2ee   : > { %v1847_v59 = vsel %vm273_vm2, %v9916_v29, %v9915_v16  ;;  %v1870_v49 = vsel %vm418_vm3, %v9918_v62, %v9917_v30  ;;  %v8023_v10 = vsel %vm1112_vm1, %v2613_v6, %v2614_v18  ;;  %v3680_v52 = vsel %vm553_vm0, %v3678_v42, %v3679_v23 }
 0x2ef   : > { %v8009_v54 = vpop.permute.xlu1 %3169  ;;  %v8011_v39 = vpop.permute.xlu0 %3167  ;;  %9919 = vst [vmem:[#allocation68_spill] sm:$0xff] %v8023_v10  ;;  %v3677_v16 = vsel %vm553_vm0, %v3675_v38, %v3676_v55  ;;  %v3704_v29 = vmul.f32 %v7912_v43, %v3700_v31  ;;  %v3701_v30 = vmul.f32 %v7862_v63, %v3700_v31  ;;  %v3703_v6 = vmul.f32 %v7919_v61, %v3700_v31 }
 0x2f0   : > { %9913 = vst [vmem:[#allocation60_spill] sm:$0xff] %v8009_v54  ;;  %9914 = vst [vmem:[#allocation67_spill] sm:$0xff] %v8011_v39  ;;  %v3702_v39 = vmul.f32 %v7854_v34, %v3700_v31  ;;  %v8034_v62 = vadd.f32 %v1847_v59, %v7792_v0  ;;  %v2631_v42 = vrot.slane %v8007_v53, 2  ;;  %v1874_v38 = vadd.f32 %v1870_v49, %v7800_v35 }
 0x2f1   : > { %3653 = vrot.lane.b32.xlu1 %v3646_v44, %s5245_s27  ;;  %3651 = vrot.lane.b32.xlu0 %v3644_v25, %s5245_s27  ;;  %v2616_v44 = vrot.slane %v2609_v5, 2  ;;  %v2630_v25 = vrot.slane %v2624_v22, 2  ;;  %v2626_v54 = vmul.f32 %v7487_v40, %v2623_v36  ;;  %v2640_v10 = vstv %s7990_s25  ;;  %s8409_s25 = sld [smem:[#allocation2 + $0x99]] }
 0x2f2   : > { %v3706_v50 = vmul.f32 %v7786_v46, %v3700_v31  ;;  %v3684_v0 = vsel %vm553_vm0, %v3679_v23, %v3683_v17  ;;  %v3682_v5 = vsel %vm553_vm0, %v3676_v55, %v3681_v26  ;;  %v3716_v22 = vrot.slane %v3702_v39, 1  ;;  %v9924_v39 = vld [vmem:[#allocation163_spill] sm:$0xff]  ;;  %v9925_v17 = vld [vmem:[#allocation164_spill] sm:$0xff] }
 0x2f3   : > { %v8037_v37 = vpop.permute.xlu1 %3173  ;;  %v8039_v12 = vpop.permute.xlu0 %3171  ;;  %v3705_v53 = vmul.f32 %v7797_v11, %v3700_v31  ;;  %v3717_v59 = vrot.slane %v3704_v29, 1  ;;  %v3738_v35 = vstv %s7999_s28  ;;  %v8054_v36 = vsel %vm1112_vm1, %v2614_v18, %v2616_v44  ;;  %s8429_s28 = sld [smem:[#allocation2 + $0x19]] }
 0x2f4   : > { %9920 = vst [vmem:[#allocation61_spill] sm:$0xff] %v8037_v37  ;;  %9921 = vst [vmem:[#allocation62_spill] sm:$0xff] %v8039_v12  ;;  %v3713_v12 = vrot.slane %v3701_v30, 1  ;;  %v3714_v37 = vrot.slane %v3703_v6, 1  ;;  %v8057_v49 = vsel %vm1112_vm1, %v2630_v25, %v2631_v42  ;;  %v8061_v23 = vmul.f32 %v7302_v14, %v2640_v10  ;;  %v9926_v30 = vld [vmem:[#allocation165_spill] sm:$0xff]  ;;  %v9927_v6 = vld [vmem:[#allocation166_spill] sm:$0xff] }
 0x2f5   : > { %3687 = vrot.lane.b32.xlu1 %v3680_v52, %s5245_s27  ;;  %3685 = vrot.lane.b32.xlu0 %v3677_v16, %s5245_s27  ;;  %v2641_v52 = vmul.f32 %v7291_v7, %v2640_v10  ;;  %v1871_v26 = vsel %vm418_vm3, %v9925_v17, %v9924_v39  ;;  %v8071_v16 = vadd.f32 %v7548_v4, %v1874_v38  ;;  %v2633_v18 = vrot.slane %v2626_v54, 2 }
 0x2f6   : > { %v3721_v29 = vrot.slane %v3706_v50, 1  ;;  %v1894_v7 = vsel %vm418_vm3, %v9927_v6, %v9926_v30  ;;  %v3719_v14 = vrot.slane %v3705_v53, 1  ;;  %v3740_v44 = vmul.f32 %v7854_v34, %v3738_v35  ;;  %v9928_v6 = vld [vmem:[#allocation167_spill] sm:$0xff] }
 0x2f7   : > { %v8063_v55 = vpop.permute.xlu1 %3193  ;;  %v8065_v31 = vpop.permute.xlu0 %3191  ;;  %v3742_v25 = vmul.f32 %v7912_v43, %v3738_v35  ;;  %v3718_v39 = vsel %vm553_vm0, %v3716_v22, %v3717_v59  ;;  %v3715_v4 = vsel %vm553_vm0, %v3713_v12, %v3714_v37  ;;  %v3739_v54 = vmul.f32 %v7862_v63, %v3738_v35  ;;  %v9929_v12 = vld [vmem:[#allocation168_spill] sm:$0xff] }
 0x2f8   : > { %9922 = vst [vmem:[#allocation63_spill] sm:$0xff] %v8063_v55  ;;  %9923 = vst [vmem:[#allocation64_spill] sm:$0xff] %v8065_v31  ;;  %v3741_v50 = vmul.f32 %v7919_v61, %v3738_v35  ;;  %v1875_v38 = vadd.f32 %v1871_v26, %v7827_v9  ;;  %v2647_v17 = vrot.slane %v2641_v52, 2  ;;  %v1898_v22 = vadd.f32 %v1894_v7, %v7832_v58 }
 0x2f9   : > { %3691 = vrot.lane.b32.xlu1 %v3684_v0, %s5245_s27  ;;  %3689 = vrot.lane.b32.xlu0 %v3682_v5, %s5245_s27  ;;  %v2648_v0 = vrot.slane %v8061_v23, 2  ;;  %v2643_v5 = vmul.f32 %v7487_v40, %v2640_v10  ;;  %v1895_v31 = vsel %vm418_vm3, %v9929_v12, %v9928_v6  ;;  %v8096_v55 = vsel %vm1112_vm1, %v2631_v42, %v2633_v18 }
 0x2fa   : > { %v3722_v9 = vsel %vm553_vm0, %v3717_v59, %v3721_v29  ;;  %v3720_v40 = vsel %vm553_vm0, %v3714_v37, %v3719_v14  ;;  %v3754_v10 = vrot.slane %v3740_v44, 1  ;;  %v3755_v52 = vrot.slane %v3742_v25, 1  ;;  %v9932_v44 = vld [vmem:[#allocation169_spill] sm:$0xff]  ;;  %v9933_v25 = vld [vmem:[#allocation170_spill] sm:$0xff] }
 0x2fb   : > { %v8087_v53 = vpop.permute.xlu1 %3197  ;;  %v8089_v30 = vpop.permute.xlu0 %3195  ;;  %v3744_v23 = vmul.f32 %v7786_v46, %v3738_v35  ;;  %v3751_v58 = vrot.slane %v3739_v54, 1  ;;  %v3752_v26 = vrot.slane %v3741_v50, 1  ;;  %v3743_v7 = vmul.f32 %v7797_v11, %v3738_v35 }
 0x2fc   : > { %v3776_v6 = vstv %s8051_s29  ;;  %v1899_v42 = vadd.f32 %v1895_v31, %v7834_v2  ;;  %v8109_v59 = vadd.f32 %v7557_v60, %v1875_v38  ;;  %v8112_v18 = vsel %vm1112_vm1, %v2647_v17, %v2648_v0  ;;  %v9936_v2 = vld [vmem:[#allocation173_spill] sm:$0xff]  ;;  %v9937_v31 = vld [vmem:[#allocation174_spill] sm:$0xff]  ;;  %s8494_s29 = sld [smem:[#allocation2 + $0x34]] }
 0x2fd   : > { %3725 = vrot.lane.b32.xlu1 %v3718_v39, %s5245_s27  ;;  %3723 = vrot.lane.b32.xlu0 %v3715_v4, %s5245_s27  ;;  %v2650_v37 = vrot.slane %v2643_v5, 2  ;;  %v1918_v35 = vsel %vm418_vm3, %v9933_v25, %v9932_v44  ;;  %v9934_v39 = vld [vmem:[#allocation171_spill] sm:$0xff]  ;;  %v9935_v4 = vld [vmem:[#allocation172_spill] sm:$0xff]  ;;  %v1942_v60 = vsel %vm418_vm3, %v9937_v31, %v9936_v2  ;;  %v8128_v50 = vadd.f32 %v7586_v13, %v1898_v22 }
 0x2fe   : > { %v1919_v54 = vsel %vm418_vm3, %v9935_v4, %v9934_v39  ;;  %v3756_v38 = vsel %vm553_vm0, %v3754_v10, %v3755_v52  ;;  %v3759_v17 = vrot.slane %v3744_v23, 1  ;;  %v3778_v5 = vmul.f32 %v7854_v34, %v3776_v6  ;;  %v9941_v2 = vld [vmem:[#allocation176_spill] sm:$0xff] }
 0x2ff   : > { %v8114_v29 = vpop.permute.xlu1 %3217  ;;  %v8116_v14 = vpop.permute.xlu0 %3215  ;;  %v3780_v12 = vmul.f32 %v7912_v43, %v3776_v6  ;;  %v3753_v44 = vsel %vm553_vm0, %v3751_v58, %v3752_v26  ;;  %v3757_v25 = vrot.slane %v3743_v7, 1  ;;  %v3777_v39 = vmul.f32 %v7862_v63, %v3776_v6  ;;  %v9940_v7 = vld [vmem:[#allocation175_spill] sm:$0xff] }
 0x300   : > { %9930 = vst [vmem:[#allocation69_spill] sm:$0xff] %v8114_v29  ;;  %9931 = vst [vmem:[#allocation70_spill] sm:$0xff] %v8116_v14  ;;  %v3779_v4 = vmul.f32 %v7919_v61, %v3776_v6  ;;  %v1922_v13 = vadd.f32 %v1918_v35, %v7842_v1  ;;  %v1923_v22 = vadd.f32 %v1919_v54, %v7873_v19  ;;  %v9942_v1 = vld [vmem:[#allocation177_spill] sm:$0xff]  ;;  %v9943_v35 = vld [vmem:[#allocation178_spill] sm:$0xff] }
 0x301   : > { %3729 = vrot.lane.b32.xlu1 %v3722_v9, %s5245_s27  ;;  %3727 = vrot.lane.b32.xlu0 %v3720_v40, %s5245_s27  ;;  %v8141_v9 = vadd.f32 %v7594_v47, %v1899_v42  ;;  %v8144_v40 = vsel %vm1112_vm1, %v2648_v0, %v2650_v37  ;;  %v1946_v58 = vadd.f32 %v1942_v60, %v7902_v41  ;;  %v3792_v42 = vrot.slane %v3778_v5, 1  ;;  %v9947_v5 = vld [vmem:[#allocation180_spill] sm:$0xff]  ;;  %v9994_v29 = vld [vmem:[#allocation222_spill] sm:$0xff] }
 0x302   : > { %v1943_v31 = vsel %vm418_vm3, %v9941_v2, %v9940_v7  ;;  %v1966_v19 = vsel %vm418_vm3, %v9943_v35, %v9942_v1  ;;  %v3782_v47 = vmul.f32 %v7786_v46, %v3776_v6  ;;  %v3760_v0 = vsel %vm553_vm0, %v3755_v52, %v3759_v17  ;;  %v9992_v14 = vld [vmem:[#allocation220_spill] sm:$0xff] }
 0x303   : > { %v8146_v10 = vpop.permute.xlu1 %3221  ;;  %v8148_v23 = vpop.permute.xlu0 %3219  ;;  %v3793_v37 = vrot.slane %v3780_v12, 1  ;;  %v3781_v41 = vmul.f32 %v7797_v11, %v3776_v6  ;;  %v3758_v54 = vsel %vm553_vm0, %v3752_v26, %v3757_v25  ;;  %v3789_v60 = vrot.slane %v3777_v39, 1  ;;  %v9946_v26 = vld [vmem:[#allocation179_spill] sm:$0xff]  ;;  %v9949_v25 = vld [vmem:[#allocation182_spill] sm:$0xff] }
 0x304   : > { %9938 = vst [vmem:[#allocation71_spill] sm:$0xff] %v8146_v10  ;;  %9939 = vst [vmem:[#allocation72_spill] sm:$0xff] %v8148_v23  ;;  %v3790_v7 = vrot.slane %v3779_v4, 1  ;;  %v3814_v2 = vstv %s8105_s30  ;;  %v1947_v1 = vadd.f32 %v1943_v31, %v7923_v57  ;;  %v1970_v35 = vadd.f32 %v1966_v19, %v7953_v24  ;;  %v9950_v39 = vld [vmem:[#allocation183_spill] sm:$0xff]  ;;  %v9951_v24 = vld [vmem:[#allocation184_spill] sm:$0xff]  ;;  %s8522_s30 = sld [smem:[#allocation2 + $0x15]] }
 0x305   : > { %3763 = vrot.lane.b32.xlu1 %v3756_v38, %s5245_s27  ;;  %3761 = vrot.lane.b32.xlu0 %v3753_v44, %s5245_s27  ;;  %v8169_v38 = vadd.f32 %v7636_v45, %v1922_v13  ;;  %v8172_v52 = vadd.f32 %v7645_v8, %v1923_v22  ;;  %v1967_v12 = vsel %vm418_vm3, %v9947_v5, %v9946_v26  ;;  %v9948_v44 = vld [vmem:[#allocation181_spill] sm:$0xff]  ;;  %v3797_v4 = vrot.slane %v3782_v47, 1  ;;  %v9991_v10 = vld [vmem:[#allocation219_spill] sm:$0xff] }
 0x306   : > { %v1990_v57 = vsel %vm418_vm3, %v9949_v25, %v9948_v44  ;;  %v1991_v45 = vsel %vm418_vm3, %v9951_v24, %v9950_v39  ;;  %v8188_v8 = vadd.f32 %v7650_v48, %v1946_v58  ;;  %v3794_v13 = vsel %vm553_vm0, %v3792_v42, %v3793_v37  ;;  %v9955_v44 = vld [vmem:[#allocation186_spill] sm:$0xff]  ;;  %v9956_v39 = vld [vmem:[#allocation187_spill] sm:$0xff] }
 0x307   : > { %v8174_v17 = vpop.permute.xlu1 %3241  ;;  %v8176_v6 = vpop.permute.xlu0 %3239  ;;  %v3795_v22 = vrot.slane %v3781_v41, 1  ;;  %v3816_v31 = vmul.f32 %v7854_v34, %v3814_v2  ;;  %v3791_v19 = vsel %vm553_vm0, %v3789_v60, %v3790_v7  ;;  %v3818_v26 = vmul.f32 %v7912_v43, %v3814_v2  ;;  %v9954_v60 = vld [vmem:[#allocation185_spill] sm:$0xff] }
 0x308   : > { %9944 = vst [vmem:[#allocation73_spill] sm:$0xff] %v8174_v17  ;;  %9945 = vst [vmem:[#allocation74_spill] sm:$0xff] %v8176_v6  ;;  %v3815_v5 = vmul.f32 %v7862_v63, %v3814_v2  ;;  %v3817_v47 = vmul.f32 %v7919_v61, %v3814_v2  ;;  %v1971_v48 = vadd.f32 %v1967_v12, %v7976_v51  ;;  %v9957_v51 = vld [vmem:[#allocation188_spill] sm:$0xff]  ;;  %v3928_v17 = vstv %s8298_s19  ;;  %s8748_s19 = sld [smem:[#allocation2 + $0xa0]] }
 0x309   : > { %3767 = vrot.lane.b32.xlu1 %v3760_v0, %s5245_s27  ;;  %3765 = vrot.lane.b32.xlu0 %v3758_v54, %s5245_s27  ;;  %v1994_v58 = vadd.f32 %v1990_v57, %v8014_v21  ;;  %v1995_v0 = vadd.f32 %v1991_v45, %v8034_v62  ;;  %v8202_v54 = vadd.f32 %v7653_v3, %v1947_v1  ;;  %v3830_v12 = vrot.slane %v3816_v31, 1  ;;  %v9960_v31 = vld [vmem:[#allocation189_spill] sm:$0xff] }
 0x30a   : > { %v2130_v25 = vsel %vm273_vm2, %v9955_v44, %v9954_v60  ;;  %v2131_v21 = vsel %vm273_vm2, %v9957_v51, %v9956_v39  ;;  %v8217_v62 = vadd.f32 %v7667_v27, %v1970_v35  ;;  %v3798_v3 = vsel %vm553_vm0, %v3793_v37, %v3797_v4 }
 0x30b   : > { %v8206_v42 = vpop.permute.xlu1 %3245  ;;  %v8208_v41 = vpop.permute.xlu0 %3243  ;;  %v3796_v1 = vsel %vm553_vm0, %v3790_v7, %v3795_v22  ;;  %v3820_v57 = vmul.f32 %v7786_v46, %v3814_v2  ;;  %v3819_v24 = vmul.f32 %v7797_v11, %v3814_v2  ;;  %v3831_v45 = vrot.slane %v3818_v26, 1  ;;  %v9962_v26 = vld [vmem:[#allocation191_spill] sm:$0xff] }
 0x30c   : > { %9952 = vst [vmem:[#allocation75_spill] sm:$0xff] %v8206_v42  ;;  %9953 = vst [vmem:[#allocation76_spill] sm:$0xff] %v8208_v41  ;;  %v3827_v60 = vrot.slane %v3815_v5, 1  ;;  %v3828_v44 = vrot.slane %v3817_v47, 1  ;;  %v3852_v27 = vstv %s8164_s4  ;;  %v8231_v35 = vadd.f32 %v2130_v25, %v8071_v16  ;;  %v9964_v5 = vld [vmem:[#allocation193_spill] sm:$0xff]  ;;  %v9965_v47 = vld [vmem:[#allocation194_spill] sm:$0xff] }
 0x30d   : > { %3801 = vrot.lane.b32.xlu1 %v3794_v13, %s5246_s26  ;;  %3799 = vrot.lane.b32.xlu0 %v3791_v19, %s5246_s26  ;;  %v8234_v37 = vadd.f32 %v7719_v33, %v1971_v48  ;;  %v8237_v4 = vadd.f32 %v7738_v32, %v1994_v58  ;;  %v8240_v7 = vadd.f32 %v7746_v15, %v1995_v0  ;;  %v9961_v19 = vld [vmem:[#allocation190_spill] sm:$0xff]  ;;  %v9963_v33 = vld [vmem:[#allocation192_spill] sm:$0xff]  ;;  %v3835_v48 = vrot.slane %v3820_v57, 1  ;;  %s8560_s4 = sld [smem:[#allocation2 + $0x4f]] }
 0x30e   : > { %v8247_v22 = vadd.f32 %v2131_v21, %v8109_v59  ;;  %v2168_v16 = vsel %vm273_vm2, %v9961_v19, %v9960_v31  ;;  %v2169_v32 = vsel %vm273_vm2, %v9963_v33, %v9962_v26  ;;  %v2206_v15 = vsel %vm273_vm2, %v9965_v47, %v9964_v5  ;;  %v9969_v19 = vld [vmem:[#allocation196_spill] sm:$0xff] }
 0x30f   : > { %v8242_v13 = vpop.permute.xlu1 %3265  ;;  %v8244_v2 = vpop.permute.xlu0 %3263  ;;  %v3833_v59 = vrot.slane %v3819_v24, 1  ;;  %v3854_v58 = vmul.f32 %v7854_v34, %v3852_v27  ;;  %v3856_v0 = vmul.f32 %v7912_v43, %v3852_v27  ;;  %v3832_v25 = vsel %vm553_vm0, %v3830_v12, %v3831_v45 }
 0x310   : > { %9958 = vst [vmem:[#allocation77_spill] sm:$0xff] %v8242_v13  ;;  %9959 = vst [vmem:[#allocation78_spill] sm:$0xff] %v8244_v2  ;;  %v3829_v39 = vsel %vm553_vm0, %v3827_v60, %v3828_v44  ;;  %v3853_v51 = vmul.f32 %v7862_v63, %v3852_v27  ;;  %v3855_v21 = vmul.f32 %v7919_v61, %v3852_v27  ;;  %v3122_v57 = vstv %s8204_s5  ;;  %v9968_v60 = vld [vmem:[#allocation195_spill] sm:$0xff]  ;;  %s8585_s5 = sld [smem:[#allocation2 + $0x30]] }
 0x311   : > { %3805 = vrot.lane.b32.xlu1 %v3798_v3, %s5246_s26  ;;  %3803 = vrot.lane.b32.xlu0 %v3796_v1, %s5246_s26  ;;  %v8267_v31 = vadd.f32 %v2168_v16, %v8128_v50  ;;  %v8270_v3 = vadd.f32 %v2169_v32, %v8141_v9  ;;  %v8273_v1 = vadd.f32 %v2206_v15, %v8169_v38  ;;  %v9970_v50 = vld [vmem:[#allocation197_spill] sm:$0xff]  ;;  %v9971_v16 = vld [vmem:[#allocation198_spill] sm:$0xff]  ;;  %v3128_v33 = vstv %s8219_s7  ;;  %s8622_s7 = sld [smem:[#allocation2 + $0x4b]] }
 0x312   : > { %v2207_v26 = vsel %vm273_vm2, %v9969_v19, %v9968_v60  ;;  %v2244_v9 = vsel %vm273_vm2, %v9971_v16, %v9970_v50  ;;  %v3858_v38 = vmul.f32 %v7786_v46, %v3852_v27  ;;  %v3836_v32 = vsel %vm553_vm0, %v3831_v45, %v3835_v48 }
 0x313   : > { %v8278_v24 = vpop.permute.xlu1 %3269  ;;  %v8280_v12 = vpop.permute.xlu0 %3267  ;;  %v3834_v5 = vsel %vm553_vm0, %v3828_v44, %v3833_v59  ;;  %v3868_v47 = vrot.slane %v3854_v58, 1  ;;  %v3869_v15 = vrot.slane %v3856_v0, 1  ;;  %v3865_v60 = vrot.slane %v3853_v51, 1  ;;  %v9975_v59 = vld [vmem:[#allocation200_spill] sm:$0xff]  ;;  %v9976_v0 = vld [vmem:[#allocation201_spill] sm:$0xff] }
 0x314   : > { %9966 = vst [vmem:[#allocation79_spill] sm:$0xff] %v8278_v24  ;;  %9967 = vst [vmem:[#allocation80_spill] sm:$0xff] %v8280_v12  ;;  %v3866_v19 = vrot.slane %v3855_v21, 1  ;;  %v3857_v12 = vmul.f32 %v7797_v11, %v3852_v27  ;;  %v3890_v50 = vstv %s8228_s8  ;;  %v8301_v16 = vadd.f32 %v2207_v26, %v8172_v52  ;;  %v9974_v27 = vld [vmem:[#allocation199_spill] sm:$0xff]  ;;  %v9977_v52 = vld [vmem:[#allocation202_spill] sm:$0xff]  ;;  %s8630_s8 = sld [smem:[#allocation2 + $0x6a]] }
 0x315   : > { %3839 = vrot.lane.b32.xlu1 %v3832_v25, %s5246_s26  ;;  %3837 = vrot.lane.b32.xlu0 %v3829_v39, %s5246_s26  ;;  %v8304_v25 = vadd.f32 %v2244_v9, %v8188_v8  ;;  %v8307_v39 = vmul.f32 %v7862_v63, %v3122_v57  ;;  %v8310_v45 = vmul.f32 %v7919_v61, %v3122_v57  ;;  %v3873_v21 = vrot.slane %v3858_v38, 1 }
 0x316   : > { %v2245_v58 = vsel %vm273_vm2, %v9975_v59, %v9974_v27  ;;  %v2282_v8 = vsel %vm273_vm2, %v9977_v52, %v9976_v0  ;;  %v8323_v51 = vmul.f32 %v7862_v63, %v3128_v33  ;;  %v3870_v57 = vsel %vm553_vm0, %v3868_v47, %v3869_v15 }
 0x317   : > { %v8312_v44 = vpop.permute.xlu1 %3289  ;;  %v8314_v48 = vpop.permute.xlu0 %3287  ;;  %v3892_v26 = vmul.f32 %v7854_v34, %v3890_v50  ;;  %v3894_v9 = vmul.f32 %v7912_v43, %v3890_v50  ;;  %v3867_v27 = vsel %vm553_vm0, %v3865_v60, %v3866_v19  ;;  %v3871_v59 = vrot.slane %v3857_v12, 1  ;;  %v9978_v60 = vld [vmem:[#allocation203_spill] sm:$0xff] }
 0x318   : > { %9972 = vst [vmem:[#allocation81_spill] sm:$0xff] %v8312_v44  ;;  %9973 = vst [vmem:[#allocation82_spill] sm:$0xff] %v8314_v48  ;;  %v3891_v0 = vmul.f32 %v7862_v63, %v3890_v50  ;;  %v3893_v52 = vmul.f32 %v7919_v61, %v3890_v50  ;;  %v8334_v38 = vadd.f32 %v2245_v58, %v8202_v54  ;;  %v3134_v47 = vstv %s8276_s10  ;;  %v9979_v44 = vld [vmem:[#allocation204_spill] sm:$0xff]  ;;  %v9981_v58 = vld [vmem:[#allocation209_spill] sm:$0xff]  ;;  %s8695_s10 = sld [smem:[#allocation2 + $0x85]] }
 0x319   : > { %3843 = vrot.lane.b32.xlu1 %v3836_v32, %s5246_s26  ;;  %3841 = vrot.lane.b32.xlu0 %v3834_v5, %s5246_s26  ;;  %v8337_v32 = vadd.f32 %v2282_v8, %v8217_v62  ;;  %v8340_v5 = vmul.f32 %v7919_v61, %v3128_v33  ;;  %v2283_v24 = vsel %vm273_vm2, %v9979_v44, %v9978_v60  ;;  %v9980_v54 = vld [vmem:[#allocation208_spill] sm:$0xff]  ;;  %v3140_v8 = vstv %s8289_s11  ;;  %s8717_s11 = sld [smem:[#allocation2 + $0x66]] }
 0x31a   : > { %v2320_v62 = vsel %vm273_vm2, %v9981_v58, %v9980_v54  ;;  %v3874_v33 = vsel %vm553_vm0, %v3869_v15, %v3873_v21  ;;  %v3906_v2 = vrot.slane %v3892_v26, 1  ;;  %v3907_v13 = vrot.slane %v3894_v9, 1  ;;  %v9982_v26 = vld [vmem:[#allocation213_spill] sm:$0xff]  ;;  %v9983_v9 = vld [vmem:[#allocation214_spill] sm:$0xff] }
 0x31b   : > { %v8345_v48 = vpop.permute.xlu1 %3293  ;;  %v8347_v12 = vpop.permute.xlu0 %3291  ;;  %v3896_v41 = vmul.f32 %v7786_v46, %v3890_v50  ;;  %v3895_v42 = vmul.f32 %v7797_v11, %v3890_v50  ;;  %v3872_v6 = vsel %vm553_vm0, %v3866_v19, %v3871_v59  ;;  %v3903_v44 = vrot.slane %v3891_v0, 1  ;;  %v9984_v59 = vld [vmem:[#allocation215_spill] sm:$0xff]  ;;  %v9987_v0 = vld [vmem:[#allocation218_spill] sm:$0xff] }
 0x31c   : > { %v3904_v60 = vrot.slane %v3893_v52, 1  ;;  %v8366_v54 = vadd.f32 %v2283_v24, %v8234_v37  ;;  %v8369_v15 = vadd.f32 %v2320_v62, %v8237_v4  ;;  %v8372_v21 = vmul.f32 %v7862_v63, %v3134_v47  ;;  %v9985_v37 = vld [vmem:[#allocation216_spill] sm:$0xff]  ;;  %v9986_v4 = vld [vmem:[#allocation217_spill] sm:$0xff] }
 0x31d   : > { %3877 = vrot.lane.b32.xlu1 %v3870_v57, %s5246_s26  ;;  %3875 = vrot.lane.b32.xlu0 %v3867_v27, %s5246_s26  ;;  %v8375_v57 = vmul.f32 %v7919_v61, %v3134_v47  ;;  %v2321_v27 = vsel %vm273_vm2, %v9983_v9, %v9982_v26  ;;  %v2358_v24 = vsel %vm418_vm3, %v9985_v37, %v9984_v59  ;;  %v3911_v62 = vrot.slane %v3896_v41, 1 }
 0x31e   : > { %v2359_v52 = vsel %vm418_vm3, %v9987_v0, %v9986_v4  ;;  %v8391_v47 = vmul.f32 %v7862_v63, %v3140_v8  ;;  %v3908_v58 = vsel %vm553_vm0, %v3906_v2, %v3907_v13  ;;  %v3909_v26 = vrot.slane %v3895_v42, 1 }
 0x31f   : > { %v8377_v50 = vpop.permute.xlu1 %3313  ;;  %v8379_v19 = vpop.permute.xlu0 %3311  ;;  %v3930_v9 = vmul.f32 %v7854_v34, %v3928_v17  ;;  %v3905_v59 = vsel %vm553_vm0, %v3903_v44, %v3904_v60  ;;  %v3932_v37 = vmul.f32 %v7912_v43, %v3928_v17  ;;  %v3929_v23 = vmul.f32 %v7862_v63, %v3928_v17 }
 0x320   : > { %v3931_v4 = vmul.f32 %v7919_v61, %v3928_v17  ;;  %v8402_v0 = vadd.f32 %v2321_v27, %v8240_v7  ;;  %v3146_v41 = vstv %s8343_s22  ;;  %v2363_v44 = vadd.f32 %v2359_v52, %v8247_v22  ;;  %v9993_v27 = vld [vmem:[#allocation221_spill] sm:$0xff]  ;;  %s8769_s22 = sld [smem:[#allocation2 + $0x81]] }
 0x321   : > { %3881 = vrot.lane.b32.xlu1 %v3874_v33, %s5246_s26  ;;  %3879 = vrot.lane.b32.xlu0 %v3872_v6, %s5246_s26  ;;  %v2362_v33 = vadd.f32 %v2358_v24, %v8231_v35  ;;  %v8406_v6 = vmul.f32 %v7919_v61, %v3140_v8  ;;  %v2396_v7 = vsel %vm418_vm3, %v9992_v14, %v9991_v10  ;;  %v3945_v52 = vrot.slane %v3932_v37, 1 }
 0x322   : > { %v2397_v35 = vsel %vm418_vm3, %v9994_v29, %v9993_v27  ;;  %v3934_v8 = vmul.f32 %v7786_v46, %v3928_v17  ;;  %v3912_v24 = vsel %vm553_vm0, %v3907_v13, %v3911_v62  ;;  %v3933_v22 = vmul.f32 %v7797_v11, %v3928_v17  ;;  %v9999_v62 = vld [vmem:[#allocation223_spill] sm:$0xff] }
 0x323   : > { %9988 = vst [vmem:[#allocation83_spill] sm:$0xff] %v8406_v6  ;;  %v8411_v42 = vpop.permute.xlu1 %3317  ;;  %v8413_v2 = vpop.permute.xlu0 %3315  ;;  %v3910_v6 = vsel %vm553_vm0, %v3904_v60, %v3909_v26  ;;  %v3942_v14 = vrot.slane %v3931_v4, 1  ;;  %v3966_v10 = vstv %s8363_s23  ;;  %v2400_v29 = vadd.f32 %v2396_v7, %v8267_v31  ;;  %v10000_v26 = vld [vmem:[#allocation224_spill] sm:$0xff]  ;;  %v10001_v31 = vld [vmem:[#allocation225_spill] sm:$0xff]  ;;  %s8800_s23 = sld [smem:[#allocation2 + $0x1a]] }
 0x324   : > { %9989 = vst [vmem:[#allocation84_spill] sm:$0xff] %v8411_v42  ;;  %9990 = vst [vmem:[#allocation85_spill] sm:$0xff] %v8413_v2  ;;  %v3944_v2 = vrot.slane %v3930_v9, 1  ;;  %v3941_v42 = vrot.slane %v3929_v23, 1  ;;  %v8433_v27 = vadd.f32 %v7892_v28, %v2362_v33  ;;  %v8439_v13 = vmul.f32 %v7919_v61, %v3146_v41 }
 0x325   : > { %3915 = vrot.lane.b32.xlu1 %v3908_v58, %s5246_s26  ;;  %3913 = vrot.lane.b32.xlu0 %v3905_v59, %s5246_s26  ;;  %v8436_v58 = vmul.f32 %v7862_v63, %v3146_v41  ;;  %v2401_v23 = vadd.f32 %v2397_v35, %v8270_v3  ;;  %v2434_v9 = vsel %vm418_vm3, %v10000_v26, %v9999_v62  ;;  %v10002_v59 = vld [vmem:[#allocation226_spill] sm:$0xff]  ;;  %v3949_v37 = vrot.slane %v3934_v8, 1 }
 0x326   : > { %9996 = vst [vmem:[#allocation87_spill] sm:$0xff] %v8439_v13  ;;  %v2435_v28 = vsel %vm418_vm3, %v10002_v59, %v10001_v31  ;;  %v8453_v4 = vadd.f32 %v7895_v56, %v2363_v44  ;;  %v3947_v33 = vrot.slane %v3933_v22, 1  ;;  %v3968_v3 = vmul.f32 %v7854_v34, %v3966_v10  ;;  %v10008_v13 = vld [vmem:[#allocation56_spill] sm:$0xff] }
 0x327   : > { %9995 = vst [vmem:[#allocation86_spill] sm:$0xff] %v8436_v58  ;;  %v8441_v60 = vpop.permute.xlu1 %3337  ;;  %v8443_v17 = vpop.permute.xlu0 %3335  ;;  %v3970_v41 = vmul.f32 %v7912_v43, %v3966_v10  ;;  %v3946_v7 = vsel %vm553_vm0, %v3944_v2, %v3945_v52  ;;  %v3943_v35 = vsel %vm553_vm0, %v3941_v42, %v3942_v14  ;;  %v3967_v62 = vmul.f32 %v7862_v63, %v3966_v10  ;;  %v10006_v2 = vld [vmem:[#allocation227_spill] sm:$0xff]  ;;  %v10007_v42 = vld [vmem:[#allocation228_spill] sm:$0xff] }
 0x328   : > { %9997 = vst [vmem:[#allocation88_spill] sm:$0xff] %v8441_v60  ;;  %9998 = vst [vmem:[#allocation89_spill] sm:$0xff] %v8443_v17  ;;  %v8463_v8 = vmul.f32 %v7919_v61, %v3966_v10  ;;  %v2438_v56 = vadd.f32 %v2434_v9, %v8273_v1  ;;  %v2439_v44 = vadd.f32 %v2435_v28, %v8301_v16  ;;  %v9469_v22 = vstv %s8409_s25 }
 0x329   : > { %3919 = vrot.lane.b32.xlu1 %v3912_v24, %s5246_s26  ;;  %3917 = vrot.lane.b32.xlu0 %v3910_v6, %s5246_s26  ;;  %v10003_v6 = vld [vmem:[#allocation53_spill] sm:$0xff]  ;;  %v2472_v59 = vsel %vm418_vm3, %v10007_v42, %v10006_v2  ;;  %v8479_v58 = vadd.f32 %v10008_v13, %v2401_v23  ;;  %v8484_v1 = vmul.f32 %v7919_v61, %v9469_v22  ;;  %v3982_v9 = vrot.slane %v3968_v3, 1 }
 0x32a   : > { %v8468_v24 = vadd.f32 %v10003_v6, %v2400_v29  ;;  %v3950_v16 = vsel %vm553_vm0, %v3945_v52, %v3949_v37  ;;  %v3948_v29 = vsel %vm553_vm0, %v3942_v14, %v3947_v33  ;;  %v3983_v28 = vrot.slane %v3970_v41, 1  ;;  %v10009_v37 = vld [vmem:[#allocation229_spill] sm:$0xff]  ;;  %v10011_v33 = vld [vmem:[#allocation59_spill] sm:$0xff] }
 0x32b   : > { %v8471_v26 = vpop.permute.xlu1 %3341  ;;  %v8473_v31 = vpop.permute.xlu0 %3339  ;;  %v3972_v6 = vmul.f32 %v7786_v46, %v3966_v10  ;;  %v3979_v2 = vrot.slane %v3967_v62, 1  ;;  %v3980_v13 = vrot.slane %v8463_v8, 1  ;;  %v3971_v23 = vmul.f32 %v7797_v11, %v3966_v10  ;;  %v10014_v11 = vld [vmem:[#allocation9_spill] sm:$0xff]  ;;  %v10015_v10 = vld [vmem:[#allocation10_spill] sm:$0xff]  ;;  %v10016_v8 = vld [vmem:[#allocation11_spill] sm:$0xff] }
 0x32c   : > { %10004 = vst [vmem:[#allocation90_spill] sm:$0xff] %v8471_v26  ;;  %10005 = vst [vmem:[#allocation91_spill] sm:$0xff] %v8473_v31  ;;  %v4106_v42 = vstv %s8429_s28  ;;  %v2476_v52 = vadd.f32 %v2472_v59, %v8304_v25  ;;  %v8501_v14 = vadd.f32 %v7982_v20, %v2438_v56  ;;  %v8504_v3 = vadd.f32 %v10011_v33, %v2439_v44  ;;  %v10017_v25 = vld [vmem:[#allocation12_spill] sm:$0xff]  ;;  %v10018_v22 = vld [vmem:[#allocation205_spill] sm:$0xff]  ;;  %s8806_s28 = sld [smem:[#allocation2 + $0x9c]] }
 0x32d   : > { %3953 = vrot.lane.b32.xlu1 %v3946_v7, %s5246_s26  ;;  %3951 = vrot.lane.b32.xlu0 %v3943_v35, %s5246_s26  ;;  %v10010_v7 = vld [vmem:[#allocation230_spill] sm:$0xff]  ;;  %v2510_v62 = vsel %vm418_vm3, %v10015_v10, %v10014_v11  ;;  %v2511_v59 = vsel %vm418_vm3, %v10017_v25, %v10016_v8  ;;  %v10020_v56 = vld [vmem:[#allocation207_spill] sm:$0xff]  ;;  %v3984_v33 = vsel %vm553_vm0, %v3982_v9, %v3983_v28  ;;  %v3987_v11 = vrot.slane %v3972_v6, 1  ;;  %v10026_v26 = vld [vmem:[#allocation68_spill] sm:$0xff] }
 0x32e   : > { %v2473_v35 = vsel %vm418_vm3, %v10010_v7, %v10009_v37  ;;  %v10019_v37 = vld [vmem:[#allocation206_spill] sm:$0xff]  ;;  %v10021_v7 = vld [vmem:[#allocation13_spill] sm:$0xff]  ;;  %v4108_v10 = vmul.f32 %v7854_v34, %v4106_v42  ;;  %v4110_v8 = vmul.f32 %v7912_v43, %v4106_v42  ;;  %v3985_v25 = vrot.slane %v3971_v23, 1 }
 0x32f   : > { %v8506_v46 = vpop.permute.xlu1 %3361  ;;  %v8508_v41 = vpop.permute.xlu0 %3359  ;;  %v2548_v20 = vsel %vm418_vm3, %v10019_v37, %v10018_v22  ;;  %v2549_v44 = vsel %vm418_vm3, %v10021_v7, %v10020_v56  ;;  %v3981_v22 = vsel %vm553_vm0, %v3979_v2, %v3980_v13  ;;  %v4107_v37 = vmul.f32 %v7862_v63, %v4106_v42  ;;  %v10024_v23 = vld [vmem:[#allocation14_spill] sm:$0xff] }
 0x330   : > { %10012 = vst [vmem:[#allocation92_spill] sm:$0xff] %v8506_v46  ;;  %10013 = vst [vmem:[#allocation93_spill] sm:$0xff] %v8508_v41  ;;  %v4109_v56 = vmul.f32 %v7919_v61, %v4106_v42  ;;  %v2477_v7 = vadd.f32 %v2473_v35, %v8334_v38  ;;  %v2552_v9 = vadd.f32 %v2548_v20, %v8369_v15  ;;  %v10025_v46 = vld [vmem:[#allocation17_spill] sm:$0xff]  ;;  %v8548_v35 = vld [vmem:[%s5376_s9 + $0xc8] sm:$0xff]  ;;  %v4122_v15 = vrot.slane %v4108_v10, 2 }
 0x331   : > { %3957 = vrot.lane.b32.xlu1 %v3950_v16, %s5246_s26  ;;  %3955 = vrot.lane.b32.xlu0 %v3948_v29, %s5246_s26  ;;  %v2514_v16 = vadd.f32 %v2510_v62, %v8337_v32  ;;  %v2515_v29 = vadd.f32 %v2511_v59, %v8366_v54  ;;  %v2553_v2 = vadd.f32 %v2549_v44, %v8402_v0  ;;  %v4123_v62 = vrot.slane %v4110_v8, 2  ;;  %v8555_v0 = vld [vmem:[%s5376_s9 + $0xc0] sm:$0xff]  ;;  %v10029_v10 = vld [vmem:[#allocation18_spill] sm:$0xff]  ;;  %v10030_v8 = vld [vmem:[#allocation19_spill] sm:$0xff] }
 0x332   : > { %v2688_v31 = vsel %vm273_vm2, %v10025_v46, %v10024_v23  ;;  %v8545_v38 = vadd.f32 %v10026_v26, %v2476_v52  ;;  %v4112_v32 = vmul.f32 %v8548_v35, %v4106_v42  ;;  %v3988_v54 = vsel %vm553_vm0, %v3983_v28, %v3987_v11 }
 0x333   : > { %v8536_v6 = vpop.permute.xlu1 %3365  ;;  %v8538_v41 = vpop.permute.xlu0 %3363  ;;  %v4111_v46 = vmul.f32 %v8555_v0, %v4106_v42  ;;  %v3986_v26 = vsel %vm553_vm0, %v3980_v13, %v3985_v25  ;;  %v4119_v52 = vrot.slane %v4107_v37, 2  ;;  %v4120_v59 = vrot.slane %v4109_v56, 2 }
 0x334   : > { %10022 = vst [vmem:[#allocation94_spill] sm:$0xff] %v8536_v6  ;;  %10023 = vst [vmem:[#allocation95_spill] sm:$0xff] %v8538_v41  ;;  %v4144_v20 = vstv %s8494_s29  ;;  %v8563_v44 = vadd.f32 %v8054_v36, %v2477_v7  ;;  %v8569_v28 = vadd.f32 %v8096_v55, %v2515_v29  ;;  %v8572_v11 = vadd.f32 %v8112_v18, %v2552_v9  ;;  %v10032_v9 = vld [vmem:[#allocation15_spill] sm:$0xff]  ;;  %s8869_s29 = sld [smem:[#allocation2 + $0x35]] }
 0x335   : > { %3991 = vrot.lane.b32.xlu1 %v3984_v33, %s5246_s26  ;;  %3989 = vrot.lane.b32.xlu0 %v3981_v22, %s5246_s26  ;;  %v8566_v33 = vadd.f32 %v8057_v49, %v2514_v16  ;;  %v2689_v22 = vsel %vm273_vm2, %v10030_v8, %v10029_v10  ;;  %v8582_v36 = vadd.f32 %v8144_v40, %v2553_v2  ;;  %v4127_v25 = vrot.slane %v4112_v32, 2  ;;  %v10039_v8 = vld [vmem:[#allocation22_spill] sm:$0xff] }
 0x336   : > { %v3446_v49 = vstv %s8522_s30  ;;  %v8588_v55 = vadd.f32 %v2688_v31, %v8433_v27  ;;  %v4124_v18 = vsel %vm1112_vm1, %v4122_v15, %v4123_v62  ;;  %v4125_v37 = vrot.slane %v4111_v46, 2  ;;  %v10031_v31 = vld [vmem:[#allocation20_spill] sm:$0xff]  ;;  %v10036_v46 = vld [vmem:[#allocation210_spill] sm:$0xff]  ;;  %s8915_s30 = sld [smem:[#allocation2 + $0x50]] }
 0x337   : > { %v8574_v42 = vpop.permute.xlu1 %3385  ;;  %v8576_v13 = vpop.permute.xlu0 %3383  ;;  %v4146_v56 = vmul.f32 %v7854_v34, %v4144_v20  ;;  %v4121_v7 = vsel %vm1112_vm1, %v4119_v52, %v4120_v59  ;;  %v4148_v40 = vmul.f32 %v7912_v43, %v4144_v20  ;;  %v4145_v16 = vmul.f32 %v7862_v63, %v4144_v20  ;;  %v10035_v15 = vld [vmem:[#allocation16_spill] sm:$0xff]  ;;  %v10038_v52 = vld [vmem:[#allocation21_spill] sm:$0xff] }
 0x338   : > { %10027 = vst [vmem:[#allocation96_spill] sm:$0xff] %v8574_v42  ;;  %10028 = vst [vmem:[#allocation97_spill] sm:$0xff] %v8576_v13  ;;  %v4147_v29 = vmul.f32 %v7919_v61, %v4144_v20  ;;  %v8599_v27 = vadd.f32 %v2689_v22, %v8453_v4  ;;  %v2726_v2 = vsel %vm273_vm2, %v10032_v9, %v10031_v31  ;;  %v10037_v4 = vld [vmem:[#allocation211_spill] sm:$0xff]  ;;  %v10040_v22 = vld [vmem:[#allocation212_spill] sm:$0xff] }
 0x339   : > { %3995 = vrot.lane.b32.xlu1 %v3988_v54, %s5246_s26  ;;  %3993 = vrot.lane.b32.xlu0 %v3986_v26, %s5246_s26  ;;  %v3447_v34 = vmul.f32 %v7862_v63, %v3446_v49  ;;  %v8610_v54 = vmul.f32 %v7919_v61, %v3446_v49  ;;  %v2727_v26 = vsel %vm273_vm2, %v10036_v46, %v10035_v15 }
 0x33a   : > { %v2764_v10 = vsel %vm273_vm2, %v10038_v52, %v10037_v4  ;;  %v2765_v31 = vsel %vm273_vm2, %v10040_v22, %v10039_v8  ;;  %v4128_v9 = vsel %vm1112_vm1, %v4123_v62, %v4127_v25  ;;  %v4126_v63 = vsel %vm1112_vm1, %v4120_v59, %v4125_v37 }
 0x33b   : > { %v8604_v23 = vpop.permute.xlu1 %3389  ;;  %v8606_v32 = vpop.permute.xlu0 %3387  ;;  %v4150_v15 = vmul.f32 %v8548_v35, %v4144_v20  ;;  %v4149_v46 = vmul.f32 %v8555_v0, %v4144_v20  ;;  %v4161_v4 = vrot.slane %v4148_v40, 2  ;;  %v4157_v52 = vrot.slane %v4145_v16, 2 }
 0x33c   : > { %10033 = vst [vmem:[#allocation98_spill] sm:$0xff] %v8604_v23  ;;  %10034 = vst [vmem:[#allocation99_spill] sm:$0xff] %v8606_v32  ;;  %v4160_v32 = vrot.slane %v4146_v56, 2  ;;  %v4158_v23 = vrot.slane %v4147_v29, 2  ;;  %v4182_v8 = vstv %s8560_s4  ;;  %v8633_v62 = vadd.f32 %v2726_v2, %v8468_v24  ;;  %v8654_v2 = vld [vmem:[%s5376_s9 + $0xa8] sm:$0xff]  ;;  %s9024_s4 = sld [smem:[#allocation2 + $0x86]] }
 0x33d   : > { %4131 = vrot.lane.b32.xlu1 %v4124_v18, %s5245_s27  ;;  %4129 = vrot.lane.b32.xlu0 %v4121_v7, %s5245_s27  ;;  %v3453_v59 = vrot.slane %v3447_v34, 1  ;;  %v3454_v37 = vrot.slane %v8610_v54, 1  ;;  %v3449_v20 = vmul.f32 %v8555_v0, %v3446_v49  ;;  %v8642_v56 = vadd.f32 %v2727_v26, %v8479_v58 }
 0x33e   : > { %v8645_v7 = vadd.f32 %v2764_v10, %v8501_v14  ;;  %v8648_v40 = vadd.f32 %v2765_v31, %v8504_v3  ;;  %v3463_v24 = vstv %s8585_s5  ;;  %v4165_v16 = vrot.slane %v4150_v15, 2  ;;  %v8661_v3 = vld [vmem:[%s5376_s9 + $0xa0] sm:$0xff]  ;;  %v10046_v15 = vld [vmem:[#allocation24_spill] sm:$0xff]  ;;  %s9070_s5 = sld [smem:[#allocation2 + $0xa1]] }
 0x33f   : > { %v8635_v25 = vpop.permute.xlu1 %3409  ;;  %v8637_v18 = vpop.permute.xlu0 %3407  ;;  %v4163_v29 = vrot.slane %v4149_v46, 2  ;;  %v4184_v49 = vmul.f32 %v8654_v2, %v4182_v8  ;;  %v4186_v58 = vmul.f32 %v7912_v43, %v4182_v8  ;;  %v4162_v14 = vsel %vm1112_vm1, %v4160_v32, %v4161_v4 }
 0x340   : > { %10041 = vst [vmem:[#allocation100_spill] sm:$0xff] %v8635_v25  ;;  %10042 = vst [vmem:[#allocation101_spill] sm:$0xff] %v8637_v18  ;;  %v4159_v34 = vsel %vm1112_vm1, %v4157_v52, %v4158_v23  ;;  %v4183_v54 = vmul.f32 %v8661_v3, %v4182_v8  ;;  %v8665_v26 = vmul.f32 %v7919_v61, %v4182_v8  ;;  %v10047_v52 = vld [vmem:[#allocation25_spill] sm:$0xff]  ;;  %v10048_v18 = vld [vmem:[#allocation26_spill] sm:$0xff] }
 0x341   : > { %4135 = vrot.lane.b32.xlu1 %v4128_v9, %s5245_s27  ;;  %4133 = vrot.lane.b32.xlu0 %v4126_v63, %s5245_s27  ;;  %v8672_v31 = vsel %vm553_vm0, %v3453_v59, %v3454_v37  ;;  %v3456_v9 = vrot.slane %v3449_v20, 1  ;;  %v8675_v43 = vmul.f32 %v8661_v3, %v3463_v24  ;;  %v8678_v32 = vmul.f32 %v7919_v61, %v3463_v24  ;;  %v10045_v63 = vld [vmem:[#allocation23_spill] sm:$0xff] }
 0x342   : > { %v2802_v46 = vsel %vm273_vm2, %v10046_v15, %v10045_v63  ;;  %v3480_v59 = vstv %s8622_s7  ;;  %v4166_v20 = vsel %vm1112_vm1, %v4161_v4, %v4165_v16  ;;  %v4164_v61 = vsel %vm1112_vm1, %v4158_v23, %v4163_v29  ;;  %s4998_s7 = sld [smem:[#allocation2 + $0x4e]] }
 0x343   : > { %v8667_v10 = vpop.permute.xlu1 %3413  ;;  %v8669_v22 = vpop.permute.xlu0 %3411  ;;  %v4198_v25 = vrot.slane %v4184_v49, 2  ;;  %v4199_v13 = vrot.slane %v4186_v58, 2  ;;  %v4195_v42 = vrot.slane %v4183_v54, 2  ;;  %v4196_v63 = vrot.slane %v8665_v26, 2  ;;  %v8724_v54 = vld [vmem:[%s5376_s9 + $0xb8] sm:$0xff] }
 0x344   : > { %10043 = vst [vmem:[#allocation102_spill] sm:$0xff] %v8667_v10  ;;  %10044 = vst [vmem:[#allocation103_spill] sm:$0xff] %v8669_v22  ;;  %v2803_v10 = vsel %vm273_vm2, %v10048_v18, %v10047_v52  ;;  %v4188_v22 = vmul.f32 %v8548_v35, %v4182_v8  ;;  %v4187_v15 = vmul.f32 %v8555_v0, %v4182_v8  ;;  %v4220_v18 = vstv %s8630_s8  ;;  %s9293_s8 = sld [smem:[#allocation4]] }
 0x345   : > { %4169 = vrot.lane.b32.xlu1 %v4162_v14, %s5245_s27  ;;  %4167 = vrot.lane.b32.xlu0 %v4159_v34, %s5245_s27  ;;  %v8698_v52 = vadd.f32 %v2802_v46, %v8545_v38  ;;  %v8705_v23 = vsel %vm553_vm0, %v3454_v37, %v3456_v9  ;;  %v3466_v16 = vmul.f32 %v8555_v0, %v3463_v24  ;;  %v3470_v58 = vrot.slane %v8675_v43, 1  ;;  %v8714_v38 = vld [vmem:[%s5376_s9 + $0xb0] sm:$0xff] }
 0x346   : > { %10051 = vst [vmem:[#allocation106_spill] sm:$0xff] %v8705_v23  ;;  %v3481_v29 = vmul.f32 %v8661_v3, %v3480_v59  ;;  %v8710_v8 = vadd.f32 %v2803_v10, %v8563_v44  ;;  %v4203_v49 = vrot.slane %v4188_v22, 2  ;;  %v3482_v34 = vmul.f32 %v8714_v38, %v3480_v59  ;;  %v10052_v46 = vld [vmem:[#allocation27_spill] sm:$0xff]  ;;  %v10054_v23 = vld [vmem:[#allocation29_spill] sm:$0xff] }
 0x347   : > { %v8700_v14 = vpop.permute.xlu1 %3433  ;;  %v8702_v4 = vpop.permute.xlu0 %3431  ;;  %v4200_v37 = vsel %vm1112_vm1, %v4198_v25, %v4199_v13  ;;  %v4222_v24 = vmul.f32 %v8654_v2, %v4220_v18  ;;  %v4224_v44 = vmul.f32 %v8724_v54, %v4220_v18  ;;  %v3471_v26 = vrot.slane %v8678_v32, 1  ;;  %v10055_v32 = vld [vmem:[#allocation30_spill] sm:$0xff] }
 0x348   : > { %10049 = vst [vmem:[#allocation104_spill] sm:$0xff] %v8700_v14  ;;  %10050 = vst [vmem:[#allocation105_spill] sm:$0xff] %v8702_v4  ;;  %v4197_v10 = vsel %vm1112_vm1, %v4195_v42, %v4196_v63  ;;  %v4201_v22 = vrot.slane %v4187_v15, 2  ;;  %v4221_v9 = vmul.f32 %v8661_v3, %v4220_v18  ;;  %v4223_v43 = vmul.f32 %v8714_v38, %v4220_v18 }
 0x349   : > { %4173 = vrot.lane.b32.xlu1 %v4166_v20, %s5245_s27  ;;  %4171 = vrot.lane.b32.xlu0 %v4164_v61, %s5245_s27  ;;  %v10053_v20 = vld [vmem:[#allocation28_spill] sm:$0xff]  ;;  %v3473_v14 = vrot.slane %v3466_v16, 1  ;;  %v3487_v41 = vrot.slane %v3481_v29, 1  ;;  %v3483_v6 = vmul.f32 %v8555_v0, %v3480_v59  ;;  %v2841_v42 = vsel %vm273_vm2, %v10055_v32, %v10054_v23 }
 0x34a   : > { %v2840_v61 = vsel %vm273_vm2, %v10053_v20, %v10052_v46  ;;  %v4204_v17 = vsel %vm1112_vm1, %v4199_v13, %v4203_v49  ;;  %v3488_v60 = vrot.slane %v3482_v34, 1  ;;  %v4236_v46 = vrot.slane %v4222_v24, 2 }
 0x34b   : > { %v3438_v25 = vpop.permute.xlu1 %3437  ;;  %v3436_v4 = vpop.permute.xlu0 %3435  ;;  %v4237_v16 = vrot.slane %v4224_v44, 2  ;;  %v4226_v29 = vmul.f32 %v8548_v35, %v4220_v18  ;;  %v4225_v59 = vmul.f32 %v8555_v0, %v4220_v18  ;;  %v4202_v20 = vsel %vm1112_vm1, %v4196_v63, %v4201_v22 }
 0x34c   : > { %v8739_v15 = vsel %vm418_vm3, %v3436_v4, %v3438_v25  ;;  %v4233_v23 = vrot.slane %v4221_v9, 2  ;;  %v4234_v32 = vrot.slane %v4223_v43, 2  ;;  %v4258_v4 = vstv %s8695_s10  ;;  %s4999_s10 = sld [smem:[#allocation2 + $0x69]] }
 0x34d   : > { %4207 = vrot.lane.b32.xlu1 %v4200_v37, %s5245_s27  ;;  %4205 = vrot.lane.b32.xlu0 %v4197_v10, %s5245_s27  ;;  %v8751_v13 = vadd.f32 %v2840_v61, %v8566_v33  ;;  %v8754_v37 = vsel %vm553_vm0, %v3470_v58, %v3471_v26  ;;  %v8757_v24 = vsel %vm553_vm0, %v3471_v26, %v3473_v14  ;;  %v3490_v44 = vrot.slane %v3483_v6, 1 }
 0x34e   : > { %v8760_v18 = vadd.f32 %v2841_v42, %v8569_v28  ;;  %v8766_v10 = vsel %vm553_vm0, %v3487_v41, %v3488_v60  ;;  %v3497_v33 = vstv %s8717_s11  ;;  %v4238_v14 = vsel %vm1112_vm1, %v4236_v46, %v4237_v16  ;;  %s9312_s11 = sld [smem:[#allocation4 + $0x1]] }
 0x34f   : > { %10056 = vst [vmem:[#allocation107_spill] sm:$0xff] %v8751_v13  ;;  %v3574_v49 = vpop.permute.xlu1 %3573  ;;  %v3572_v34 = vpop.permute.xlu0 %3571  ;;  %10058 = vst [vmem:[#allocation113_spill] sm:$0xff] %v8766_v10  ;;  %v4241_v58 = vrot.slane %v4226_v29, 2  ;;  %v4239_v6 = vrot.slane %v4225_v59, 2  ;;  %v4260_v28 = vmul.f32 %v8654_v2, %v4258_v4  ;;  %v4235_v26 = vsel %vm1112_vm1, %v4233_v23, %v4234_v32  ;;  %v10060_v29 = vld [vmem:[#allocation31_spill] sm:$0xff]  ;;  %v10061_v59 = vld [vmem:[#allocation32_spill] sm:$0xff] }
 0x350   : > { %10057 = vst [vmem:[#allocation108_spill] sm:$0xff] %v8760_v18  ;;  %v8763_v63 = vsel %vm273_vm2, %v3572_v34, %v3574_v49  ;;  %v4262_v22 = vmul.f32 %v8724_v54, %v4258_v4  ;;  %v4259_v41 = vmul.f32 %v8661_v3, %v4258_v4  ;;  %v4261_v9 = vmul.f32 %v8714_v38, %v4258_v4  ;;  %v10062_v23 = vld [vmem:[#allocation33_spill] sm:$0xff]  ;;  %v10063_v49 = vld [vmem:[#allocation34_spill] sm:$0xff] }
 0x351   : > { %4211 = vrot.lane.b32.xlu1 %v4204_v17, %s5245_s27  ;;  %4209 = vrot.lane.b32.xlu0 %v4202_v20, %s5245_s27  ;;  %v8780_v17 = vsel %vm553_vm0, %v3488_v60, %v3490_v44  ;;  %v3498_v25 = vmul.f32 %v8661_v3, %v3497_v33  ;;  %v3499_v42 = vmul.f32 %v8714_v38, %v3497_v33 }
 0x352   : > { %10059 = vst [vmem:[#allocation114_spill] sm:$0xff] %v8780_v17  ;;  %v3500_v46 = vmul.f32 %v8555_v0, %v3497_v33  ;;  %v2878_v20 = vsel %vm273_vm2, %v10061_v59, %v10060_v29  ;;  %v2879_v34 = vsel %vm273_vm2, %v10063_v49, %v10062_v23  ;;  %v4264_v60 = vmul.f32 %v8548_v35, %v4258_v4 }
 0x353   : > { %v3578_v43 = vpop.permute.xlu1 %3577  ;;  %v3576_v61 = vpop.permute.xlu0 %3575  ;;  %v4242_v44 = vsel %vm1112_vm1, %v4237_v16, %v4241_v58  ;;  %v4240_v33 = vsel %vm1112_vm1, %v4234_v32, %v4239_v6  ;;  %v4274_v17 = vrot.slane %v4260_v28, 2  ;;  %v4263_v29 = vmul.f32 %v8555_v0, %v4258_v4  ;;  %v10065_v32 = vld [vmem:[#allocation35_spill] sm:$0xff]  ;;  %v10066_v58 = vld [vmem:[#allocation36_spill] sm:$0xff] }
 0x354   : > { %v8792_v18 = vsel %vm273_vm2, %v3576_v61, %v3578_v43  ;;  %v4275_v59 = vrot.slane %v4262_v22, 2  ;;  %v4271_v23 = vrot.slane %v4259_v41, 2  ;;  %v4272_v43 = vrot.slane %v4261_v9, 2 }
 0x355   : > { %4245 = vrot.lane.b32.xlu1 %v4238_v14, %s5245_s27  ;;  %4243 = vrot.lane.b32.xlu0 %v4235_v26, %s5245_s27  ;;  %v4296_v61 = vstv %s8748_s19  ;;  %v8804_v49 = vadd.f32 %v2878_v20, %v8572_v11  ;;  %v3504_v26 = vrot.slane %v3498_v25, 1  ;;  %v3505_v10 = vrot.slane %v3499_v42, 1  ;;  %s198_s19 = sand.u32 1, %s5217_s12   ;;  %s9326_s12 = sld [smem:[#allocation2 + $0x84]] }
 0x356   : > { %v3507_v16 = vrot.slane %v3500_v46, 1  ;;  %v2916_v4 = vsel %vm418_vm3, %v10066_v58, %v10065_v32  ;;  %v4279_v28 = vrot.slane %v4264_v60, 2  ;;  %v8815_v22 = vstv %s8769_s22  ;;  %v10073_v32 = vld [vmem:[#allocation39_spill] sm:$0xff]  ;;  %v10074_v58 = vld [vmem:[#allocation40_spill] sm:$0xff]  ;;  %s5036_s22 = smul.u32 96, %s198_s19 }
 0x357   : > { %10064 = vst [vmem:[#allocation109_spill] sm:$0xff] %v8804_v49  ;;  %v3612_v14 = vpop.permute.xlu1 %3611  ;;  %v3610_v13 = vpop.permute.xlu0 %3609  ;;  %10067 = vst [vmem:[#allocation110_spill] sm:$0xff] %v8815_v22  ;;  %v8818_v11 = vadd.f32 %v2879_v34, %v8582_v36  ;;  %v4277_v41 = vrot.slane %v4263_v29, 2  ;;  %v4298_v9 = vmul.f32 %v8654_v2, %v4296_v61  ;;  %v8824_v25 = vmul.f32 %v8724_v54, %v4296_v61  ;;  %v10071_v29 = vld [vmem:[#allocation37_spill] sm:$0xff] }
 0x358   : > { %v8812_v6 = vsel %vm273_vm2, %v3610_v13, %v3612_v14  ;;  %v4276_v42 = vsel %vm1112_vm1, %v4274_v17, %v4275_v59  ;;  %v4273_v13 = vsel %vm1112_vm1, %v4271_v23, %v4272_v43  ;;  %v4297_v46 = vmul.f32 %v8661_v3, %v4296_v61  ;;  %v10072_v23 = vld [vmem:[#allocation38_spill] sm:$0xff] }
 0x359   : > { %4249 = vrot.lane.b32.xlu1 %v4242_v44, %s5245_s27  ;;  %4247 = vrot.lane.b32.xlu0 %v4240_v33, %s5245_s27  ;;  %v8830_v20 = vmul.f32 %v8714_v38, %v4296_v61  ;;  %v2920_v36 = vadd.f32 %v2916_v4, %v8588_v55  ;;  %v8834_v44 = vsel %vm553_vm0, %v3504_v26, %v3505_v10 }
 0x35a   : > { %10068 = vst [vmem:[#allocation111_spill] sm:$0xff] %v8834_v44  ;;  %v8837_v33 = vsel %vm553_vm0, %v3505_v10, %v3507_v16  ;;  %v8841_v17 = vmul.f32 %v8661_v3, %v8815_v22  ;;  %v2917_v14 = vsel %vm418_vm3, %v10072_v23, %v10071_v29  ;;  %v2954_v55 = vsel %vm418_vm3, %v10074_v58, %v10073_v32  ;;  %v10082_v44 = vld [vmem:[#allocation46_spill] sm:$0xff] }
 0x35b   : > { %v3616_v34 = vpop.permute.xlu1 %3615  ;;  %v3614_v60 = vpop.permute.xlu0 %3613  ;;  %10069 = vst [vmem:[#allocation112_spill] sm:$0xff] %v8837_v33  ;;  %v4280_v26 = vsel %vm1112_vm1, %v4275_v59, %v4279_v28  ;;  %v4278_v10 = vsel %vm1112_vm1, %v4272_v43, %v4277_v41  ;;  %v4312_v16 = vrot.slane %v4298_v9, 2  ;;  %v4313_v33 = vrot.slane %v8824_v25, 2  ;;  %v10077_v9 = vld [vmem:[#allocation41_spill] sm:$0xff]  ;;  %v10078_v25 = vld [vmem:[#allocation42_spill] sm:$0xff] }
 0x35c   : > { %10070 = vst [vmem:[#allocation115_spill] sm:$0xff] %v8841_v17  ;;  %v8850_v4 = vsel %vm273_vm2, %v3614_v60, %v3616_v34  ;;  %v4334_v29 = vstv %s8800_s23  ;;  %v4309_v23 = vrot.slane %v4297_v46, 2  ;;  %v4310_v49 = vrot.slane %v8830_v20, 2  ;;  %v10083_v17 = vld [vmem:[#allocation47_spill] sm:$0xff]  ;;  %s9333_s23 = sld [smem:[#allocation4 + $0x2]] }
 0x35d   : > { %4283 = vrot.lane.b32.xlu1 %v4276_v42, %s5245_s27  ;;  %4281 = vrot.lane.b32.xlu0 %v4273_v13, %s5245_s27  ;;  %v4302_v32 = vmul.f32 %v8548_v35, %v4296_v61  ;;  %v4301_v34 = vmul.f32 %v8555_v0, %v4296_v61  ;;  %v2921_v59 = vadd.f32 %v2917_v14, %v8599_v27  ;;  %v8872_v41 = vstv %s8806_s28  ;;  %s9342_s28 = scalar_lea.vmem [#allocation6], %s5036_s22 }
 0x35e   : > { %v8863_v28 = vadd.f32 %v8307_v39, %v2920_v36  ;;  %v8867_v43 = vmul.f32 %v8714_v38, %v8815_v22  ;;  %10076 = vst [vmem:[#allocation117_spill] sm:$0xff] %v8872_v41  ;;  %v2955_v46 = vsel %vm418_vm3, %v10078_v25, %v10077_v9  ;;  %v4336_v39 = vmul.f32 %v8654_v2, %v4334_v29  ;;  %v10079_v25 = vld [vmem:[#allocation43_spill] sm:$0xff]  ;;  %v10080_v22 = vld [vmem:[#allocation44_spill] sm:$0xff] }
 0x35f   : > { %v3650_v42 = vpop.permute.xlu1 %3649  ;;  %v3648_v13 = vpop.permute.xlu0 %3647  ;;  %v8882_v27 = vmul.f32 %v8724_v54, %v4334_v29  ;;  %v2958_v20 = vadd.f32 %v2954_v55, %v8633_v62  ;;  %v4335_v36 = vmul.f32 %v8661_v3, %v4334_v29  ;;  %v8889_v60 = vmul.f32 %v8714_v38, %v4334_v29 }
 0x360   : > { %10075 = vst [vmem:[#allocation116_spill] sm:$0xff] %v8867_v43  ;;  %v8878_v61 = vsel %vm273_vm2, %v3648_v13, %v3650_v42  ;;  %v4314_v14 = vsel %vm1112_vm1, %v4312_v16, %v4313_v33  ;;  %v4311_v58 = vsel %vm1112_vm1, %v4309_v23, %v4310_v49  ;;  %v4317_v42 = vrot.slane %v4302_v32, 2  ;;  %v10081_v16 = vld [vmem:[#allocation45_spill] sm:$0xff] }
 0x361   : > { %4287 = vrot.lane.b32.xlu1 %v4280_v26, %s5245_s27  ;;  %4285 = vrot.lane.b32.xlu0 %v4278_v10, %s5245_s27  ;;  %v4315_v13 = vrot.slane %v4301_v34, 2  ;;  %v2959_v9 = vadd.f32 %v2955_v46, %v8642_v56  ;;  %v2992_v62 = vsel %vm418_vm3, %v10080_v22, %v10079_v25  ;;  %v8899_v10 = vmul.f32 %v8714_v38, %v8872_v41 }
 0x362   : > { %v3534_v43 = vmul.f32 %v8555_v0, %v8872_v41  ;;  %v2993_v23 = vsel %vm418_vm3, %v10082_v44, %v10081_v16  ;;  %v4350_v56 = vrot.slane %v4336_v39, 2  ;;  %v4351_v22 = vrot.slane %v8882_v27, 2 }
 0x363   : > { %v3654_v55 = vpop.permute.xlu1 %3653  ;;  %v3652_v26 = vpop.permute.xlu0 %3651  ;;  %v4347_v34 = vrot.slane %v4335_v36, 2  ;;  %v4348_v46 = vrot.slane %v8889_v60, 2  ;;  %v4340_v25 = vmul.f32 %v8548_v35, %v4334_v29  ;;  %v4339_v41 = vmul.f32 %v8555_v0, %v4334_v29 }
 0x364   : > { %v8907_v32 = vsel %vm273_vm2, %v3652_v26, %v3654_v55  ;;  %v8918_v44 = vadd.f32 %v8310_v45, %v2921_v59  ;;  %v8921_v39 = vadd.f32 %v8323_v51, %v2958_v20  ;;  %v4318_v27 = vsel %vm1112_vm1, %v4313_v33, %v4317_v42  ;;  %v10084_v45 = vld [vmem:[#allocation48_spill] sm:$0xff] }
 0x365   : > { %4321 = vrot.lane.b32.xlu1 %v4314_v14, %s5245_s27  ;;  %4319 = vrot.lane.b32.xlu0 %v4311_v58, %s5245_s27  ;;  %v4316_v14 = vsel %vm1112_vm1, %v4310_v49, %v4315_v13  ;;  %v2996_v36 = vadd.f32 %v2992_v62, %v8645_v7  ;;  %v4372_v55 = vstv %s8869_s29  ;;  %v3539_v26 = vrot.slane %v8899_v10, 1  ;;  %v10086_v62 = vld [vmem:[#allocation50_spill] sm:$0xff]  ;;  %s9361_s29 = sld [smem:[#allocation4 + $0x3]] }
 0x366   : > { %v3541_v29 = vrot.slane %v3534_v43, 1  ;;  %v2997_v16 = vadd.f32 %v2993_v23, %v8648_v40  ;;  %v3030_v59 = vsel %vm418_vm3, %v10084_v45, %v10083_v17  ;;  %v8933_v51 = vadd.f32 %v8340_v5, %v2959_v9  ;;  %v10085_v9 = vld [vmem:[#allocation49_spill] sm:$0xff] }
 0x367   : > { %v3688_v58 = vpop.permute.xlu1 %3687  ;;  %v3686_v60 = vpop.permute.xlu0 %3685  ;;  %v4352_v7 = vsel %vm1112_vm1, %v4350_v56, %v4351_v22  ;;  %v4349_v49 = vsel %vm1112_vm1, %v4347_v34, %v4348_v46  ;;  %v4355_v43 = vrot.slane %v4340_v25, 2  ;;  %v4353_v40 = vrot.slane %v4339_v41, 2 }
 0x368   : > { %v8936_v33 = vsel %vm273_vm2, %v3686_v60, %v3688_v58  ;;  %v4374_v20 = vmul.f32 %v8654_v2, %v4372_v55  ;;  %v4376_v17 = vmul.f32 %v8724_v54, %v4372_v55  ;;  %v4373_v5 = vmul.f32 %v8661_v3, %v4372_v55 }
 0x369   : > { %4325 = vrot.lane.b32.xlu1 %v4318_v27, %s5245_s27  ;;  %4323 = vrot.lane.b32.xlu0 %v4316_v14, %s5245_s27  ;;  %v4375_v42 = vmul.f32 %v8714_v38, %v4372_v55  ;;  %v3034_v13 = vadd.f32 %v3030_v59, %v8698_v52  ;;  %v3031_v23 = vsel %vm418_vm3, %v10086_v62, %v10085_v9  ;;  %s8958_s27 = sld [smem:[#allocation2 + $0x6b]]  ;;  %v10087_v27 = vld [vmem:[#allocation57_spill] sm:$0xff]  ;;  %v10088_v14 = vld [vmem:[#allocation58_spill] sm:$0xff]  ;;  %v4410_v59 = vstv %s8915_s30 }
 0x36a   : > { %v8951_v56 = vadd.f32 %v8372_v21, %v2996_v36  ;;  %v8956_v25 = vsel %vm553_vm0, %v3539_v26, %v3541_v29  ;;  %v3107_v52 = vsel %vm418_vm3, %v10088_v14, %v10087_v27  ;;  %v4378_v60 = vmul.f32 %v8548_v35, %v4372_v55  ;;  %s9382_s30 = sld [smem:[#allocation4 + $0x4]] }
 0x36b   : > { %v3692_v34 = vpop.permute.xlu1 %3691  ;;  %v3690_v41 = vpop.permute.xlu0 %3689  ;;  %v4377_v21 = vmul.f32 %v8555_v0, %v4372_v55  ;;  %v8969_v36 = vadd.f32 %v8375_v57, %v2997_v16  ;;  %v4356_v29 = vsel %vm1112_vm1, %v4351_v22, %v4355_v43  ;;  %v4354_v45 = vsel %vm1112_vm1, %v4348_v46, %v4353_v40  ;;  %v10089_v57 = vld [vmem:[#allocation60_spill] sm:$0xff]  ;;  %v10090_v16 = vld [vmem:[#allocation67_spill] sm:$0xff] }
 0x36c   : > { %v8964_v58 = vsel %vm273_vm2, %v3690_v41, %v3692_v34  ;;  %v4388_v9 = vrot.slane %v4374_v20, 2  ;;  %v4389_v62 = vrot.slane %v4376_v17, 2  ;;  %v4385_v34 = vrot.slane %v4373_v5, 2  ;;  %v10091_v5 = vld [vmem:[#allocation51_spill] sm:$0xff] }
 0x36d   : > { %4359 = vrot.lane.b32.xlu1 %v4352_v7, %s5246_s26  ;;  %4357 = vrot.lane.b32.xlu0 %v4349_v49, %s5246_s26  ;;  %v4386_v41 = vrot.slane %v4375_v42, 2  ;;  %v8977_v27 = vadd.f32 %v3031_v23, %v8710_v8  ;;  %v3111_v55 = vadd.f32 %v3107_v52, %v8818_v11  ;;  %v3175_v7 = vsel %vm273_vm2, %v10090_v16, %v10089_v57  ;;  %v10092_v42 = vld [vmem:[#allocation52_spill] sm:$0xff] }
 0x36e   : > { %v8984_v49 = vadd.f32 %v8391_v47, %v3034_v13  ;;  %v4393_v40 = vrot.slane %v4378_v60, 2  ;;  %v4391_v20 = vrot.slane %v4377_v21, 2  ;;  %v4412_v8 = vmul.f32 %v8654_v2, %v4410_v59  ;;  %v10093_v21 = vld [vmem:[#allocation61_spill] sm:$0xff] }
 0x36f   : > { %v3726_v22 = vpop.permute.xlu1 %3725  ;;  %v3724_v43 = vpop.permute.xlu0 %3723  ;;  %v8993_v11 = vmul.f32 %v8724_v54, %v4410_v59  ;;  %v4411_v47 = vmul.f32 %v8661_v3, %v4410_v59  ;;  %v8997_v17 = vmul.f32 %v8714_v38, %v4410_v59  ;;  %v9002_v13 = vsel %vm418_vm3, %v10092_v42, %v10091_v5 }
 0x370   : > { %v8987_v46 = vsel %vm273_vm2, %v3724_v43, %v3726_v22  ;;  %v3296_v23 = vsel %vm273_vm2, %v8347_v12, %v8345_v48  ;;  %v4390_v14 = vsel %vm1112_vm1, %v4388_v9, %v4389_v62  ;;  %v4387_v52 = vsel %vm1112_vm1, %v4385_v34, %v4386_v41 }
 0x371   : > { %4363 = vrot.lane.b32.xlu1 %v4356_v29, %s5246_s26  ;;  %4361 = vrot.lane.b32.xlu0 %v4354_v45, %s5246_s26  ;;  %v3179_v60 = vadd.f32 %v3175_v7, %v8863_v28  ;;  %v10094_v29 = vld [vmem:[#allocation62_spill] sm:$0xff]  ;;  %v3156_v57 = vadd.f32 %v8484_v1, %v3111_v55  ;;  %v4448_v43 = vstv %s8958_s27  ;;  %v4394_v48 = vsel %vm1112_vm1, %v4389_v62, %v4393_v40  ;;  %s9402_s27 = sld [smem:[#allocation4 + $0x5]] }
 0x372   : > { %v3176_v45 = vsel %vm273_vm2, %v10094_v29, %v10093_v21  ;;  %v4392_v12 = vsel %vm1112_vm1, %v4386_v41, %v4391_v20  ;;  %v4426_v9 = vrot.slane %v4412_v8, 2  ;;  %v4427_v28 = vrot.slane %v8993_v11, 2  ;;  %v10097_v29 = vld [vmem:[#allocation84_spill] sm:$0xff] }
 0x373   : > { %v3730_v16 = vpop.permute.xlu1 %3729  ;;  %v3728_v22 = vpop.permute.xlu0 %3727  ;;  %v3300_v34 = vadd.f32 %v3296_v23, %v3156_v57  ;;  %v4423_v7 = vrot.slane %v4411_v47, 2  ;;  %v4424_v1 = vrot.slane %v8997_v17, 2  ;;  %v3319_v55 = vsel %vm418_vm3, %v8379_v19, %v8377_v50  ;;  %v10095_v19 = vld [vmem:[#allocation63_spill] sm:$0xff]  ;;  %v10096_v23 = vld [vmem:[#allocation64_spill] sm:$0xff] }
 0x374   : > { %v9016_v5 = vsel %vm273_vm2, %v3728_v22, %v3730_v16  ;;  %v4416_v62 = vmul.f32 %v8548_v35, %v4410_v59  ;;  %v4415_v41 = vmul.f32 %v8555_v0, %v4410_v59  ;;  %v4450_v40 = vmul.f32 %v8654_v2, %v4448_v43 }
 0x375   : > { %4397 = vrot.lane.b32.xlu1 %v4390_v14, %s5246_s26  ;;  %4395 = vrot.lane.b32.xlu0 %v4387_v52, %s5246_s26  ;;  %v3444_v20 = vadd.f32 %v8739_v15, %v3300_v34  ;;  %v9034_v11 = vmul.f32 %v8724_v54, %v4448_v43  ;;  %v4449_v47 = vmul.f32 %v8661_v3, %v4448_v43 }
 0x376   : > { %v9038_v17 = vmul.f32 %v8714_v38, %v4448_v43  ;;  %v3180_v50 = vadd.f32 %v3176_v45, %v8918_v44  ;;  %v3199_v59 = vsel %vm273_vm2, %v10096_v23, %v10095_v19  ;;  %v3200_v15 = vsel %vm273_vm2, %v8089_v30, %v8087_v53  ;;  %v10098_v45 = vld [vmem:[#allocation85_spill] sm:$0xff] }
 0x377   : > { %v3764_v8 = vpop.permute.xlu1 %3763  ;;  %v3762_v42 = vpop.permute.xlu0 %3761  ;;  %v3323_v52 = vadd.f32 %v3319_v55, %v3179_v60  ;;  %v4428_v21 = vsel %vm1112_vm1, %v4426_v9, %v4427_v28  ;;  %v4425_v44 = vsel %vm1112_vm1, %v4423_v7, %v4424_v1  ;;  %v3320_v57 = vsel %vm418_vm3, %v10098_v45, %v10097_v29 }
 0x378   : > { %v9048_v14 = vsel %vm273_vm2, %v3762_v42, %v3764_v8  ;;  %v4431_v16 = vrot.slane %v4416_v62, 2  ;;  %v4429_v22 = vrot.slane %v4415_v41, 2  ;;  %v4464_v34 = vrot.slane %v4450_v40, 2 }
 0x379   : > { %4401 = vrot.lane.b32.xlu1 %v4394_v48, %s5246_s26  ;;  %4399 = vrot.lane.b32.xlu0 %v4392_v12, %s5246_s26  ;;  %v3546_v30 = vadd.f32 %v8956_v25, %v3444_v20  ;;  %v4465_v48 = vrot.slane %v9034_v11, 2  ;;  %v4461_v55 = vrot.slane %v4449_v47, 2  ;;  %v4462_v12 = vrot.slane %v9038_v17, 2  ;;  %v10099_v20 = vld [vmem:[#allocation88_spill] sm:$0xff]  ;;  %v10100_v11 = vld [vmem:[#allocation89_spill] sm:$0xff] }
 0x37a   : > { %v3203_v9 = vadd.f32 %v3199_v59, %v8921_v39  ;;  %v4454_v8 = vmul.f32 %v8548_v35, %v4448_v43  ;;  %v4453_v62 = vmul.f32 %v8555_v0, %v4448_v43  ;;  %v3324_v41 = vadd.f32 %v3320_v57, %v3180_v50  ;;  %v10102_v50 = vld [vmem:[#allocation70_spill] sm:$0xff] }
 0x37b   : > { %v3768_v53 = vpop.permute.xlu1 %3767  ;;  %v3766_v60 = vpop.permute.xlu0 %3765  ;;  %v3460_v40 = vadd.f32 %v8672_v31, %v3323_v52  ;;  %v4486_v25 = vstv %s9024_s4  ;;  %v3204_v39 = vadd.f32 %v3200_v15, %v8933_v51  ;;  %v3343_v47 = vsel %vm418_vm3, %v10100_v11, %v10099_v20  ;;  %v10101_v31 = vld [vmem:[#allocation69_spill] sm:$0xff]  ;;  %s5029_s4 = sshll.u32 (%p5314_p5), %s5225_s14, 1 }
 0x37c   : > { %v3770_v7 = vsel %vm273_vm2, %v3766_v60, %v3768_v53  ;;  %v4432_v43 = vsel %vm1112_vm1, %v4427_v28, %v4431_v16  ;;  %v4430_v17 = vsel %vm1112_vm1, %v4424_v1, %v4429_v22  ;;  %v3223_v19 = vsel %vm273_vm2, %v10102_v50, %v10101_v31  ;;  %v10103_v1 = vld [vmem:[#allocation106_spill] sm:$0xff]  ;;  %v10105_v22 = vld [vmem:[#allocation91_spill] sm:$0xff]  ;;  %v10107_v50 = vld [vmem:[#allocation93_spill] sm:$0xff] }
 0x37d   : > { %v9065_v42 = vadd.f32 %v3770_v7, %v3546_v30  ;;  %4435 = vrot.lane.b32.xlu1 %v4428_v21, %s5246_s26  ;;  %4433 = vrot.lane.b32.xlu0 %v4425_v44, %s5246_s26  ;;  %v3583_v23 = vadd.f32 %v8763_v63, %v3460_v40  ;;  %v4466_v21 = vsel %vm1112_vm1, %v4464_v34, %v4465_v48  ;;  %v4469_v44 = vrot.slane %v4454_v8, 2  ;;  %v10104_v63 = vld [vmem:[#allocation90_spill] sm:$0xff] }
 0x37e   : > { %v4463_v51 = vsel %vm1112_vm1, %v4461_v55, %v4462_v12  ;;  %v4467_v29 = vrot.slane %v4453_v62, 2  ;;  %v4488_v28 = vmul.f32 %v8654_v2, %v4486_v25  ;;  %v3347_v45 = vadd.f32 %v3343_v47, %v3203_v9 }
 0x37f   : > { %v3802_v59 = vpop.permute.xlu1 %3801  ;;  %v3800_v52 = vpop.permute.xlu0 %3799  ;;  %v3461_v57 = vadd.f32 %v10103_v1, %v3324_v41  ;;  %v3344_v34 = vsel %vm418_vm3, %v10105_v22, %v10104_v63  ;;  %v4490_v53 = vmul.f32 %v8724_v54, %v4486_v25  ;;  %v4487_v30 = vmul.f32 %v8661_v3, %v4486_v25  ;;  %v10111_v22 = vld [vmem:[#allocation95_spill] sm:$0xff] }
 0x380   : > { %v3807_v15 = vsel %vm418_vm3, %v3800_v52, %v3802_v59  ;;  %v4489_v60 = vmul.f32 %v8714_v38, %v4486_v25  ;;  %v3227_v55 = vadd.f32 %v3223_v19, %v8951_v56  ;;  %v4492_v62 = vmul.f32 %v8548_v35, %v4486_v25  ;;  %v10106_v56 = vld [vmem:[#allocation92_spill] sm:$0xff]  ;;  %v10108_v59 = vld [vmem:[#allocation71_spill] sm:$0xff] }
 0x381   : > { %v9087_v16 = vadd.f32 %v3807_v15, %v3583_v23  ;;  %4439 = vrot.lane.b32.xlu1 %v4432_v43, %s5246_s26  ;;  %4437 = vrot.lane.b32.xlu0 %v4430_v17, %s5246_s26  ;;  %v3584_v9 = vadd.f32 %v8792_v18, %v3461_v57  ;;  %v4491_v41 = vmul.f32 %v8555_v0, %v4486_v25  ;;  %v4502_v47 = vrot.slane %v4488_v28, 2 }
 0x382   : > { %v4470_v20 = vsel %vm1112_vm1, %v4465_v48, %v4469_v44  ;;  %v4468_v11 = vsel %vm1112_vm1, %v4462_v12, %v4467_v29  ;;  %v3348_v43 = vadd.f32 %v3344_v34, %v3204_v39  ;;  %v3477_v17 = vadd.f32 %v8754_v37, %v3347_v45  ;;  %v10109_v12 = vld [vmem:[#allocation72_spill] sm:$0xff] }
 0x383   : > { %v3806_v7 = vpop.permute.xlu1 %3805  ;;  %v3804_v8 = vpop.permute.xlu0 %3803  ;;  %v4524_v18 = vstv %s9070_s5  ;;  %v3367_v25 = vsel %vm418_vm3, %v10107_v50, %v10106_v56  ;;  %v4503_v19 = vrot.slane %v4490_v53, 2  ;;  %v4499_v23 = vrot.slane %v4487_v30, 2  ;;  %v10115_v56 = vld [vmem:[#allocation96_spill] sm:$0xff]  ;;  %v10116_v50 = vld [vmem:[#allocation97_spill] sm:$0xff]  ;;  %s5038_s5 = smul.u32 (%p5314_p5), 24, %s5229_s15 }
 0x384   : > { %v3808_v40 = vsel %vm418_vm3, %v3804_v8, %v3806_v7  ;;  %v4500_v48 = vrot.slane %v4489_v60, 2  ;;  %v3224_v39 = vsel %vm273_vm2, %v10109_v12, %v10108_v59  ;;  %v3621_v37 = vadd.f32 %v8812_v6, %v3477_v17  ;;  %v10110_v6 = vld [vmem:[#allocation94_spill] sm:$0xff]  ;;  %v10112_v60 = vld [vmem:[#allocation73_spill] sm:$0xff]  ;;  %v10117_v59 = vld [vmem:[#allocation107_spill] sm:$0xff] }
 0x385   : > { %v9105_v31 = vadd.f32 %v3808_v40, %v3584_v9  ;;  %4473 = vrot.lane.b32.xlu1 %v4466_v21, %s5246_s26  ;;  %4471 = vrot.lane.b32.xlu0 %v4463_v51, %s5246_s26  ;;  %v4507_v44 = vrot.slane %v4492_v62, 2  ;;  %v4505_v21 = vrot.slane %v4491_v41, 2  ;;  %v4526_v29 = vmul.f32 %v8654_v2, %v4524_v18  ;;  %s4647_s24 = sadd.s32 (%p5314_p5), %s5038_s5, %s5029_s4 }
 0x386   : > { %v9120_v28 = vmul.f32 %v8724_v54, %v4524_v18  ;;  %v4525_v45 = vmul.f32 %v8661_v3, %v4524_v18  ;;  %v3371_v1 = vadd.f32 %v3367_v25, %v3227_v55  ;;  %v3478_v57 = vadd.f32 %v8757_v24, %v3348_v43  ;;  %v10113_v24 = vld [vmem:[#allocation74_spill] sm:$0xff]  ;;  %v10114_v43 = vld [vmem:[#allocation113_spill] sm:$0xff] }
 0x387   : > { %v3840_v52 = vpop.permute.xlu1 %3839  ;;  %v3838_v15 = vpop.permute.xlu0 %3837  ;;  %v3368_v34 = vsel %vm418_vm3, %v10111_v22, %v10110_v6  ;;  %v4504_v2 = vsel %vm1112_vm1, %v4502_v47, %v4503_v19  ;;  %v4501_v54 = vsel %vm1112_vm1, %v4499_v23, %v4500_v48  ;;  %v4527_v53 = vmul.f32 %v8714_v38, %v4524_v18  ;;  %v10125_v22 = vld [vmem:[#allocation99_spill] sm:$0xff] }
 0x388   : > { %v3845_v51 = vsel %vm418_vm3, %v3838_v15, %v3840_v52  ;;  %v3228_v30 = vadd.f32 %v3224_v39, %v8969_v36  ;;  %v3247_v55 = vsel %vm273_vm2, %v10113_v24, %v10112_v60  ;;  %v3622_v9 = vadd.f32 %v8850_v4, %v3478_v57  ;;  %v10123_v57 = vld [vmem:[#allocation114_spill] sm:$0xff] }
 0x389   : > { %v9124_v63 = vadd.f32 %v3845_v51, %v3621_v37  ;;  %4477 = vrot.lane.b32.xlu1 %v4470_v20, %s5246_s26  ;;  %4475 = vrot.lane.b32.xlu0 %v4468_v11, %s5246_s26  ;;  %v4508_v62 = vsel %vm1112_vm1, %v4503_v19, %v4507_v44  ;;  %v4506_v40 = vsel %vm1112_vm1, %v4500_v48, %v4505_v21  ;;  %v4540_v20 = vrot.slane %v4526_v29, 2  ;;  %v10118_v37 = vld [vmem:[#allocation83_spill] sm:$0xff]  ;;  %v10119_v51 = vld [vmem:[#allocation54_spill] sm:$0xff] }
 0x38a   : > { %v4541_v11 = vrot.slane %v9120_v28, 2  ;;  %v3372_v47 = vadd.f32 %v3368_v34, %v3228_v30  ;;  %v3494_v36 = vadd.f32 %v10114_v43, %v3371_v1  ;;  %v4537_v4 = vrot.slane %v4525_v45, 2  ;;  %v10120_v29 = vld [vmem:[#allocation55_spill] sm:$0xff]  ;;  %v10126_v60 = vld [vmem:[#allocation86_spill] sm:$0xff] }
 0x38b   : > { %v3844_v7 = vpop.permute.xlu1 %3843  ;;  %v3842_v8 = vpop.permute.xlu0 %3841  ;;  %v3391_v25 = vsel %vm418_vm3, %v10116_v50, %v10115_v56  ;;  %v4538_v19 = vrot.slane %v4527_v53, 2  ;;  %v4530_v23 = vmul.f32 %v8548_v35, %v4524_v18  ;;  %v4529_v48 = vmul.f32 %v8555_v0, %v4524_v18  ;;  %v10121_v45 = vld [vmem:[#allocation75_spill] sm:$0xff]  ;;  %v10122_v35 = vld [vmem:[#allocation76_spill] sm:$0xff] }
 0x38c   : > { %v3846_v41 = vsel %vm418_vm3, %v3842_v8, %v3844_v7  ;;  %v3072_v12 = vadd.f32 %v9002_v13, %v10117_v59  ;;  %v3251_v39 = vadd.f32 %v3247_v55, %v8984_v49  ;;  %v3144_v52 = vadd.f32 %v10118_v37, %v8977_v27  ;;  %v10136_v37 = vld [vmem:[#allocation101_spill] sm:$0xff] }
 0x38d   : > { %v9144_v17 = vadd.f32 %v3846_v41, %v3622_v9  ;;  %4511 = vrot.lane.b32.xlu1 %v4504_v2, %s5246_s26  ;;  %4509 = vrot.lane.b32.xlu0 %v4501_v54, %s5246_s26  ;;  %v3659_v15 = vadd.f32 %v8878_v61, %v3494_v36  ;;  %v3069_v28 = vsel %vm418_vm3, %v10120_v29, %v10119_v51  ;;  %v10124_v61 = vld [vmem:[#allocation98_spill] sm:$0xff]  ;;  %v4545_v54 = vrot.slane %v4530_v23, 2  ;;  %v10127_v9 = vld [vmem:[#allocation115_spill] sm:$0xff]  ;;  %v10131_v36 = vld [vmem:[#allocation77_spill] sm:$0xff] }
 0x38e   : > { %v3248_v18 = vsel %vm273_vm2, %v10122_v35, %v10121_v45  ;;  %v4542_v13 = vsel %vm1112_vm1, %v4540_v20, %v4541_v11  ;;  %v3395_v49 = vadd.f32 %v3391_v25, %v3251_v39  ;;  %v3495_v6 = vadd.f32 %v10123_v57, %v3372_v47  ;;  %v10129_v20 = vld [vmem:[#allocation65_spill] sm:$0xff]  ;;  %v10130_v47 = vld [vmem:[#allocation66_spill] sm:$0xff]  ;;  %v10133_v23 = vld [vmem:[#allocation111_spill] sm:$0xff] }
 0x38f   : > { %v3878_v44 = vpop.permute.xlu1 %3877  ;;  %v3876_v21 = vpop.permute.xlu0 %3875  ;;  %v3392_v34 = vsel %vm418_vm3, %v10125_v22, %v10124_v61  ;;  %v4539_v2 = vsel %vm1112_vm1, %v4537_v4, %v4538_v19  ;;  %v4543_v53 = vrot.slane %v4529_v48, 2  ;;  %v3252_v30 = vadd.f32 %v3248_v18, %v3144_v52  ;;  %v10132_v4 = vld [vmem:[#allocation78_spill] sm:$0xff]  ;;  %v10134_v48 = vld [vmem:[#allocation116_spill] sm:$0xff]  ;;  %v10140_v57 = vld [vmem:[#allocation87_spill] sm:$0xff] }
 0x390   : > { %v3883_v1 = vsel %vm418_vm3, %v3876_v21, %v3878_v44  ;;  %v3149_v24 = vadd.f32 %v10126_v60, %v3072_v12  ;;  %v3660_v55 = vadd.f32 %v8907_v32, %v3495_v6  ;;  %v3521_v7 = vrot.slane %v10127_v9, 1  ;;  %v10135_v39 = vld [vmem:[#allocation100_spill] sm:$0xff]  ;;  %v10141_v61 = vld [vmem:[#allocation79_spill] sm:$0xff] }
 0x391   : > { %v9168_v27 = vadd.f32 %v3883_v1, %v3659_v15  ;;  %4515 = vrot.lane.b32.xlu1 %v4508_v62, %s5246_s26  ;;  %4513 = vrot.lane.b32.xlu0 %v4506_v40, %s5246_s26  ;;  %v10128_v62 = vld [vmem:[#allocation108_spill] sm:$0xff]  ;;  %v3106_v43 = vsel %vm418_vm3, %v10130_v47, %v10129_v20  ;;  %v3271_v56 = vsel %vm273_vm2, %v10132_v4, %v10131_v36  ;;  %v3522_v59 = vrot.slane %v10134_v48, 1  ;;  %v10137_v15 = vld [vmem:[#allocation110_spill] sm:$0xff]  ;;  %v10147_v20 = vld [vmem:[#allocation81_spill] sm:$0xff] }
 0x392   : > { %v3073_v40 = vadd.f32 %v3069_v28, %v10128_v62  ;;  %v3396_v25 = vadd.f32 %v3392_v34, %v3252_v30  ;;  %v3511_v32 = vadd.f32 %v10133_v23, %v3395_v49  ;;  %v3415_v52 = vsel %vm418_vm3, %v10136_v37, %v10135_v39  ;;  %v10142_v22 = vld [vmem:[#allocation80_spill] sm:$0xff]  ;;  %v10148_v47 = vld [vmem:[#allocation82_spill] sm:$0xff]  ;;  %v10150_v23 = vld [vmem:[#allocation105_spill] sm:$0xff] }
 0x393   : > { %v3882_v8 = vpop.permute.xlu1 %3881  ;;  %v3880_v41 = vpop.permute.xlu0 %3879  ;;  %v3517_v44 = vmul.f32 %v8555_v0, %v10137_v15  ;;  %v4546_v21 = vsel %vm1112_vm1, %v4541_v11, %v4545_v54  ;;  %v4544_v51 = vsel %vm1112_vm1, %v4538_v19, %v4543_v53  ;;  %v3275_v29 = vadd.f32 %v3271_v56, %v3149_v24  ;;  %v10143_v19 = vld [vmem:[#allocation112_spill] sm:$0xff]  ;;  %v10145_v53 = vld [vmem:[#allocation103_spill] sm:$0xff] }
 0x394   : > { %v3884_v50 = vsel %vm418_vm3, %v3880_v41, %v3882_v8  ;;  %v10138_v28 = vstv %s8409_s25  ;;  %v3697_v35 = vadd.f32 %v8936_v33, %v3511_v32  ;;  %v3150_v6 = vadd.f32 %v10140_v57, %v3073_v40  ;;  %v10144_v33 = vld [vmem:[#allocation102_spill] sm:$0xff]  ;;  %s4997_s25 = sld [smem:[#allocation2 + $0x33]] }
 0x395   : > { %v9189_v12 = vadd.f32 %v3884_v50, %v3660_v55  ;;  %4549 = vrot.lane.b32.xlu1 %v4542_v13, %s5246_s26  ;;  %4547 = vrot.lane.b32.xlu0 %v4539_v2, %s5246_s26  ;;  %v3153_v45 = vmul.f32 %v8661_v3, %v10138_v28  ;;  %v10139_v13 = vld [vmem:[#allocation109_spill] sm:$0xff]  ;;  %v3272_v0 = vsel %vm273_vm2, %v10142_v22, %v10141_v61  ;;  %v3524_v24 = vrot.slane %v3517_v44, 1 }
 0x396   : > { %v3110_v49 = vadd.f32 %v3106_v43, %v10139_v13  ;;  %v3419_v34 = vadd.f32 %v3415_v52, %v3275_v29  ;;  %v3512_v2 = vadd.f32 %v10143_v19, %v3396_v25  ;;  %v3416_v30 = vsel %vm418_vm3, %v10145_v53, %v10144_v33  ;;  %v10146_v55 = vld [vmem:[#allocation117_spill] sm:$0xff] }
 0x397   : > { %v3916_v18 = vpop.permute.xlu1 %3915  ;;  %v3914_v1 = vpop.permute.xlu0 %3913  ;;  %v3523_v60 = vsel %vm553_vm0, %v3521_v7, %v3522_v59  ;;  %v3532_v9 = vmul.f32 %v8661_v3, %v10146_v55  ;;  %v3276_v8 = vadd.f32 %v3272_v0, %v3150_v6  ;;  %v3295_v43 = vsel %vm273_vm2, %v10148_v47, %v10147_v20  ;;  %v10149_v7 = vld [vmem:[#allocation104_spill] sm:$0xff] }
 0x398   : > { %v3921_v11 = vsel %vm418_vm3, %v3914_v1, %v3916_v18  ;;  %v3698_v41 = vadd.f32 %v8964_v58, %v3512_v2  ;;  %v3155_v4 = vadd.f32 %v3153_v45, %v3110_v49  ;;  %v3528_v50 = vadd.f32 %v3523_v60, %v3419_v34 }
 0x399   : > { %v9211_v54 = vadd.f32 %v3921_v11, %v3697_v35  ;;  %4553 = vrot.lane.b32.xlu1 %v4546_v21, %s5246_s26  ;;  %4551 = vrot.lane.b32.xlu0 %v4544_v51, %s5246_s26  ;;  %v3420_v56 = vadd.f32 %v3416_v30, %v3276_v8  ;;  %v3439_v32 = vsel %vm418_vm3, %v10150_v23, %v10149_v7  ;;  %v3538_v58 = vrot.slane %v3532_v9, 1  ;;  %s4996_s26 = sld [smem:[#allocation2 + $0x18]]  ;;  %v9286_v7 = vld [vmem:[%s5376_s9 + $0xc0] sm:$0xff] }
 0x39a   : > { %v3525_v48 = vsel %vm553_vm0, %v3522_v59, %v3524_v24  ;;  %v3299_v39 = vadd.f32 %v3295_v43, %v3155_v4  ;;  %v3735_v37 = vadd.f32 %v8987_v46, %v3528_v50 }
 0x39b   : > { %v3920_v62 = vpop.permute.xlu1 %3919  ;;  %v3918_v40 = vpop.permute.xlu0 %3917  ;;  %v3529_v51 = vadd.f32 %v3525_v48, %v3420_v56  ;;  %v3540_v28 = vsel %vm553_vm0, %v3538_v58, %v3539_v26 }
 0x39c   : > { %v3922_v36 = vsel %vm418_vm3, %v3918_v40, %v3920_v62  ;;  %v3443_v21 = vadd.f32 %v3439_v32, %v3299_v39  ;;  %v4021_v32 = vstv %s4997_s25 }
 0x39d   : > { %v9226_v25 = vadd.f32 %v3922_v36, %v3698_v41  ;;  %v3736_v45 = vadd.f32 %v9016_v5, %v3529_v51 }
 0x39e   : > { %v3545_v1 = vadd.f32 %v3540_v28, %v3443_v21 }
 0x39f   : > { %v3954_v52 = vpop.permute.xlu1 %3953  ;;  %v3952_v15 = vpop.permute.xlu0 %3951  ;;  %v4004_v62 = vstv %s4996_s26  ;;  %s5030_s26 = sshll.u32 (%p5314_p5), %s4647_s24, 3 }
 0x3a0   : > { %v3959_v44 = vsel %vm418_vm3, %v3952_v15, %v3954_v52  ;;  %v3773_v13 = vadd.f32 %v9048_v14, %v3545_v1  ;;  %v4005_v47 = vmul.f32 %v8661_v3, %v4004_v62  ;;  %v4006_v43 = vmul.f32 %v8714_v38, %v4004_v62 }
 0x3a1   : > { %v9234_v29 = vadd.f32 %v3959_v44, %v3735_v37  ;;  %v4007_v23 = vmul.f32 %v9286_v7, %v4004_v62  ;;  %v9297_v37 = vld [vmem:[%s5376_s9 + $0xa0] sm:$0xff]  ;;  %v4023_v15 = vmul.f32 %v8714_v38, %v4021_v32 }
 0x3a2   : > { %v4011_v56 = vrot.slane %v4005_v47, 2  ;;  %v4012_v50 = vrot.slane %v4006_v43, 2  ;;  %v4022_v52 = vmul.f32 %v9297_v37, %v4021_v32 }
 0x3a3   : > { %v3958_v35 = vpop.permute.xlu1 %3957  ;;  %v3956_v59 = vpop.permute.xlu0 %3955  ;;  %v4014_v39 = vrot.slane %v4007_v23, 2 }
 0x3a4   : > { %v3960_v18 = vsel %vm418_vm3, %v3956_v59, %v3958_v35  ;;  %v4013_v3 = vsel %vm1112_vm1, %v4011_v56, %v4012_v50  ;;  %v4028_v35 = vrot.slane %v4022_v52, 2  ;;  %v4029_v59 = vrot.slane %v4023_v15, 2 }
 0x3a5   : > { %v9241_v46 = vadd.f32 %v3960_v18, %v3736_v45  ;;  %v4018_v28 = vadd.f32 %v4013_v3, %v9087_v16  ;;  %v4015_v45 = vsel %vm1112_vm1, %v4012_v50, %v4014_v39  ;;  %v4024_v18 = vmul.f32 %v9286_v7, %v4021_v32 }
 0x3a6   : > { %v4019_v16 = vadd.f32 %v4015_v45, %v9105_v31 }
 0x3a7   : > { %v3992_v49 = vpop.permute.xlu1 %3991  ;;  %v3990_v57 = vpop.permute.xlu0 %3989 }
 0x3a8   : > { %v3997_v6 = vsel %vm418_vm3, %v3990_v57, %v3992_v49 }
 0x3a9   : > { %v9245_v61 = vadd.f32 %v3997_v6, %v3773_v13  ;;  %v4038_v13 = vstv %s4998_s7 }
 0x3aa   : > { %v4039_v62 = vmul.f32 %v9297_v37, %v4038_v13  ;;  %v4040_v47 = vmul.f32 %v8714_v38, %v4038_v13  ;;  %v4041_v15 = vmul.f32 %v9286_v7, %v4038_v13 }
 0x3ab   : > { %v3996_v10 = vpop.permute.xlu1 %3995  ;;  %v3994_v22 = vpop.permute.xlu0 %3993 }
 0x3ac   : > { %v3998_v26 = vsel %vm418_vm3, %v3994_v22, %v3996_v10  ;;  %v4562_v10 = vstv %s9293_s8  ;;  %v4045_v52 = vrot.slane %v4039_v62, 2  ;;  %v4046_v38 = vrot.slane %v4040_v47, 2  ;;  %s4649_s8 = scalar_lea.vmem (%p5314_p5), %s9468_s3, %s5030_s26 }
 0x3ad   : > { %v9249_v5 = vadd.f32 %v3998_v26, %v9065_v42 }
 0x3af   : > { %v4132_v0 = vpop.permute.xlu1 %4131  ;;  %v4130_v11 = vpop.permute.xlu0 %4129 }
 0x3b0   : > { %v4137_v51 = vsel %vm273_vm2, %v4130_v11, %v4132_v0  ;;  %v4030_v0 = vsel %vm1112_vm1, %v4028_v35, %v4029_v59  ;;  %v4031_v11 = vrot.slane %v4024_v18, 2  ;;  %v4574_v18 = vstv %s9312_s11 }
 0x3b1   : > { %v4141_v1 = vadd.f32 %v4137_v51, %v4018_v28  ;;  %v4035_v23 = vadd.f32 %v4030_v0, %v9124_v63  ;;  %v4055_v28 = vstv %s4999_s10 }
 0x3b2   : > { %v4032_v39 = vsel %vm1112_vm1, %v4029_v59, %v4031_v11 }
 0x3b3   : > { %v4136_v34 = vpop.permute.xlu1 %4135  ;;  %v4134_v19 = vpop.permute.xlu0 %4133 }
 0x3b4   : > { %v4138_v6 = vsel %vm273_vm2, %v4134_v19, %v4136_v34 }
 0x3b5   : > { %v4142_v43 = vadd.f32 %v4138_v6, %v4019_v16  ;;  %v4047_v6 = vsel %vm1112_vm1, %v4045_v52, %v4046_v38  ;;  %v9339_v16 = vld [vmem:[%s5376_s9 + $0xb0] sm:$0xff]  ;;  %s9353_s9 = sld [smem:[#allocation2 + $0x9f]] }
 0x3b7   : > { %v9251_v2 = vpop.permute.xlu1 %4169  ;;  %v9253_v14 = vpop.permute.xlu0 %4167 }
 0x3b8   : > { %v4175_v19 = vsel %vm273_vm2, %v9253_v14, %v9251_v2 }
 0x3b9   : > { %v4179_v51 = vadd.f32 %v4175_v19, %v4035_v23 }
 0x3bb   : > { %v9255_v33 = vpop.permute.xlu1 %4173  ;;  %v9257_v53 = vpop.permute.xlu0 %4171 }
 0x3bc   : > { %v4176_v63 = vsel %vm273_vm2, %v9257_v53, %v9255_v33 }
 0x3bf   : > { %v9259_v30 = vpop.permute.xlu1 %4207  ;;  %v9261_v60 = vpop.permute.xlu0 %4205 }
 0x3c0   : > { %v4213_v62 = vsel %vm273_vm2, %v9261_v60, %v9259_v30 }
 0x3c3   : > { %v9263_v24 = vpop.permute.xlu1 %4211  ;;  %v9265_v42 = vpop.permute.xlu0 %4209 }
 0x3c7   : > { %v9267_v55 = vpop.permute.xlu1 %4245  ;;  %v9269_v9 = vpop.permute.xlu0 %4243 }
 0x3cb   : > { %v9271_v8 = vpop.permute.xlu1 %4249  ;;  %v9273_v41 = vpop.permute.xlu0 %4247 }
 0x3cf   : > { %v9275_v40 = vpop.permute.xlu1 %4283  ;;  %v9277_v20 = vpop.permute.xlu0 %4281 }
 0x3d3   : > { %v9281_v36 = vpop.permute.xlu1 %4287  ;;  %v9283_v4 = vpop.permute.xlu0 %4285 }
 0x3d7   : > { %v9289_v48 = vpop.permute.xlu1 %4321  ;;  %v9291_v58 = vpop.permute.xlu0 %4319 }
 0x3db   : > { %v9301_v44 = vpop.permute.xlu1 %4325  ;;  %v9303_v21 = vpop.permute.xlu0 %4323 }
 0x3df   : > { %v4360_v49 = vpop.permute.xlu1 %4359  ;;  %v4358_v57 = vpop.permute.xlu0 %4357 }
 0x3e0   : > { %v4365_v22 = vsel %vm418_vm3, %v4358_v57, %v4360_v49 }
 0x3e1   : > { %v4369_v26 = vadd.f32 %v4365_v22, %v4141_v1  ;;  %v4036_v1 = vadd.f32 %v4032_v39, %v9144_v17  ;;  %v4048_v22 = vrot.slane %v4041_v15, 2  ;;  %v4072_v39 = vstv %s9326_s12 }
 0x3e2   : > { %v4214_v15 = vsel %vm273_vm2, %v9265_v42, %v9263_v24 }
 0x3e3   : > { %v4563_v56 = vadd.f32 %v4562_v10, %v4369_v26  ;;  %v4364_v50 = vpop.permute.xlu1 %4363  ;;  %v4362_v34 = vpop.permute.xlu0 %4361  ;;  %v4057_v26 = vmul.f32 %v9339_v16, %v4055_v28  ;;  %v4180_v33 = vadd.f32 %v4176_v63, %v4036_v1  ;;  %v4049_v19 = vsel %vm1112_vm1, %v4046_v38, %v4048_v22 }
 0x3e4   : > { %v4366_v31 = vsel %vm418_vm3, %v4362_v34, %v4364_v50 }
 0x3e5   : > { %v4565_v32 = vmax.f32 %v4563_v56, 0.0  ;;  %v4370_v3 = vadd.f32 %v4366_v31, %v4142_v43  ;;  %v4052_v43 = vadd.f32 %v4047_v6, %v9168_v27  ;;  %v4063_v23 = vrot.slane %v4057_v26, 2 }
 0x3e7   : > { %v4567_v2 = vmin.f32 %v4565_v32, 6.0  ;;  %v4564_v14 = vadd.f32 %v4562_v10, %v4370_v3  ;;  %v4398_v45 = vpop.permute.xlu1 %4397  ;;  %v4396_v35 = vpop.permute.xlu0 %4395  ;;  %v4056_v10 = vmul.f32 %v9297_v37, %v4055_v28  ;;  %v4058_v32 = vmul.f32 %v9286_v7, %v4055_v28 }
 0x3e8   : > { %v4403_v59 = vsel %vm418_vm3, %v4396_v35, %v4398_v45  ;;  %v4217_v3 = vadd.f32 %v4213_v62, %v4052_v43  ;;  %v4053_v28 = vadd.f32 %v4049_v19, %v9189_v12  ;;  %v4251_v12 = vsel %vm273_vm2, %v9269_v9, %v9267_v55 }
 0x3e9   : > { %v4569_v13 = vmul.f32 0.16666667, %v4567_v2  ;;  %v4566_v49 = vmax.f32 %v4564_v14, 0.0  ;;  %v4407_v57 = vadd.f32 %v4403_v59, %v4179_v51  ;;  %v4062_v31 = vrot.slane %v4056_v10, 2 }
 0x3ea   : > { %v4587_v51 = vstv %s9333_s23  ;;  %v4065_v63 = vrot.slane %v4058_v32, 2  ;;  %v4074_v59 = vmul.f32 %v9339_v16, %v4072_v39  ;;  %v4218_v1 = vadd.f32 %v4214_v15, %v4053_v28 }
 0x3eb   : > { %4571 = vst [vmem:[%s9342_s28] sm:$0xff] %v4569_v13  ;;  %v4568_v53 = vmin.f32 %v4566_v49, 6.0  ;;  %v4575_v17 = vadd.f32 %v4574_v18, %v4407_v57  ;;  %v4402_v0 = vpop.permute.xlu1 %4401  ;;  %v4400_v11 = vpop.permute.xlu0 %4399  ;;  %v4064_v35 = vsel %vm1112_vm1, %v4062_v31, %v4063_v23  ;;  %v4089_v62 = vstv %s9353_s9 }
 0x3ec   : > { %v4404_v47 = vsel %vm418_vm3, %v4400_v11, %v4402_v0  ;;  %v4069_v6 = vadd.f32 %v4064_v35, %v9211_v54  ;;  %v4075_v0 = vmul.f32 %v9286_v7, %v4072_v39  ;;  %v4252_v54 = vsel %vm273_vm2, %v9273_v41, %v9271_v8 }
 0x3ed   : > { %v4570_v56 = vmul.f32 0.16666667, %v4568_v53  ;;  %v4577_v50 = vmax.f32 %v4575_v17, 0.0  ;;  %v4408_v34 = vadd.f32 %v4404_v47, %v4180_v33  ;;  %v4066_v33 = vsel %vm1112_vm1, %v4063_v23, %v4065_v63 }
 0x3ee   : > { %v4080_v17 = vrot.slane %v4074_v59, 2  ;;  %v4255_v11 = vadd.f32 %v4251_v12, %v4069_v6  ;;  %v4613_v59 = vstv %s9382_s30 }
 0x3ef   : > { %4572 = vst [vmem:[%s9342_s28 + $0x8] sm:$0xff] %v4570_v56  ;;  %v4579_v30 = vmin.f32 %v4577_v50, 6.0  ;;  %v4576_v60 = vadd.f32 %v4574_v18, %v4408_v34  ;;  %v4436_v52 = vpop.permute.xlu1 %4435  ;;  %v4434_v27 = vpop.permute.xlu0 %4433  ;;  %v4073_v18 = vmul.f32 %v9297_v37, %v4072_v39  ;;  %v4600_v56 = vstv %s9361_s29 }
 0x3f0   : > { %v4441_v38 = vsel %vm418_vm3, %v4434_v27, %v4436_v52  ;;  %v4070_v34 = vadd.f32 %v4066_v33, %v9226_v25  ;;  %v4090_v39 = vmul.f32 %v9297_v37, %v4089_v62  ;;  %v4289_v25 = vsel %vm273_vm2, %v9277_v20, %v9275_v40 }
 0x3f1   : > { %v4581_v2 = vmul.f32 0.16666667, %v4579_v30  ;;  %v4578_v14 = vmax.f32 %v4576_v60, 0.0  ;;  %v4445_v45 = vadd.f32 %v4441_v38, %v4217_v3  ;;  %v4079_v53 = vrot.slane %v4073_v18, 2 }
 0x3f2   : > { %v4082_v3 = vrot.slane %v4075_v0, 2  ;;  %v4091_v30 = vmul.f32 %v9339_v16, %v4089_v62  ;;  %v4256_v60 = vadd.f32 %v4252_v54, %v4070_v34 }
 0x3f3   : > { %5015 = vst [vmem:[%s9342_s28 + $0x10] sm:$0xff] %v4581_v2  ;;  %v4580_v24 = vmin.f32 %v4578_v14, 6.0  ;;  %v4588_v42 = vadd.f32 %v4587_v51, %v4445_v45  ;;  %v4440_v13 = vpop.permute.xlu1 %4439  ;;  %v4438_v49 = vpop.permute.xlu0 %4437  ;;  %v4081_v32 = vsel %vm1112_vm1, %v4079_v53, %v4080_v17  ;;  %v4096_v2 = vrot.slane %v4090_v39, 2 }
 0x3f4   : > { %v4442_v57 = vsel %vm418_vm3, %v4438_v49, %v4440_v13  ;;  %v4083_v16 = vsel %vm1112_vm1, %v4080_v17, %v4082_v3  ;;  %v4097_v14 = vrot.slane %v4091_v30, 2  ;;  %v4092_v45 = vmul.f32 %v9286_v7, %v4089_v62 }
 0x3f5   : > { %v4582_v22 = vmul.f32 0.16666667, %v4580_v24  ;;  %v4590_v10 = vmax.f32 %v4588_v42, 0.0  ;;  %v4446_v26 = vadd.f32 %v4442_v57, %v4218_v1  ;;  %v4087_v24 = vadd.f32 %v4083_v16, %v9241_v46 }
 0x3f6   : > { %v4098_v49 = vsel %vm1112_vm1, %v4096_v2, %v4097_v14  ;;  %v4099_v12 = vrot.slane %v4092_v45, 2 }
 0x3f7   : > { %5016 = vst [vmem:[%s9342_s28 + $0x18] sm:$0xff] %v4582_v22  ;;  %v4592_v47 = vmin.f32 %v4590_v10, 6.0  ;;  %v4589_v43 = vadd.f32 %v4587_v51, %v4446_v26  ;;  %v4474_v55 = vpop.permute.xlu1 %4473  ;;  %v4472_v9 = vpop.permute.xlu0 %4471  ;;  %v4086_v51 = vadd.f32 %v4081_v32, %v9234_v29  ;;  %v4290_v29 = vsel %vm273_vm2, %v9283_v4, %v9281_v36 }
 0x3f8   : > { %v4479_v50 = vsel %vm418_vm3, %v4472_v9, %v4474_v55  ;;  %v4294_v57 = vadd.f32 %v4290_v29, %v4087_v24  ;;  %v4327_v4 = vsel %vm273_vm2, %v9291_v58, %v9289_v48  ;;  %v4103_v26 = vadd.f32 %v4098_v49, %v9245_v61 }
 0x3f9   : > { %v4594_v19 = vmul.f32 0.16666667, %v4592_v47  ;;  %v4591_v31 = vmax.f32 %v4589_v43, 0.0  ;;  %v4483_v23 = vadd.f32 %v4479_v50, %v4255_v11  ;;  %v4293_v35 = vadd.f32 %v4289_v25, %v4086_v51  ;;  %v4702_v25 = vld [vmem:[%s9342_s28 + $0x8] sm:$0xff] (%p5314_p5) }
 0x3fa   : > { %v4100_v0 = vsel %vm1112_vm1, %v4097_v14, %v4099_v12  ;;  %v4331_v11 = vadd.f32 %v4327_v4, %v4103_v26  ;;  %v4328_v48 = vsel %vm273_vm2, %v9303_v21, %v9301_v44  ;;  %v4626_v58 = vstv %s9402_s27  ;;  %4703 = vst [vmem:[%s4649_s8 + $0x8] sm:$0xff] (%p5314_p5), %v4702_v25 }
 0x3fb   : > { %5018 = vst [vmem:[%s9342_s28 + $0x20] sm:$0xff] %v4594_v19  ;;  %v4593_v8 = vmin.f32 %v4591_v31, 6.0  ;;  %v4601_v41 = vadd.f32 %v4600_v56, %v4483_v23  ;;  %v4478_v52 = vpop.permute.xlu1 %4477  ;;  %v4476_v27 = vpop.permute.xlu0 %4475  ;;  %v4104_v9 = vadd.f32 %v4100_v0, %v9249_v5 }
 0x3fc   : > { %v4480_v15 = vsel %vm418_vm3, %v4476_v27, %v4478_v52  ;;  %v4700_v27 = vld [vmem:[%s9342_s28] sm:$0xff] (%p5314_p5) }
 0x3fd   : > { %v4595_v38 = vmul.f32 0.16666667, %v4593_v8  ;;  %v4603_v37 = vmax.f32 %v4601_v41, 0.0  ;;  %v4484_v28 = vadd.f32 %v4480_v15, %v4256_v60  ;;  %v4332_v34 = vadd.f32 %v4328_v48, %v4104_v9  ;;  %v4704_v15 = vld [vmem:[%s9342_s28 + $0x10] sm:$0xff] (%p5314_p5)  ;;  %4701 = vst [vmem:[%s4649_s8] sm:$0xff] (%p5314_p5), %v4700_v27 }
 0x3fe   : > { %v4706_v51 = vld [vmem:[%s9342_s28 + $0x18] sm:$0xff] (%p5314_p5)  ;;  %4705 = vst [vmem:[%s4649_s8 + $0x20] sm:$0xff] (%p5314_p5), %v4704_v15 }
 0x3ff   : > { %5019 = vst [vmem:[%s9342_s28 + $0x28] sm:$0xff] %v4595_v38  ;;  %v4605_v63 = vmin.f32 %v4603_v37, 6.0  ;;  %v4602_v18 = vadd.f32 %v4600_v56, %v4484_v28  ;;  %v4512_v40 = vpop.permute.xlu1 %4511  ;;  %v4510_v20 = vpop.permute.xlu0 %4509  ;;  %4707 = vst [vmem:[%s4649_s8 + $0x28] sm:$0xff] (%p5314_p5), %v4706_v51 }
 0x400   : > { %v4517_v1 = vsel %vm418_vm3, %v4510_v20, %v4512_v40 }
 0x401   : > { %v4607_v42 = vmul.f32 0.16666667, %v4605_v63  ;;  %v4604_v7 = vmax.f32 %v4602_v18, 0.0  ;;  %v4521_v13 = vadd.f32 %v4517_v1, %v4293_v35 }
 0x402   : > { %v4708_v38 = vld [vmem:[%s9342_s28 + $0x20] sm:$0xff] (%p5314_p5) }
 0x403   : > { %5021 = vst [vmem:[%s9342_s28 + $0x30] sm:$0xff] %v4607_v42  ;;  %v4606_v6 = vmin.f32 %v4604_v7, 6.0  ;;  %v4614_v22 = vadd.f32 %v4613_v59, %v4521_v13  ;;  %v4516_v10 = vpop.permute.xlu1 %4515  ;;  %v4514_v36 = vpop.permute.xlu0 %4513  ;;  %4709 = vst [vmem:[%s4649_s8 + $0x40] sm:$0xff] (%p5314_p5), %v4708_v38 }
 0x404   : > { %v4518_v46 = vsel %vm418_vm3, %v4514_v36, %v4516_v10 }
 0x405   : > { %v4608_v33 = vmul.f32 0.16666667, %v4606_v6  ;;  %v4616_v53 = vmax.f32 %v4614_v22, 0.0  ;;  %v4522_v17 = vadd.f32 %v4518_v46, %v4294_v57 }
 0x406   : > { %v4710_v37 = vld [vmem:[%s9342_s28 + $0x28] sm:$0xff] (%p5314_p5) }
 0x407   : > { %5022 = vst [vmem:[%s9342_s28 + $0x38] sm:$0xff] %v4608_v33  ;;  %v4618_v62 = vmin.f32 %v4616_v53, 6.0  ;;  %v4615_v47 = vadd.f32 %v4613_v59, %v4522_v17  ;;  %v4550_v43 = vpop.permute.xlu1 %4549  ;;  %v4548_v55 = vpop.permute.xlu0 %4547  ;;  %4711 = vst [vmem:[%s4649_s8 + $0x48] sm:$0xff] (%p5314_p5), %v4710_v37 }
 0x408   : > { %v4555_v61 = vsel %vm418_vm3, %v4548_v55, %v4550_v43 }
 0x409   : > { %v4620_v54 = vmul.f32 0.16666667, %v4618_v62  ;;  %v4617_v56 = vmax.f32 %v4615_v47, 0.0  ;;  %v4559_v50 = vadd.f32 %v4555_v61, %v4331_v11 }
 0x40a   : > { %v4712_v28 = vld [vmem:[%s9342_s28 + $0x30] sm:$0xff] (%p5314_p5) }
 0x40b   : > { %5024 = vst [vmem:[%s9342_s28 + $0x40] sm:$0xff] %v4620_v54  ;;  %v4619_v19 = vmin.f32 %v4617_v56, 6.0  ;;  %v4627_v31 = vadd.f32 %v4626_v58, %v4559_v50  ;;  %v4554_v23 = vpop.permute.xlu1 %4553  ;;  %v4552_v32 = vpop.permute.xlu0 %4551  ;;  %4713 = vst [vmem:[%s4649_s8 + $0x60] sm:$0xff] (%p5314_p5), %v4712_v28 }
 0x40c   : > { %v4556_v3 = vsel %vm418_vm3, %v4552_v32, %v4554_v23 }
 0x40d   : > { %v4621_v44 = vmul.f32 0.16666667, %v4619_v19  ;;  %v4629_v21 = vmax.f32 %v4627_v31, 0.0  ;;  %v4560_v39 = vadd.f32 %v4556_v3, %v4332_v34 }
 0x40e   : > { %v4714_v16 = vld [vmem:[%s9342_s28 + $0x38] sm:$0xff] (%p5314_p5) }
 0x40f   : > { %5025 = vst [vmem:[%s9342_s28 + $0x48] sm:$0xff] %v4621_v44  ;;  %v4631_v30 = vmin.f32 %v4629_v21, 6.0  ;;  %v4628_v60 = vadd.f32 %v4626_v58, %v4560_v39  ;;  %4715 = vst [vmem:[%s4649_s8 + $0x68] sm:$0xff] (%p5314_p5), %v4714_v16 }
 0x411   : > { %v4633_v5 = vmul.f32 0.16666667, %v4631_v30  ;;  %v4630_v8 = vmax.f32 %v4628_v60, 0.0 }
 0x412   : > { %v4716_v2 = vld [vmem:[%s9342_s28 + $0x40] sm:$0xff] (%p5314_p5) }
 0x413   : > { %5027 = vst [vmem:[%s9342_s28 + $0x50] sm:$0xff] %v4633_v5  ;;  %v4632_v41 = vmin.f32 %v4630_v8, 6.0  ;;  %4644 = sbr.rel (!%p5314_p5) target bundleno = 1056 (0x420), region = 44  ;;  %4717 = vst [vmem:[%s4649_s8 + $0x80] sm:$0xff] (%p5314_p5), %v4716_v2 }
 0x415   : > { %v4634_v52 = vmul.f32 0.16666667, %v4632_v41 }
 0x416   : > { %v4718_v14 = vld [vmem:[%s9342_s28 + $0x48] sm:$0xff] (%p5314_p5) }
 0x417   : > { %5028 = vst [vmem:[%s9342_s28 + $0x58] sm:$0xff] %v4634_v52  ;;  %4719 = vst [vmem:[%s4649_s8 + $0x88] sm:$0xff] (%p5314_p5), %v4718_v14 }
 0x41a   : > { %v4720_v45 = vld [vmem:[%s9342_s28 + $0x50] sm:$0xff] }
 0x41b   : > { %4721 = vst [vmem:[%s4649_s8 + $0xa0] sm:$0xff] %v4720_v45 }
 0x41e   : > { %v4722_v35 = vld [vmem:[%s9342_s28 + $0x58] sm:$0xff] }
 0x41f   : > { %4723 = vst [vmem:[%s4649_s8 + $0xa8] sm:$0xff] %v4722_v35 }
 0x420 PF: > { %s15_s18 = sadd.s32 1, %s5241_s18   ;;  %s10151_s12 = smov %s5221_s13 }
 0x421   : > { %p12_p5 = scmp.ge.s32.totalorder %s15_s18, 6   ;;  %s10152_s13 = smov %s5343_s6 }
 0x422   : > { %s10153_s14 = smov %s5233_s16  ;;  %s10154_s15 = smov %s5237_s17 }
 0x423   : > { %s10155_s16 = smov %s10158_s20  ;;  %s10156_s17 = smov %s10162_s21 }
 0x424   :  { %14 = sbr.rel (!%p12_p5) target bundleno = 5 (0x5), region = 117 }
 0x429   :  { %4739 = vsyncpa [#allocation3], 1 }
 0x42a   :  { %4741 = vsyncpa [#allocation3 + $0x1], 1 }
 0x42b   :  { %4742 = vsyncpa [#allocation5], 1 }

</bundles_post_ra>
